<compile_context>
chip_gen: v7x
topology: tpu7x:2x2x1
jax: 0.10.0
libtpu: 0.0.40
codegen_flags: <defaults>
</compile_context>

<pallas_src>
import functools

import jax
import jax.numpy as jnp
from jax.experimental import pallas as pl
from jax.experimental.pallas import tpu as pltpu

EMBED = 768          # attention / text embed dim
IMG_FEAT = 2048      # raw image feature dim
N_HEAD = 4
HEAD_DIM = EMBED // N_HEAD   # 192
FUSED = 2 * EMBED            # 1536
LANES = 128


def _fusion_kernel(cls_ref, img_ref,
                   wimg_ref, simg_ref, bimg_ref,
                   wkp_ref, skp_ref, bkp_ref,
                   w2v_ref, s2v_ref, w2a_ref, s2a_ref, b2_ref,
                   w3_ref, s3_ref, b3_ref,
                   out_ref):
    cls_rep = cls_ref[...]                         # (blk_b, 768) f32 == text[:, 0, :]
    img = img_ref[...]                             # (blk_b, R, 2048) f32

    # img_pooled = image_features.mean(dim=1)
    img_pooled = jnp.mean(img, axis=1)             # (blk_b, 2048) f32
    xb = img_pooled.astype(jnp.bfloat16)

    # visual_reps = relu(linear_img(img_pooled)); int8 weights -> bf16 on the
    # VPU (free slack), f32 accumulation on the MXU, per-out-channel scale.
    visual = (jnp.dot(xb, wimg_ref[...].astype(jnp.bfloat16),
                      preferred_element_type=jnp.float32)
              * simg_ref[...] + bimg_ref[...])
    visual = jnp.maximum(visual, 0.0)              # (blk_b, 768) f32
    visual_b = visual.astype(jnp.bfloat16)

    # Attention(k=visual.unsqueeze(1), q=text_features), scaled_dot_product,
    # 4 heads: with k_len == 1 the softmax over the key axis is exactly 1, so
    # every query position's head output equals the per-head kx and
    #   attn(k, q).mean(dim=1) == proj(w_k(visual)) == visual @ W_kp + b_kp
    # with W_kp = Wk @ Wproj folded offline.  w_q and the whole score path are
    # algebraically dead; attn-internal dropout(0.1) is identity at inference.
    attended_text = (jnp.dot(visual_b, wkp_ref[...].astype(jnp.bfloat16),
                             preferred_element_type=jnp.float32)
                     * skp_ref[...] + bkp_ref[...])

    attn_mult = cls_rep * attended_text                          # (blk_b, 768) f32

    # linear2 on cat([visual, attn_mult]) == visual@W2[:768] + attn_mult@W2[768:]
    # (split offline) — removes the (blk_b, 1536) concat materialization.
    x = (jnp.dot(visual_b, w2v_ref[...].astype(jnp.bfloat16),
                 preferred_element_type=jnp.float32) * s2v_ref[...]
         + jnp.dot(attn_mult.astype(jnp.bfloat16), w2a_ref[...].astype(jnp.bfloat16),
                   preferred_element_type=jnp.float32) * s2a_ref[...]
         + b2_ref[...])
    x = jnp.maximum(x, 0.0)
    # dropout1(0.3): identity at inference

    # linear3 (padded offline to a 128-lane-dense slab; sliced in the wrapper)
    logits = (jnp.dot(x.astype(jnp.bfloat16), w3_ref[...].astype(jnp.bfloat16),
                      preferred_element_type=jnp.float32)
              * s3_ref[...] + b3_ref[...])
    out_ref[...] = logits


def init_params(key, num_classes):
    """Raw module-equivalent parameters (nn.Linear weights stored as (in, out))."""
    ks = jax.random.split(key, 12)
    s = 0.02
    return {
        'w_img':  jax.random.normal(ks[0], (IMG_FEAT, EMBED), jnp.float32) * s,
        'b_img':  jax.random.normal(ks[1], (1, EMBED), jnp.float32) * s,
        'w_k':    jax.random.normal(ks[2], (EMBED, EMBED), jnp.float32) * s,
        'b_k':    jax.random.normal(ks[3], (1, EMBED), jnp.float32) * s,
        # w_q / b_q exist in the module but are dead at inference
        # (softmax over a single key is exactly 1); never streamed to the kernel.
        'w_q':    jax.random.normal(ks[4], (EMBED, EMBED), jnp.float32) * s,
        'b_q':    jax.random.normal(ks[5], (1, EMBED), jnp.float32) * s,
        'w_proj': jax.random.normal(ks[6], (EMBED, EMBED), jnp.float32) * s,
        'b_proj': jax.random.normal(ks[7], (1, EMBED), jnp.float32) * s,
        'w2':     jax.random.normal(ks[8], (FUSED, EMBED), jnp.float32) * s,
        'b2':     jax.random.normal(ks[9], (1, EMBED), jnp.float32) * s,
        'w3':     jax.random.normal(ks[10], (EMBED, num_classes), jnp.float32) * s,
        'b3':     jax.random.normal(ks[11], (1, num_classes), jnp.float32) * s,
    }


def _quantize_per_out_channel(w):
    """Symmetric int8 quantization with a per-output-channel f32 scale."""
    amax = jnp.max(jnp.abs(w), axis=0, keepdims=True)            # (1, out)
    scale = jnp.maximum(amax, 1e-12) / 127.0
    q = jnp.clip(jnp.round(w / scale), -127.0, 127.0).astype(jnp.int8)
    return q, scale.astype(jnp.float32)


def prepare_inference_params(params, num_classes):
    """One-time offline prep (NOT in the per-call path):
       - fold Wk @ Wproj into W_kp / b_kp (in f32),
       - split linear2 into the visual / attn halves,
       - pad the classifier to a multiple of 128 lanes,
       - int8-quantize every weight matrix with per-out-channel f32 scales."""
    c_pad = ((num_classes + LANES - 1) // LANES) * LANES
    w_kp = params['w_k'] @ params['w_proj']                       # (768, 768)
    b_kp = params['b_k'] @ params['w_proj'] + params['b_proj']    # (1, 768)
    w3p = jnp.zeros((EMBED, c_pad), jnp.float32).at[:, :num_classes].set(params['w3'])
    b3p = jnp.zeros((1, c_pad), jnp.float32).at[:, :num_classes].set(params['b3'])
    w2v = params['w2'][:EMBED]                                    # (768, 768)
    w2a = params['w2'][EMBED:]                                    # (768, 768)

    wimg_q, s_img = _quantize_per_out_channel(params['w_img'])
    wkp_q, s_kp = _quantize_per_out_channel(w_kp)
    w2v_q, s2v = _quantize_per_out_channel(w2v)
    w2a_q, s2a = _quantize_per_out_channel(w2a)
    w3_q, s3 = _quantize_per_out_channel(w3p)

    return {
        'w_img': wimg_q, 's_img': s_img, 'b_img': params['b_img'],
        'w_kp':  wkp_q,  's_kp':  s_kp,  'b_kp':  b_kp,
        'w2v':   w2v_q,  's2v':   s2v,
        'w2a':   w2a_q,  's2a':   s2a,   'b2':    params['b2'],
        'w3':    w3_q,   's3':    s3,    'b3':    b3p,
    }


def _pick_batch_block(batch, regions):
    """Batch-block choice: full batch when tiny; otherwise 8-aligned (f32
    sublane) and capped so the double-buffered f32 image tile stays ~8 MiB."""
    if batch <= 8:
        return batch
    cap = (8 * 1024 * 1024) // max(1, regions * IMG_FEAT * 4 * 2)
    cap = max(8, min(256, (cap // 8) * 8))
    blk = min(batch, cap)
    return max(8, (blk // 8) * 8)


@functools.partial(jax.jit, static_argnames=('num_classes',))
def multi_att_fusion2(text_features, image_features, prep, *, num_classes):
    B = text_features.shape[0]
    R = image_features.shape[1]
    c_pad = prep['w3'].shape[1]
    blk_b = _pick_batch_block(B, R)
    nb = pl.cdiv(B, blk_b)

    # Only the CLS token is ever used by the module; slice in the wrapper so
    # the kernel never streams the full (B, S, 768) sequence.
    cls_rep = text_features[:, 0, :]                              # (B, 768)

    # Weights / scales / biases: full-shape blocks, same index every grid step
    # => DMA'd once per call, VMEM-resident across the batch grid.
    full2 = lambda i: (0, 0)

    ins = (cls_rep, image_features,
           prep['w_img'], prep['s_img'], prep['b_img'],
           prep['w_kp'], prep['s_kp'], prep['b_kp'],
           prep['w2v'], prep['s2v'], prep['w2a'], prep['s2a'], prep['b2'],
           prep['w3'], prep['s3'], prep['b3'])

    in_specs = [
        pl.BlockSpec((blk_b, EMBED), lambda i: (i, 0)),             # cls tokens
        pl.BlockSpec((blk_b, R, IMG_FEAT), lambda i: (i, 0, 0)),    # image regions
        pl.BlockSpec((IMG_FEAT, EMBED), full2),                     # w_img int8
        pl.BlockSpec((1, EMBED), full2),                            # s_img
        pl.BlockSpec((1, EMBED), full2),                            # b_img
        pl.BlockSpec((EMBED, EMBED), full2),                        # w_kp int8
        pl.BlockSpec((1, EMBED), full2),                            # s_kp
        pl.BlockSpec((1, EMBED), full2),                            # b_kp
        pl.BlockSpec((EMBED, EMBED), full2),                        # w2_vis int8
        pl.BlockSpec((1, EMBED), full2),                            # s2_vis
        pl.BlockSpec((EMBED, EMBED), full2),                        # w2_att int8
        pl.BlockSpec((1, EMBED), full2),                            # s2_att
        pl.BlockSpec((1, EMBED), full2),                            # b2
        pl.BlockSpec((EMBED, c_pad), full2),                        # w3 int8 (padded)
        pl.BlockSpec((1, c_pad), full2),                            # s3
        pl.BlockSpec((1, c_pad), full2),                            # b3
    ]

    logits_pad = pl.pallas_call(
        _fusion_kernel,
        out_shape=jax.ShapeDtypeStruct((B, c_pad), jnp.float32),
        grid=(nb,),
        in_specs=in_specs,
        out_specs=pl.BlockSpec((blk_b, c_pad), lambda i: (i, 0)),
        # Footprint: ~3.3 MiB int8 weights + bf16 dequant temporaries + batch
        # tiles (image tile capped at ~8 MiB double-buffered).  32 MiB leaves
        # headroom on every generation incl. v7x's 64 MiB per-TC VMEM.
        compiler_params=pltpu.CompilerParams(
            dimension_semantics=("arbitrary",),
            vmem_limit_bytes=32 * 1024 * 1024),
    )(*ins)
    return logits_pad[:, :num_classes]


# ----------------------------------------------------------------------------
# References for numerics checks (requested by the review).
# ----------------------------------------------------------------------------

def reference_prepared(cls_rep, image_features, prep):
    """Plain-JAX replica of the kernel's exact compute path (same dtypes/order)."""
    f32, bf16 = jnp.float32, jnp.bfloat16
    img_pooled = jnp.mean(image_features, axis=1)
    visual = (jnp.dot(img_pooled.astype(bf16), prep['w_img'].astype(bf16),
                      preferred_element_type=f32) * prep['s_img'] + prep['b_img'])
    visual = jnp.maximum(visual, 0.0)
    vb = visual.astype(bf16)
    attended = (jnp.dot(vb, prep['w_kp'].astype(bf16),
                        preferred_element_type=f32) * prep['s_kp'] + prep['b_kp'])
    attn_mult = cls_rep * attended
    x = (jnp.dot(vb, prep['w2v'].astype(bf16), preferred_element_type=f32) * prep['s2v']
         + jnp.dot(attn_mult.astype(bf16), prep['w2a'].astype(bf16),
                   preferred_element_type=f32) * prep['s2a']
         + prep['b2'])
    x = jnp.maximum(x, 0.0)
    return (jnp.dot(x.astype(bf16), prep['w3'].astype(bf16),
                    preferred_element_type=f32) * prep['s3'] + prep['b3'])


def reference_module(text_features, image_features, params):
    """f32 replica of the original PyTorch forward (inference mode), including
    the explicit 4-head scaled-dot-product attention with a single key."""
    B, S, _ = text_features.shape
    cls_rep = text_features[:, 0, :]
    img_pooled = jnp.mean(image_features, axis=1)
    visual = jax.nn.relu(img_pooled @ params['w_img'] + params['b_img'])
    k = visual[:, None, :]                                        # (B, 1, 768)
    q = text_features                                             # (B, S, 768)
    kx = (k.reshape(B, EMBED) @ params['w_k'] + params['b_k']).reshape(B, 1, N_HEAD, HEAD_DIM)
    qx = (q.reshape(B * S, EMBED) @ params['w_q'] + params['b_q']).reshape(B, S, N_HEAD, HEAD_DIM)
    kx = jnp.transpose(kx, (2, 0, 1, 3)).reshape(N_HEAD * B, 1, HEAD_DIM)
    qx = jnp.transpose(qx, (2, 0, 1, 3)).reshape(N_HEAD * B, S, HEAD_DIM)
    score = jnp.einsum('nqh,nkh->nqk', qx, kx) / (float(HEAD_DIM) ** 0.5)
    score = jax.nn.softmax(score, axis=-1)                        # k_len == 1 -> ones
    out = jnp.einsum('nqk,nkh->nqh', score, kx)                   # values == keys
    out = jnp.concatenate(jnp.split(out, N_HEAD, axis=0), axis=-1)
    out = out @ params['w_proj'] + params['b_proj']               # (B, S, 768)
    attended_text = jnp.mean(out, axis=1)
    attn_mult = cls_rep * attended_text
    mm = jnp.concatenate([visual, attn_mult], axis=-1)
    x = jax.nn.relu(mm @ params['w2'] + params['b2'])
    return x @ params['w3'] + params['b3']


if __name__ == "__main__":
    key = jax.random.PRNGKey(0)
    k_text, k_img, k_par = jax.random.split(key, 3)

    B, S, R = 2, 8, 4            # batch, text seq_len, image regions
    num_classes = 3

    text_features = jax.random.normal(k_text, (B, S, EMBED), jnp.float32)
    image_features = jax.random.normal(k_img, (B, R, IMG_FEAT), jnp.float32)
    params = init_params(k_par, num_classes)
    prep = prepare_inference_params(params, num_classes)

    logits = multi_att_fusion2(text_features, image_features, prep,
                               num_classes=num_classes)
    jax.block_until_ready(logits)
    assert logits.shape == (B, num_classes) and logits.dtype == jnp.float32

    # 1) Kernel-path check: identical quantized/bf16 math in plain JAX.
    ref_q = reference_prepared(text_features[:, 0, :], image_features,
                               prep)[:, :num_classes]
    assert float(jnp.max(jnp.abs(logits - ref_q))) < 5e-3, \
        "kernel differs from prepared-params reference"

    # 2) Module-level check (validates the attention fold; tolerance covers
    #    the int8 + bf16 weight quantization error).
    ref_m = reference_module(text_features, image_features, params)
    err = float(jnp.max(jnp.abs(logits - ref_m)))
    tol = 2e-2 + 0.1 * float(jnp.max(jnp.abs(ref_m)))
    assert err < tol, f"kernel vs f32 module reference: {err} >= {tol}"

    print("KERNEL_OK")
</pallas_src>

<mosaic_0001>
module attributes {stable_mosaic.version = 11 : i64} {
  func.func @_fusion_kernel(%arg0: i32, %arg1: memref<2x768xf32, #tpu.memory_space<vmem>>, %arg2: memref<2x4x2048xf32, #tpu.memory_space<vmem>>, %arg3: memref<2048x768xi8, #tpu.memory_space<vmem>>, %arg4: memref<1x768xf32, #tpu.memory_space<vmem>>, %arg5: memref<1x768xf32, #tpu.memory_space<vmem>>, %arg6: memref<768x768xi8, #tpu.memory_space<vmem>>, %arg7: memref<1x768xf32, #tpu.memory_space<vmem>>, %arg8: memref<1x768xf32, #tpu.memory_space<vmem>>, %arg9: memref<768x768xi8, #tpu.memory_space<vmem>>, %arg10: memref<1x768xf32, #tpu.memory_space<vmem>>, %arg11: memref<768x768xi8, #tpu.memory_space<vmem>>, %arg12: memref<1x768xf32, #tpu.memory_space<vmem>>, %arg13: memref<1x768xf32, #tpu.memory_space<vmem>>, %arg14: memref<768x128xi8, #tpu.memory_space<vmem>>, %arg15: memref<1x128xf32, #tpu.memory_space<vmem>>, %arg16: memref<1x128xf32, #tpu.memory_space<vmem>>, %arg17: memref<2x128xf32, #tpu.memory_space<vmem>>) attributes {dimension_semantics = [#tpu.dimension_semantics<arbitrary>], iteration_bounds = array<i64: 1>, scalar_prefetch = 0 : i64, scratch_operands = 0 : i64, tpu.core_type = #tpu.core_type<tc>, window_params = [{transform_indices = @transform_0, window_bounds = array<i64: 2, 768>}, {transform_indices = @transform_1, window_bounds = array<i64: 2, 4, 2048>}, {pipeline_mode = #tpu.pipeline_mode<synchronous>, transform_indices = @transform_2, window_bounds = array<i64: 2048, 768>}, {pipeline_mode = #tpu.pipeline_mode<synchronous>, transform_indices = @transform_3, window_bounds = array<i64: 1, 768>}, {pipeline_mode = #tpu.pipeline_mode<synchronous>, transform_indices = @transform_4, window_bounds = array<i64: 1, 768>}, {pipeline_mode = #tpu.pipeline_mode<synchronous>, transform_indices = @transform_5, window_bounds = array<i64: 768, 768>}, {pipeline_mode = #tpu.pipeline_mode<synchronous>, transform_indices = @transform_6, window_bounds = array<i64: 1, 768>}, {pipeline_mode = #tpu.pipeline_mode<synchronous>, transform_indices = @transform_7, window_bounds = array<i64: 1, 768>}, {pipeline_mode = #tpu.pipeline_mode<synchronous>, transform_indices = @transform_8, window_bounds = array<i64: 768, 768>}, {pipeline_mode = #tpu.pipeline_mode<synchronous>, transform_indices = @transform_9, window_bounds = array<i64: 1, 768>}, {pipeline_mode = #tpu.pipeline_mode<synchronous>, transform_indices = @transform_10, window_bounds = array<i64: 768, 768>}, {pipeline_mode = #tpu.pipeline_mode<synchronous>, transform_indices = @transform_11, window_bounds = array<i64: 1, 768>}, {pipeline_mode = #tpu.pipeline_mode<synchronous>, transform_indices = @transform_12, window_bounds = array<i64: 1, 768>}, {pipeline_mode = #tpu.pipeline_mode<synchronous>, transform_indices = @transform_13, window_bounds = array<i64: 768, 128>}, {pipeline_mode = #tpu.pipeline_mode<synchronous>, transform_indices = @transform_14, window_bounds = array<i64: 1, 128>}, {pipeline_mode = #tpu.pipeline_mode<synchronous>, transform_indices = @transform_15, window_bounds = array<i64: 1, 128>}, {transform_indices = @transform_16, window_bounds = array<i64: 2, 128>}]} {
    %c0 = arith.constant 0 : index
    %c0_0 = arith.constant 0 : index
    %0 = vector.load %arg1[%c0, %c0_0] : memref<2x768xf32, #tpu.memory_space<vmem>>, vector<2x768xf32>
    %c0_1 = arith.constant 0 : index
    %c0_2 = arith.constant 0 : index
    %c0_3 = arith.constant 0 : index
    %1 = vector.load %arg2[%c0_1, %c0_2, %c0_3] : memref<2x4x2048xf32, #tpu.memory_space<vmem>>, vector<2x4x2048xf32>
    %cst = arith.constant dense<0.000000e+00> : vector<2x2048xf32>
    %2 = vector.multi_reduction <add>, %1, %cst [1] : vector<2x4x2048xf32> to vector<2x2048xf32>
    %cst_4 = arith.constant 4.000000e+00 : f32
    %3 = vector.broadcast %cst_4 : f32 to vector<2x2048xf32>
    %4 = arith.divf %2, %3 : vector<2x2048xf32>
    %5 = arith.truncf %4 : vector<2x2048xf32> to vector<2x2048xbf16>
    %c0_5 = arith.constant 0 : index
    %c0_6 = arith.constant 0 : index
    %6 = vector.load %arg3[%c0_5, %c0_6] : memref<2048x768xi8, #tpu.memory_space<vmem>>, vector<2048x768xi8>
    %7 = arith.sitofp %6 : vector<2048x768xi8> to vector<2048x768xbf16>
    %cst_7 = arith.constant dense<0.000000e+00> : vector<2x768xf32>
    %8 = tpu.matmul %5, %7, %cst_7 {dimension_numbers = #tpu.dot_dimension_numbers<[1], [0], [0], [1], [0, 0, 1, 1], [], []>} : vector<2x2048xbf16>, vector<2048x768xbf16>, vector<2x768xf32> -> vector<2x768xf32>
    %c0_8 = arith.constant 0 : index
    %c0_9 = arith.constant 0 : index
    %9 = vector.load %arg4[%c0_8, %c0_9] : memref<1x768xf32, #tpu.memory_space<vmem>>, vector<1x768xf32>
    %10 = vector.broadcast %9 : vector<1x768xf32> to vector<2x768xf32>
    %11 = arith.mulf %8, %10 : vector<2x768xf32>
    %c0_10 = arith.constant 0 : index
    %c0_11 = arith.constant 0 : index
    %12 = vector.load %arg5[%c0_10, %c0_11] : memref<1x768xf32, #tpu.memory_space<vmem>>, vector<1x768xf32>
    %13 = vector.broadcast %12 : vector<1x768xf32> to vector<2x768xf32>
    %14 = arith.addf %11, %13 : vector<2x768xf32>
    %cst_12 = arith.constant 0.000000e+00 : f32
    %15 = vector.broadcast %cst_12 : f32 to vector<2x768xf32>
    %16 = arith.maximumf %14, %15 : vector<2x768xf32>
    %17 = arith.truncf %16 : vector<2x768xf32> to vector<2x768xbf16>
    %c0_13 = arith.constant 0 : index
    %c0_14 = arith.constant 0 : index
    %18 = vector.load %arg6[%c0_13, %c0_14] : memref<768x768xi8, #tpu.memory_space<vmem>>, vector<768x768xi8>
    %19 = arith.sitofp %18 : vector<768x768xi8> to vector<768x768xbf16>
    %cst_15 = arith.constant dense<0.000000e+00> : vector<2x768xf32>
    %20 = tpu.matmul %17, %19, %cst_15 {dimension_numbers = #tpu.dot_dimension_numbers<[1], [0], [0], [1], [0, 0, 1, 1], [], []>} : vector<2x768xbf16>, vector<768x768xbf16>, vector<2x768xf32> -> vector<2x768xf32>
    %c0_16 = arith.constant 0 : index
    %c0_17 = arith.constant 0 : index
    %21 = vector.load %arg7[%c0_16, %c0_17] : memref<1x768xf32, #tpu.memory_space<vmem>>, vector<1x768xf32>
    %22 = vector.broadcast %21 : vector<1x768xf32> to vector<2x768xf32>
    %23 = arith.mulf %20, %22 : vector<2x768xf32>
    %c0_18 = arith.constant 0 : index
    %c0_19 = arith.constant 0 : index
    %24 = vector.load %arg8[%c0_18, %c0_19] : memref<1x768xf32, #tpu.memory_space<vmem>>, vector<1x768xf32>
    %25 = vector.broadcast %24 : vector<1x768xf32> to vector<2x768xf32>
    %26 = arith.addf %23, %25 : vector<2x768xf32>
    %27 = arith.mulf %0, %26 : vector<2x768xf32>
    %c0_20 = arith.constant 0 : index
    %c0_21 = arith.constant 0 : index
    %28 = vector.load %arg9[%c0_20, %c0_21] : memref<768x768xi8, #tpu.memory_space<vmem>>, vector<768x768xi8>
    %29 = arith.sitofp %28 : vector<768x768xi8> to vector<768x768xbf16>
    %cst_22 = arith.constant dense<0.000000e+00> : vector<2x768xf32>
    %30 = tpu.matmul %17, %29, %cst_22 {dimension_numbers = #tpu.dot_dimension_numbers<[1], [0], [0], [1], [0, 0, 1, 1], [], []>} : vector<2x768xbf16>, vector<768x768xbf16>, vector<2x768xf32> -> vector<2x768xf32>
    %c0_23 = arith.constant 0 : index
    %c0_24 = arith.constant 0 : index
    %31 = vector.load %arg10[%c0_23, %c0_24] : memref<1x768xf32, #tpu.memory_space<vmem>>, vector<1x768xf32>
    %32 = vector.broadcast %31 : vector<1x768xf32> to vector<2x768xf32>
    %33 = arith.mulf %30, %32 : vector<2x768xf32>
    %34 = arith.truncf %27 : vector<2x768xf32> to vector<2x768xbf16>
    %c0_25 = arith.constant 0 : index
    %c0_26 = arith.constant 0 : index
    %35 = vector.load %arg11[%c0_25, %c0_26] : memref<768x768xi8, #tpu.memory_space<vmem>>, vector<768x768xi8>
    %36 = arith.sitofp %35 : vector<768x768xi8> to vector<768x768xbf16>
    %cst_27 = arith.constant dense<0.000000e+00> : vector<2x768xf32>
    %37 = tpu.matmul %34, %36, %cst_27 {dimension_numbers = #tpu.dot_dimension_numbers<[1], [0], [0], [1], [0, 0, 1, 1], [], []>} : vector<2x768xbf16>, vector<768x768xbf16>, vector<2x768xf32> -> vector<2x768xf32>
    %c0_28 = arith.constant 0 : index
    %c0_29 = arith.constant 0 : index
    %38 = vector.load %arg12[%c0_28, %c0_29] : memref<1x768xf32, #tpu.memory_space<vmem>>, vector<1x768xf32>
    %39 = vector.broadcast %38 : vector<1x768xf32> to vector<2x768xf32>
    %40 = arith.mulf %37, %39 : vector<2x768xf32>
    %41 = arith.addf %33, %40 : vector<2x768xf32>
    %c0_30 = arith.constant 0 : index
    %c0_31 = arith.constant 0 : index
    %42 = vector.load %arg13[%c0_30, %c0_31] : memref<1x768xf32, #tpu.memory_space<vmem>>, vector<1x768xf32>
    %43 = vector.broadcast %42 : vector<1x768xf32> to vector<2x768xf32>
    %44 = arith.addf %41, %43 : vector<2x768xf32>
    %cst_32 = arith.constant 0.000000e+00 : f32
    %45 = vector.broadcast %cst_32 : f32 to vector<2x768xf32>
    %46 = arith.maximumf %44, %45 : vector<2x768xf32>
    %47 = arith.truncf %46 : vector<2x768xf32> to vector<2x768xbf16>
    %c0_33 = arith.constant 0 : index
    %c0_34 = arith.constant 0 : index
    %48 = vector.load %arg14[%c0_33, %c0_34] : memref<768x128xi8, #tpu.memory_space<vmem>>, vector<768x128xi8>
    %49 = arith.sitofp %48 : vector<768x128xi8> to vector<768x128xbf16>
    %cst_35 = arith.constant dense<0.000000e+00> : vector<2x128xf32>
    %50 = tpu.matmul %47, %49, %cst_35 {dimension_numbers = #tpu.dot_dimension_numbers<[1], [0], [0], [1], [0, 0, 1, 1], [], []>} : vector<2x768xbf16>, vector<768x128xbf16>, vector<2x128xf32> -> vector<2x128xf32>
    %c0_36 = arith.constant 0 : index
    %c0_37 = arith.constant 0 : index
    %51 = vector.load %arg15[%c0_36, %c0_37] : memref<1x128xf32, #tpu.memory_space<vmem>>, vector<1x128xf32>
    %52 = vector.broadcast %51 : vector<1x128xf32> to vector<2x128xf32>
    %53 = arith.mulf %50, %52 : vector<2x128xf32>
    %c0_38 = arith.constant 0 : index
    %c0_39 = arith.constant 0 : index
    %54 = vector.load %arg16[%c0_38, %c0_39] : memref<1x128xf32, #tpu.memory_space<vmem>>, vector<1x128xf32>
    %55 = vector.broadcast %54 : vector<1x128xf32> to vector<2x128xf32>
    %56 = arith.addf %53, %55 : vector<2x128xf32>
    %c0_40 = arith.constant 0 : index
    %c0_41 = arith.constant 0 : index
    %57 = vector.load %arg17[%c0_40, %c0_41] : memref<2x128xf32, #tpu.memory_space<vmem>>, vector<2x128xf32>
    tpu.vector_store %arg17[%c0_40, %c0_41], %56 {strides = array<i32>} : memref<2x128xf32, #tpu.memory_space<vmem>>, vector<2x128xf32>,
    return
  }
  func.func @transform_0(%arg0: i32) -> (i32, i32) {
    %c0_i32 = arith.constant 0 : i32
    %c0_i32_0 = arith.constant 0 : i32
    return %arg0, %c0_i32 : i32, i32
  }
  func.func @transform_1(%arg0: i32) -> (i32, i32, i32) {
    %c0_i32 = arith.constant 0 : i32
    %c0_i32_0 = arith.constant 0 : i32
    %c0_i32_1 = arith.constant 0 : i32
    return %arg0, %c0_i32, %c0_i32_0 : i32, i32, i32
  }
  func.func @transform_2(%arg0: i32) -> (i32, i32) {
    %c0_i32 = arith.constant 0 : i32
    %c0_i32_0 = arith.constant 0 : i32
    %c0_i32_1 = arith.constant 0 : i32
    return %c0_i32, %c0_i32_0 : i32, i32
  }
  func.func @transform_3(%arg0: i32) -> (i32, i32) {
    %c0_i32 = arith.constant 0 : i32
    %c0_i32_0 = arith.constant 0 : i32
    %c0_i32_1 = arith.constant 0 : i32
    return %c0_i32, %c0_i32_0 : i32, i32
  }
  func.func @transform_4(%arg0: i32) -> (i32, i32) {
    %c0_i32 = arith.constant 0 : i32
    %c0_i32_0 = arith.constant 0 : i32
    %c0_i32_1 = arith.constant 0 : i32
    return %c0_i32, %c0_i32_0 : i32, i32
  }
  func.func @transform_5(%arg0: i32) -> (i32, i32) {
    %c0_i32 = arith.constant 0 : i32
    %c0_i32_0 = arith.constant 0 : i32
    %c0_i32_1 = arith.constant 0 : i32
    return %c0_i32, %c0_i32_0 : i32, i32
  }
  func.func @transform_6(%arg0: i32) -> (i32, i32) {
    %c0_i32 = arith.constant 0 : i32
    %c0_i32_0 = arith.constant 0 : i32
    %c0_i32_1 = arith.constant 0 : i32
    return %c0_i32, %c0_i32_0 : i32, i32
  }
  func.func @transform_7(%arg0: i32) -> (i32, i32) {
    %c0_i32 = arith.constant 0 : i32
    %c0_i32_0 = arith.constant 0 : i32
    %c0_i32_1 = arith.constant 0 : i32
    return %c0_i32, %c0_i32_0 : i32, i32
  }
  func.func @transform_8(%arg0: i32) -> (i32, i32) {
    %c0_i32 = arith.constant 0 : i32
    %c0_i32_0 = arith.constant 0 : i32
    %c0_i32_1 = arith.constant 0 : i32
    return %c0_i32, %c0_i32_0 : i32, i32
  }
  func.func @transform_9(%arg0: i32) -> (i32, i32) {
    %c0_i32 = arith.constant 0 : i32
    %c0_i32_0 = arith.constant 0 : i32
    %c0_i32_1 = arith.constant 0 : i32
    return %c0_i32, %c0_i32_0 : i32, i32
  }
  func.func @transform_10(%arg0: i32) -> (i32, i32) {
    %c0_i32 = arith.constant 0 : i32
    %c0_i32_0 = arith.constant 0 : i32
    %c0_i32_1 = arith.constant 0 : i32
    return %c0_i32, %c0_i32_0 : i32, i32
  }
  func.func @transform_11(%arg0: i32) -> (i32, i32) {
    %c0_i32 = arith.constant 0 : i32
    %c0_i32_0 = arith.constant 0 : i32
    %c0_i32_1 = arith.constant 0 : i32
    return %c0_i32, %c0_i32_0 : i32, i32
  }
  func.func @transform_12(%arg0: i32) -> (i32, i32) {
    %c0_i32 = arith.constant 0 : i32
    %c0_i32_0 = arith.constant 0 : i32
    %c0_i32_1 = arith.constant 0 : i32
    return %c0_i32, %c0_i32_0 : i32, i32
  }
  func.func @transform_13(%arg0: i32) -> (i32, i32) {
    %c0_i32 = arith.constant 0 : i32
    %c0_i32_0 = arith.constant 0 : i32
    %c0_i32_1 = arith.constant 0 : i32
    return %c0_i32, %c0_i32_0 : i32, i32
  }
  func.func @transform_14(%arg0: i32) -> (i32, i32) {
    %c0_i32 = arith.constant 0 : i32
    %c0_i32_0 = arith.constant 0 : i32
    %c0_i32_1 = arith.constant 0 : i32
    return %c0_i32, %c0_i32_0 : i32, i32
  }
  func.func @transform_15(%arg0: i32) -> (i32, i32) {
    %c0_i32 = arith.constant 0 : i32
    %c0_i32_0 = arith.constant 0 : i32
    %c0_i32_1 = arith.constant 0 : i32
    return %c0_i32, %c0_i32_0 : i32, i32
  }
  func.func @transform_16(%arg0: i32) -> (i32, i32) {
    %c0_i32 = arith.constant 0 : i32
    %c0_i32_0 = arith.constant 0 : i32
    return %arg0, %c0_i32 : i32, i32
  }
}

</mosaic_0001>

<bundles_post_ra>
// kernel: multi_att_fusion2.1
= control target key start
LH: loop header
LB: loop body
LE: loop exit
PB: predicated region body
PF: predicated region fallthrough
CT: control target
= control target key end

     0   :  { %s7268_s0 = inlined_call_operand.vmem [shape: f32[2,768], index: 0, kind: input, shape index: {}]   ;;  %s7269_s1 = inlined_call_operand.hbm [shape: f32[2,4,2048], index: 1, kind: input, shape index: {}]   ;;  %s7270_s2 = inlined_call_operand.hbm [shape: s8[2048,768], index: 2, kind: input, shape index: {}]   ;;  %s7271_s3 = inlined_call_operand.hbm [shape: f32[1,768], index: 3, kind: input, shape index: {}]   ;;  %s7272_s4 = inlined_call_operand.hbm [shape: f32[1,768], index: 4, kind: input, shape index: {}]   ;;  %s7273_s5 = inlined_call_operand.hbm [shape: s8[768,768], index: 5, kind: input, shape index: {}]   ;;  %s7274_s6 = inlined_call_operand.hbm [shape: f32[1,768], index: 6, kind: input, shape index: {}]   ;;  %s7275_s7 = inlined_call_operand.hbm [shape: f32[1,768], index: 7, kind: input, shape index: {}]   ;;  %s7276_s8 = inlined_call_operand.hbm [shape: s8[768,768], index: 8, kind: input, shape index: {}]   ;;  %s7277_s9 = inlined_call_operand.hbm [shape: f32[1,768], index: 9, kind: input, shape index: {}]   ;;  %s7278_s10 = inlined_call_operand.hbm [shape: s8[768,768], index: 10, kind: input, shape index: {}]   ;;  %s7279_s11 = inlined_call_operand.hbm [shape: f32[1,768], index: 11, kind: input, shape index: {}]   ;;  %s7280_s12 = inlined_call_operand.hbm [shape: f32[1,768], index: 12, kind: input, shape index: {}]   ;;  %s7281_s13 = inlined_call_operand.hbm [shape: s8[768,128], index: 13, kind: input, shape index: {}]   ;;  %s7282_s14 = inlined_call_operand.hbm [shape: f32[1,128], index: 14, kind: input, shape index: {}]   ;;  %s7283_s15 = inlined_call_operand.hbm [shape: f32[1,128], index: 15, kind: input, shape index: {}]   ;;  %s7284_s16 = inlined_call_operand.hbm [shape: f32[2,128], index: 16, kind: output, shape index: {}]  }
   0x1   :  { %7287 = sst [smem:[#allocation36_spill]] %s7268_s0 }
   0x2   :  { %7288 = sst [smem:[#allocation37_spill]] %s7284_s16 }
   0x3   :  { %21 = vsyncpa [#allocation3], 0 }
   0x4   :  { %22 = vsyncpa [#allocation6], 0 }
   0x5   :  { %23 = vsyncpa [#allocation9], 0 }
   0x6   :  { %24 = vsyncpa [#allocation12], 0 }
   0x7   :  { %25 = vsyncpa [#allocation15], 0 }
   0x8   :  { %26 = vsyncpa [#allocation18], 0 }
   0x9   :  { %27 = vsyncpa [#allocation21], 0 }
   0xa   :  { %28 = vsyncpa [#allocation24], 0 }
   0xb   :  { %29 = vsyncpa [#allocation4], 0  ;;  %s6486_s21 = smov [#allocation5]   ;;  %s6116_s25 = scalar_lea.hbm %s7270_s2, 49152 }
   0xc   :  { %s49_s22 = sshll.u32 %s6486_s21, 4  ;;  %p6117_p0 = scmp.ne.s32.totalorder %s7270_s2, %s6116_s25  ;;  %s50_s22 = int_to_ptr.vmem [resolvable:$true] %s49_s22 }
   0xd   :  { %p6120_p1 = scmp.lt.u32.totalorder %s6116_s25, %s7270_s2 }
   0xf   :  { %p6122_p2 = pnand %p6120_p1, %p6117_p0 }
  0x11   :  { %6125 = shalt.err (!%p6122_p2)
}
  0x12   :  { %s6126_s30 = scalar_lea.vmem %s50_s22, 49152  ;;  %p6131_p4 = scmp.lt.s32.totalorder %s50_s22, %s50_s22 }
  0x13   :  { %p6127_p3 = scmp.ne.s32.totalorder %s50_s22, %s6126_s30  ;;  %p6132_p5 = scmp.lt.s32.totalorder %s6126_s30, %s6126_s30 }
  0x15   :  { %p6133_p6 = por %p6132_p5, %p6131_p4 }
  0x17   :  { %p6134_p7 = pnand %p6133_p6, %p6127_p3 }
  0x19   :  { %6137 = shalt.err (!%p6134_p7)
}
  0x1a   :  { %s6487_s0 = smov 768   ;;  %s6488_s17 = smov 48  }
  0x1b   :  { %55 = dma.hbm_to_vmem [thread:$0]  %s7270_s2, 49152, %s50_s22, [#allocation6], %s6487_s0, %s6487_s0, %s6488_s17  }
  0x1c   :  { %s6489_s20 = smov [#allocation8]   ;;  %s6490_s23 = smov [#allocation11]  }
  0x1d   :  { %s72_s21 = sshll.u32 %s6489_s20, 4  ;;  %s94_s24 = sshll.u32 %s6490_s23, 4  ;;  %s73_s21 = int_to_ptr.vmem [resolvable:$true] %s72_s21  ;;  %s95_s24 = int_to_ptr.vmem [resolvable:$true] %s94_s24 }
  0x1e   :  { %s6138_s27 = scalar_lea.hbm %s7272_s4, 96 }
  0x1f   :  { %p6139_p8 = scmp.ne.s32.totalorder %s7272_s4, %s6138_s27  ;;  %p6142_p9 = scmp.lt.u32.totalorder %s6138_s27, %s7272_s4 }
  0x21   :  { %p6144_p10 = pnand %p6142_p9, %p6139_p8 }
  0x23   :  { %6147 = shalt.err (!%p6144_p10)
}
  0x24   :  { %s6148_s2 = scalar_lea.vmem %s73_s21, 96  ;;  %p6153_p12 = scmp.lt.s32.totalorder %s73_s21, %s73_s21 }
  0x25   :  { %p6149_p11 = scmp.ne.s32.totalorder %s73_s21, %s6148_s2  ;;  %p6154_p13 = scmp.lt.s32.totalorder %s6148_s2, %s6148_s2 }
  0x27   :  { %p6155_p0 = por %p6154_p13, %p6153_p12 }
  0x29   :  { %p6156_p1 = pnand %p6155_p0, %p6149_p11 }
  0x2b   :  { %6159 = shalt.err (!%p6156_p1)
}
  0x2c   :  { %75 = dma.hbm_to_vmem [thread:$0]  %s7272_s4, 96, %s73_s21, [#allocation9]  }
  0x2d   :  { %s6160_s23 = scalar_lea.hbm %s7274_s6, 96 }
  0x2e   :  { %p6161_p2 = scmp.ne.s32.totalorder %s7274_s6, %s6160_s23  ;;  %p6164_p3 = scmp.lt.u32.totalorder %s6160_s23, %s7274_s6 }
  0x30   :  { %p6166_p4 = pnand %p6164_p3, %p6161_p2 }
  0x32   :  { %6169 = shalt.err (!%p6166_p4)
}
  0x33   :  { %s6170_s28 = scalar_lea.vmem %s95_s24, 96  ;;  %p6175_p6 = scmp.lt.s32.totalorder %s95_s24, %s95_s24 }
  0x34   :  { %p6171_p5 = scmp.ne.s32.totalorder %s95_s24, %s6170_s28  ;;  %p6176_p7 = scmp.lt.s32.totalorder %s6170_s28, %s6170_s28 }
  0x36   :  { %p6177_p8 = por %p6176_p7, %p6175_p6 }
  0x38   :  { %p6178_p9 = pnand %p6177_p8, %p6171_p5 }
  0x3a   :  { %6181 = shalt.err (!%p6178_p9)
}
  0x3b   :  { %97 = dma.hbm_to_vmem [thread:$0]  %s7274_s6, 96, %s95_s24, [#allocation12]  }
  0x3c   :  { %s6491_s29 = smov [#allocation14]   ;;  %s6492_s2 = smov [#allocation17]  }
  0x3d   :  { %s113_s30 = sshll.u32 %s6491_s29, 4  ;;  %s135_s22 = sshll.u32 %s6492_s2, 4  ;;  %s114_s30 = int_to_ptr.vmem [resolvable:$true] %s113_s30  ;;  %s136_s22 = int_to_ptr.vmem [resolvable:$true] %s135_s22 }
  0x3e   :  { %s6182_s20 = scalar_lea.hbm %s7276_s8, 18432 }
  0x3f   :  { %p6183_p10 = scmp.ne.s32.totalorder %s7276_s8, %s6182_s20  ;;  %p6186_p11 = scmp.lt.u32.totalorder %s6182_s20, %s7276_s8 }
  0x41   :  { %p6188_p12 = pnand %p6186_p11, %p6183_p10 }
  0x43   :  { %6191 = shalt.err (!%p6188_p12)
}
  0x44   :  { %s6192_s6 = scalar_lea.vmem %s114_s30, 18432  ;;  %p6197_p0 = scmp.lt.s32.totalorder %s114_s30, %s114_s30 }
  0x45   :  { %p6193_p13 = scmp.ne.s32.totalorder %s114_s30, %s6192_s6  ;;  %p6198_p1 = scmp.lt.s32.totalorder %s6192_s6, %s6192_s6 }
  0x47   :  { %p6199_p2 = por %p6198_p1, %p6197_p0 }
  0x49   :  { %p6200_p3 = pnand %p6199_p2, %p6193_p13 }
  0x4b   :  { %6203 = shalt.err (!%p6200_p3)
}
  0x4c   :  { %119 = dma.hbm_to_vmem [thread:$0]  %s7276_s8, 18432, %s114_s30, [#allocation15], %s6487_s0, %s6487_s0, %s6488_s17  }
  0x4d   :  { %s6204_s21 = scalar_lea.hbm %s7278_s10, 18432 }
  0x4e   :  { %p6205_p4 = scmp.ne.s32.totalorder %s7278_s10, %s6204_s21  ;;  %p6208_p5 = scmp.lt.u32.totalorder %s6204_s21, %s7278_s10 }
  0x50   :  { %p6210_p6 = pnand %p6208_p5, %p6205_p4 }
  0x52   :  { %6213 = shalt.err (!%p6210_p6)
}
  0x53   :  { %s6214_s20 = scalar_lea.vmem %s136_s22, 18432  ;;  %p6219_p8 = scmp.lt.s32.totalorder %s136_s22, %s136_s22 }
  0x54   :  { %p6215_p7 = scmp.ne.s32.totalorder %s136_s22, %s6214_s20  ;;  %p6220_p9 = scmp.lt.s32.totalorder %s6214_s20, %s6214_s20 }
  0x56   :  { %p6221_p10 = por %p6220_p9, %p6219_p8 }
  0x58   :  { %p6222_p11 = pnand %p6221_p10, %p6215_p7 }
  0x5a   :  { %6225 = shalt.err (!%p6222_p11)
}
  0x5b   :  { %141 = dma.hbm_to_vmem [thread:$0]  %s7278_s10, 18432, %s136_s22, [#allocation18], %s6487_s0, %s6487_s0, %s6488_s17  }
  0x5c   :  { %s6493_s23 = smov [#allocation20]   ;;  %s6494_s25 = smov [#allocation23]  }
  0x5d   :  { %s158_s16 = sshll.u32 %s6493_s23, 4  ;;  %s180_s26 = sshll.u32 %s6494_s25, 4  ;;  %s159_s16 = int_to_ptr.vmem [resolvable:$true] %s158_s16  ;;  %s181_s26 = int_to_ptr.vmem [resolvable:$true] %s180_s26 }
  0x5e   :  { %s6226_s27 = scalar_lea.hbm %s7280_s12, 96 }
  0x5f   :  { %p6227_p12 = scmp.ne.s32.totalorder %s7280_s12, %s6226_s27  ;;  %p6230_p13 = scmp.lt.u32.totalorder %s6226_s27, %s7280_s12 }
  0x61   :  { %p6232_p0 = pnand %p6230_p13, %p6227_p12 }
  0x63   :  { %6235 = shalt.err (!%p6232_p0)
}
  0x64   :  { %s6236_s10 = scalar_lea.vmem %s159_s16, 96  ;;  %p6241_p2 = scmp.lt.s32.totalorder %s159_s16, %s159_s16 }
  0x65   :  { %p6237_p1 = scmp.ne.s32.totalorder %s159_s16, %s6236_s10  ;;  %p6242_p3 = scmp.lt.s32.totalorder %s6236_s10, %s6236_s10 }
  0x67   :  { %p6243_p4 = por %p6242_p3, %p6241_p2 }
  0x69   :  { %p6244_p5 = pnand %p6243_p4, %p6237_p1 }
  0x6b   :  { %6247 = shalt.err (!%p6244_p5)
}
  0x6c   :  { %161 = dma.hbm_to_vmem [thread:$0]  %s7280_s12, 96, %s159_s16, [#allocation21]  }
  0x6d   :  { %s6248_s20 = scalar_lea.hbm %s7282_s14, 16 }
  0x6e   :  { %p6249_p6 = scmp.ne.s32.totalorder %s7282_s14, %s6248_s20  ;;  %p6252_p7 = scmp.lt.u32.totalorder %s6248_s20, %s7282_s14 }
  0x70   :  { %p6254_p8 = pnand %p6252_p7, %p6249_p6 }
  0x72   :  { %6257 = shalt.err (!%p6254_p8)
}
  0x73   :  { %s6258_s6 = scalar_lea.vmem %s181_s26, 16  ;;  %s6262_s24 = scalar_lea.vmem %s181_s26, 32 }
  0x74   :  { %p6259_p9 = scmp.ne.s32.totalorder %s181_s26, %s6258_s6  ;;  %p6263_p10 = scmp.lt.s32.totalorder %s181_s26, %s181_s26 }
  0x75   :  { %p6264_p11 = scmp.lt.s32.totalorder %s6262_s24, %s6258_s6 }
  0x77   :  { %p6265_p12 = por %p6264_p11, %p6263_p10 }
  0x79   :  { %p6266_p13 = pnand %p6265_p12, %p6259_p9 }
  0x7b   :  { %6269 = shalt.err (!%p6266_p13)
}
  0x7c   :  { %183 = dma.hbm_to_vmem [thread:$0]  %s7282_s14, 16, %s181_s26, [#allocation24]  }
  0x7d   :  { %s6495_s27 = smov [#allocation2]   ;;  %s6270_s29 = scalar_lea.hbm %s7269_s1, 2048 }
  0x7e   :  { %s37_s28 = sshll.u32 %s6495_s27, 4  ;;  %p6271_p0 = scmp.ne.s32.totalorder %s7269_s1, %s6270_s29  ;;  %s38_s28 = int_to_ptr.vmem [resolvable:$true] %s37_s28 }
  0x7f   :  { %p6274_p1 = scmp.lt.u32.totalorder %s6270_s29, %s7269_s1 }
  0x81   :  { %p6276_p2 = pnand %p6274_p1, %p6271_p0 }
  0x83   :  { %6279 = shalt.err (!%p6276_p2)
}
  0x84   :  { %s6280_s19 = scalar_lea.vmem %s38_s28, 2048  ;;  %p6285_p4 = scmp.lt.s32.totalorder %s38_s28, %s38_s28 }
  0x85   :  { %p6281_p3 = scmp.ne.s32.totalorder %s38_s28, %s6280_s19  ;;  %p6286_p5 = scmp.lt.s32.totalorder %s6280_s19, %s6280_s19 }
  0x87   :  { %p6287_p6 = por %p6286_p5, %p6285_p4 }
  0x89   :  { %p6288_p7 = pnand %p6287_p6, %p6281_p3 }
  0x8b   :  { %6291 = shalt.err (!%p6288_p7)
}
  0x8c   :  { %s6496_s14 = smov 1024   ;;  %s6497_s26 = smov 64  }
  0x8d   :  { %43 = dma.hbm_to_vmem [thread:$0]  %s7269_s1, 2048, %s38_s28, [#allocation3], %s6496_s14, %s6496_s14, %s6497_s26  }
  0x8e   :  { %s6498_s30 = smov [#allocation7]   ;;  %s6499_s25 = smov [#allocation10]  }
  0x8f   :  { %s62_s23 = sshll.u32 %s6498_s30, 4  ;;  %s81_s6 = sshll.u32 %s6499_s25, 4  ;;  %s63_s23 = int_to_ptr.vmem [resolvable:$true] %s62_s23  ;;  %s6699_s6 = int_to_ptr.vmem [resolvable:$true] %s81_s6 }
  0x90   :  { %s6292_s16 = scalar_lea.hbm %s7271_s3, 96 }
  0x91   :  { %p6293_p8 = scmp.ne.s32.totalorder %s7271_s3, %s6292_s16  ;;  %p6296_p9 = scmp.lt.u32.totalorder %s6292_s16, %s7271_s3 }
  0x93   :  { %p6298_p10 = pnand %p6296_p9, %p6293_p8 }
  0x95   :  { %6301 = shalt.err (!%p6298_p10)
}
  0x96   :  { %s6302_s1 = scalar_lea.vmem %s63_s23, 96  ;;  %p6307_p12 = scmp.lt.s32.totalorder %s63_s23, %s63_s23 }
  0x97   :  { %p6303_p11 = scmp.ne.s32.totalorder %s63_s23, %s6302_s1  ;;  %p6308_p13 = scmp.lt.s32.totalorder %s6302_s1, %s6302_s1 }
  0x99   :  { %p6309_p0 = por %p6308_p13, %p6307_p12 }
  0x9b   :  { %p6310_p1 = pnand %p6309_p0, %p6303_p11 }
  0x9d   :  { %6313 = shalt.err (!%p6310_p1)
}
  0x9e   :  { %65 = dma.hbm_to_vmem [thread:$0]  %s7271_s3, 96, %s63_s23, [#allocation6]  }
  0x9f   :  { %s6314_s18 = scalar_lea.hbm %s7273_s5, 18432 }
  0xa0   :  { %p6315_p2 = scmp.ne.s32.totalorder %s7273_s5, %s6314_s18  ;;  %p6318_p3 = scmp.lt.u32.totalorder %s6314_s18, %s7273_s5 }
  0xa2   :  { %p6320_p4 = pnand %p6318_p3, %p6315_p2 }
  0xa4   :  { %6323 = shalt.err (!%p6320_p4)
}
  0xa5   :  { %s6324_s8 = scalar_lea.vmem %s6699_s6, 18432  ;;  %p6329_p6 = scmp.lt.s32.totalorder %s6699_s6, %s6699_s6 }
  0xa6   :  { %p6325_p5 = scmp.ne.s32.totalorder %s6699_s6, %s6324_s8  ;;  %p6330_p7 = scmp.lt.s32.totalorder %s6324_s8, %s6324_s8 }
  0xa8   :  { %p6331_p8 = por %p6330_p7, %p6329_p6 }
  0xaa   :  { %p6332_p9 = pnand %p6331_p8, %p6325_p5 }
  0xac   :  { %6335 = shalt.err (!%p6332_p9)
}
  0xad   :  { %87 = dma.hbm_to_vmem [thread:$0]  %s7273_s5, 18432, %s6699_s6, [#allocation9], %s6487_s0, %s6487_s0, %s6488_s17  }
  0xae   :  { %s6500_s23 = smov [#allocation13]   ;;  %s6501_s24 = smov [#allocation16]  }
  0xaf   :  { %s104_s25 = sshll.u32 %s6500_s23, 4  ;;  %s126_s12 = sshll.u32 %s6501_s24, 4  ;;  %s105_s25 = int_to_ptr.vmem [resolvable:$true] %s104_s25  ;;  %s127_s12 = int_to_ptr.vmem [resolvable:$true] %s126_s12 }
  0xb0   :  { %s6336_s4 = scalar_lea.hbm %s7275_s7, 96 }
  0xb1   :  { %p6337_p10 = scmp.ne.s32.totalorder %s7275_s7, %s6336_s4  ;;  %p6340_p11 = scmp.lt.u32.totalorder %s6336_s4, %s7275_s7 }
  0xb3   :  { %p6342_p12 = pnand %p6340_p11, %p6337_p10 }
  0xb5   :  { %6345 = shalt.err (!%p6342_p12)
}
  0xb6   :  { %s6346_s5 = scalar_lea.vmem %s105_s25, 96  ;;  %p6351_p0 = scmp.lt.s32.totalorder %s105_s25, %s105_s25 }
  0xb7   :  { %p6347_p13 = scmp.ne.s32.totalorder %s105_s25, %s6346_s5  ;;  %p6352_p1 = scmp.lt.s32.totalorder %s6346_s5, %s6346_s5 }
  0xb9   :  { %p6353_p2 = por %p6352_p1, %p6351_p0 }
  0xbb   :  { %p6354_p3 = pnand %p6353_p2, %p6347_p13 }
  0xbd   :  { %6357 = shalt.err (!%p6354_p3)
}
  0xbe   :  { %107 = dma.hbm_to_vmem [thread:$0]  %s7275_s7, 96, %s105_s25, [#allocation12]  }
  0xbf   :  { %s6358_s22 = scalar_lea.hbm %s7277_s9, 96 }
  0xc0   :  { %p6359_p4 = scmp.ne.s32.totalorder %s7277_s9, %s6358_s22  ;;  %p6362_p5 = scmp.lt.u32.totalorder %s6358_s22, %s7277_s9 }
  0xc2   :  { %p6364_p6 = pnand %p6362_p5, %p6359_p4 }
  0xc4   :  { %6367 = shalt.err (!%p6364_p6)
}
  0xc5   :  { %s6368_s26 = scalar_lea.vmem %s127_s12, 96  ;;  %p6373_p8 = scmp.lt.s32.totalorder %s127_s12, %s127_s12 }
  0xc6   :  { %p6369_p7 = scmp.ne.s32.totalorder %s127_s12, %s6368_s26  ;;  %p6374_p9 = scmp.lt.s32.totalorder %s6368_s26, %s6368_s26 }
  0xc8   :  { %p6375_p10 = por %p6374_p9, %p6373_p8 }
  0xca   :  { %p6376_p11 = pnand %p6375_p10, %p6369_p7 }
  0xcc   :  { %6379 = shalt.err (!%p6376_p11)
}
  0xcd   :  { %129 = dma.hbm_to_vmem [thread:$0]  %s7277_s9, 96, %s127_s12, [#allocation15]  }
  0xce   :  { %s6502_s8 = smov [#allocation19]   ;;  %s6503_s30 = smov [#allocation22]  }
  0xcf   :  { %s148_s3 = sshll.u32 %s6502_s8, 4  ;;  %s167_s23 = sshll.u32 %s6503_s30, 4  ;;  %s149_s3 = int_to_ptr.vmem [resolvable:$true] %s148_s3  ;;  %s6757_s23 = int_to_ptr.vmem [resolvable:$true] %s167_s23 }
  0xd0   :  { %s6380_s16 = scalar_lea.hbm %s7279_s11, 96 }
  0xd1   :  { %p6381_p12 = scmp.ne.s32.totalorder %s7279_s11, %s6380_s16  ;;  %p6384_p13 = scmp.lt.u32.totalorder %s6380_s16, %s7279_s11 }
  0xd3   :  { %p6386_p0 = pnand %p6384_p13, %p6381_p12 }
  0xd5   :  { %6389 = shalt.err (!%p6386_p0)
}
  0xd6   :  { %s6390_s9 = scalar_lea.vmem %s149_s3, 96  ;;  %p6395_p2 = scmp.lt.s32.totalorder %s149_s3, %s149_s3 }
  0xd7   :  { %p6391_p1 = scmp.ne.s32.totalorder %s149_s3, %s6390_s9  ;;  %p6396_p3 = scmp.lt.s32.totalorder %s6390_s9, %s6390_s9 }
  0xd9   :  { %p6397_p4 = por %p6396_p3, %p6395_p2 }
  0xdb   :  { %p6398_p5 = pnand %p6397_p4, %p6391_p1 }
  0xdd   :  { %6401 = shalt.err (!%p6398_p5)
}
  0xde   :  { %151 = dma.hbm_to_vmem [thread:$0]  %s7279_s11, 96, %s149_s3, [#allocation18]  }
  0xdf   :  { %s6402_s0 = scalar_lea.hbm %s7281_s13, 3072 }
  0xe0   :  { %p6403_p6 = scmp.ne.s32.totalorder %s7281_s13, %s6402_s0  ;;  %p6406_p7 = scmp.lt.u32.totalorder %s6402_s0, %s7281_s13 }
  0xe2   :  { %p6408_p8 = pnand %p6406_p7, %p6403_p6 }
  0xe4   :  { %6411 = shalt.err (!%p6408_p8)
}
  0xe5   :  { %s6412_s2 = scalar_lea.vmem %s6757_s23, 3072  ;;  %p6417_p10 = scmp.lt.s32.totalorder %s6757_s23, %s6757_s23 }
  0xe6   :  { %p6413_p9 = scmp.ne.s32.totalorder %s6757_s23, %s6412_s2  ;;  %p6418_p11 = scmp.lt.s32.totalorder %s6412_s2, %s6412_s2 }
  0xe8   :  { %p6419_p12 = por %p6418_p11, %p6417_p10 }
  0xea   :  { %p6420_p13 = pnand %p6419_p12, %p6413_p9 }
  0xec   :  { %6423 = shalt.err (!%p6420_p13)
}
  0xed   :  { %s6504_s11 = smov 128   ;;  %s6505_s18 = smov 8  }
  0xee   :  { %173 = dma.hbm_to_vmem [thread:$0]  %s7281_s13, 3072, %s6757_s23, [#allocation21], %s6504_s11, %s6504_s11, %s6505_s18  }
  0xef   :  { %s6506_s26 = smov [#allocation25]   ;;  %s6424_s3 = scalar_lea.hbm %s7283_s15, 16 }
  0xf0   :  { %s190_s7 = sshll.u32 %s6506_s26, 4  ;;  %p6425_p0 = scmp.ne.s32.totalorder %s7283_s15, %s6424_s3  ;;  %s191_s7 = int_to_ptr.vmem [resolvable:$true] %s190_s7 }
  0xf1   :  { %p6428_p1 = scmp.lt.u32.totalorder %s6424_s3, %s7283_s15 }
  0xf3   :  { %p6430_p2 = pnand %p6428_p1, %p6425_p0 }
  0xf5   :  { %6433 = shalt.err (!%p6430_p2)
}
  0xf6   :  { %s6434_s27 = scalar_lea.vmem %s191_s7, 16  ;;  %s6438_s13 = scalar_lea.vmem %s191_s7, 32 }
  0xf7   :  { %p6435_p3 = scmp.ne.s32.totalorder %s191_s7, %s6434_s27  ;;  %p6439_p4 = scmp.lt.s32.totalorder %s191_s7, %s191_s7 }
  0xf8   :  { %p6440_p5 = scmp.lt.s32.totalorder %s6438_s13, %s6434_s27 }
  0xfa   :  { %p6441_p6 = por %p6440_p5, %p6439_p4 }
  0xfc   :  { %p6442_p7 = pnand %p6441_p6, %p6435_p3 }
  0xfe   :  { %6445 = shalt.err (!%p6442_p7)
}
  0xff   :  { %193 = dma.hbm_to_vmem [thread:$0]  %s7283_s15, 16, %s191_s7, [#allocation24]  }
 0x100   :  { %6468 = dma.done.wait [#allocation3], 2048  }
 0x101   :  { %6469 = vsyncadd [#allocation3], 4294965248 }
 0x102   :  { %6470 = dma.done.wait [#allocation6], 49248  }
 0x103   :  { %6471 = vsyncadd [#allocation6], 4294918048 }
 0x104   :  { %6472 = dma.done.wait [#allocation9], 18528  }
 0x105   :  { %6473 = vsyncadd [#allocation9], 4294948768 }
 0x106   :  { %6474 = dma.done.wait [#allocation12], 192  }
 0x107   :  { %6475 = vsyncadd [#allocation12], 4294967104 }
 0x108   :  { %6476 = dma.done.wait [#allocation15], 18528  }
 0x109   :  { %6477 = vsyncadd [#allocation15], 4294948768 }
 0x10a   :  { %6478 = dma.done.wait [#allocation18], 18528  }
 0x10b   :  { %6479 = vsyncadd [#allocation18], 4294948768 }
 0x10c   :  { %6480 = dma.done.wait [#allocation21], 3168  }
 0x10d   :  { %6481 = vsyncadd [#allocation21], 4294964128 }
 0x10e   :  { %6482 = dma.done.wait [#allocation24], 32  }
 0x10f   :  { %6483 = vsyncadd [#allocation24], 4294967264  ;;  %v597_v0 = vld [vmem:[#allocation5 + $0x8] sm:$0xff]  ;;  %v599_v1 = vld [vmem:[#allocation5 + $0x18] sm:$0xff]  ;;  %vm306_vm0 = vcmask 1043456   ;;  %vm1812_vm1 = vcmask 1041409  }
 0x110   :  { %v596_v2 = vld [vmem:[#allocation5] sm:$0xff]  ;;  %v981_v3 = vunpack.c.l.s8.bf16 %v597_v0  ;;  %v987_v4 = vunpack.c.h.s8.bf16 %v597_v0  ;;  %v983_v5 = vunpack.c.l.s8.bf16 %v599_v1  ;;  %v989_v6 = vunpack.c.h.s8.bf16 %v599_v1  ;;  %v598_v7 = vld [vmem:[#allocation5 + $0x10] sm:$0xff]  ;;  %v603_v10 = vld [vmem:[#allocation5 + $0x38] sm:$0xff]  ;;  %s7289_s29 = sld [smem:[#allocation36_spill]]  ;;  %s6508_s1 = smov [#allocation26]  }
 0x111   :  { %v980_v8 = vunpack.c.l.s8.bf16 %v596_v2  ;;  %v982_v9 = vunpack.c.l.s8.bf16 %v598_v7  ;;  %v605_v11 = vld [vmem:[#allocation5 + $0x48] sm:$0xff]  ;;  %v986_v12 = vunpack.c.h.s8.bf16 %v596_v2  ;;  %v988_v13 = vunpack.c.h.s8.bf16 %v598_v7  ;;  %v602_v16 = vld [vmem:[#allocation5 + $0x30] sm:$0xff]  ;;  %v604_v17 = vld [vmem:[#allocation5 + $0x40] sm:$0xff]  ;;  %s5833_s28 = sshll.u32 %s6508_s1, 4  ;;  %s5834_s28 = int_to_ptr.vmem [resolvable:$true] %s5833_s28 }
 0x112   :  { %1861 = vmatprep.subr.bf16.mxu0 %v981_v3  ;;  %2189 = vmatprep.subr.bf16.mxu1 %v983_v5  ;;  %v993_v14 = vunpack.c.l.s8.bf16 %v603_v10  ;;  %v995_v15 = vunpack.c.l.s8.bf16 %v605_v11  ;;  %v992_v18 = vunpack.c.l.s8.bf16 %v602_v16  ;;  %v994_v19 = vunpack.c.l.s8.bf16 %v604_v17  ;;  %v609_v22 = vld [vmem:[#allocation5 + $0x68] sm:$0xff]  ;;  %v611_v23 = vld [vmem:[#allocation5 + $0x78] sm:$0xff]  ;;  %v608_v28 = vld [vmem:[#allocation5 + $0x60] sm:$0xff]  ;;  %s6446_s5 = scalar_lea.vmem %s5834_s28, 32  ;;  %p6451_p9 = scmp.lt.s32.totalorder %s5834_s28, %s5834_s28 }
 0x113   :  { %1862 = vmatpush1.bf16.msra.mxu0 %v980_v8  ;;  %2190 = vmatpush1.bf16.msra.mxu1 %v982_v9  ;;  %v999_v20 = vunpack.c.h.s8.bf16 %v603_v10  ;;  %v1001_v21 = vunpack.c.h.s8.bf16 %v605_v11  ;;  %v998_v24 = vunpack.c.h.s8.bf16 %v602_v16  ;;  %v1000_v25 = vunpack.c.h.s8.bf16 %v604_v17  ;;  %v610_v29 = vld [vmem:[#allocation5 + $0x70] sm:$0xff]  ;;  %v242_v30 = vld [vmem:[#allocation2] sm:$0xff]  ;;  %v615_v38 = vld [vmem:[#allocation5 + $0x98] sm:$0xff]  ;;  %p6447_p8 = scmp.ne.s32.totalorder %s5834_s28, %s6446_s5  ;;  %p6452_p10 = scmp.lt.s32.totalorder %s6446_s5, %s6446_s5 }
 0x114   :  { %1863 = vmatprep.subr.bf16.mxu0 %v987_v4  ;;  %2191 = vmatprep.subr.bf16.mxu1 %v989_v6  ;;  %v1005_v26 = vunpack.c.l.s8.bf16 %v609_v22  ;;  %v1007_v27 = vunpack.c.l.s8.bf16 %v611_v23  ;;  %v250_v31 = vld [vmem:[#allocation2 + $0x40] sm:$0xff]  ;;  %v1004_v32 = vunpack.c.l.s8.bf16 %v608_v28  ;;  %v1006_v33 = vunpack.c.l.s8.bf16 %v610_v29  ;;  %v617_v39 = vld [vmem:[#allocation5 + $0xa8] sm:$0xff]  ;;  %v614_v44 = vld [vmem:[#allocation5 + $0x90] sm:$0xff] }
 0x115   :  { %v1011_v34 = vunpack.c.h.s8.bf16 %v609_v22  ;;  %v1013_v35 = vunpack.c.h.s8.bf16 %v611_v23  ;;  %v274_v36 = vcombine.high %v242_v30, %v242_v30  ;;  %v282_v37 = vcombine.high %v250_v31, %v250_v31  ;;  %v616_v50 = vld [vmem:[#allocation5 + $0xa0] sm:$0xff]  ;;  %v621_v62 = vld [vmem:[#allocation5 + $0xc8] sm:$0xff]  ;;  %v623_v63 = vld [vmem:[#allocation5 + $0xd8] sm:$0xff]  ;;  %p6453_p11 = por %p6452_p10, %p6451_p9 }
 0x116   :  { %v1010_v40 = vunpack.c.h.s8.bf16 %v608_v28  ;;  %v1012_v43 = vunpack.c.h.s8.bf16 %v610_v29  ;;  %v307_v47 = vsel %vm306_vm0, %v242_v30, 0.0  ;;  %v1017_v48 = vunpack.c.l.s8.bf16 %v615_v38  ;;  %v620_v5 = vld [vmem:[#allocation5 + $0xc0] sm:$0xff]  ;;  %v622_v11 = vld [vmem:[#allocation5 + $0xd0] sm:$0xff]  ;;  %v627_v22 = vld [vmem:[#allocation5 + $0xf8] sm:$0xff] }
 0x117   :  { %1864 = vmatpush1.bf16.msra.mxu0 %v986_v12  ;;  %2192 = vmatpush1.bf16.msra.mxu1 %v988_v13  ;;  %v314_v41 = vsel %vm306_vm0, %v274_v36, 0.0  ;;  %v426_v42 = vsel %vm306_vm0, %v282_v37, 0.0  ;;  %v1019_v49 = vunpack.c.l.s8.bf16 %v617_v39  ;;  %v419_v51 = vsel %vm306_vm0, %v250_v31, 0.0  ;;  %v629_v23 = vld [vmem:[#allocation5 + $0x108] sm:$0xff]  ;;  %p6454_p12 = pnand %p6453_p11, %p6447_p8 }
 0x118   :  { %1865 = vmatprep.subr.bf16.mxu0 %v993_v14  ;;  %2193 = vmatprep.subr.bf16.mxu1 %v995_v15  ;;  %v315_v45 = vrot.slane %v314_v41, 4  ;;  %v427_v46 = vrot.slane %v426_v42, 4  ;;  %v1016_v54 = vunpack.c.l.s8.bf16 %v614_v44  ;;  %v308_v55 = vrot.slane %v307_v47, 4 }
 0x119   :  { %v1018_v56 = vunpack.c.l.s8.bf16 %v616_v50  ;;  %v420_v59 = vrot.slane %v419_v51, 4  ;;  %v1023_v60 = vunpack.c.h.s8.bf16 %v615_v38  ;;  %v1025_v61 = vunpack.c.h.s8.bf16 %v617_v39 }
 0x11a   :  { %v316_v52 = vadd.f32 %v315_v45, %v314_v41  ;;  %v428_v53 = vadd.f32 %v427_v46, %v426_v42  ;;  %v1022_v2 = vunpack.c.h.s8.bf16 %v614_v44  ;;  %v309_v3 = vadd.f32 %v308_v55, %v307_v47  ;;  %v6807_v44 = vld [vmem:[#allocation2 + $0x8] sm:$0xff]  ;;  %v635_v47 = vld [vmem:[#allocation5 + $0x138] sm:$0xff] }
 0x11b   :  { %1866 = vmatpush1.bf16.msra.mxu0 %v992_v18  ;;  %2194 = vmatpush1.bf16.msra.mxu1 %v994_v19  ;;  %v1024_v4 = vunpack.c.h.s8.bf16 %v616_v50  ;;  %v421_v8 = vadd.f32 %v420_v59, %v419_v51  ;;  %v1029_v9 = vunpack.c.l.s8.bf16 %v621_v62  ;;  %v1031_v10 = vunpack.c.l.s8.bf16 %v623_v63  ;;  %v6809_v45 = vld [vmem:[#allocation2 + $0x48] sm:$0xff] }
 0x11c   :  { %1867 = vmatprep.subr.bf16.mxu0 %v999_v20  ;;  %2195 = vmatprep.subr.bf16.mxu1 %v1001_v21  ;;  %v317_v57 = vrot.slane %v316_v52, 2  ;;  %v429_v58 = vrot.slane %v428_v53, 2  ;;  %v1028_v14 = vunpack.c.l.s8.bf16 %v620_v5  ;;  %v310_v15 = vrot.slane %v309_v3, 2  ;;  %v633_v46 = vld [vmem:[#allocation5 + $0x128] sm:$0xff] }
 0x11d   :  { %v1030_v16 = vunpack.c.l.s8.bf16 %v622_v11  ;;  %v422_v19 = vrot.slane %v421_v8, 2  ;;  %v1035_v20 = vunpack.c.h.s8.bf16 %v621_v62  ;;  %v1037_v21 = vunpack.c.h.s8.bf16 %v623_v63 }
 0x11e   :  { %v318_v0 = vadd.f32 %v317_v57, %v316_v52  ;;  %v430_v1 = vadd.f32 %v429_v58, %v428_v53  ;;  %v1036_v28 = vunpack.c.h.s8.bf16 %v622_v11  ;;  %v1047_v42 = vunpack.c.h.s8.bf16 %v627_v22  ;;  %v634_v57 = vld [vmem:[#allocation5 + $0x130] sm:$0xff] }
 0x11f   :  { %1868 = vmatpush1.bf16.msra.mxu0 %v998_v24  ;;  %2196 = vmatpush1.bf16.msra.mxu1 %v1000_v25  ;;  %v423_v31 = vadd.f32 %v422_v19, %v421_v8  ;;  %v275_v52 = vcombine.high %v6807_v44, %v6807_v44  ;;  %v283_v53 = vcombine.high %v6809_v45, %v6809_v45  ;;  %v1055_v55 = vunpack.c.l.s8.bf16 %v635_v47 }
 0x120   :  { %1869 = vmatprep.subr.bf16.mxu0 %v1005_v26  ;;  %2197 = vmatprep.subr.bf16.mxu1 %v1007_v27  ;;  %v319_v6 = vrot.slane %v318_v0, 1  ;;  %v431_v7 = vrot.slane %v430_v1, 1  ;;  %v1034_v26 = vunpack.c.h.s8.bf16 %v620_v5  ;;  %v311_v27 = vadd.f32 %v310_v15, %v309_v3 }
 0x121   :  { %v424_v41 = vrot.slane %v423_v31, 1  ;;  %v328_v58 = vsel %vm306_vm0, %v275_v52, 0.0  ;;  %v440_v59 = vsel %vm306_vm0, %v283_v53, 0.0  ;;  %v1054_v63 = vunpack.c.l.s8.bf16 %v634_v57 }
 0x122   :  { %v320_v12 = vadd.f32 %v319_v6, %v318_v0  ;;  %v432_v13 = vadd.f32 %v431_v7, %v430_v1  ;;  %v312_v38 = vrot.slane %v311_v27, 1  ;;  %v1061_v3 = vunpack.c.h.s8.bf16 %v635_v47  ;;  %v639_v6 = vld [vmem:[#allocation5 + $0x158] sm:$0xff]  ;;  %v641_v7 = vld [vmem:[#allocation5 + $0x168] sm:$0xff] }
 0x123   :  { %1870 = vmatpush1.bf16.msra.mxu0 %v1004_v32  ;;  %2198 = vmatpush1.bf16.msra.mxu1 %v1006_v33  ;;  %v1041_v32 = vunpack.c.l.s8.bf16 %v627_v22  ;;  %v1043_v33 = vunpack.c.l.s8.bf16 %v629_v23  ;;  %v425_v51 = vadd.f32 %v424_v41, %v423_v31  ;;  %v1060_v11 = vunpack.c.h.s8.bf16 %v634_v57  ;;  %v647_v31 = vld [vmem:[#allocation5 + $0x198] sm:$0xff]  ;;  %v646_v41 = vld [vmem:[#allocation5 + $0x190] sm:$0xff] }
 0x124   :  { %1871 = vmatprep.subr.bf16.mxu0 %v1011_v34  ;;  %2199 = vmatprep.subr.bf16.mxu1 %v1013_v35  ;;  %v533_v17 = vmul.f32 0.25, %v320_v12  ;;  %v549_v18 = vmul.f32 0.25, %v432_v13  ;;  %v626_v34 = vld [vmem:[#allocation5 + $0xf0] sm:$0xff]  ;;  %v628_v35 = vld [vmem:[#allocation5 + $0x100] sm:$0xff]  ;;  %v1067_v15 = vunpack.c.l.s8.bf16 %v641_v7  ;;  %v1085_v52 = vunpack.c.h.s8.bf16 %v647_v31 }
 0x125   :  { %v1040_v39 = vunpack.c.l.s8.bf16 %v626_v34  ;;  %v1048_v50 = vunpack.c.h.s8.bf16 %v628_v35  ;;  %v548_v1 = vmul.f32 0.25, %v425_v51 }
 0x126   :  { %v565_v24 = vpack.c.bf16 %v533_v17, %v533_v17  ;;  %v581_v25 = vpack.c.bf16 %v549_v18, %v549_v18  ;;  %v640_v17 = vld [vmem:[#allocation5 + $0x160] sm:$0xff] }
 0x127   :  { %1872 = vmatpush1.bf16.msra.mxu0 %v1010_v40  ;;  %2200 = vmatpush1.bf16.msra.mxu1 %v1012_v43  ;;  %v1042_v40 = vunpack.c.l.s8.bf16 %v628_v35  ;;  %v1049_v43 = vunpack.c.h.s8.bf16 %v629_v23  ;;  %v580_v13 = vpack.c.bf16 %v548_v1, %v548_v1  ;;  %v1066_v23 = vunpack.c.l.s8.bf16 %v640_v17 }
 0x128   :  { %1873 = vmatprep.subr.bf16.mxu0 %v1017_v48  ;;  %2201 = vmatprep.subr.bf16.mxu1 %v1019_v49  ;;  %v1781_v29 = vunpack.c.l.b16 %v565_v24  ;;  %v1797_v30 = vunpack.c.l.b16 %v581_v25  ;;  %v1046_v48 = vunpack.c.h.s8.bf16 %v626_v34  ;;  %v313_v49 = vadd.f32 %v312_v38, %v311_v27 }
 0x129   :  { %v1796_v25 = vunpack.c.l.b16 %v580_v13  ;;  %v1073_v27 = vunpack.c.h.s8.bf16 %v641_v7  ;;  %v1072_v35 = vunpack.c.h.s8.bf16 %v640_v17  ;;  %v663_v17 = vld [vmem:[#allocation5 + $0x218] sm:$0xff] }
 0x12a   :  { %v1814_v36 = vsel %vm1812_vm1, %v1797_v30, %v1781_v29  ;;  %v532_v0 = vmul.f32 0.25, %v313_v49  ;;  %v645_v30 = vld [vmem:[#allocation5 + $0x188] sm:$0xff] }
 0x12b   :  { %1874 = vmatpush1.bf16.msra.mxu0 %v1016_v54  ;;  %2202 = vmatpush1.bf16.msra.mxu1 %v1018_v56  ;;  %v6805_v37 = vpack.c.b16 %v1814_v36, %v1814_v36  ;;  %v1053_v54 = vunpack.c.l.s8.bf16 %v633_v46  ;;  %v632_v56 = vld [vmem:[#allocation5 + $0x120] sm:$0xff]  ;;  %v1077_v38 = vunpack.c.l.s8.bf16 %v645_v30  ;;  %v1083_v51 = vunpack.c.h.s8.bf16 %v645_v30 }
 0x12c   :  { %1875 = vmatprep.subr.bf16.mxu0 %v1023_v60  ;;  %2203 = vmatprep.subr.bf16.mxu1 %v1025_v61  ;;  %v329_v60 = vrot.slane %v328_v58, 4  ;;  %v441_v61 = vrot.slane %v440_v59, 4  ;;  %v1052_v62 = vunpack.c.l.s8.bf16 %v632_v56  ;;  %v564_v12 = vpack.c.bf16 %v532_v0, %v532_v0 }
 0x12d   :  { %1893 = vmatprep.mubr.bf16.mxu0 %v6805_v37  ;;  %2221 = vmatprep.mubr.bf16.mxu1 %v6805_v37 }
 0x12e   :  { %v442_v5 = vadd.f32 %v441_v61, %v440_v59  ;;  %v1780_v24 = vunpack.c.l.b16 %v564_v12  ;;  %v650_v61 = vld [vmem:[#allocation5 + $0x1b0] sm:$0xff] }
 0x12f   :  { %1876 = vmatpush1.bf16.msra.mxu0 %v1022_v2  ;;  %2204 = vmatpush1.bf16.msra.mxu1 %v1024_v4  ;;  %v1059_v2 = vunpack.c.h.s8.bf16 %v633_v46  ;;  %v330_v4 = vadd.f32 %v329_v60, %v328_v58  ;;  %v1084_v58 = vunpack.c.h.s8.bf16 %v646_v41 }
 0x130   :  { %1877 = vmatprep.subr.bf16.mxu0 %v1029_v9  ;;  %2205 = vmatprep.subr.bf16.mxu1 %v1031_v10  ;;  %v443_v9 = vrot.slane %v442_v5, 2  ;;  %v1058_v10 = vunpack.c.h.s8.bf16 %v632_v56  ;;  %v1813_v36 = vsel %vm1812_vm1, %v1796_v25, %v1780_v24  ;;  %v1113_v25 = vunpack.c.l.s8.bf16 %v663_v17 }
 0x131   :  { %v331_v8 = vrot.slane %v330_v4, 2  ;;  %v6820_v46 = vpack.c.b16 %v1813_v36, %v1813_v36 }
 0x132   :  { %v444_v19 = vadd.f32 %v443_v9, %v442_v5  ;;  %v1094_v5 = vunpack.c.h.s8.bf16 %v650_v61  ;;  %v656_v9 = vld [vmem:[#allocation5 + $0x1e0] sm:$0xff] }
 0x133   :  { %1878 = vmatpush1.bf16.msra.mxu0 %v1028_v14  ;;  %2206 = vmatpush1.bf16.msra.mxu1 %v1030_v16  ;;  %v1065_v14 = vunpack.c.l.s8.bf16 %v639_v6  ;;  %v638_v16 = vld [vmem:[#allocation5 + $0x150] sm:$0xff]  ;;  %v332_v18 = vadd.f32 %v331_v8, %v330_v4  ;;  %v659_v4 = vld [vmem:[#allocation5 + $0x1f8] sm:$0xff] }
 0x134   :  { %1879 = vmatprep.subr.bf16.mxu0 %v1035_v20  ;;  %2207 = vmatprep.subr.bf16.mxu1 %v1037_v21  ;;  %v445_v21 = vrot.slane %v444_v19, 1  ;;  %v1064_v22 = vunpack.c.l.s8.bf16 %v638_v16  ;;  %v1070_v34 = vunpack.c.h.s8.bf16 %v638_v16  ;;  %v1103_v8 = vunpack.c.l.s8.bf16 %v659_v4  ;;  %v6831_v16 = vld [vmem:[#allocation2 + $0x50] sm:$0xff] }
 0x135   :  { %v333_v20 = vrot.slane %v332_v18, 1  ;;  %v284_v24 = vcombine.high %v6831_v16, %v6831_v16 }
 0x136   :  { %v446_v29 = vadd.f32 %v445_v21, %v444_v19  ;;  %v1106_v19 = vunpack.c.h.s8.bf16 %v656_v9  ;;  %v662_v21 = vld [vmem:[#allocation5 + $0x210] sm:$0xff] }
 0x137   :  { %1880 = vmatpush1.bf16.msra.mxu0 %v1034_v26  ;;  %2208 = vmatpush1.bf16.msra.mxu1 %v1036_v28  ;;  %v1071_v26 = vunpack.c.h.s8.bf16 %v639_v6  ;;  %v334_v28 = vadd.f32 %v333_v20, %v332_v18  ;;  %v665_v18 = vld [vmem:[#allocation5 + $0x228] sm:$0xff] }
 0x138   :  { %1881 = vmatprep.subr.bf16.mxu0 %v1041_v32  ;;  %2209 = vmatprep.subr.bf16.mxu1 %v1043_v33  ;;  %v551_v33 = vmul.f32 0.25, %v446_v29  ;;  %v1112_v29 = vunpack.c.l.s8.bf16 %v662_v21  ;;  %v1121_v36 = vunpack.c.h.s8.bf16 %v665_v18 }
 0x139   :  { %v535_v32 = vmul.f32 0.25, %v334_v28  ;;  %v433_v28 = vsel %vm306_vm0, %v6809_v45, 0.0  ;;  %v1118_v45 = vunpack.c.h.s8.bf16 %v662_v21 }
 0x13b   :  { %1882 = vmatpush1.bf16.msra.mxu0 %v1040_v39  ;;  %2210 = vmatpush1.bf16.msra.mxu1 %v1042_v40  ;;  %v1079_v39 = vunpack.c.l.s8.bf16 %v647_v31  ;;  %v644_v40 = vld [vmem:[#allocation5 + $0x180] sm:$0xff] }
 0x13c   :  { %1883 = vmatprep.subr.bf16.mxu0 %v1047_v42  ;;  %2211 = vmatprep.subr.bf16.mxu1 %v1049_v43  ;;  %v567_v42 = vpack.c.bf16 %v535_v32, %v535_v32  ;;  %v583_v43 = vpack.c.bf16 %v551_v33, %v551_v33  ;;  %v1076_v49 = vunpack.c.l.s8.bf16 %v644_v40  ;;  %v1082_v57 = vunpack.c.h.s8.bf16 %v644_v40 }
 0x13d   :  { %v434_v32 = vrot.slane %v433_v28, 4 }
 0x13e   :  { %v1783_v47 = vunpack.c.l.b16 %v567_v42 }
 0x13f   :  { %1884 = vmatpush1.bf16.msra.mxu0 %v1046_v48  ;;  %2212 = vmatpush1.bf16.msra.mxu1 %v1048_v50  ;;  %v1799_v48 = vunpack.c.l.b16 %v583_v43  ;;  %v1078_v50 = vunpack.c.l.s8.bf16 %v646_v41  ;;  %v435_v43 = vadd.f32 %v434_v32, %v433_v28  ;;  %v680_v28 = vld [vmem:[#allocation5 + $0x2a0] sm:$0xff] }
 0x140   :  { %1885 = vmatprep.subr.bf16.mxu0 %v1053_v54  ;;  %2213 = vmatprep.subr.bf16.mxu1 %v1055_v55  ;;  %v651_v54 = vld [vmem:[#allocation5 + $0x1b8] sm:$0xff]  ;;  %v653_v55 = vld [vmem:[#allocation5 + $0x1c8] sm:$0xff]  ;;  %v1148_v32 = vunpack.c.l.s8.bf16 %v680_v28 }
 0x141   :  { %v1816_v53 = vsel %vm1812_vm1, %v1799_v48, %v1783_v47  ;;  %v1089_v59 = vunpack.c.l.s8.bf16 %v651_v54  ;;  %v1091_v60 = vunpack.c.l.s8.bf16 %v653_v55  ;;  %v1095_v1 = vunpack.c.h.s8.bf16 %v651_v54 }
 0x142   :  { %v6823_v56 = vpack.c.b16 %v1816_v53, %v1816_v53 }
 0x143   :  { %1886 = vmatpush1.bf16.msra.mxu0 %v1052_v62  ;;  %2214 = vmatpush1.bf16.msra.mxu1 %v1054_v63  ;;  %v652_v62 = vld [vmem:[#allocation5 + $0x1c0] sm:$0xff]  ;;  %v1088_v63 = vunpack.c.l.s8.bf16 %v650_v61  ;;  %v677_v61 = vld [vmem:[#allocation5 + $0x288] sm:$0xff] }
 0x144   :  { %1887 = vmatprep.subr.bf16.mxu0 %v1059_v2  ;;  %2215 = vmatprep.subr.bf16.mxu1 %v1061_v3  ;;  %v1090_v0 = vunpack.c.l.s8.bf16 %v652_v62  ;;  %v1097_v2 = vunpack.c.h.s8.bf16 %v653_v55  ;;  %v657_v3 = vld [vmem:[#allocation5 + $0x1e8] sm:$0xff]  ;;  %v1096_v6 = vunpack.c.h.s8.bf16 %v652_v62 }
 0x145   :  { %v1101_v7 = vunpack.c.l.s8.bf16 %v657_v3  ;;  %v1107_v13 = vunpack.c.h.s8.bf16 %v657_v3 }
 0x147   :  { %1888 = vmatpush1.bf16.msra.mxu0 %v1058_v10  ;;  %2216 = vmatpush1.bf16.msra.mxu1 %v1060_v11  ;;  %v658_v10 = vld [vmem:[#allocation5 + $0x1f0] sm:$0xff]  ;;  %v1100_v11 = vunpack.c.l.s8.bf16 %v656_v9 }
 0x148   :  { %1889 = vmatprep.subr.bf16.mxu0 %v1065_v14  ;;  %2217 = vmatprep.subr.bf16.mxu1 %v1067_v15  ;;  %v1102_v12 = vunpack.c.l.s8.bf16 %v658_v10  ;;  %v1109_v14 = vunpack.c.h.s8.bf16 %v659_v4  ;;  %v6829_v15 = vld [vmem:[#allocation2 + $0x10] sm:$0xff]  ;;  %v1108_v20 = vunpack.c.h.s8.bf16 %v658_v10 }
 0x14b   :  { %1890 = vmatpush1.bf16.msra.mxu0 %v1064_v22  ;;  %2218 = vmatpush1.bf16.msra.mxu1 %v1066_v23  ;;  %v664_v22 = vld [vmem:[#allocation5 + $0x220] sm:$0xff]  ;;  %v276_v23 = vcombine.high %v6829_v15, %v6829_v15 }
 0x14c   :  { %1891 = vmatprep.subr.bf16.mxu0 %v1071_v26  ;;  %2219 = vmatprep.subr.bf16.mxu1 %v1073_v27  ;;  %v1115_v26 = vunpack.c.l.s8.bf16 %v665_v18  ;;  %v321_v27 = vsel %vm306_vm0, %v6807_v44, 0.0  ;;  %v1114_v30 = vunpack.c.l.s8.bf16 %v664_v22  ;;  %v1120_v41 = vunpack.c.h.s8.bf16 %v664_v22  ;;  %v681_v18 = vld [vmem:[#allocation5 + $0x2a8] sm:$0xff] }
 0x14d   :  { %v322_v31 = vrot.slane %v321_v27, 4  ;;  %v342_v33 = vsel %vm306_vm0, %v276_v23, 0.0 }
 0x14e   :  { %v343_v44 = vrot.slane %v342_v33, 4 }
 0x14f   :  { %1892 = vmatpush1.bf16.msra.mxu0 %v1070_v34  ;;  %2220 = vmatpush1.bf16.msra.mxu1 %v1072_v35  ;;  %v454_v34 = vsel %vm306_vm0, %v284_v24, 0.0  ;;  %v1119_v35 = vunpack.c.h.s8.bf16 %v663_v17  ;;  %v323_v42 = vadd.f32 %v322_v31, %v321_v27  ;;  %v1145_v17 = vunpack.c.h.s8.bf16 %v677_v61 }
 0x150   :  { %1902 = vmatprep.subr.bf16.mxu0 %v1077_v38  ;;  %2230 = vmatprep.subr.bf16.mxu1 %v1079_v39  ;;  %v669_v38 = vld [vmem:[#allocation5 + $0x248] sm:$0xff]  ;;  %v671_v39 = vld [vmem:[#allocation5 + $0x258] sm:$0xff]  ;;  %v455_v40 = vrot.slane %v454_v34, 4 }
 0x151   :  { %v1125_v47 = vunpack.c.l.s8.bf16 %v669_v38  ;;  %v1127_v48 = vunpack.c.l.s8.bf16 %v671_v39  ;;  %v324_v55 = vrot.slane %v323_v42, 2 }
 0x152   :  { %1894 = vmatmul.mubr.bf16.vlgmr.msra.gmra.mrb[0].mxu0 %v6820_v46  ;;  %2222 = vmatmul.mubr.bf16.vlgmr.msra.gmra.mrb[0].mxu1 %v6820_v46 }
 0x153   :  { %1903 = vmatpush1.bf16.msra.mxu0 %v1076_v49  ;;  %2231 = vmatpush1.bf16.msra.mxu1 %v1078_v50  ;;  %v668_v49 = vld [vmem:[#allocation5 + $0x240] sm:$0xff]  ;;  %v670_v50 = vld [vmem:[#allocation5 + $0x250] sm:$0xff] }
 0x154   :  { %1904 = vmatprep.subr.bf16.mxu0 %v1083_v51  ;;  %2232 = vmatprep.subr.bf16.mxu1 %v1085_v52  ;;  %v344_v51 = vadd.f32 %v343_v44, %v342_v33  ;;  %v456_v52 = vadd.f32 %v455_v40, %v454_v34  ;;  %v1124_v53 = vunpack.c.l.s8.bf16 %v668_v49  ;;  %v1126_v54 = vunpack.c.l.s8.bf16 %v670_v50  ;;  %v689_v44 = vld [vmem:[#allocation5 + $0x2e8] sm:$0xff] }
 0x155   :  { %1934 = vmatprep.mubr.bf16.mxu0 %v6823_v56  ;;  %2262 = vmatprep.mubr.bf16.mxu1 %v6823_v56 }
 0x156   :  { %v345_v62 = vrot.slane %v344_v51, 2 }
 0x157   :  { %1905 = vmatpush1.bf16.msra.mxu0 %v1082_v57  ;;  %2233 = vmatpush1.bf16.msra.mxu1 %v1084_v58  ;;  %v436_v57 = vrot.slane %v435_v43, 2  ;;  %v1131_v58 = vunpack.c.h.s8.bf16 %v669_v38 }
 0x158   :  { %1906 = vmatprep.subr.bf16.mxu0 %v1089_v59  ;;  %2234 = vmatprep.subr.bf16.mxu1 %v1091_v60  ;;  %v1133_v59 = vunpack.c.h.s8.bf16 %v671_v39  ;;  %v675_v60 = vld [vmem:[#allocation5 + $0x278] sm:$0xff] }
 0x159   :  { %v437_v3 = vadd.f32 %v436_v57, %v435_v43  ;;  %v1137_v4 = vunpack.c.l.s8.bf16 %v675_v60  ;;  %v687_v39 = vld [vmem:[#allocation5 + $0x2d8] sm:$0xff] }
 0x15b   :  { %1907 = vmatpush1.bf16.msra.mxu0 %v1088_v63  ;;  %2235 = vmatpush1.bf16.msra.mxu1 %v1090_v0  ;;  %v457_v63 = vrot.slane %v456_v52, 2  ;;  %v1130_v0 = vunpack.c.h.s8.bf16 %v668_v49  ;;  %v1163_v49 = vunpack.c.l.s8.bf16 %v689_v44 }
 0x15c   :  { %1908 = vmatprep.subr.bf16.mxu0 %v1095_v1  ;;  %2236 = vmatprep.subr.bf16.mxu1 %v1097_v2  ;;  %v1132_v1 = vunpack.c.h.s8.bf16 %v670_v50  ;;  %v325_v2 = vadd.f32 %v324_v55, %v323_v42  ;;  %v686_v50 = vld [vmem:[#allocation5 + $0x2d0] sm:$0xff] }
 0x15d   :  { %v458_v9 = vadd.f32 %v457_v63, %v456_v52 }
 0x15f   :  { %1909 = vmatpush1.bf16.msra.mxu0 %v1094_v5  ;;  %2237 = vmatpush1.bf16.msra.mxu1 %v1096_v6  ;;  %v1139_v5 = vunpack.c.l.s8.bf16 %v677_v61  ;;  %v674_v6 = vld [vmem:[#allocation5 + $0x270] sm:$0xff]  ;;  %v459_v21 = vrot.slane %v458_v9, 1  ;;  %v693_v61 = vld [vmem:[#allocation5 + $0x308] sm:$0xff] }
 0x160   :  { %1910 = vmatprep.subr.bf16.mxu0 %v1101_v7  ;;  %2238 = vmatprep.subr.bf16.mxu1 %v1103_v8  ;;  %v676_v7 = vld [vmem:[#allocation5 + $0x280] sm:$0xff]  ;;  %v346_v8 = vadd.f32 %v345_v62, %v344_v51  ;;  %v1136_v10 = vunpack.c.l.s8.bf16 %v674_v6  ;;  %v1142_v22 = vunpack.c.h.s8.bf16 %v674_v6  ;;  %v695_v62 = vld [vmem:[#allocation5 + $0x318] sm:$0xff] }
 0x161   :  { %v1144_v23 = vunpack.c.h.s8.bf16 %v676_v7  ;;  %v460_v31 = vadd.f32 %v459_v21, %v458_v9  ;;  %v688_v51 = vld [vmem:[#allocation5 + $0x2e0] sm:$0xff] }
 0x162   :  { %v1162_v55 = vunpack.c.l.s8.bf16 %v688_v51  ;;  %v692_v6 = vld [vmem:[#allocation5 + $0x300] sm:$0xff] }
 0x163   :  { %1911 = vmatpush1.bf16.msra.mxu0 %v1100_v11  ;;  %2239 = vmatpush1.bf16.msra.mxu1 %v1102_v12  ;;  %v1138_v11 = vunpack.c.l.s8.bf16 %v676_v7  ;;  %v326_v12 = vrot.slane %v325_v2, 1  ;;  %v694_v7 = vld [vmem:[#allocation5 + $0x310] sm:$0xff] }
 0x164   :  { %1912 = vmatprep.subr.bf16.mxu0 %v1107_v13  ;;  %2240 = vmatprep.subr.bf16.mxu1 %v1109_v14  ;;  %v438_v13 = vrot.slane %v437_v3, 1  ;;  %v1143_v14 = vunpack.c.h.s8.bf16 %v675_v60  ;;  %v1169_v60 = vunpack.c.h.s8.bf16 %v689_v44 }
 0x165   :  { %v327_v24 = vadd.f32 %v326_v12, %v325_v2  ;;  %v1168_v2 = vunpack.c.h.s8.bf16 %v688_v51  ;;  %v1179_v12 = vunpack.c.h.s8.bf16 %v693_v61 }
 0x167   :  { %1913 = vmatpush1.bf16.msra.mxu0 %v1106_v19  ;;  %2241 = vmatpush1.bf16.msra.mxu1 %v1108_v20  ;;  %v683_v19 = vld [vmem:[#allocation5 + $0x2b8] sm:$0xff]  ;;  %v347_v20 = vrot.slane %v346_v8, 1  ;;  %v534_v34 = vmul.f32 0.25, %v327_v24  ;;  %v700_v24 = vld [vmem:[#allocation5 + $0x340] sm:$0xff] }
 0x168   :  { %1914 = vmatprep.subr.bf16.mxu0 %v1113_v25  ;;  %2242 = vmatprep.subr.bf16.mxu1 %v1115_v26  ;;  %v439_v25 = vadd.f32 %v438_v13, %v437_v3  ;;  %v1149_v26 = vunpack.c.l.s8.bf16 %v681_v18  ;;  %v1151_v27 = vunpack.c.l.s8.bf16 %v683_v19  ;;  %v1157_v38 = vunpack.c.h.s8.bf16 %v683_v19 }
 0x169   :  { %v566_v43 = vpack.c.bf16 %v534_v34, %v534_v34  ;;  %v1181_v13 = vunpack.c.h.s8.bf16 %v695_v62  ;;  %v1178_v19 = vunpack.c.h.s8.bf16 %v692_v6 }
 0x16b   :  { %1915 = vmatpush1.bf16.msra.mxu0 %v1112_v29  ;;  %2243 = vmatpush1.bf16.msra.mxu1 %v1114_v30  ;;  %v682_v29 = vld [vmem:[#allocation5 + $0x2b0] sm:$0xff]  ;;  %v348_v30 = vadd.f32 %v347_v20, %v346_v8  ;;  %v1782_v57 = vunpack.c.l.b16 %v566_v43  ;;  %v1180_v20 = vunpack.c.h.s8.bf16 %v694_v7  ;;  %v713_v43 = vld [vmem:[#allocation5 + $0x3a8] sm:$0xff] }
 0x16c   :  { %1916 = vmatprep.subr.bf16.mxu0 %v1119_v35  ;;  %2244 = vmatprep.subr.bf16.mxu1 %v1121_v36  ;;  %v1150_v33 = vunpack.c.l.s8.bf16 %v682_v29  ;;  %v550_v35 = vmul.f32 0.25, %v439_v25  ;;  %v1155_v36 = vunpack.c.h.s8.bf16 %v681_v18  ;;  %v1156_v42 = vunpack.c.h.s8.bf16 %v682_v29  ;;  %v705_v29 = vld [vmem:[#allocation5 + $0x368] sm:$0xff] }
 0x16d   :  { %v537_v40 = vmul.f32 0.25, %v348_v30  ;;  %v707_v30 = vld [vmem:[#allocation5 + $0x378] sm:$0xff]  ;;  %v1203_v44 = vunpack.c.h.s8.bf16 %v705_v29 }
 0x16e   :  { %v1199_v34 = vunpack.c.l.s8.bf16 %v707_v30 }
 0x16f   :  { %1917 = vmatpush1.bf16.msra.mxu0 %v1118_v45  ;;  %2245 = vmatpush1.bf16.msra.mxu1 %v1120_v41  ;;  %v553_v45 = vmul.f32 0.25, %v460_v31  ;;  %v1154_v41 = vunpack.c.h.s8.bf16 %v680_v28  ;;  %v569_v52 = vpack.c.bf16 %v537_v40, %v537_v40  ;;  %v1205_v40 = vunpack.c.h.s8.bf16 %v707_v30 }
 0x170   :  { %1918 = vmatprep.subr.bf16.mxu0 %v1125_v47  ;;  %2246 = vmatprep.subr.bf16.mxu1 %v1127_v48  ;;  %v582_v47 = vpack.c.bf16 %v550_v35, %v550_v35  ;;  %v1161_v48 = vunpack.c.l.s8.bf16 %v687_v39  ;;  %v704_v35 = vld [vmem:[#allocation5 + $0x360] sm:$0xff] }
 0x171   :  { %v1785_v63 = vunpack.c.l.b16 %v569_v52 }
 0x173   :  { %1919 = vmatpush1.bf16.msra.mxu0 %v1124_v53  ;;  %2247 = vmatpush1.bf16.msra.mxu1 %v1126_v54  ;;  %v585_v53 = vpack.c.bf16 %v553_v45, %v553_v45  ;;  %v1160_v54 = vunpack.c.l.s8.bf16 %v686_v50  ;;  %v6853_v45 = vld [vmem:[#allocation2 + $0x18] sm:$0xff] }
 0x174   :  { %1920 = vmatprep.subr.bf16.mxu0 %v1131_v58  ;;  %2248 = vmatprep.subr.bf16.mxu1 %v1133_v59  ;;  %v1798_v58 = vunpack.c.l.b16 %v582_v47  ;;  %v1167_v59 = vunpack.c.h.s8.bf16 %v687_v39  ;;  %v1202_v47 = vunpack.c.h.s8.bf16 %v704_v35  ;;  %v277_v51 = vcombine.high %v6853_v45, %v6853_v45 }
 0x176   :  { %v1815_v3 = vsel %vm1812_vm1, %v1798_v58, %v1782_v57  ;;  %v447_v57 = vsel %vm306_vm0, %v6831_v16, 0.0 }
 0x177   :  { %1921 = vmatpush1.bf16.msra.mxu0 %v1130_v0  ;;  %2249 = vmatpush1.bf16.msra.mxu1 %v1132_v1  ;;  %v1801_v0 = vunpack.c.l.b16 %v585_v53  ;;  %v1166_v1 = vunpack.c.h.s8.bf16 %v686_v50  ;;  %v6844_v8 = vpack.c.b16 %v1815_v3, %v1815_v3  ;;  %v712_v50 = vld [vmem:[#allocation5 + $0x3a0] sm:$0xff]  ;;  %v719_v3 = vld [vmem:[#allocation5 + $0x3d8] sm:$0xff] }
 0x178   :  { %1922 = vmatprep.subr.bf16.mxu0 %v1137_v4  ;;  %2250 = vmatprep.subr.bf16.mxu1 %v1139_v5  ;;  %v1173_v4 = vunpack.c.l.s8.bf16 %v693_v61  ;;  %v1175_v5 = vunpack.c.l.s8.bf16 %v695_v62  ;;  %v448_v61 = vrot.slane %v447_v57, 4  ;;  %v356_v62 = vsel %vm306_vm0, %v277_v51, 0.0 }
 0x179   :  { %v1818_v9 = vsel %vm1812_vm1, %v1801_v0, %v1785_v63 }
 0x17a   :  { %v6847_v18 = vpack.c.b16 %v1818_v9, %v1818_v9 }
 0x17b   :  { %1923 = vmatpush1.bf16.msra.mxu0 %v1136_v10  ;;  %2251 = vmatpush1.bf16.msra.mxu1 %v1138_v11  ;;  %v1172_v10 = vunpack.c.l.s8.bf16 %v692_v6  ;;  %v1174_v11 = vunpack.c.l.s8.bf16 %v694_v7  ;;  %v449_v7 = vadd.f32 %v448_v61, %v447_v57 }
 0x17c   :  { %1924 = vmatprep.subr.bf16.mxu0 %v1143_v14  ;;  %2252 = vmatprep.subr.bf16.mxu1 %v1145_v17  ;;  %v699_v14 = vld [vmem:[#allocation5 + $0x338] sm:$0xff]  ;;  %v701_v17 = vld [vmem:[#allocation5 + $0x348] sm:$0xff] }
 0x17d   :  { %v1185_v21 = vunpack.c.l.s8.bf16 %v699_v14  ;;  %v1193_v28 = vunpack.c.h.s8.bf16 %v701_v17 }
 0x17f   :  { %1925 = vmatpush1.bf16.msra.mxu0 %v1142_v22  ;;  %2253 = vmatpush1.bf16.msra.mxu1 %v1144_v23  ;;  %v1187_v22 = vunpack.c.l.s8.bf16 %v701_v17  ;;  %v698_v23 = vld [vmem:[#allocation5 + $0x330] sm:$0xff] }
 0x180   :  { %1926 = vmatprep.subr.bf16.mxu0 %v1149_v26  ;;  %2254 = vmatprep.subr.bf16.mxu1 %v1151_v27  ;;  %v1184_v25 = vunpack.c.l.s8.bf16 %v698_v23  ;;  %v1186_v26 = vunpack.c.l.s8.bf16 %v700_v24  ;;  %v1191_v27 = vunpack.c.h.s8.bf16 %v699_v14  ;;  %v1190_v31 = vunpack.c.h.s8.bf16 %v698_v23 }
 0x181   :  { %v1229_v23 = vunpack.c.h.s8.bf16 %v719_v3 }
 0x183   :  { %1927 = vmatpush1.bf16.msra.mxu0 %v1148_v32  ;;  %2255 = vmatpush1.bf16.msra.mxu1 %v1150_v33  ;;  %v1192_v32 = vunpack.c.h.s8.bf16 %v700_v24  ;;  %v1197_v33 = vunpack.c.l.s8.bf16 %v705_v29  ;;  %v723_v24 = vld [vmem:[#allocation5 + $0x3f8] sm:$0xff] }
 0x184   :  { %1928 = vmatprep.subr.bf16.mxu0 %v1155_v36  ;;  %2256 = vmatprep.subr.bf16.mxu1 %v1157_v38  ;;  %v706_v36 = vld [vmem:[#allocation5 + $0x370] sm:$0xff]  ;;  %v1196_v38 = vunpack.c.l.s8.bf16 %v704_v35  ;;  %v724_v35 = vld [vmem:[#allocation5 + $0x400] sm:$0xff] }
 0x185   :  { %v1198_v39 = vunpack.c.l.s8.bf16 %v706_v36 }
 0x187   :  { %1929 = vmatpush1.bf16.msra.mxu0 %v1154_v41  ;;  %2257 = vmatpush1.bf16.msra.mxu1 %v1156_v42  ;;  %v6855_v41 = vld [vmem:[#allocation2 + $0x58] sm:$0xff] }
 0x188   :  { %1930 = vmatprep.subr.bf16.mxu0 %v1161_v48  ;;  %2258 = vmatprep.subr.bf16.mxu1 %v1163_v49  ;;  %v711_v42 = vld [vmem:[#allocation5 + $0x398] sm:$0xff]  ;;  %v1204_v48 = vunpack.c.h.s8.bf16 %v706_v36  ;;  %v710_v49 = vld [vmem:[#allocation5 + $0x390] sm:$0xff]  ;;  %v285_v52 = vcombine.high %v6855_v41, %v6855_v41 }
 0x189   :  { %v1209_v53 = vunpack.c.l.s8.bf16 %v711_v42  ;;  %v1208_v58 = vunpack.c.l.s8.bf16 %v710_v49  ;;  %v1215_v0 = vunpack.c.h.s8.bf16 %v711_v42  ;;  %v1214_v16 = vunpack.c.h.s8.bf16 %v710_v49  ;;  %v731_v49 = vld [vmem:[#allocation5 + $0x438] sm:$0xff] }
 0x18a   :  { %v468_v63 = vsel %vm306_vm0, %v285_v52, 0.0 }
 0x18b   :  { %1931 = vmatpush1.bf16.msra.mxu0 %v1160_v54  ;;  %2259 = vmatpush1.bf16.msra.mxu1 %v1162_v55  ;;  %v1211_v54 = vunpack.c.l.s8.bf16 %v713_v43  ;;  %v335_v55 = vsel %vm306_vm0, %v6829_v15, 0.0  ;;  %v357_v15 = vrot.slane %v356_v62, 4 }
 0x18c   :  { %1932 = vmatprep.subr.bf16.mxu0 %v1167_v59  ;;  %2260 = vmatprep.subr.bf16.mxu1 %v1169_v60  ;;  %v1210_v59 = vunpack.c.l.s8.bf16 %v712_v50  ;;  %v336_v60 = vrot.slane %v335_v55, 4 }
 0x18e   :  { %v337_v6 = vadd.f32 %v336_v60, %v335_v55  ;;  %v730_v60 = vld [vmem:[#allocation5 + $0x430] sm:$0xff] }
 0x18f   :  { %1933 = vmatpush1.bf16.msra.mxu0 %v1166_v1  ;;  %2261 = vmatpush1.bf16.msra.mxu1 %v1168_v2  ;;  %v1217_v1 = vunpack.c.h.s8.bf16 %v713_v43  ;;  %v717_v2 = vld [vmem:[#allocation5 + $0x3c8] sm:$0xff]  ;;  %v1239_v43 = vunpack.c.h.s8.bf16 %v723_v24 }
 0x190   :  { %1943 = vmatprep.subr.bf16.mxu0 %v1173_v4  ;;  %2271 = vmatprep.subr.bf16.mxu1 %v1175_v5  ;;  %v469_v4 = vrot.slane %v468_v63, 4  ;;  %v1216_v5 = vunpack.c.h.s8.bf16 %v712_v50  ;;  %v1221_v9 = vunpack.c.l.s8.bf16 %v717_v2 }
 0x192   :  { %1935 = vmatmul.mubr.bf16.vlgmr.msra.gmra.mrb[0].mxu0 %v6844_v8  ;;  %2263 = vmatmul.mubr.bf16.vlgmr.msra.gmra.mrb[0].mxu1 %v6844_v8  ;;  %v470_v14 = vadd.f32 %v469_v4, %v468_v63  ;;  %v735_v4 = vld [vmem:[#allocation5 + $0x458] sm:$0xff] }
 0x193   :  { %1944 = vmatpush1.bf16.msra.mxu0 %v1172_v10  ;;  %2272 = vmatpush1.bf16.msra.mxu1 %v1174_v11  ;;  %v1223_v10 = vunpack.c.l.s8.bf16 %v719_v3  ;;  %v716_v11 = vld [vmem:[#allocation5 + $0x3c0] sm:$0xff] }
 0x194   :  { %1945 = vmatprep.subr.bf16.mxu0 %v1179_v12  ;;  %2273 = vmatprep.subr.bf16.mxu1 %v1181_v13  ;;  %v718_v12 = vld [vmem:[#allocation5 + $0x3d0] sm:$0xff]  ;;  %v358_v13 = vadd.f32 %v357_v15, %v356_v62  ;;  %v1220_v17 = vunpack.c.l.s8.bf16 %v716_v11  ;;  %v1253_v15 = vunpack.c.h.s8.bf16 %v731_v49 }
 0x195   :  { %1975 = vmatprep.mubr.bf16.mxu0 %v6847_v18  ;;  %2303 = vmatprep.mubr.bf16.mxu1 %v6847_v18  ;;  %v1228_v29 = vunpack.c.h.s8.bf16 %v718_v12 }
 0x197   :  { %1946 = vmatpush1.bf16.msra.mxu0 %v1178_v19  ;;  %2274 = vmatpush1.bf16.msra.mxu1 %v1180_v20  ;;  %v1222_v19 = vunpack.c.l.s8.bf16 %v718_v12  ;;  %v338_v20 = vrot.slane %v337_v6, 2  ;;  %v1257_v12 = vunpack.c.l.s8.bf16 %v735_v4 }
 0x198   :  { %1947 = vmatprep.subr.bf16.mxu0 %v1185_v21  ;;  %2275 = vmatprep.subr.bf16.mxu1 %v1187_v22  ;;  %v450_v21 = vrot.slane %v449_v7, 2  ;;  %v1227_v22 = vunpack.c.h.s8.bf16 %v717_v2 }
 0x199   :  { %v339_v30 = vadd.f32 %v338_v20, %v337_v6 }
 0x19b   :  { %1948 = vmatpush1.bf16.msra.mxu0 %v1184_v25  ;;  %2276 = vmatpush1.bf16.msra.mxu1 %v1186_v26  ;;  %v725_v25 = vld [vmem:[#allocation5 + $0x408] sm:$0xff]  ;;  %v359_v26 = vrot.slane %v358_v13, 2 }
 0x19c   :  { %1949 = vmatprep.subr.bf16.mxu0 %v1191_v27  ;;  %2277 = vmatprep.subr.bf16.mxu1 %v1193_v28  ;;  %v471_v27 = vrot.slane %v470_v14, 2  ;;  %v1226_v28 = vunpack.c.h.s8.bf16 %v716_v11 }
 0x19d   :  { %v360_v36 = vadd.f32 %v359_v26, %v358_v13 }
 0x19f   :  { %1950 = vmatpush1.bf16.msra.mxu0 %v1190_v31  ;;  %2278 = vmatpush1.bf16.msra.mxu1 %v1192_v32  ;;  %v451_v31 = vadd.f32 %v450_v21, %v449_v7  ;;  %v1233_v32 = vunpack.c.l.s8.bf16 %v723_v24  ;;  %v361_v50 = vrot.slane %v360_v36, 1 }
 0x1a0   :  { %1951 = vmatprep.subr.bf16.mxu0 %v1197_v33  ;;  %2279 = vmatprep.subr.bf16.mxu1 %v1199_v34  ;;  %v1235_v33 = vunpack.c.l.s8.bf16 %v725_v25  ;;  %v722_v34 = vld [vmem:[#allocation5 + $0x3f0] sm:$0xff] }
 0x1a1   :  { %v452_v42 = vrot.slane %v451_v31, 1  ;;  %v1238_v52 = vunpack.c.h.s8.bf16 %v722_v34  ;;  %v362_v61 = vadd.f32 %v361_v50, %v360_v36  ;;  %v740_v36 = vld [vmem:[#allocation5 + $0x480] sm:$0xff] }
 0x1a3   :  { %1952 = vmatpush1.bf16.msra.mxu0 %v1196_v38  ;;  %2280 = vmatpush1.bf16.msra.mxu1 %v1198_v39  ;;  %v472_v38 = vadd.f32 %v471_v27, %v470_v14  ;;  %v1232_v39 = vunpack.c.l.s8.bf16 %v722_v34  ;;  %v453_v55 = vadd.f32 %v452_v42, %v451_v31  ;;  %v734_v14 = vld [vmem:[#allocation5 + $0x450] sm:$0xff]  ;;  %v741_v27 = vld [vmem:[#allocation5 + $0x488] sm:$0xff] }
 0x1a4   :  { %1953 = vmatprep.subr.bf16.mxu0 %v1203_v44  ;;  %2281 = vmatprep.subr.bf16.mxu1 %v1205_v40  ;;  %v1234_v44 = vunpack.c.l.s8.bf16 %v724_v35  ;;  %v340_v40 = vrot.slane %v339_v30, 1  ;;  %v1256_v21 = vunpack.c.l.s8.bf16 %v734_v14  ;;  %v1262_v31 = vunpack.c.h.s8.bf16 %v734_v14 }
 0x1a5   :  { %v473_v51 = vrot.slane %v472_v38, 1  ;;  %v552_v2 = vmul.f32 0.25, %v453_v55  ;;  %v1269_v34 = vunpack.c.l.s8.bf16 %v741_v27  ;;  %v746_v55 = vld [vmem:[#allocation5 + $0x4b0] sm:$0xff] }
 0x1a7   :  { %1954 = vmatpush1.bf16.msra.mxu0 %v1202_v47  ;;  %2282 = vmatpush1.bf16.msra.mxu1 %v1204_v48  ;;  %v1241_v47 = vunpack.c.h.s8.bf16 %v725_v25  ;;  %v729_v48 = vld [vmem:[#allocation5 + $0x428] sm:$0xff]  ;;  %v474_v62 = vadd.f32 %v473_v51, %v472_v38  ;;  %v584_v11 = vpack.c.bf16 %v552_v2, %v552_v2  ;;  %v1263_v25 = vunpack.c.h.s8.bf16 %v735_v4  ;;  %v742_v38 = vld [vmem:[#allocation5 + $0x490] sm:$0xff] }
 0x1a8   :  { %1955 = vmatprep.subr.bf16.mxu0 %v1209_v53  ;;  %2283 = vmatprep.subr.bf16.mxu1 %v1211_v54  ;;  %v1240_v53 = vunpack.c.h.s8.bf16 %v724_v35  ;;  %v341_v54 = vadd.f32 %v340_v40, %v339_v30  ;;  %v1245_v57 = vunpack.c.l.s8.bf16 %v729_v48  ;;  %v1251_v3 = vunpack.c.h.s8.bf16 %v729_v48  ;;  %v747_v48 = vld [vmem:[#allocation5 + $0x4b8] sm:$0xff]  ;;  %v754_v4 = vld [vmem:[#allocation5 + $0x4f0] sm:$0xff] }
 0x1a9   :  { %v555_v6 = vmul.f32 0.25, %v474_v62  ;;  %v1800_v24 = vunpack.c.l.b16 %v584_v11  ;;  %v1268_v40 = vunpack.c.l.s8.bf16 %v740_v36  ;;  %v1270_v42 = vunpack.c.l.s8.bf16 %v742_v38  ;;  %v753_v62 = vld [vmem:[#allocation5 + $0x4e8] sm:$0xff]  ;;  %v759_v11 = vld [vmem:[#allocation5 + $0x518] sm:$0xff] }
 0x1aa   :  { %v1274_v51 = vunpack.c.h.s8.bf16 %v740_v36  ;;  %v1293_v2 = vunpack.c.l.s8.bf16 %v753_v62  ;;  %v1300_v14 = vunpack.c.h.s8.bf16 %v754_v4 }
 0x1ab   :  { %1956 = vmatpush1.bf16.msra.mxu0 %v1208_v58  ;;  %2284 = vmatpush1.bf16.msra.mxu1 %v1210_v59  ;;  %v1247_v58 = vunpack.c.l.s8.bf16 %v731_v49  ;;  %v728_v59 = vld [vmem:[#allocation5 + $0x420] sm:$0xff]  ;;  %v587_v20 = vpack.c.bf16 %v555_v6, %v555_v6  ;;  %v749_v49 = vld [vmem:[#allocation5 + $0x4c8] sm:$0xff]  ;;  %v1299_v6 = vunpack.c.h.s8.bf16 %v753_v62 }
 0x1ac   :  { %1957 = vmatprep.subr.bf16.mxu0 %v1215_v0  ;;  %2285 = vmatprep.subr.bf16.mxu1 %v1217_v1  ;;  %v1244_v63 = vunpack.c.l.s8.bf16 %v728_v59  ;;  %v1246_v0 = vunpack.c.l.s8.bf16 %v730_v60  ;;  %v536_v1 = vmul.f32 0.25, %v341_v54  ;;  %v1250_v7 = vunpack.c.h.s8.bf16 %v728_v59 }
 0x1ad   :  { %v1803_v30 = vunpack.c.l.b16 %v587_v20  ;;  %v1283_v54 = vunpack.c.l.s8.bf16 %v749_v49 }
 0x1af   :  { %1958 = vmatpush1.bf16.msra.mxu0 %v1214_v16  ;;  %2286 = vmatpush1.bf16.msra.mxu1 %v1216_v5  ;;  %v737_v16 = vld [vmem:[#allocation5 + $0x468] sm:$0xff]  ;;  %v539_v5 = vmul.f32 0.25, %v362_v61  ;;  %v1289_v61 = vunpack.c.h.s8.bf16 %v749_v49 }
 0x1b0   :  { %1959 = vmatprep.subr.bf16.mxu0 %v1221_v9  ;;  %2287 = vmatprep.subr.bf16.mxu1 %v1223_v10  ;;  %v1252_v9 = vunpack.c.h.s8.bf16 %v730_v60  ;;  %v568_v10 = vpack.c.bf16 %v536_v1, %v536_v1  ;;  %v1259_v13 = vunpack.c.l.s8.bf16 %v737_v16  ;;  %v1265_v26 = vunpack.c.h.s8.bf16 %v737_v16 }
 0x1b1   :  { %v1287_v60 = vunpack.c.h.s8.bf16 %v747_v48 }
 0x1b3   :  { %1960 = vmatpush1.bf16.msra.mxu0 %v1220_v17  ;;  %2288 = vmatpush1.bf16.msra.mxu1 %v1222_v19  ;;  %v736_v17 = vld [vmem:[#allocation5 + $0x460] sm:$0xff]  ;;  %v571_v19 = vpack.c.bf16 %v539_v5, %v539_v5  ;;  %v1294_v5 = vunpack.c.l.s8.bf16 %v754_v4  ;;  %v770_v4 = vld [vmem:[#allocation5 + $0x570] sm:$0xff] }
 0x1b4   :  { %1961 = vmatprep.subr.bf16.mxu0 %v1227_v22  ;;  %2289 = vmatprep.subr.bf16.mxu1 %v1229_v23  ;;  %v1258_v22 = vunpack.c.l.s8.bf16 %v736_v17  ;;  %v1784_v23 = vunpack.c.l.b16 %v568_v10  ;;  %v6879_v10 = vld [vmem:[#allocation2 + $0x60] sm:$0xff] }
 0x1b7   :  { %1962 = vmatpush1.bf16.msra.mxu0 %v1226_v28  ;;  %2290 = vmatpush1.bf16.msra.mxu1 %v1228_v29  ;;  %v743_v28 = vld [vmem:[#allocation5 + $0x498] sm:$0xff]  ;;  %v1787_v29 = vunpack.c.l.b16 %v571_v19  ;;  %v760_v19 = vld [vmem:[#allocation5 + $0x520] sm:$0xff] }
 0x1b8   :  { %1963 = vmatprep.subr.bf16.mxu0 %v1233_v32  ;;  %2291 = vmatprep.subr.bf16.mxu1 %v1235_v33  ;;  %v1264_v32 = vunpack.c.h.s8.bf16 %v736_v17  ;;  %v1817_v33 = vsel %vm1812_vm1, %v1800_v24, %v1784_v23  ;;  %v1271_v35 = vunpack.c.l.s8.bf16 %v743_v28  ;;  %v758_v17 = vld [vmem:[#allocation5 + $0x510] sm:$0xff]  ;;  %v349_v24 = vsel %vm306_vm0, %v6853_v45, 0.0 }
 0x1bb   :  { %1964 = vmatpush1.bf16.msra.mxu0 %v1232_v39  ;;  %2292 = vmatpush1.bf16.msra.mxu1 %v1234_v44  ;;  %v6868_v39 = vpack.c.b16 %v1817_v33, %v1817_v33  ;;  %v1820_v44 = vsel %vm1812_vm1, %v1803_v30, %v1787_v29 }
 0x1bc   :  { %1965 = vmatprep.subr.bf16.mxu0 %v1239_v43  ;;  %2293 = vmatprep.subr.bf16.mxu1 %v1241_v47  ;;  %v1275_v43 = vunpack.c.h.s8.bf16 %v741_v27  ;;  %v1277_v47 = vunpack.c.h.s8.bf16 %v743_v28  ;;  %v6871_v50 = vpack.c.b16 %v1820_v44, %v1820_v44  ;;  %v1306_v27 = vunpack.c.l.s8.bf16 %v760_v19 }
 0x1bd   :  { %v350_v28 = vrot.slane %v349_v24, 4 }
 0x1bf   :  { %1966 = vmatpush1.bf16.msra.mxu0 %v1238_v52  ;;  %2294 = vmatpush1.bf16.msra.mxu1 %v1240_v53  ;;  %v1276_v52 = vunpack.c.h.s8.bf16 %v742_v38  ;;  %v1281_v53 = vunpack.c.l.s8.bf16 %v747_v48  ;;  %v1312_v38 = vunpack.c.h.s8.bf16 %v760_v19  ;;  %v351_v44 = vadd.f32 %v350_v28, %v349_v24  ;;  %v766_v48 = vld [vmem:[#allocation5 + $0x550] sm:$0xff]  ;;  %v777_v19 = vld [vmem:[#allocation5 + $0x5a8] sm:$0xff] }
 0x1c0   :  { %1967 = vmatprep.subr.bf16.mxu0 %v1245_v57  ;;  %2295 = vmatprep.subr.bf16.mxu1 %v1247_v58  ;;  %v748_v57 = vld [vmem:[#allocation5 + $0x4c0] sm:$0xff]  ;;  %v1280_v58 = vunpack.c.l.s8.bf16 %v746_v55 }
 0x1c1   :  { %v1282_v59 = vunpack.c.l.s8.bf16 %v748_v57  ;;  %v1288_v1 = vunpack.c.h.s8.bf16 %v748_v57 }
 0x1c3   :  { %1968 = vmatpush1.bf16.msra.mxu0 %v1244_v63  ;;  %2296 = vmatpush1.bf16.msra.mxu1 %v1246_v0  ;;  %v755_v63 = vld [vmem:[#allocation5 + $0x4f8] sm:$0xff]  ;;  %v1286_v0 = vunpack.c.h.s8.bf16 %v746_v55 }
 0x1c4   :  { %1969 = vmatprep.subr.bf16.mxu0 %v1251_v3  ;;  %2297 = vmatprep.subr.bf16.mxu1 %v1253_v15  ;;  %v1295_v3 = vunpack.c.l.s8.bf16 %v755_v63  ;;  %v752_v15 = vld [vmem:[#allocation5 + $0x4e0] sm:$0xff] }
 0x1c5   :  { %v1292_v16 = vunpack.c.l.s8.bf16 %v752_v15 }
 0x1c7   :  { %1970 = vmatpush1.bf16.msra.mxu0 %v1250_v7  ;;  %2298 = vmatpush1.bf16.msra.mxu1 %v1252_v9  ;;  %v1301_v7 = vunpack.c.h.s8.bf16 %v755_v63  ;;  %v6877_v9 = vld [vmem:[#allocation2 + $0x20] sm:$0xff] }
 0x1c8   :  { %1971 = vmatprep.subr.bf16.mxu0 %v1257_v12  ;;  %2299 = vmatprep.subr.bf16.mxu1 %v1259_v13  ;;  %v761_v12 = vld [vmem:[#allocation5 + $0x528] sm:$0xff]  ;;  %v1298_v13 = vunpack.c.h.s8.bf16 %v752_v15  ;;  %v278_v20 = vcombine.high %v6877_v9, %v6877_v9 }
 0x1c9   :  { %v1307_v23 = vunpack.c.l.s8.bf16 %v761_v12  ;;  %v1313_v33 = vunpack.c.h.s8.bf16 %v761_v12 }
 0x1ca   :  { %v370_v30 = vsel %vm306_vm0, %v278_v20, 0.0  ;;  %v779_v20 = vld [vmem:[#allocation5 + $0x5b8] sm:$0xff] }
 0x1cb   :  { %1972 = vmatpush1.bf16.msra.mxu0 %v1256_v21  ;;  %2300 = vmatpush1.bf16.msra.mxu1 %v1258_v22  ;;  %v286_v21 = vcombine.high %v6879_v10, %v6879_v10  ;;  %v1305_v22 = vunpack.c.l.s8.bf16 %v759_v11  ;;  %v371_v45 = vrot.slane %v370_v30, 4  ;;  %v1343_v28 = vunpack.c.l.s8.bf16 %v779_v20 }
 0x1cc   :  { %1973 = vmatprep.subr.bf16.mxu0 %v1263_v25  ;;  %2301 = vmatprep.subr.bf16.mxu1 %v1265_v26  ;;  %v461_v25 = vsel %vm306_vm0, %v6855_v41, 0.0  ;;  %v1304_v26 = vunpack.c.l.s8.bf16 %v758_v17  ;;  %v1310_v41 = vunpack.c.h.s8.bf16 %v758_v17 }
 0x1cd   :  { %v462_v29 = vrot.slane %v461_v25, 4  ;;  %v372_v49 = vadd.f32 %v371_v45, %v370_v30  ;;  %v778_v30 = vld [vmem:[#allocation5 + $0x5b0] sm:$0xff] }
 0x1cf   :  { %1974 = vmatpush1.bf16.msra.mxu0 %v1262_v31  ;;  %2302 = vmatpush1.bf16.msra.mxu1 %v1264_v32  ;;  %v482_v31 = vsel %vm306_vm0, %v286_v21, 0.0  ;;  %v1311_v32 = vunpack.c.h.s8.bf16 %v759_v11 }
 0x1d0   :  { %1984 = vmatprep.subr.bf16.mxu0 %v1269_v34  ;;  %2312 = vmatprep.subr.bf16.mxu1 %v1271_v35  ;;  %v765_v34 = vld [vmem:[#allocation5 + $0x548] sm:$0xff]  ;;  %v767_v35 = vld [vmem:[#allocation5 + $0x558] sm:$0xff]  ;;  %v483_v36 = vrot.slane %v482_v31, 4 }
 0x1d1   :  { %v1323_v57 = vunpack.c.h.s8.bf16 %v765_v34 }
 0x1d2   :  { %1976 = vmatmul.mubr.bf16.vlgmr.msra.gmra.mrb[0].mxu0 %v6868_v39  ;;  %2304 = vmatmul.mubr.bf16.vlgmr.msra.gmra.mrb[0].mxu1 %v6868_v39 }
 0x1d3   :  { %1985 = vmatpush1.bf16.msra.mxu0 %v1268_v40  ;;  %2313 = vmatpush1.bf16.msra.mxu1 %v1270_v42  ;;  %v463_v40 = vadd.f32 %v462_v29, %v461_v25  ;;  %v1317_v42 = vunpack.c.l.s8.bf16 %v765_v34  ;;  %v776_v29 = vld [vmem:[#allocation5 + $0x5a0] sm:$0xff]  ;;  %v1342_v34 = vunpack.c.l.s8.bf16 %v778_v30 }
 0x1d4   :  { %1986 = vmatprep.subr.bf16.mxu0 %v1275_v43  ;;  %2314 = vmatprep.subr.bf16.mxu1 %v1277_v47  ;;  %v1319_v43 = vunpack.c.l.s8.bf16 %v767_v35  ;;  %v764_v47 = vld [vmem:[#allocation5 + $0x540] sm:$0xff] }
 0x1d5   :  { %2016 = vmatprep.mubr.bf16.mxu0 %v6871_v50  ;;  %2344 = vmatprep.mubr.bf16.mxu1 %v6871_v50  ;;  %v464_v55 = vrot.slane %v463_v40, 2  ;;  %v1322_v63 = vunpack.c.h.s8.bf16 %v764_v47 }
 0x1d7   :  { %1987 = vmatpush1.bf16.msra.mxu0 %v1274_v51  ;;  %2315 = vmatpush1.bf16.msra.mxu1 %v1276_v52  ;;  %v484_v51 = vadd.f32 %v483_v36, %v482_v31  ;;  %v1316_v52 = vunpack.c.l.s8.bf16 %v764_v47  ;;  %v1347_v36 = vunpack.c.h.s8.bf16 %v777_v19  ;;  %v1348_v47 = vunpack.c.h.s8.bf16 %v778_v30 }
 0x1d8   :  { %1988 = vmatprep.subr.bf16.mxu0 %v1281_v53  ;;  %2316 = vmatprep.subr.bf16.mxu1 %v1283_v54  ;;  %v1318_v53 = vunpack.c.l.s8.bf16 %v766_v48  ;;  %v352_v54 = vrot.slane %v351_v44, 2 }
 0x1d9   :  { %v485_v62 = vrot.slane %v484_v51, 2 }
 0x1db   :  { %1989 = vmatpush1.bf16.msra.mxu0 %v1280_v58  ;;  %2317 = vmatpush1.bf16.msra.mxu1 %v1282_v59  ;;  %v1325_v58 = vunpack.c.h.s8.bf16 %v767_v35  ;;  %v771_v59 = vld [vmem:[#allocation5 + $0x578] sm:$0xff] }
 0x1dc   :  { %1990 = vmatprep.subr.bf16.mxu0 %v1287_v60  ;;  %2318 = vmatprep.subr.bf16.mxu1 %v1289_v61  ;;  %v773_v60 = vld [vmem:[#allocation5 + $0x588] sm:$0xff]  ;;  %v373_v61 = vrot.slane %v372_v49, 2 }
 0x1dd   :  { %v1331_v15 = vunpack.c.l.s8.bf16 %v773_v60  ;;  %v1337_v17 = vunpack.c.h.s8.bf16 %v773_v60 }
 0x1df   :  { %1991 = vmatpush1.bf16.msra.mxu0 %v1286_v0  ;;  %2319 = vmatpush1.bf16.msra.mxu1 %v1288_v1  ;;  %v1324_v0 = vunpack.c.h.s8.bf16 %v766_v48  ;;  %v353_v1 = vadd.f32 %v352_v54, %v351_v44  ;;  %v785_v44 = vld [vmem:[#allocation5 + $0x5e8] sm:$0xff]  ;;  %v784_v54 = vld [vmem:[#allocation5 + $0x5e0] sm:$0xff] }
 0x1e0   :  { %1992 = vmatprep.subr.bf16.mxu0 %v1293_v2  ;;  %2320 = vmatprep.subr.bf16.mxu1 %v1295_v3  ;;  %v465_v2 = vadd.f32 %v464_v55, %v463_v40  ;;  %v1329_v3 = vunpack.c.l.s8.bf16 %v771_v59 }
 0x1e1   :  { %v354_v12 = vrot.slane %v353_v1, 1 }
 0x1e3   :  { %1993 = vmatpush1.bf16.msra.mxu0 %v1292_v16  ;;  %2321 = vmatpush1.bf16.msra.mxu1 %v1294_v5  ;;  %v772_v16 = vld [vmem:[#allocation5 + $0x580] sm:$0xff]  ;;  %v374_v5 = vadd.f32 %v373_v61, %v372_v49  ;;  %v355_v25 = vadd.f32 %v354_v12, %v353_v1  ;;  %v791_v1 = vld [vmem:[#allocation5 + $0x618] sm:$0xff] }
 0x1e4   :  { %1994 = vmatprep.subr.bf16.mxu0 %v1299_v6  ;;  %2322 = vmatprep.subr.bf16.mxu1 %v1301_v7  ;;  %v486_v6 = vadd.f32 %v485_v62, %v484_v51  ;;  %v1328_v7 = vunpack.c.l.s8.bf16 %v770_v4  ;;  %v1330_v11 = vunpack.c.l.s8.bf16 %v772_v16  ;;  %v1336_v24 = vunpack.c.h.s8.bf16 %v772_v16 }
 0x1e5   :  { %v375_v21 = vrot.slane %v374_v5, 1  ;;  %v538_v35 = vmul.f32 0.25, %v355_v25 }
 0x1e7   :  { %1995 = vmatpush1.bf16.msra.mxu0 %v1298_v13  ;;  %2323 = vmatpush1.bf16.msra.mxu1 %v1300_v14  ;;  %v466_v13 = vrot.slane %v465_v2, 1  ;;  %v1335_v14 = vunpack.c.h.s8.bf16 %v771_v59  ;;  %v376_v31 = vadd.f32 %v375_v21, %v374_v5  ;;  %v570_v48 = vpack.c.bf16 %v538_v35, %v538_v35  ;;  %v795_v21 = vld [vmem:[#allocation5 + $0x638] sm:$0xff] }
 0x1e8   :  { %1996 = vmatprep.subr.bf16.mxu0 %v1305_v22  ;;  %2324 = vmatprep.subr.bf16.mxu1 %v1307_v23  ;;  %v487_v22 = vrot.slane %v486_v6, 1  ;;  %v1334_v23 = vunpack.c.h.s8.bf16 %v770_v4  ;;  %v1354_v59 = vunpack.c.l.s8.bf16 %v784_v54  ;;  %v1360_v4 = vunpack.c.h.s8.bf16 %v784_v54  ;;  %v803_v35 = vld [vmem:[#allocation5 + $0x678] sm:$0xff] }
 0x1e9   :  { %v541_v40 = vmul.f32 0.25, %v376_v31  ;;  %v1786_v60 = vunpack.c.l.b16 %v570_v48  ;;  %v1397_v48 = vunpack.c.h.s8.bf16 %v803_v35 }
 0x1eb   :  { %1997 = vmatpush1.bf16.msra.mxu0 %v1304_v26  ;;  %2325 = vmatpush1.bf16.msra.mxu1 %v1306_v27  ;;  %v467_v26 = vadd.f32 %v466_v13, %v465_v2  ;;  %v1341_v27 = vunpack.c.l.s8.bf16 %v777_v19  ;;  %v573_v55 = vpack.c.bf16 %v541_v40, %v541_v40  ;;  %v802_v40 = vld [vmem:[#allocation5 + $0x670] sm:$0xff] }
 0x1ec   :  { %1998 = vmatprep.subr.bf16.mxu0 %v1311_v32  ;;  %2326 = vmatprep.subr.bf16.mxu1 %v1313_v33  ;;  %v488_v32 = vadd.f32 %v487_v22, %v486_v6  ;;  %v1340_v33 = vunpack.c.l.s8.bf16 %v776_v29  ;;  %v1367_v6 = vunpack.c.l.s8.bf16 %v791_v1  ;;  %v797_v22 = vld [vmem:[#allocation5 + $0x648] sm:$0xff] }
 0x1ed   :  { %v554_v45 = vmul.f32 0.25, %v467_v26  ;;  %v1789_v2 = vunpack.c.l.b16 %v573_v55  ;;  %v1377_v26 = vunpack.c.l.s8.bf16 %v795_v21  ;;  %v1396_v55 = vunpack.c.h.s8.bf16 %v802_v40 }
 0x1ef   :  { %1999 = vmatpush1.bf16.msra.mxu0 %v1310_v41  ;;  %2327 = vmatpush1.bf16.msra.mxu1 %v1312_v38  ;;  %v1349_v41 = vunpack.c.h.s8.bf16 %v779_v20  ;;  %v783_v38 = vld [vmem:[#allocation5 + $0x5d8] sm:$0xff]  ;;  %v586_v49 = vpack.c.bf16 %v554_v45, %v554_v45  ;;  %v1373_v20 = vunpack.c.h.s8.bf16 %v791_v1 }
 0x1f0   :  { %2000 = vmatprep.subr.bf16.mxu0 %v1317_v42  ;;  %2328 = vmatprep.subr.bf16.mxu1 %v1319_v43  ;;  %v557_v42 = vmul.f32 0.25, %v488_v32  ;;  %v1346_v43 = vunpack.c.h.s8.bf16 %v776_v29  ;;  %v1353_v51 = vunpack.c.l.s8.bf16 %v783_v38  ;;  %v1359_v62 = vunpack.c.h.s8.bf16 %v783_v38  ;;  %v796_v29 = vld [vmem:[#allocation5 + $0x640] sm:$0xff] }
 0x1f1   :  { %v1802_v61 = vunpack.c.l.b16 %v586_v49  ;;  %v1378_v31 = vunpack.c.l.s8.bf16 %v796_v29  ;;  %v1383_v32 = vunpack.c.h.s8.bf16 %v795_v21  ;;  %v1391_v38 = vunpack.c.l.s8.bf16 %v803_v35  ;;  %v6901_v49 = vld [vmem:[#allocation2 + $0x28] sm:$0xff] }
 0x1f3   :  { %2001 = vmatpush1.bf16.msra.mxu0 %v1316_v52  ;;  %2329 = vmatpush1.bf16.msra.mxu1 %v1318_v53  ;;  %v1355_v52 = vunpack.c.l.s8.bf16 %v785_v44  ;;  %v782_v53 = vld [vmem:[#allocation5 + $0x5d0] sm:$0xff]  ;;  %v1819_v16 = vsel %vm1812_vm1, %v1802_v61, %v1786_v60 }
 0x1f4   :  { %2002 = vmatprep.subr.bf16.mxu0 %v1323_v57  ;;  %2330 = vmatprep.subr.bf16.mxu1 %v1325_v58  ;;  %v589_v57 = vpack.c.bf16 %v557_v42, %v557_v42  ;;  %v1352_v58 = vunpack.c.l.s8.bf16 %v782_v53  ;;  %v6892_v12 = vpack.c.b16 %v1819_v16, %v1819_v16 }
 0x1f7   :  { %2003 = vmatpush1.bf16.msra.mxu0 %v1322_v63  ;;  %2331 = vmatpush1.bf16.msra.mxu1 %v1324_v0  ;;  %v1361_v63 = vunpack.c.h.s8.bf16 %v785_v44  ;;  %v789_v0 = vld [vmem:[#allocation5 + $0x608] sm:$0xff]  ;;  %v800_v44 = vld [vmem:[#allocation5 + $0x660] sm:$0xff] }
 0x1f8   :  { %2004 = vmatprep.subr.bf16.mxu0 %v1329_v3  ;;  %2332 = vmatprep.subr.bf16.mxu1 %v1331_v15  ;;  %v1805_v3 = vunpack.c.l.b16 %v589_v57  ;;  %v1358_v15 = vunpack.c.h.s8.bf16 %v782_v53  ;;  %v1365_v5 = vunpack.c.l.s8.bf16 %v789_v0  ;;  %v1371_v19 = vunpack.c.h.s8.bf16 %v789_v0  ;;  %v809_v53 = vld [vmem:[#allocation5 + $0x6a8] sm:$0xff]  ;;  %v806_v57 = vld [vmem:[#allocation5 + $0x690] sm:$0xff] }
 0x1f9   :  { %v1388_v42 = vunpack.c.l.s8.bf16 %v800_v44  ;;  %v1394_v54 = vunpack.c.h.s8.bf16 %v800_v44  ;;  %v475_v0 = vsel %vm306_vm0, %v6879_v10, 0.0  ;;  %v1400_v1 = vunpack.c.l.s8.bf16 %v806_v57 }
 0x1fa   :  { %v1822_v13 = vsel %vm1812_vm1, %v1805_v3, %v1789_v2  ;;  %v1406_v10 = vunpack.c.h.s8.bf16 %v806_v57 }
 0x1fb   :  { %2005 = vmatpush1.bf16.msra.mxu0 %v1328_v7  ;;  %2333 = vmatpush1.bf16.msra.mxu1 %v1330_v11  ;;  %v788_v7 = vld [vmem:[#allocation5 + $0x600] sm:$0xff]  ;;  %v790_v11 = vld [vmem:[#allocation5 + $0x610] sm:$0xff] }
 0x1fc   :  { %2006 = vmatprep.subr.bf16.mxu0 %v1335_v14  ;;  %2334 = vmatprep.subr.bf16.mxu1 %v1337_v17  ;;  %v1364_v14 = vunpack.c.l.s8.bf16 %v788_v7  ;;  %v1366_v17 = vunpack.c.l.s8.bf16 %v790_v11  ;;  %v1372_v25 = vunpack.c.h.s8.bf16 %v790_v11  ;;  %v815_v11 = vld [vmem:[#allocation5 + $0x6d8] sm:$0xff] }
 0x1fd   :  { %v1415_v21 = vunpack.c.l.s8.bf16 %v815_v11 }
 0x1ff   :  { %2007 = vmatpush1.bf16.msra.mxu0 %v1334_v23  ;;  %2335 = vmatpush1.bf16.msra.mxu1 %v1336_v24  ;;  %v6895_v23 = vpack.c.b16 %v1822_v13, %v1822_v13  ;;  %v1370_v24 = vunpack.c.h.s8.bf16 %v788_v7  ;;  %v813_v7 = vld [vmem:[#allocation5 + $0x6c8] sm:$0xff] }
 0x200   :  { %2008 = vmatprep.subr.bf16.mxu0 %v1341_v27  ;;  %2336 = vmatprep.subr.bf16.mxu1 %v1343_v28  ;;  %v1379_v27 = vunpack.c.l.s8.bf16 %v797_v22  ;;  %v794_v28 = vld [vmem:[#allocation5 + $0x630] sm:$0xff] }
 0x201   :  { %v1376_v30 = vunpack.c.l.s8.bf16 %v794_v28  ;;  %v1382_v45 = vunpack.c.h.s8.bf16 %v794_v28 }
 0x203   :  { %2009 = vmatpush1.bf16.msra.mxu0 %v1340_v33  ;;  %2337 = vmatpush1.bf16.msra.mxu1 %v1342_v34  ;;  %v1385_v33 = vunpack.c.h.s8.bf16 %v797_v22  ;;  %v801_v34 = vld [vmem:[#allocation5 + $0x668] sm:$0xff]  ;;  %v812_v22 = vld [vmem:[#allocation5 + $0x6c0] sm:$0xff] }
 0x204   :  { %2010 = vmatprep.subr.bf16.mxu0 %v1347_v36  ;;  %2338 = vmatprep.subr.bf16.mxu1 %v1349_v41  ;;  %v1384_v36 = vunpack.c.h.s8.bf16 %v796_v29  ;;  %v1389_v41 = vunpack.c.l.s8.bf16 %v801_v34 }
 0x207   :  { %2011 = vmatpush1.bf16.msra.mxu0 %v1346_v43  ;;  %2339 = vmatpush1.bf16.msra.mxu1 %v1348_v47  ;;  %v1390_v43 = vunpack.c.l.s8.bf16 %v802_v40  ;;  %v1395_v47 = vunpack.c.h.s8.bf16 %v801_v34  ;;  %v821_v34 = vld [vmem:[#allocation5 + $0x708] sm:$0xff] }
 0x208   :  { %2012 = vmatprep.subr.bf16.mxu0 %v1353_v51  ;;  %2340 = vmatprep.subr.bf16.mxu1 %v1355_v52  ;;  %v6903_v51 = vld [vmem:[#allocation2 + $0x68] sm:$0xff]  ;;  %v807_v52 = vld [vmem:[#allocation5 + $0x698] sm:$0xff] }
 0x209   :  { %v287_v60 = vcombine.high %v6903_v51, %v6903_v51  ;;  %v1401_v61 = vunpack.c.l.s8.bf16 %v807_v52 }
 0x20b   :  { %2013 = vmatpush1.bf16.msra.mxu0 %v1352_v58  ;;  %2341 = vmatpush1.bf16.msra.mxu1 %v1354_v59  ;;  %v808_v58 = vld [vmem:[#allocation5 + $0x6a0] sm:$0xff]  ;;  %v279_v59 = vcombine.high %v6901_v49, %v6901_v49  ;;  %v496_v16 = vsel %vm306_vm0, %v287_v60, 0.0  ;;  %v825_v60 = vld [vmem:[#allocation5 + $0x728] sm:$0xff] }
 0x20c   :  { %2014 = vmatprep.subr.bf16.mxu0 %v1359_v62  ;;  %2342 = vmatprep.subr.bf16.mxu1 %v1361_v63  ;;  %v1403_v62 = vunpack.c.l.s8.bf16 %v809_v53  ;;  %v363_v63 = vsel %vm306_vm0, %v6877_v9, 0.0  ;;  %v1402_v2 = vunpack.c.l.s8.bf16 %v808_v58  ;;  %v497_v13 = vrot.slane %v496_v16, 4 }
 0x20d   :  { %v364_v3 = vrot.slane %v363_v63, 4 }
 0x20f   :  { %2015 = vmatpush1.bf16.msra.mxu0 %v1358_v15  ;;  %2343 = vmatpush1.bf16.msra.mxu1 %v1360_v4  ;;  %v476_v15 = vrot.slane %v475_v0, 4  ;;  %v384_v4 = vsel %vm306_vm0, %v279_v59, 0.0  ;;  %v1433_v59 = vunpack.c.h.s8.bf16 %v821_v34 }
 0x210   :  { %2025 = vmatprep.subr.bf16.mxu0 %v1365_v5  ;;  %2353 = vmatprep.subr.bf16.mxu1 %v1367_v6  ;;  %v1407_v5 = vunpack.c.h.s8.bf16 %v807_v52  ;;  %v1409_v6 = vunpack.c.h.s8.bf16 %v809_v53  ;;  %v385_v9 = vrot.slane %v384_v4, 4 }
 0x212   :  { %2017 = vmatmul.mubr.bf16.vlgmr.msra.gmra.mrb[0].mxu0 %v6892_v12  ;;  %2345 = vmatmul.mubr.bf16.vlgmr.msra.gmra.mrb[0].mxu1 %v6892_v12 }
 0x213   :  { %2026 = vmatpush1.bf16.msra.mxu0 %v1364_v14  ;;  %2354 = vmatpush1.bf16.msra.mxu1 %v1366_v17  ;;  %v1408_v14 = vunpack.c.h.s8.bf16 %v808_v58  ;;  %v365_v17 = vadd.f32 %v364_v3, %v363_v63 }
 0x214   :  { %2027 = vmatprep.subr.bf16.mxu0 %v1371_v19  ;;  %2355 = vmatprep.subr.bf16.mxu1 %v1373_v20  ;;  %v477_v19 = vadd.f32 %v476_v15, %v475_v0  ;;  %v1413_v20 = vunpack.c.l.s8.bf16 %v813_v7  ;;  %v1437_v15 = vunpack.c.l.s8.bf16 %v825_v60 }
 0x215   :  { %2057 = vmatprep.mubr.bf16.mxu0 %v6895_v23  ;;  %2385 = vmatprep.mubr.bf16.mxu1 %v6895_v23  ;;  %v366_v29 = vrot.slane %v365_v17, 2 }
 0x217   :  { %2028 = vmatpush1.bf16.msra.mxu0 %v1370_v24  ;;  %2356 = vmatpush1.bf16.msra.mxu1 %v1372_v25  ;;  %v814_v24 = vld [vmem:[#allocation5 + $0x6d0] sm:$0xff]  ;;  %v386_v25 = vadd.f32 %v385_v9, %v384_v4 }
 0x218   :  { %2029 = vmatprep.subr.bf16.mxu0 %v1377_v26  ;;  %2357 = vmatprep.subr.bf16.mxu1 %v1379_v27  ;;  %v498_v26 = vadd.f32 %v497_v13, %v496_v16  ;;  %v1412_v27 = vunpack.c.l.s8.bf16 %v812_v22  ;;  %v1414_v28 = vunpack.c.l.s8.bf16 %v814_v24  ;;  %v824_v16 = vld [vmem:[#allocation5 + $0x720] sm:$0xff] }
 0x219   :  { %v387_v35 = vrot.slane %v386_v25, 2 }
 0x21b   :  { %2030 = vmatpush1.bf16.msra.mxu0 %v1376_v30  ;;  %2358 = vmatpush1.bf16.msra.mxu1 %v1378_v31  ;;  %v478_v30 = vrot.slane %v477_v19, 2  ;;  %v1419_v31 = vunpack.c.h.s8.bf16 %v813_v7 }
 0x21c   :  { %2031 = vmatprep.subr.bf16.mxu0 %v1383_v32  ;;  %2359 = vmatprep.subr.bf16.mxu1 %v1385_v33  ;;  %v1421_v32 = vunpack.c.h.s8.bf16 %v815_v11  ;;  %v819_v33 = vld [vmem:[#allocation5 + $0x6f8] sm:$0xff]  ;;  %v1436_v11 = vunpack.c.l.s8.bf16 %v824_v16 }
 0x21d   :  { %v479_v44 = vadd.f32 %v478_v30, %v477_v19  ;;  %v1425_v40 = vunpack.c.l.s8.bf16 %v819_v33  ;;  %v1431_v58 = vunpack.c.h.s8.bf16 %v819_v33  ;;  %v831_v19 = vld [vmem:[#allocation5 + $0x758] sm:$0xff]  ;;  %v830_v30 = vld [vmem:[#allocation5 + $0x750] sm:$0xff] }
 0x21f   :  { %2032 = vmatpush1.bf16.msra.mxu0 %v1382_v45  ;;  %2360 = vmatpush1.bf16.msra.mxu1 %v1384_v36  ;;  %v499_v45 = vrot.slane %v498_v26, 2  ;;  %v1418_v36 = vunpack.c.h.s8.bf16 %v812_v22  ;;  %v480_v57 = vrot.slane %v479_v44, 1 }
 0x220   :  { %2033 = vmatprep.subr.bf16.mxu0 %v1389_v41  ;;  %2361 = vmatprep.subr.bf16.mxu1 %v1391_v38  ;;  %v1420_v41 = vunpack.c.h.s8.bf16 %v814_v24  ;;  %v367_v38 = vadd.f32 %v366_v29, %v365_v17  ;;  %v1442_v24 = vunpack.c.h.s8.bf16 %v824_v16 }
 0x221   :  { %v500_v52 = vadd.f32 %v499_v45, %v498_v26  ;;  %v481_v3 = vadd.f32 %v480_v57, %v479_v44  ;;  %v837_v44 = vld [vmem:[#allocation5 + $0x788] sm:$0xff]  ;;  %v838_v57 = vld [vmem:[#allocation5 + $0x790] sm:$0xff] }
 0x223   :  { %2034 = vmatpush1.bf16.msra.mxu0 %v1388_v42  ;;  %2362 = vmatpush1.bf16.msra.mxu1 %v1390_v43  ;;  %v1427_v42 = vunpack.c.l.s8.bf16 %v821_v34  ;;  %v818_v43 = vld [vmem:[#allocation5 + $0x6f0] sm:$0xff]  ;;  %v501_v63 = vrot.slane %v500_v52, 1  ;;  %v1448_v34 = vunpack.c.l.s8.bf16 %v830_v30 }
 0x224   :  { %2035 = vmatprep.subr.bf16.mxu0 %v1395_v47  ;;  %2363 = vmatprep.subr.bf16.mxu1 %v1397_v48  ;;  %v820_v47 = vld [vmem:[#allocation5 + $0x700] sm:$0xff]  ;;  %v388_v48 = vadd.f32 %v387_v35, %v386_v25  ;;  %v1424_v53 = vunpack.c.l.s8.bf16 %v818_v43  ;;  %v1430_v0 = vunpack.c.h.s8.bf16 %v818_v43 }
 0x225   :  { %v502_v7 = vadd.f32 %v501_v63, %v500_v52 }
 0x227   :  { %2036 = vmatpush1.bf16.msra.mxu0 %v1394_v54  ;;  %2364 = vmatpush1.bf16.msra.mxu1 %v1396_v55  ;;  %v1426_v54 = vunpack.c.l.s8.bf16 %v820_v47  ;;  %v368_v55 = vrot.slane %v367_v38, 1  ;;  %v559_v22 = vmul.f32 0.25, %v502_v7 }
 0x228   :  { %2037 = vmatprep.subr.bf16.mxu0 %v1401_v61  ;;  %2365 = vmatprep.subr.bf16.mxu1 %v1403_v62  ;;  %v827_v61 = vld [vmem:[#allocation5 + $0x738] sm:$0xff]  ;;  %v389_v62 = vrot.slane %v388_v48, 1 }
 0x229   :  { %v1439_v4 = vunpack.c.l.s8.bf16 %v827_v61  ;;  %v1445_v17 = vunpack.c.h.s8.bf16 %v827_v61  ;;  %v591_v33 = vpack.c.bf16 %v559_v22, %v559_v22  ;;  %v1462_v61 = vunpack.c.l.s8.bf16 %v838_v57  ;;  %v848_v22 = vld [vmem:[#allocation5 + $0x7e0] sm:$0xff] }
 0x22b   :  { %2038 = vmatpush1.bf16.msra.mxu0 %v1400_v1  ;;  %2366 = vmatpush1.bf16.msra.mxu1 %v1402_v2  ;;  %v1432_v1 = vunpack.c.h.s8.bf16 %v820_v47  ;;  %v369_v2 = vadd.f32 %v368_v55, %v367_v38  ;;  %v1807_v43 = vunpack.c.l.b16 %v591_v33  ;;  %v1454_v47 = vunpack.c.h.s8.bf16 %v830_v30  ;;  %v836_v55 = vld [vmem:[#allocation5 + $0x780] sm:$0xff]  ;;  %v6927_v30 = vld [vmem:[#allocation2 + $0x70] sm:$0xff] }
 0x22c   :  { %2039 = vmatprep.subr.bf16.mxu0 %v1407_v5  ;;  %2367 = vmatprep.subr.bf16.mxu1 %v1409_v6  ;;  %v826_v5 = vld [vmem:[#allocation5 + $0x730] sm:$0xff]  ;;  %v390_v6 = vadd.f32 %v389_v62, %v388_v48  ;;  %v1467_v62 = vunpack.c.h.s8.bf16 %v837_v44  ;;  %v1490_v33 = vunpack.c.h.s8.bf16 %v848_v22 }
 0x22d   :  { %v1438_v9 = vunpack.c.l.s8.bf16 %v826_v5  ;;  %v540_v13 = vmul.f32 0.25, %v369_v2  ;;  %v1444_v25 = vunpack.c.h.s8.bf16 %v826_v5  ;;  %v842_v5 = vld [vmem:[#allocation5 + $0x7b0] sm:$0xff] }
 0x22e   :  { %v1472_v7 = vunpack.c.l.s8.bf16 %v842_v5 }
 0x22f   :  { %2040 = vmatpush1.bf16.msra.mxu0 %v1406_v10  ;;  %2368 = vmatpush1.bf16.msra.mxu1 %v1408_v14  ;;  %v556_v10 = vmul.f32 0.25, %v481_v3  ;;  %v1443_v14 = vunpack.c.h.s8.bf16 %v825_v60  ;;  %v572_v26 = vpack.c.bf16 %v540_v13, %v540_v13  ;;  %v1460_v60 = vunpack.c.l.s8.bf16 %v836_v55 }
 0x230   :  { %2041 = vmatprep.subr.bf16.mxu0 %v1413_v20  ;;  %2369 = vmatprep.subr.bf16.mxu1 %v1415_v21  ;;  %v833_v20 = vld [vmem:[#allocation5 + $0x768] sm:$0xff]  ;;  %v543_v21 = vmul.f32 0.25, %v390_v6  ;;  %v1466_v3 = vunpack.c.h.s8.bf16 %v836_v55  ;;  %v844_v6 = vld [vmem:[#allocation5 + $0x7c0] sm:$0xff] }
 0x231   :  { %v1451_v29 = vunpack.c.l.s8.bf16 %v833_v20  ;;  %v1788_v45 = vunpack.c.l.b16 %v572_v26  ;;  %v1457_v38 = vunpack.c.h.s8.bf16 %v833_v20 }
 0x233   :  { %2042 = vmatpush1.bf16.msra.mxu0 %v1412_v27  ;;  %2370 = vmatpush1.bf16.msra.mxu1 %v1414_v28  ;;  %v588_v27 = vpack.c.bf16 %v556_v10, %v556_v10  ;;  %v1449_v28 = vunpack.c.l.s8.bf16 %v831_v19  ;;  %v849_v10 = vld [vmem:[#allocation5 + $0x7e8] sm:$0xff] }
 0x234   :  { %2043 = vmatprep.subr.bf16.mxu0 %v1419_v31  ;;  %2371 = vmatprep.subr.bf16.mxu1 %v1421_v32  ;;  %v832_v31 = vld [vmem:[#allocation5 + $0x760] sm:$0xff]  ;;  %v575_v32 = vpack.c.bf16 %v543_v21, %v543_v21  ;;  %v1485_v20 = vunpack.c.l.s8.bf16 %v849_v10 }
 0x235   :  { %v1450_v35 = vunpack.c.l.s8.bf16 %v832_v31  ;;  %v1456_v48 = vunpack.c.h.s8.bf16 %v832_v31  ;;  %v855_v31 = vld [vmem:[#allocation5 + $0x818] sm:$0xff] }
 0x236   :  { %v1503_v55 = vunpack.c.h.s8.bf16 %v855_v31 }
 0x237   :  { %2044 = vmatpush1.bf16.msra.mxu0 %v1418_v36  ;;  %2372 = vmatpush1.bf16.msra.mxu1 %v1420_v41  ;;  %v1804_v36 = vunpack.c.l.b16 %v588_v27  ;;  %v1455_v41 = vunpack.c.h.s8.bf16 %v831_v19  ;;  %v1480_v19 = vunpack.c.h.s8.bf16 %v844_v6  ;;  %v1491_v27 = vunpack.c.h.s8.bf16 %v849_v10 }
 0x238   :  { %2045 = vmatprep.subr.bf16.mxu0 %v1425_v40  ;;  %2373 = vmatprep.subr.bf16.mxu1 %v1427_v42  ;;  %v839_v40 = vld [vmem:[#allocation5 + $0x798] sm:$0xff]  ;;  %v1791_v42 = vunpack.c.l.b16 %v575_v32  ;;  %v857_v32 = vld [vmem:[#allocation5 + $0x828] sm:$0xff] }
 0x239   :  { %v1821_v52 = vsel %vm1812_vm1, %v1804_v36, %v1788_v45  ;;  %v1469_v63 = vunpack.c.h.s8.bf16 %v839_v40  ;;  %v856_v45 = vld [vmem:[#allocation5 + $0x820] sm:$0xff] }
 0x23b   :  { %2046 = vmatpush1.bf16.msra.mxu0 %v1424_v53  ;;  %2374 = vmatpush1.bf16.msra.mxu1 %v1426_v54  ;;  %v1461_v53 = vunpack.c.l.s8.bf16 %v837_v44  ;;  %v1463_v54 = vunpack.c.l.s8.bf16 %v839_v40  ;;  %v1499_v44 = vunpack.c.l.s8.bf16 %v857_v32  ;;  %v377_v40 = vsel %vm306_vm0, %v6901_v49, 0.0 }
 0x23c   :  { %2047 = vmatprep.subr.bf16.mxu0 %v1431_v58  ;;  %2375 = vmatprep.subr.bf16.mxu1 %v1433_v59  ;;  %v6916_v58 = vpack.c.b16 %v1821_v52, %v1821_v52  ;;  %v1824_v59 = vsel %vm1812_vm1, %v1807_v43, %v1791_v42  ;;  %v489_v42 = vsel %vm306_vm0, %v6903_v51, 0.0 }
 0x23d   :  { %v6919_v2 = vpack.c.b16 %v1824_v59, %v1824_v59  ;;  %v490_v52 = vrot.slane %v489_v42, 4  ;;  %v861_v59 = vld [vmem:[#allocation5 + $0x848] sm:$0xff] }
 0x23f   :  { %2048 = vmatpush1.bf16.msra.mxu0 %v1430_v0  ;;  %2376 = vmatpush1.bf16.msra.mxu1 %v1432_v1  ;;  %v843_v0 = vld [vmem:[#allocation5 + $0x7b8] sm:$0xff]  ;;  %v845_v1 = vld [vmem:[#allocation5 + $0x7c8] sm:$0xff] }
 0x240   :  { %2049 = vmatprep.subr.bf16.mxu0 %v1437_v15  ;;  %2377 = vmatprep.subr.bf16.mxu1 %v1439_v4  ;;  %v1468_v15 = vunpack.c.h.s8.bf16 %v838_v57  ;;  %v1473_v4 = vunpack.c.l.s8.bf16 %v843_v0  ;;  %v1475_v16 = vunpack.c.l.s8.bf16 %v845_v1  ;;  %v1481_v13 = vunpack.c.h.s8.bf16 %v845_v1 }
 0x241   :  { %v1505_v57 = vunpack.c.h.s8.bf16 %v857_v32  ;;  %v1509_v1 = vunpack.c.l.s8.bf16 %v861_v59 }
 0x243   :  { %2050 = vmatpush1.bf16.msra.mxu0 %v1436_v11  ;;  %2378 = vmatpush1.bf16.msra.mxu1 %v1438_v9  ;;  %v1474_v11 = vunpack.c.l.s8.bf16 %v844_v6  ;;  %v1479_v9 = vunpack.c.h.s8.bf16 %v843_v0  ;;  %v491_v0 = vadd.f32 %v490_v52, %v489_v42 }
 0x244   :  { %2051 = vmatprep.subr.bf16.mxu0 %v1443_v14  ;;  %2379 = vmatprep.subr.bf16.mxu1 %v1445_v17  ;;  %v851_v14 = vld [vmem:[#allocation5 + $0x7f8] sm:$0xff]  ;;  %v1478_v17 = vunpack.c.h.s8.bf16 %v842_v5 }
 0x245   :  { %v1487_v21 = vunpack.c.l.s8.bf16 %v851_v14 }
 0x247   :  { %2052 = vmatpush1.bf16.msra.mxu0 %v1442_v24  ;;  %2380 = vmatpush1.bf16.msra.mxu1 %v1444_v25  ;;  %v850_v24 = vld [vmem:[#allocation5 + $0x7f0] sm:$0xff]  ;;  %v1484_v25 = vunpack.c.l.s8.bf16 %v848_v22 }
 0x248   :  { %2053 = vmatprep.subr.bf16.mxu0 %v1449_v28  ;;  %2381 = vmatprep.subr.bf16.mxu1 %v1451_v29  ;;  %v1486_v26 = vunpack.c.l.s8.bf16 %v850_v24  ;;  %v1493_v28 = vunpack.c.h.s8.bf16 %v851_v14  ;;  %v6925_v29 = vld [vmem:[#allocation2 + $0x30] sm:$0xff]  ;;  %v867_v14 = vld [vmem:[#allocation5 + $0x878] sm:$0xff] }
 0x249   :  { %v280_v36 = vcombine.high %v6925_v29, %v6925_v29 }
 0x24b   :  { %2054 = vmatpush1.bf16.msra.mxu0 %v1448_v34  ;;  %2382 = vmatpush1.bf16.msra.mxu1 %v1450_v35  ;;  %v1492_v34 = vunpack.c.h.s8.bf16 %v850_v24  ;;  %v854_v35 = vld [vmem:[#allocation5 + $0x810] sm:$0xff] }
 0x24c   :  { %2055 = vmatprep.subr.bf16.mxu0 %v1455_v41  ;;  %2383 = vmatprep.subr.bf16.mxu1 %v1457_v38  ;;  %v288_v41 = vcombine.high %v6927_v30, %v6927_v30  ;;  %v1497_v38 = vunpack.c.l.s8.bf16 %v855_v31  ;;  %v1496_v43 = vunpack.c.l.s8.bf16 %v854_v35  ;;  %v1502_v51 = vunpack.c.h.s8.bf16 %v854_v35  ;;  %v868_v31 = vld [vmem:[#allocation5 + $0x880] sm:$0xff] }
 0x24d   :  { %v1522_v35 = vunpack.c.l.s8.bf16 %v868_v31 }
 0x24f   :  { %2056 = vmatpush1.bf16.msra.mxu0 %v1454_v47  ;;  %2384 = vmatpush1.bf16.msra.mxu1 %v1456_v48  ;;  %v1498_v47 = vunpack.c.l.s8.bf16 %v856_v45  ;;  %v378_v48 = vrot.slane %v377_v40, 4 }
 0x250   :  { %2066 = vmatprep.subr.bf16.mxu0 %v1461_v53  ;;  %2394 = vmatprep.subr.bf16.mxu1 %v1463_v54  ;;  %v398_v53 = vsel %vm306_vm0, %v280_v36, 0.0  ;;  %v510_v54 = vsel %vm306_vm0, %v288_v41, 0.0  ;;  %v1527_v41 = vunpack.c.h.s8.bf16 %v867_v14 }
 0x251   :  { %v399_v49 = vrot.slane %v398_v53, 4 }
 0x252   :  { %2058 = vmatmul.mubr.bf16.vlgmr.msra.gmra.mrb[0].mxu0 %v6916_v58  ;;  %2386 = vmatmul.mubr.bf16.vlgmr.msra.gmra.mrb[0].mxu1 %v6916_v58 }
 0x253   :  { %2067 = vmatpush1.bf16.msra.mxu0 %v1460_v60  ;;  %2395 = vmatpush1.bf16.msra.mxu1 %v1462_v61  ;;  %v863_v60 = vld [vmem:[#allocation5 + $0x858] sm:$0xff]  ;;  %v511_v61 = vrot.slane %v510_v54, 4 }
 0x254   :  { %2068 = vmatprep.subr.bf16.mxu0 %v1467_v62  ;;  %2396 = vmatprep.subr.bf16.mxu1 %v1469_v63  ;;  %v1504_v62 = vunpack.c.h.s8.bf16 %v856_v45  ;;  %v379_v63 = vadd.f32 %v378_v48, %v377_v40  ;;  %v1517_v10 = vunpack.c.h.s8.bf16 %v863_v60  ;;  %v875_v40 = vld [vmem:[#allocation5 + $0x8b8] sm:$0xff]  ;;  %v1528_v48 = vunpack.c.h.s8.bf16 %v868_v31 }
 0x255   :  { %2098 = vmatprep.mubr.bf16.mxu0 %v6919_v2  ;;  %2426 = vmatprep.mubr.bf16.mxu1 %v6919_v2  ;;  %v512_v5 = vadd.f32 %v511_v61, %v510_v54 }
 0x257   :  { %2069 = vmatpush1.bf16.msra.mxu0 %v1466_v3  ;;  %2397 = vmatpush1.bf16.msra.mxu1 %v1468_v15  ;;  %v1511_v3 = vunpack.c.l.s8.bf16 %v863_v60  ;;  %v860_v15 = vld [vmem:[#allocation5 + $0x840] sm:$0xff] }
 0x258   :  { %2070 = vmatprep.subr.bf16.mxu0 %v1473_v4  ;;  %2398 = vmatprep.subr.bf16.mxu1 %v1475_v16  ;;  %v862_v4 = vld [vmem:[#allocation5 + $0x850] sm:$0xff]  ;;  %v400_v16 = vadd.f32 %v399_v49, %v398_v53  ;;  %v1508_v6 = vunpack.c.l.s8.bf16 %v860_v15 }
 0x259   :  { %v1516_v22 = vunpack.c.h.s8.bf16 %v862_v4 }
 0x25b   :  { %2071 = vmatpush1.bf16.msra.mxu0 %v1472_v7  ;;  %2399 = vmatpush1.bf16.msra.mxu1 %v1474_v11  ;;  %v1510_v7 = vunpack.c.l.s8.bf16 %v862_v4  ;;  %v380_v11 = vrot.slane %v379_v63, 2 }
 0x25c   :  { %2072 = vmatprep.subr.bf16.mxu0 %v1479_v9  ;;  %2400 = vmatprep.subr.bf16.mxu1 %v1481_v13  ;;  %v492_v9 = vrot.slane %v491_v0, 2  ;;  %v1515_v13 = vunpack.c.h.s8.bf16 %v861_v59  ;;  %v874_v59 = vld [vmem:[#allocation5 + $0x8b0] sm:$0xff] }
 0x25d   :  { %v381_v24 = vadd.f32 %v380_v11, %v379_v63 }
 0x25f   :  { %2073 = vmatpush1.bf16.msra.mxu0 %v1478_v17  ;;  %2401 = vmatpush1.bf16.msra.mxu1 %v1480_v19  ;;  %v869_v17 = vld [vmem:[#allocation5 + $0x888] sm:$0xff]  ;;  %v401_v19 = vrot.slane %v400_v16, 2  ;;  %v382_v45 = vrot.slane %v381_v24, 1 }
 0x260   :  { %2074 = vmatprep.subr.bf16.mxu0 %v1485_v20  ;;  %2402 = vmatprep.subr.bf16.mxu1 %v1487_v21  ;;  %v513_v20 = vrot.slane %v512_v5, 2  ;;  %v1514_v21 = vunpack.c.h.s8.bf16 %v860_v15  ;;  %v881_v15 = vld [vmem:[#allocation5 + $0x8e8] sm:$0xff] }
 0x261   :  { %v402_v32 = vadd.f32 %v401_v19, %v400_v16  ;;  %v383_v52 = vadd.f32 %v382_v45, %v381_v24 }
 0x263   :  { %2075 = vmatpush1.bf16.msra.mxu0 %v1484_v25  ;;  %2403 = vmatpush1.bf16.msra.mxu1 %v1486_v26  ;;  %v493_v25 = vadd.f32 %v492_v9, %v491_v0  ;;  %v1521_v26 = vunpack.c.l.s8.bf16 %v867_v14  ;;  %v403_v42 = vrot.slane %v402_v32, 1  ;;  %v880_v14 = vld [vmem:[#allocation5 + $0x8e0] sm:$0xff] }
 0x264   :  { %2076 = vmatprep.subr.bf16.mxu0 %v1491_v27  ;;  %2404 = vmatprep.subr.bf16.mxu1 %v1493_v28  ;;  %v1523_v27 = vunpack.c.l.s8.bf16 %v869_v17  ;;  %v866_v28 = vld [vmem:[#allocation5 + $0x870] sm:$0xff] }
 0x265   :  { %v494_v36 = vrot.slane %v493_v25, 1  ;;  %v404_v60 = vadd.f32 %v403_v42, %v402_v32 }
 0x267   :  { %2077 = vmatpush1.bf16.msra.mxu0 %v1490_v33  ;;  %2405 = vmatpush1.bf16.msra.mxu1 %v1492_v34  ;;  %v514_v33 = vadd.f32 %v513_v20, %v512_v5  ;;  %v1520_v34 = vunpack.c.l.s8.bf16 %v866_v28  ;;  %v495_v53 = vadd.f32 %v494_v36, %v493_v25  ;;  %v545_v4 = vmul.f32 0.25, %v404_v60 }
 0x268   :  { %2078 = vmatprep.subr.bf16.mxu0 %v1497_v38  ;;  %2406 = vmatprep.subr.bf16.mxu1 %v1499_v44  ;;  %v1529_v38 = vunpack.c.h.s8.bf16 %v869_v17  ;;  %v873_v44 = vld [vmem:[#allocation5 + $0x8a8] sm:$0xff] }
 0x269   :  { %v1533_v54 = vunpack.c.l.s8.bf16 %v873_v44  ;;  %v558_v63 = vmul.f32 0.25, %v495_v53  ;;  %v1539_v0 = vunpack.c.h.s8.bf16 %v873_v44  ;;  %v577_v17 = vpack.c.bf16 %v545_v4, %v545_v4  ;;  %v893_v53 = vld [vmem:[#allocation5 + $0x948] sm:$0xff] }
 0x26a   :  { %v1571_v60 = vunpack.c.l.s8.bf16 %v893_v53 }
 0x26b   :  { %2079 = vmatpush1.bf16.msra.mxu0 %v1496_v43  ;;  %2407 = vmatpush1.bf16.msra.mxu1 %v1498_v47  ;;  %v515_v43 = vrot.slane %v514_v33, 1  ;;  %v1526_v47 = vunpack.c.h.s8.bf16 %v866_v28  ;;  %v590_v11 = vpack.c.bf16 %v558_v63, %v558_v63  ;;  %v887_v28 = vld [vmem:[#allocation5 + $0x918] sm:$0xff]  ;;  %v1793_v31 = vunpack.c.l.b16 %v577_v17 }
 0x26c   :  { %2080 = vmatprep.subr.bf16.mxu0 %v1503_v55  ;;  %2408 = vmatprep.subr.bf16.mxu1 %v1505_v57  ;;  %v1535_v55 = vunpack.c.l.s8.bf16 %v875_v40  ;;  %v872_v57 = vld [vmem:[#allocation5 + $0x8a0] sm:$0xff]  ;;  %v1559_v36 = vunpack.c.l.s8.bf16 %v887_v28  ;;  %v6951_v17 = vld [vmem:[#allocation2 + $0x78] sm:$0xff] }
 0x26d   :  { %v516_v49 = vadd.f32 %v515_v43, %v514_v33  ;;  %v1532_v61 = vunpack.c.l.s8.bf16 %v872_v57  ;;  %v1538_v5 = vunpack.c.h.s8.bf16 %v872_v57  ;;  %v1806_v24 = vunpack.c.l.b16 %v590_v11 }
 0x26f   :  { %2081 = vmatpush1.bf16.msra.mxu0 %v1502_v51  ;;  %2409 = vmatpush1.bf16.msra.mxu1 %v1504_v62  ;;  %v1534_v51 = vunpack.c.l.s8.bf16 %v874_v59  ;;  %v542_v62 = vmul.f32 0.25, %v383_v52  ;;  %v561_v16 = vmul.f32 0.25, %v516_v49  ;;  %v891_v52 = vld [vmem:[#allocation5 + $0x938] sm:$0xff]  ;;  %v890_v49 = vld [vmem:[#allocation5 + $0x930] sm:$0xff] }
 0x270   :  { %2082 = vmatprep.subr.bf16.mxu0 %v1509_v1  ;;  %2410 = vmatprep.subr.bf16.mxu1 %v1511_v3  ;;  %v1541_v1 = vunpack.c.h.s8.bf16 %v875_v40  ;;  %v879_v3 = vld [vmem:[#allocation5 + $0x8d8] sm:$0xff]  ;;  %v1575_v63 = vunpack.c.h.s8.bf16 %v891_v52 }
 0x271   :  { %v1545_v9 = vunpack.c.l.s8.bf16 %v879_v3  ;;  %v593_v19 = vpack.c.bf16 %v561_v16, %v561_v16  ;;  %v1551_v25 = vunpack.c.h.s8.bf16 %v879_v3  ;;  %v899_v3 = vld [vmem:[#allocation5 + $0x978] sm:$0xff] }
 0x273   :  { %2083 = vmatpush1.bf16.msra.mxu0 %v1508_v6  ;;  %2411 = vmatpush1.bf16.msra.mxu1 %v1510_v7  ;;  %v1540_v6 = vunpack.c.h.s8.bf16 %v874_v59  ;;  %v574_v7 = vpack.c.bf16 %v542_v62, %v542_v62  ;;  %v1809_v32 = vunpack.c.l.b16 %v593_v19  ;;  %v1569_v59 = vunpack.c.l.s8.bf16 %v891_v52  ;;  %v903_v19 = vld [vmem:[#allocation5 + $0x998] sm:$0xff] }
 0x274   :  { %2084 = vmatprep.subr.bf16.mxu0 %v1515_v13  ;;  %2412 = vmatprep.subr.bf16.mxu1 %v1517_v10  ;;  %v1547_v13 = vunpack.c.l.s8.bf16 %v881_v15  ;;  %v878_v10 = vld [vmem:[#allocation5 + $0x8d0] sm:$0xff] }
 0x275   :  { %v1544_v20 = vunpack.c.l.s8.bf16 %v878_v10  ;;  %v1550_v33 = vunpack.c.h.s8.bf16 %v878_v10  ;;  %v1826_v40 = vsel %vm1812_vm1, %v1809_v32, %v1793_v31  ;;  %v1589_v10 = vunpack.c.h.s8.bf16 %v899_v3 }
 0x276   :  { %v391_v32 = vsel %vm306_vm0, %v6925_v29, 0.0 }
 0x277   :  { %2085 = vmatpush1.bf16.msra.mxu0 %v1514_v21  ;;  %2413 = vmatpush1.bf16.msra.mxu1 %v1516_v22  ;;  %v1546_v21 = vunpack.c.l.s8.bf16 %v880_v14  ;;  %v1790_v22 = vunpack.c.l.b16 %v574_v7  ;;  %v898_v7 = vld [vmem:[#allocation5 + $0x970] sm:$0xff] }
 0x278   :  { %2086 = vmatprep.subr.bf16.mxu0 %v1521_v26  ;;  %2414 = vmatprep.subr.bf16.mxu1 %v1523_v27  ;;  %v1553_v26 = vunpack.c.h.s8.bf16 %v881_v15  ;;  %v885_v27 = vld [vmem:[#allocation5 + $0x908] sm:$0xff]  ;;  %v1574_v15 = vunpack.c.h.s8.bf16 %v890_v49 }
 0x279   :  { %v1557_v45 = vunpack.c.l.s8.bf16 %v885_v27 }
 0x27b   :  { %2087 = vmatpush1.bf16.msra.mxu0 %v1520_v34  ;;  %2415 = vmatpush1.bf16.msra.mxu1 %v1522_v35  ;;  %v1552_v34 = vunpack.c.h.s8.bf16 %v880_v14  ;;  %v1823_v35 = vsel %vm1812_vm1, %v1806_v24, %v1790_v22  ;;  %v6949_v14 = vld [vmem:[#allocation2 + $0x38] sm:$0xff]  ;;  %v1588_v22 = vunpack.c.h.s8.bf16 %v898_v7  ;;  %v902_v24 = vld [vmem:[#allocation5 + $0x990] sm:$0xff] }
 0x27c   :  { %2088 = vmatprep.subr.bf16.mxu0 %v1527_v41  ;;  %2416 = vmatprep.subr.bf16.mxu1 %v1529_v38  ;;  %v884_v41 = vld [vmem:[#allocation5 + $0x900] sm:$0xff]  ;;  %v886_v38 = vld [vmem:[#allocation5 + $0x910] sm:$0xff]  ;;  %v6940_v44 = vpack.c.b16 %v1823_v35, %v1823_v35 }
 0x27d   :  { %v1556_v42 = vunpack.c.l.s8.bf16 %v884_v41  ;;  %v1558_v43 = vunpack.c.l.s8.bf16 %v886_v38  ;;  %v1564_v57 = vunpack.c.h.s8.bf16 %v886_v38 }
 0x27f   :  { %2089 = vmatpush1.bf16.msra.mxu0 %v1526_v47  ;;  %2417 = vmatpush1.bf16.msra.mxu1 %v1528_v48  ;;  %v1563_v47 = vunpack.c.h.s8.bf16 %v885_v27  ;;  %v1565_v48 = vunpack.c.h.s8.bf16 %v887_v28  ;;  %v289_v27 = vcombine.high %v6951_v17, %v6951_v17  ;;  %v1593_v28 = vunpack.c.l.s8.bf16 %v903_v19 }
 0x280   :  { %2090 = vmatprep.subr.bf16.mxu0 %v1533_v54  ;;  %2418 = vmatprep.subr.bf16.mxu1 %v1535_v55  ;;  %v6943_v54 = vpack.c.b16 %v1826_v40, %v1826_v40  ;;  %v1562_v55 = vunpack.c.h.s8.bf16 %v884_v41  ;;  %v1599_v40 = vunpack.c.h.s8.bf16 %v903_v19 }
 0x281   :  { %v524_v38 = vsel %vm306_vm0, %v289_v27, 0.0 }
 0x283   :  { %2091 = vmatpush1.bf16.msra.mxu0 %v1532_v61  ;;  %2419 = vmatpush1.bf16.msra.mxu1 %v1534_v51  ;;  %v892_v61 = vld [vmem:[#allocation5 + $0x940] sm:$0xff]  ;;  %v1568_v51 = vunpack.c.l.s8.bf16 %v890_v49  ;;  %v910_v49 = vld [vmem:[#allocation5 + $0x9d0] sm:$0xff] }
 0x284   :  { %2092 = vmatprep.subr.bf16.mxu0 %v1539_v0  ;;  %2420 = vmatprep.subr.bf16.mxu1 %v1541_v1  ;;  %v1570_v62 = vunpack.c.l.s8.bf16 %v892_v61  ;;  %v1577_v0 = vunpack.c.h.s8.bf16 %v893_v53  ;;  %v897_v1 = vld [vmem:[#allocation5 + $0x968] sm:$0xff]  ;;  %v1576_v4 = vunpack.c.h.s8.bf16 %v892_v61 }
 0x285   :  { %v1581_v16 = vunpack.c.l.s8.bf16 %v897_v1 }
 0x287   :  { %2093 = vmatpush1.bf16.msra.mxu0 %v1538_v5  ;;  %2421 = vmatpush1.bf16.msra.mxu1 %v1540_v6  ;;  %v1583_v5 = vunpack.c.l.s8.bf16 %v899_v3  ;;  %v896_v6 = vld [vmem:[#allocation5 + $0x960] sm:$0xff] }
 0x288   :  { %2094 = vmatprep.subr.bf16.mxu0 %v1545_v9  ;;  %2422 = vmatprep.subr.bf16.mxu1 %v1547_v13  ;;  %v1580_v11 = vunpack.c.l.s8.bf16 %v896_v6  ;;  %v1582_v9 = vunpack.c.l.s8.bf16 %v898_v7  ;;  %v1587_v13 = vunpack.c.h.s8.bf16 %v897_v1 }
 0x28b   :  { %2095 = vmatpush1.bf16.msra.mxu0 %v1544_v20  ;;  %2423 = vmatpush1.bf16.msra.mxu1 %v1546_v21  ;;  %v905_v20 = vld [vmem:[#allocation5 + $0x9a8] sm:$0xff]  ;;  %v1586_v21 = vunpack.c.h.s8.bf16 %v896_v6 }
 0x28c   :  { %2096 = vmatprep.subr.bf16.mxu0 %v1551_v25  ;;  %2424 = vmatprep.subr.bf16.mxu1 %v1553_v26  ;;  %v904_v25 = vld [vmem:[#allocation5 + $0x9a0] sm:$0xff]  ;;  %v281_v26 = vcombine.high %v6949_v14, %v6949_v14  ;;  %v1595_v31 = vunpack.c.l.s8.bf16 %v905_v20 }
 0x28d   :  { %v1594_v35 = vunpack.c.l.s8.bf16 %v904_v25  ;;  %v1600_v52 = vunpack.c.h.s8.bf16 %v904_v25 }
 0x28e   :  { %v412_v41 = vsel %vm306_vm0, %v281_v26, 0.0 }
 0x28f   :  { %2097 = vmatpush1.bf16.msra.mxu0 %v1550_v33  ;;  %2425 = vmatpush1.bf16.msra.mxu1 %v1552_v34  ;;  %v503_v33 = vsel %vm306_vm0, %v6927_v30, 0.0  ;;  %v1592_v34 = vunpack.c.l.s8.bf16 %v902_v24  ;;  %v413_v29 = vrot.slane %v412_v41, 4  ;;  %v1598_v30 = vunpack.c.h.s8.bf16 %v902_v24 }
 0x290   :  { %2107 = vmatprep.subr.bf16.mxu0 %v1557_v45  ;;  %2435 = vmatprep.subr.bf16.mxu1 %v1559_v36  ;;  %v392_v45 = vrot.slane %v391_v32, 4  ;;  %v504_v36 = vrot.slane %v503_v33, 4 }
 0x291   :  { %v414_v61 = vadd.f32 %v413_v29, %v412_v41  ;;  %v922_v29 = vld [vmem:[#allocation5 + $0xa30] sm:$0xff] }
 0x292   :  { %2099 = vmatmul.mubr.bf16.vlgmr.msra.gmra.mrb[0].mxu0 %v6940_v44  ;;  %2427 = vmatmul.mubr.bf16.vlgmr.msra.gmra.mrb[0].mxu1 %v6940_v44  ;;  %v393_v53 = vadd.f32 %v392_v45, %v391_v32 }
 0x293   :  { %2108 = vmatpush1.bf16.msra.mxu0 %v1556_v42  ;;  %2436 = vmatpush1.bf16.msra.mxu1 %v1558_v43  ;;  %v1601_v42 = vunpack.c.h.s8.bf16 %v905_v20  ;;  %v909_v43 = vld [vmem:[#allocation5 + $0x9c8] sm:$0xff]  ;;  %v914_v20 = vld [vmem:[#allocation5 + $0x9f0] sm:$0xff] }
 0x294   :  { %2109 = vmatprep.subr.bf16.mxu0 %v1563_v47  ;;  %2437 = vmatprep.subr.bf16.mxu1 %v1565_v48  ;;  %v911_v47 = vld [vmem:[#allocation5 + $0x9d8] sm:$0xff]  ;;  %v525_v48 = vrot.slane %v524_v38, 4  ;;  %v1611_v3 = vunpack.c.h.s8.bf16 %v909_v43  ;;  %v1616_v25 = vunpack.c.l.s8.bf16 %v914_v20 }
 0x295   :  { %2139 = vmatprep.mubr.bf16.mxu0 %v6943_v54  ;;  %2467 = vmatprep.mubr.bf16.mxu1 %v6943_v54 }
 0x297   :  { %2110 = vmatpush1.bf16.msra.mxu0 %v1562_v55  ;;  %2438 = vmatpush1.bf16.msra.mxu1 %v1564_v57  ;;  %v505_v55 = vadd.f32 %v504_v36, %v503_v33  ;;  %v1605_v57 = vunpack.c.l.s8.bf16 %v909_v43  ;;  %v921_v33 = vld [vmem:[#allocation5 + $0xa28] sm:$0xff]  ;;  %v1622_v36 = vunpack.c.h.s8.bf16 %v914_v20 }
 0x298   :  { %2111 = vmatprep.subr.bf16.mxu0 %v1569_v59  ;;  %2439 = vmatprep.subr.bf16.mxu1 %v1571_v60  ;;  %v1607_v59 = vunpack.c.l.s8.bf16 %v911_v47  ;;  %v908_v60 = vld [vmem:[#allocation5 + $0x9c0] sm:$0xff] }
 0x299   :  { %v506_v1 = vrot.slane %v505_v55, 2  ;;  %v1610_v7 = vunpack.c.h.s8.bf16 %v908_v60 }
 0x29b   :  { %2112 = vmatpush1.bf16.msra.mxu0 %v1568_v51  ;;  %2440 = vmatpush1.bf16.msra.mxu1 %v1570_v62  ;;  %v526_v51 = vadd.f32 %v525_v48, %v524_v38  ;;  %v1604_v62 = vunpack.c.l.s8.bf16 %v908_v60 }
 0x29c   :  { %2113 = vmatprep.subr.bf16.mxu0 %v1575_v63  ;;  %2441 = vmatprep.subr.bf16.mxu1 %v1577_v0  ;;  %v1606_v63 = vunpack.c.l.s8.bf16 %v910_v49  ;;  %v394_v0 = vrot.slane %v393_v53, 2 }
 0x29d   :  { %v527_v6 = vrot.slane %v526_v51, 2 }
 0x29f   :  { %2114 = vmatpush1.bf16.msra.mxu0 %v1574_v15  ;;  %2442 = vmatpush1.bf16.msra.mxu1 %v1576_v4  ;;  %v1613_v15 = vunpack.c.h.s8.bf16 %v911_v47  ;;  %v915_v4 = vld [vmem:[#allocation5 + $0x9f8] sm:$0xff]  ;;  %v528_v24 = vadd.f32 %v527_v6, %v526_v51  ;;  %v920_v47 = vld [vmem:[#allocation5 + $0xa20] sm:$0xff] }
 0x2a0   :  { %2115 = vmatprep.subr.bf16.mxu0 %v1581_v16  ;;  %2443 = vmatprep.subr.bf16.mxu1 %v1583_v5  ;;  %v917_v16 = vld [vmem:[#allocation5 + $0xa08] sm:$0xff]  ;;  %v415_v5 = vrot.slane %v414_v61, 2 }
 0x2a1   :  { %v1619_v19 = vunpack.c.l.s8.bf16 %v917_v16  ;;  %v1625_v32 = vunpack.c.h.s8.bf16 %v917_v16  ;;  %v529_v45 = vrot.slane %v528_v24, 1  ;;  %v926_v16 = vld [vmem:[#allocation5 + $0xa50] sm:$0xff] }
 0x2a3   :  { %2116 = vmatpush1.bf16.msra.mxu0 %v1580_v11  ;;  %2444 = vmatpush1.bf16.msra.mxu1 %v1582_v9  ;;  %v1612_v11 = vunpack.c.h.s8.bf16 %v910_v49  ;;  %v395_v9 = vadd.f32 %v394_v0, %v393_v53  ;;  %v1630_v53 = vunpack.c.l.s8.bf16 %v922_v29  ;;  %v927_v49 = vld [vmem:[#allocation5 + $0xa58] sm:$0xff]  ;;  %v1636_v0 = vunpack.c.h.s8.bf16 %v922_v29 }
 0x2a4   :  { %2117 = vmatprep.subr.bf16.mxu0 %v1587_v13  ;;  %2445 = vmatprep.subr.bf16.mxu1 %v1589_v10  ;;  %v507_v13 = vadd.f32 %v506_v1, %v505_v55  ;;  %v1617_v10 = vunpack.c.l.s8.bf16 %v915_v4 }
 0x2a5   :  { %v396_v27 = vrot.slane %v395_v9, 1 }
 0x2a7   :  { %2118 = vmatpush1.bf16.msra.mxu0 %v1586_v21  ;;  %2446 = vmatpush1.bf16.msra.mxu1 %v1588_v22  ;;  %v916_v21 = vld [vmem:[#allocation5 + $0xa00] sm:$0xff]  ;;  %v416_v22 = vadd.f32 %v415_v5, %v414_v61  ;;  %v397_v38 = vadd.f32 %v396_v27, %v395_v9  ;;  %v929_v61 = vld [vmem:[#allocation5 + $0xa68] sm:$0xff] }
 0x2a8   :  { %2119 = vmatprep.subr.bf16.mxu0 %v1593_v28  ;;  %2447 = vmatprep.subr.bf16.mxu1 %v1595_v31  ;;  %v1618_v26 = vunpack.c.l.s8.bf16 %v916_v21  ;;  %v508_v28 = vrot.slane %v507_v13, 1  ;;  %v1623_v31 = vunpack.c.h.s8.bf16 %v915_v4  ;;  %v1624_v41 = vunpack.c.h.s8.bf16 %v916_v21  ;;  %v928_v5 = vld [vmem:[#allocation5 + $0xa60] sm:$0xff]  ;;  %v933_v21 = vld [vmem:[#allocation5 + $0xa88] sm:$0xff] }
 0x2a9   :  { %v544_v55 = vmul.f32 0.25, %v397_v38  ;;  %v1643_v4 = vunpack.c.l.s8.bf16 %v929_v61  ;;  %v1642_v9 = vunpack.c.l.s8.bf16 %v928_v5  ;;  %v1649_v20 = vunpack.c.h.s8.bf16 %v929_v61  ;;  %v945_v61 = vld [vmem:[#allocation5 + $0xae8] sm:$0xff] }
 0x2aa   :  { %v1648_v27 = vunpack.c.h.s8.bf16 %v928_v5  ;;  %v1659_v38 = vunpack.c.h.s8.bf16 %v933_v21  ;;  %v1683_v5 = vunpack.c.h.s8.bf16 %v945_v61 }
 0x2ab   :  { %2120 = vmatpush1.bf16.msra.mxu0 %v1592_v34  ;;  %2448 = vmatpush1.bf16.msra.mxu1 %v1594_v35  ;;  %v923_v34 = vld [vmem:[#allocation5 + $0xa38] sm:$0xff]  ;;  %v417_v35 = vrot.slane %v416_v22, 1  ;;  %v576_v1 = vpack.c.bf16 %v544_v55, %v544_v55  ;;  %v940_v55 = vld [vmem:[#allocation5 + $0xac0] sm:$0xff] }
 0x2ac   :  { %2121 = vmatprep.subr.bf16.mxu0 %v1599_v40  ;;  %2449 = vmatprep.subr.bf16.mxu1 %v1601_v42  ;;  %v509_v40 = vadd.f32 %v508_v28, %v507_v13  ;;  %v1629_v42 = vunpack.c.l.s8.bf16 %v921_v33  ;;  %v1631_v43 = vunpack.c.l.s8.bf16 %v923_v34  ;;  %v1637_v60 = vunpack.c.h.s8.bf16 %v923_v34  ;;  %v934_v34 = vld [vmem:[#allocation5 + $0xa90] sm:$0xff] }
 0x2ad   :  { %v418_v48 = vadd.f32 %v417_v35, %v416_v22  ;;  %v1792_v13 = vunpack.c.l.b16 %v576_v1  ;;  %v935_v22 = vld [vmem:[#allocation5 + $0xa98] sm:$0xff] }
 0x2af   :  { %2122 = vmatpush1.bf16.msra.mxu0 %v1598_v30  ;;  %2450 = vmatpush1.bf16.msra.mxu1 %v1600_v52  ;;  %v530_v30 = vadd.f32 %v529_v45, %v528_v24  ;;  %v1628_v52 = vunpack.c.l.s8.bf16 %v920_v47  ;;  %v547_v51 = vmul.f32 0.25, %v418_v48  ;;  %v1660_v48 = vunpack.c.h.s8.bf16 %v934_v34 }
 0x2b0   :  { %2123 = vmatprep.subr.bf16.mxu0 %v1605_v57  ;;  %2451 = vmatprep.subr.bf16.mxu1 %v1607_v59  ;;  %v560_v57 = vmul.f32 0.25, %v509_v40  ;;  %v1635_v59 = vunpack.c.h.s8.bf16 %v921_v33  ;;  %v932_v33 = vld [vmem:[#allocation5 + $0xa80] sm:$0xff]  ;;  %v1661_v40 = vunpack.c.h.s8.bf16 %v935_v22 }
 0x2b1   :  { %v579_v6 = vpack.c.bf16 %v547_v51, %v547_v51  ;;  %v1658_v29 = vunpack.c.h.s8.bf16 %v932_v33  ;;  %v947_v51 = vld [vmem:[#allocation5 + $0xaf8] sm:$0xff] }
 0x2b2   :  { %v1679_v1 = vunpack.c.l.s8.bf16 %v947_v51 }
 0x2b3   :  { %2124 = vmatpush1.bf16.msra.mxu0 %v1604_v62  ;;  %2452 = vmatpush1.bf16.msra.mxu1 %v1606_v63  ;;  %v563_v62 = vmul.f32 0.25, %v530_v30  ;;  %v1634_v63 = vunpack.c.h.s8.bf16 %v920_v47  ;;  %v1795_v24 = vunpack.c.l.b16 %v579_v6  ;;  %v1685_v6 = vunpack.c.h.s8.bf16 %v947_v51 }
 0x2b4   :  { %2125 = vmatprep.subr.bf16.mxu0 %v1611_v3  ;;  %2453 = vmatprep.subr.bf16.mxu1 %v1613_v15  ;;  %v592_v3 = vpack.c.bf16 %v560_v57, %v560_v57  ;;  %v1641_v15 = vunpack.c.l.s8.bf16 %v927_v49 }
 0x2b7   :  { %2126 = vmatpush1.bf16.msra.mxu0 %v1610_v7  ;;  %2454 = vmatpush1.bf16.msra.mxu1 %v1612_v11  ;;  %v595_v7 = vpack.c.bf16 %v563_v62, %v563_v62  ;;  %v1640_v11 = vunpack.c.l.s8.bf16 %v926_v16 }
 0x2b8   :  { %2127 = vmatprep.subr.bf16.mxu0 %v1617_v10  ;;  %2455 = vmatprep.subr.bf16.mxu1 %v1619_v19  ;;  %v1808_v10 = vunpack.c.l.b16 %v592_v3  ;;  %v1647_v19 = vunpack.c.h.s8.bf16 %v927_v49  ;;  %v944_v3 = vld [vmem:[#allocation5 + $0xae0] sm:$0xff] }
 0x2ba   :  { %v1825_v28 = vsel %vm1812_vm1, %v1808_v10, %v1792_v13 }
 0x2bb   :  { %2128 = vmatpush1.bf16.msra.mxu0 %v1616_v25  ;;  %2456 = vmatpush1.bf16.msra.mxu1 %v1618_v26  ;;  %v1811_v25 = vunpack.c.l.b16 %v595_v7  ;;  %v1646_v26 = vunpack.c.h.s8.bf16 %v926_v16  ;;  %v6964_v35 = vpack.c.b16 %v1825_v28, %v1825_v28  ;;  %v951_v7 = vld [vmem:[#allocation5 + $0xb18] sm:$0xff] }
 0x2bc   :  { %2129 = vmatprep.subr.bf16.mxu0 %v1623_v31  ;;  %2457 = vmatprep.subr.bf16.mxu1 %v1625_v32  ;;  %v1653_v31 = vunpack.c.l.s8.bf16 %v933_v21  ;;  %v1655_v32 = vunpack.c.l.s8.bf16 %v935_v22  ;;  %v1689_v10 = vunpack.c.l.s8.bf16 %v951_v7  ;;  %v952_v21 = vld [vmem:[#allocation5 + $0xb20] sm:$0xff]  ;;  %v405_v22 = vsel %vm306_vm0, %v6949_v14, 0.0 }
 0x2bd   :  { %v1828_v45 = vsel %vm1812_vm1, %v1811_v25, %v1795_v24  ;;  %v517_v24 = vsel %vm306_vm0, %v6951_v17, 0.0 }
 0x2be   :  { %v6967_v47 = vpack.c.b16 %v1828_v45, %v1828_v45  ;;  %v518_v28 = vrot.slane %v517_v24, 4 }
 0x2bf   :  { %2130 = vmatpush1.bf16.msra.mxu0 %v1622_v36  ;;  %2458 = vmatpush1.bf16.msra.mxu1 %v1624_v41  ;;  %v1652_v36 = vunpack.c.l.s8.bf16 %v932_v33  ;;  %v1654_v41 = vunpack.c.l.s8.bf16 %v934_v34  ;;  %v957_v33 = vld [vmem:[#allocation5 + $0xb48] sm:$0xff]  ;;  %v959_v34 = vld [vmem:[#allocation5 + $0xb58] sm:$0xff] }
 0x2c0   :  { %2131 = vmatprep.subr.bf16.mxu0 %v1629_v42  ;;  %2459 = vmatprep.subr.bf16.mxu1 %v1631_v43  ;;  %v939_v42 = vld [vmem:[#allocation5 + $0xab8] sm:$0xff]  ;;  %v941_v43 = vld [vmem:[#allocation5 + $0xac8] sm:$0xff]  ;;  %v1701_v17 = vunpack.c.l.s8.bf16 %v957_v33 }
 0x2c1   :  { %v1665_v30 = vunpack.c.l.s8.bf16 %v939_v42  ;;  %v1673_v49 = vunpack.c.h.s8.bf16 %v941_v43 }
 0x2c3   :  { %2132 = vmatpush1.bf16.msra.mxu0 %v1628_v52  ;;  %2460 = vmatpush1.bf16.msra.mxu1 %v1630_v53  ;;  %v1667_v52 = vunpack.c.l.s8.bf16 %v941_v43  ;;  %v938_v53 = vld [vmem:[#allocation5 + $0xab0] sm:$0xff] }
 0x2c4   :  { %2133 = vmatprep.subr.bf16.mxu0 %v1635_v59  ;;  %2461 = vmatprep.subr.bf16.mxu1 %v1637_v60  ;;  %v1664_v57 = vunpack.c.l.s8.bf16 %v938_v53  ;;  %v1666_v59 = vunpack.c.l.s8.bf16 %v940_v55  ;;  %v1671_v60 = vunpack.c.h.s8.bf16 %v939_v42  ;;  %v1670_v62 = vunpack.c.h.s8.bf16 %v938_v53  ;;  %v958_v42 = vld [vmem:[#allocation5 + $0xb50] sm:$0xff] }
 0x2c5   :  { %v1709_v53 = vunpack.c.h.s8.bf16 %v959_v34 }
 0x2c7   :  { %2134 = vmatpush1.bf16.msra.mxu0 %v1634_v63  ;;  %2462 = vmatpush1.bf16.msra.mxu1 %v1636_v0  ;;  %v1672_v63 = vunpack.c.h.s8.bf16 %v940_v55  ;;  %v1677_v0 = vunpack.c.l.s8.bf16 %v945_v61  ;;  %v963_v55 = vld [vmem:[#allocation5 + $0xb78] sm:$0xff] }
 0x2c8   :  { %2135 = vmatprep.subr.bf16.mxu0 %v1641_v15  ;;  %2463 = vmatprep.subr.bf16.mxu1 %v1643_v4  ;;  %v946_v15 = vld [vmem:[#allocation5 + $0xaf0] sm:$0xff]  ;;  %v1676_v4 = vunpack.c.l.s8.bf16 %v944_v3  ;;  %v1713_v51 = vunpack.c.l.s8.bf16 %v963_v55 }
 0x2c9   :  { %v1678_v16 = vunpack.c.l.s8.bf16 %v946_v15  ;;  %v1684_v13 = vunpack.c.h.s8.bf16 %v946_v15 }
 0x2cb   :  { %2136 = vmatpush1.bf16.msra.mxu0 %v1640_v11  ;;  %2464 = vmatpush1.bf16.msra.mxu1 %v1642_v9  ;;  %v953_v11 = vld [vmem:[#allocation5 + $0xb28] sm:$0xff]  ;;  %v1682_v9 = vunpack.c.h.s8.bf16 %v944_v3 }
 0x2cc   :  { %2137 = vmatprep.subr.bf16.mxu0 %v1647_v19  ;;  %2465 = vmatprep.subr.bf16.mxu1 %v1649_v20  ;;  %v1691_v19 = vunpack.c.l.s8.bf16 %v953_v11  ;;  %v950_v20 = vld [vmem:[#allocation5 + $0xb10] sm:$0xff] }
 0x2cd   :  { %v1688_v25 = vunpack.c.l.s8.bf16 %v950_v20  ;;  %v1694_v45 = vunpack.c.h.s8.bf16 %v950_v20 }
 0x2cf   :  { %2138 = vmatpush1.bf16.msra.mxu0 %v1646_v26  ;;  %2466 = vmatpush1.bf16.msra.mxu1 %v1648_v27  ;;  %v1690_v26 = vunpack.c.l.s8.bf16 %v952_v21  ;;  %v406_v27 = vrot.slane %v405_v22, 4 }
 0x2d0   :  { %2148 = vmatprep.subr.bf16.mxu0 %v1653_v31  ;;  %2476 = vmatprep.subr.bf16.mxu1 %v1655_v32  ;;  %v1695_v31 = vunpack.c.h.s8.bf16 %v951_v7  ;;  %v1697_v32 = vunpack.c.h.s8.bf16 %v953_v11  ;;  %v971_v7 = vld [vmem:[#allocation5 + $0xbb8] sm:$0xff] }
 0x2d1   :  { %v407_v14 = vadd.f32 %v406_v27, %v405_v22  ;;  %v1727_v20 = vunpack.c.l.s8.bf16 %v971_v7  ;;  %v970_v22 = vld [vmem:[#allocation5 + $0xbb0] sm:$0xff] }
 0x2d2   :  { %2140 = vmatmul.mubr.bf16.vlgmr.msra.gmra.mrb[0].mxu0 %v6964_v35  ;;  %2468 = vmatmul.mubr.bf16.vlgmr.msra.gmra.mrb[0].mxu1 %v6964_v35 }
 0x2d3   :  { %2149 = vmatpush1.bf16.msra.mxu0 %v1652_v36  ;;  %2477 = vmatpush1.bf16.msra.mxu1 %v1654_v41  ;;  %v1696_v36 = vunpack.c.h.s8.bf16 %v952_v21  ;;  %v519_v41 = vadd.f32 %v518_v28, %v517_v24  ;;  %v968_v21 = vld [vmem:[#allocation5 + $0xba0] sm:$0xff] }
 0x2d4   :  { %2150 = vmatprep.subr.bf16.mxu0 %v1659_v38  ;;  %2478 = vmatprep.subr.bf16.mxu1 %v1661_v40  ;;  %v1703_v38 = vunpack.c.l.s8.bf16 %v959_v34  ;;  %v956_v40 = vld [vmem:[#allocation5 + $0xb40] sm:$0xff]  ;;  %v1724_v24 = vunpack.c.l.s8.bf16 %v968_v21  ;;  %v1730_v34 = vunpack.c.h.s8.bf16 %v968_v21 }
 0x2d5   :  { %2180 = vmatprep.mubr.bf16.mxu0 %v6967_v47  ;;  %2508 = vmatprep.mubr.bf16.mxu1 %v6967_v47  ;;  %v1700_v43 = vunpack.c.l.s8.bf16 %v956_v40 }
 0x2d7   :  { %2151 = vmatpush1.bf16.msra.mxu0 %v1658_v29  ;;  %2479 = vmatpush1.bf16.msra.mxu1 %v1660_v48  ;;  %v1702_v29 = vunpack.c.l.s8.bf16 %v958_v42  ;;  %v408_v48 = vrot.slane %v407_v14, 2 }
 0x2d8   :  { %2152 = vmatprep.subr.bf16.mxu0 %v1665_v30  ;;  %2480 = vmatprep.subr.bf16.mxu1 %v1667_v52  ;;  %v520_v30 = vrot.slane %v519_v41, 2  ;;  %v1707_v52 = vunpack.c.h.s8.bf16 %v957_v33  ;;  %v977_v33 = vld [vmem:[#allocation5 + $0xbe8] sm:$0xff] }
 0x2da   :  { %v521_v61 = vadd.f32 %v520_v30, %v519_v41 }
 0x2db   :  { %2153 = vmatpush1.bf16.msra.mxu0 %v1664_v57  ;;  %2481 = vmatpush1.bf16.msra.mxu1 %v1666_v59  ;;  %v965_v57 = vld [vmem:[#allocation5 + $0xb88] sm:$0xff]  ;;  %v1706_v59 = vunpack.c.h.s8.bf16 %v956_v40  ;;  %v976_v40 = vld [vmem:[#allocation5 + $0xbe0] sm:$0xff] }
 0x2dc   :  { %2154 = vmatprep.subr.bf16.mxu0 %v1671_v60  ;;  %2482 = vmatprep.subr.bf16.mxu1 %v1673_v49  ;;  %v1708_v60 = vunpack.c.h.s8.bf16 %v958_v42  ;;  %v409_v49 = vadd.f32 %v408_v48, %v407_v14 }
 0x2de   :  { %v410_v15 = vrot.slane %v409_v49, 1 }
 0x2df   :  { %2155 = vmatpush1.bf16.msra.mxu0 %v1670_v62  ;;  %2483 = vmatpush1.bf16.msra.mxu1 %v1672_v63  ;;  %v1715_v62 = vunpack.c.l.s8.bf16 %v965_v57  ;;  %v962_v63 = vld [vmem:[#allocation5 + $0xb70] sm:$0xff] }
 0x2e0   :  { %2156 = vmatprep.subr.bf16.mxu0 %v1677_v0  ;;  %2484 = vmatprep.subr.bf16.mxu1 %v1679_v1  ;;  %v964_v0 = vld [vmem:[#allocation5 + $0xb80] sm:$0xff]  ;;  %v1712_v1 = vunpack.c.l.s8.bf16 %v962_v63  ;;  %v1718_v11 = vunpack.c.h.s8.bf16 %v962_v63  ;;  %v607_v63 = vld [vmem:[#allocation5 + $0x58] sm:$0xff] }
 0x2e1   :  { %v1714_v3 = vunpack.c.l.s8.bf16 %v964_v0 }
 0x2e3   :  { %2157 = vmatpush1.bf16.msra.mxu0 %v1676_v4  ;;  %2485 = vmatpush1.bf16.msra.mxu1 %v1678_v16  ;;  %v522_v4 = vrot.slane %v521_v61, 1  ;;  %v1719_v16 = vunpack.c.h.s8.bf16 %v963_v55 }
 0x2e4   :  { %2158 = vmatprep.subr.bf16.mxu0 %v1683_v5  ;;  %2486 = vmatprep.subr.bf16.mxu1 %v1685_v6  ;;  %v1721_v5 = vunpack.c.h.s8.bf16 %v965_v57  ;;  %v969_v6 = vld [vmem:[#allocation5 + $0xba8] sm:$0xff]  ;;  %v1744_v57 = vunpack.c.h.s8.bf16 %v976_v40 }
 0x2e5   :  { %v1731_v28 = vunpack.c.h.s8.bf16 %v969_v6 }
 0x2e7   :  { %2159 = vmatpush1.bf16.msra.mxu0 %v1682_v9  ;;  %2487 = vmatpush1.bf16.msra.mxu1 %v1684_v13  ;;  %v1720_v9 = vunpack.c.h.s8.bf16 %v964_v0  ;;  %v411_v13 = vadd.f32 %v410_v15, %v409_v49  ;;  %v600_v49 = vld [vmem:[#allocation5 + $0x20] sm:$0xff] }
 0x2e8   :  { %2160 = vmatprep.subr.bf16.mxu0 %v1689_v10  ;;  %2488 = vmatprep.subr.bf16.mxu1 %v1691_v19  ;;  %v523_v10 = vadd.f32 %v522_v4, %v521_v61  ;;  %v1725_v19 = vunpack.c.l.s8.bf16 %v969_v6  ;;  %v990_v0 = vunpack.c.h.s8.bf16 %v600_v49  ;;  %v1003_v4 = vunpack.c.h.s8.bf16 %v607_v63 }
 0x2ea   :  { %v562_v27 = vmul.f32 0.25, %v523_v10 }
 0x2eb   :  { %2161 = vmatpush1.bf16.msra.mxu0 %v1688_v25  ;;  %2489 = vmatpush1.bf16.msra.mxu1 %v1690_v26  ;;  %v1726_v25 = vunpack.c.l.s8.bf16 %v970_v22  ;;  %v546_v26 = vmul.f32 0.25, %v411_v13  ;;  %v619_v13 = vld [vmem:[#allocation5 + $0xb8] sm:$0xff] }
 0x2ec   :  { %2162 = vmatprep.subr.bf16.mxu0 %v1695_v31  ;;  %2490 = vmatprep.subr.bf16.mxu1 %v1697_v32  ;;  %v1733_v31 = vunpack.c.h.s8.bf16 %v971_v7  ;;  %v975_v32 = vld [vmem:[#allocation5 + $0xbd8] sm:$0xff]  ;;  %v594_v14 = vpack.c.bf16 %v562_v27, %v562_v27  ;;  %v612_v7 = vld [vmem:[#allocation5 + $0x80] sm:$0xff]  ;;  %v1021_v10 = vunpack.c.l.s8.bf16 %v619_v13  ;;  %v1027_v21 = vunpack.c.h.s8.bf16 %v619_v13 }
 0x2ed   :  { %v1737_v41 = vunpack.c.l.s8.bf16 %v975_v32  ;;  %v1743_v30 = vunpack.c.h.s8.bf16 %v975_v32  ;;  %v2934_v27 = vld [vmem:[#allocation10 + $0x8] sm:$0xff] }
 0x2ee   :  { %v1810_v48 = vunpack.c.l.b16 %v594_v14 }
 0x2ef   :  { %2163 = vmatpush1.bf16.msra.mxu0 %v1694_v45  ;;  %2491 = vmatpush1.bf16.msra.mxu1 %v1696_v36  ;;  %v1732_v45 = vunpack.c.h.s8.bf16 %v970_v22  ;;  %v578_v36 = vpack.c.bf16 %v546_v26, %v546_v26  ;;  %v625_v22 = vld [vmem:[#allocation5 + $0xe8] sm:$0xff]  ;;  %v624_v26 = vld [vmem:[#allocation5 + $0xe0] sm:$0xff] }
 0x2f0   :  { %2164 = vmatprep.subr.bf16.mxu0 %v1701_v17  ;;  %2492 = vmatprep.subr.bf16.mxu1 %v1703_v38  ;;  %v1739_v17 = vunpack.c.l.s8.bf16 %v977_v33  ;;  %v974_v38 = vld [vmem:[#allocation5 + $0xbd0] sm:$0xff] }
 0x2f1   :  { %v1736_v42 = vunpack.c.l.s8.bf16 %v974_v38  ;;  %v1742_v55 = vunpack.c.h.s8.bf16 %v974_v38  ;;  %v630_v38 = vld [vmem:[#allocation5 + $0x110] sm:$0xff] }
 0x2f3   :  { %2165 = vmatpush1.bf16.msra.mxu0 %v1700_v43  ;;  %2493 = vmatpush1.bf16.msra.mxu1 %v1702_v29  ;;  %v1738_v43 = vunpack.c.l.s8.bf16 %v976_v40  ;;  %v1794_v29 = vunpack.c.l.b16 %v578_v36  ;;  %v3084_v36 = vunpack.c.h.s8.bf16 %v2934_v27  ;;  %v2940_v40 = vld [vmem:[#allocation10 + $0x38] sm:$0xff] }
 0x2f4   :  { %2166 = vmatprep.subr.bf16.mxu0 %v1707_v52  ;;  %2494 = vmatprep.subr.bf16.mxu1 %v1709_v53  ;;  %v1745_v52 = vunpack.c.h.s8.bf16 %v977_v33  ;;  %v601_v53 = vld [vmem:[#allocation5 + $0x28] sm:$0xff]  ;;  %v1032_v33 = vunpack.c.l.s8.bf16 %v624_v26 }
 0x2f7   :  { %2167 = vmatpush1.bf16.msra.mxu0 %v1706_v59  ;;  %2495 = vmatpush1.bf16.msra.mxu1 %v1708_v60  ;;  %v1827_v59 = vsel %vm1812_vm1, %v1810_v48, %v1794_v29  ;;  %v985_v60 = vunpack.c.l.s8.bf16 %v601_v53  ;;  %v1044_v48 = vunpack.c.l.s8.bf16 %v630_v38 }
 0x2f8   :  { %2168 = vmatprep.subr.bf16.mxu0 %v1713_v51  ;;  %2496 = vmatprep.subr.bf16.mxu1 %v1715_v62  ;;  %v6978_v61 = vpack.c.b16 %v1827_v59, %v1827_v59  ;;  %v984_v51 = vunpack.c.l.s8.bf16 %v600_v49  ;;  %v991_v62 = vunpack.c.h.s8.bf16 %v601_v53  ;;  %v3096_v53 = vunpack.c.h.s8.bf16 %v2940_v40  ;;  %v2946_v49 = vld [vmem:[#allocation10 + $0x68] sm:$0xff] }
 0x2fb   :  { %2169 = vmatpush1.bf16.msra.mxu0 %v1712_v1  ;;  %2497 = vmatpush1.bf16.msra.mxu1 %v1714_v3  ;;  %v997_v1 = vunpack.c.l.s8.bf16 %v607_v63  ;;  %v606_v3 = vld [vmem:[#allocation5 + $0x50] sm:$0xff] }
 0x2fc   :  { %2170 = vmatprep.subr.bf16.mxu0 %v1719_v16  ;;  %2498 = vmatprep.subr.bf16.mxu1 %v1721_v5  ;;  %v996_v15 = vunpack.c.l.s8.bf16 %v606_v3  ;;  %v613_v16 = vld [vmem:[#allocation5 + $0x88] sm:$0xff]  ;;  %v1002_v5 = vunpack.c.h.s8.bf16 %v606_v3  ;;  %v643_v3 = vld [vmem:[#allocation5 + $0x178] sm:$0xff] }
 0x2fd   :  { %v1009_v6 = vunpack.c.l.s8.bf16 %v613_v16 }
 0x2ff   :  { %2171 = vmatpush1.bf16.msra.mxu0 %v1718_v11  ;;  %2499 = vmatpush1.bf16.msra.mxu1 %v1720_v9  ;;  %v1008_v11 = vunpack.c.l.s8.bf16 %v612_v7  ;;  %v1015_v9 = vunpack.c.h.s8.bf16 %v613_v16 }
 0x300   :  { %2172 = vmatprep.subr.bf16.mxu0 %v1725_v19  ;;  %2500 = vmatprep.subr.bf16.mxu1 %v1727_v20  ;;  %v618_v19 = vld [vmem:[#allocation5 + $0xb0] sm:$0xff] }
 0x301   :  { %v1020_v20 = vunpack.c.l.s8.bf16 %v618_v19 }
 0x303   :  { %2173 = vmatpush1.bf16.msra.mxu0 %v1724_v24  ;;  %2501 = vmatpush1.bf16.msra.mxu1 %v1726_v25  ;;  %v1026_v24 = vunpack.c.h.s8.bf16 %v618_v19  ;;  %v1033_v25 = vunpack.c.l.s8.bf16 %v625_v22  ;;  %v649_v19 = vld [vmem:[#allocation5 + $0x1a8] sm:$0xff] }
 0x304   :  { %2174 = vmatprep.subr.bf16.mxu0 %v1731_v28  ;;  %2502 = vmatprep.subr.bf16.mxu1 %v1733_v31  ;;  %v3078_v28 = vunpack.c.l.s8.bf16 %v2934_v27  ;;  %v2933_v31 = vld [vmem:[#allocation10] sm:$0xff] }
 0x305   :  { %v3077_v32 = vunpack.c.l.s8.bf16 %v2933_v31  ;;  %v3083_v14 = vunpack.c.h.s8.bf16 %v2933_v31 }
 0x307   :  { %2175 = vmatpush1.bf16.msra.mxu0 %v1730_v34  ;;  %2503 = vmatpush1.bf16.msra.mxu1 %v1732_v45  ;;  %v1039_v34 = vunpack.c.h.s8.bf16 %v625_v22  ;;  %v631_v45 = vld [vmem:[#allocation5 + $0x118] sm:$0xff] }
 0x308   :  { %2176 = vmatprep.subr.bf16.mxu0 %v1737_v41  ;;  %2504 = vmatprep.subr.bf16.mxu1 %v1739_v17  ;;  %v1038_v41 = vunpack.c.h.s8.bf16 %v624_v26  ;;  %v1045_v17 = vunpack.c.l.s8.bf16 %v631_v45  ;;  %v2958_v26 = vld [vmem:[#allocation10 + $0xc8] sm:$0xff] }
 0x309   :  { %v3126_v27 = vunpack.c.l.s8.bf16 %v2958_v26 }
 0x30b   :  { %2177 = vmatpush1.bf16.msra.mxu0 %v1736_v42  ;;  %2505 = vmatpush1.bf16.msra.mxu1 %v1738_v43  ;;  %v3090_v42 = vunpack.c.l.s8.bf16 %v2940_v40  ;;  %v2939_v43 = vld [vmem:[#allocation10 + $0x30] sm:$0xff] }
 0x30c   :  { %2178 = vmatprep.subr.bf16.mxu0 %v1743_v30  ;;  %2506 = vmatprep.subr.bf16.mxu1 %v1745_v52  ;;  %v3089_v29 = vunpack.c.l.s8.bf16 %v2939_v43  ;;  %v1051_v30 = vunpack.c.h.s8.bf16 %v631_v45  ;;  %v637_v52 = vld [vmem:[#allocation5 + $0x148] sm:$0xff]  ;;  %v3132_v45 = vunpack.c.h.s8.bf16 %v2958_v26 }
 0x30d   :  { %v1057_v59 = vunpack.c.l.s8.bf16 %v637_v52 }
 0x30f   :  { %2179 = vmatpush1.bf16.msra.mxu0 %v1742_v55  ;;  %2507 = vmatpush1.bf16.msra.mxu1 %v1744_v57  ;;  %v3095_v55 = vunpack.c.h.s8.bf16 %v2939_v43  ;;  %v1050_v57 = vunpack.c.h.s8.bf16 %v630_v38  ;;  %v2964_v38 = vld [vmem:[#allocation10 + $0xf8] sm:$0xff] }
 0x310   :  { %2517 = vmatprep.subr.bf16.mxu0 %v985_v60  ;;  %3365 = vmatprep.subr.bf16.mxu1 %v3078_v28  ;;  %v636_v60 = vld [vmem:[#allocation5 + $0x140] sm:$0xff]  ;;  %v2957_v28 = vld [vmem:[#allocation10 + $0xc0] sm:$0xff]  ;;  %v3138_v40 = vunpack.c.l.s8.bf16 %v2964_v38 }
 0x311   :  { %v1062_v16 = vunpack.c.h.s8.bf16 %v636_v60  ;;  %v3125_v31 = vunpack.c.l.s8.bf16 %v2957_v28 }
 0x312   :  { %2181 = vmatmul.mubr.bf16.vlgmr.msra.gmra.mrb[0].mxu0 %v6978_v61  ;;  %2509 = vmatmul.mubr.bf16.vlgmr.msra.gmra.mrb[0].mxu1 %v6978_v61 }
 0x313   :  { %2518 = vmatpush1.bf16.msra.mxu0 %v984_v51  ;;  %2549 = vmatprep.mubr.bf16.mxu0 %v6805_v37  ;;  %v1014_v37 = vunpack.c.h.s8.bf16 %v612_v7  ;;  %v3102_v51 = vunpack.c.l.s8.bf16 %v2946_v49  ;;  %v2952_v7 = vld [vmem:[#allocation10 + $0x98] sm:$0xff] }
 0x314   :  { %2519 = vmatprep.subr.bf16.mxu0 %v991_v62  ;;  %3366 = vmatpush1.bf16.msra.mxu1 %v3077_v32  ;;  %v2945_v62 = vld [vmem:[#allocation10 + $0x60] sm:$0xff] }
 0x315   :  { %3367 = vmatprep.subr.bf16.mxu1 %v3084_v36  ;;  %v3101_v63 = vunpack.c.l.s8.bf16 %v2945_v62  ;;  %v3131_v36 = vunpack.c.h.s8.bf16 %v2957_v28 }
 0x317   :  { %2520 = vmatpush1.bf16.msra.mxu0 %v990_v0  ;;  %v1056_v0 = vunpack.c.l.s8.bf16 %v636_v60  ;;  %v2969_v60 = vld [vmem:[#allocation10 + $0x120] sm:$0xff] }
 0x318   :  { %2521 = vmatprep.subr.bf16.mxu0 %v997_v1  ;;  %3368 = vmatpush1.bf16.msra.mxu1 %v3083_v14  ;;  %v1063_v1 = vunpack.c.h.s8.bf16 %v637_v52 }
 0x319   :  { %3369 = vmatprep.subr.bf16.mxu1 %v3090_v42  ;;  %v2963_v42 = vld [vmem:[#allocation10 + $0xf0] sm:$0xff] }
 0x31a   :  { %v3137_v43 = vunpack.c.l.s8.bf16 %v2963_v42  ;;  %v3143_v52 = vunpack.c.h.s8.bf16 %v2963_v42 }
 0x31b   :  { %2522 = vmatpush1.bf16.msra.mxu0 %v996_v15  ;;  %v3108_v15 = vunpack.c.h.s8.bf16 %v2946_v49  ;;  %v3149_v49 = vunpack.c.l.s8.bf16 %v2969_v60 }
 0x31c   :  { %2523 = vmatprep.subr.bf16.mxu0 %v1003_v4  ;;  %3370 = vmatpush1.bf16.msra.mxu1 %v3089_v29  ;;  %v3107_v4 = vunpack.c.h.s8.bf16 %v2945_v62 }
 0x31d   :  { %3371 = vmatprep.subr.bf16.mxu1 %v3096_v53 }
 0x31f   :  { %2524 = vmatpush1.bf16.msra.mxu0 %v1002_v5  ;;  %v1069_v5 = vunpack.c.l.s8.bf16 %v643_v3 }
 0x320   :  { %2525 = vmatprep.subr.bf16.mxu0 %v1009_v6  ;;  %3372 = vmatpush1.bf16.msra.mxu1 %v3095_v55  ;;  %v642_v6 = vld [vmem:[#allocation5 + $0x170] sm:$0xff]  ;;  %v660_v55 = vld [vmem:[#allocation5 + $0x200] sm:$0xff] }
 0x321   :  { %3373 = vmatprep.subr.bf16.mxu1 %v3102_v51  ;;  %v1074_v22 = vunpack.c.h.s8.bf16 %v642_v6  ;;  %v1104_v51 = vunpack.c.l.s8.bf16 %v660_v55 }
 0x323   :  { %2526 = vmatpush1.bf16.msra.mxu0 %v1008_v11  ;;  %v3114_v11 = vunpack.c.l.s8.bf16 %v2952_v7 }
 0x324   :  { %2527 = vmatprep.subr.bf16.mxu0 %v1015_v9  ;;  %3374 = vmatpush1.bf16.msra.mxu1 %v3101_v63  ;;  %v2951_v9 = vld [vmem:[#allocation10 + $0x90] sm:$0xff] }
 0x325   :  { %3375 = vmatprep.subr.bf16.mxu1 %v3108_v15  ;;  %v3113_v13 = vunpack.c.l.s8.bf16 %v2951_v9  ;;  %v667_v63 = vld [vmem:[#allocation5 + $0x238] sm:$0xff] }
 0x326   :  { %v1117_v15 = vunpack.c.l.s8.bf16 %v667_v63 }
 0x327   :  { %2528 = vmatpush1.bf16.msra.mxu0 %v1014_v37  ;;  %v1068_v37 = vunpack.c.l.s8.bf16 %v642_v6 }
 0x328   :  { %2529 = vmatprep.subr.bf16.mxu0 %v1021_v10  ;;  %3376 = vmatpush1.bf16.msra.mxu1 %v3107_v4  ;;  %v1075_v10 = vunpack.c.h.s8.bf16 %v643_v3  ;;  %v1110_v3 = vunpack.c.h.s8.bf16 %v660_v55  ;;  %v666_v4 = vld [vmem:[#allocation5 + $0x230] sm:$0xff] }
 0x329   :  { %3377 = vmatprep.subr.bf16.mxu1 %v3114_v11  ;;  %v1116_v11 = vunpack.c.l.s8.bf16 %v666_v4 }
 0x32b   :  { %2530 = vmatpush1.bf16.msra.mxu0 %v1020_v20  ;;  %v3120_v20 = vunpack.c.h.s8.bf16 %v2952_v7 }
 0x32c   :  { %2531 = vmatprep.subr.bf16.mxu0 %v1027_v21  ;;  %3378 = vmatpush1.bf16.msra.mxu1 %v3113_v13  ;;  %v3119_v21 = vunpack.c.h.s8.bf16 %v2951_v9  ;;  %v1123_v9 = vunpack.c.h.s8.bf16 %v667_v63  ;;  %v673_v13 = vld [vmem:[#allocation5 + $0x268] sm:$0xff] }
 0x32d   :  { %3379 = vmatprep.subr.bf16.mxu1 %v3120_v20  ;;  %v1129_v20 = vunpack.c.l.s8.bf16 %v673_v13  ;;  %v1135_v26 = vunpack.c.h.s8.bf16 %v673_v13 }
 0x32f   :  { %2532 = vmatpush1.bf16.msra.mxu0 %v1026_v24  ;;  %v1081_v24 = vunpack.c.l.s8.bf16 %v649_v19 }
 0x330   :  { %2533 = vmatprep.subr.bf16.mxu0 %v1033_v25  ;;  %v648_v25 = vld [vmem:[#allocation5 + $0x1a0] sm:$0xff]  ;;  %3380 = vmatpush1.bf16.msra.mxu1 %v3119_v21 }
 0x331   :  { %v1080_v32 = vunpack.c.l.s8.bf16 %v648_v25  ;;  %3381 = vmatprep.subr.bf16.mxu1 %v3126_v27  ;;  %v1086_v14 = vunpack.c.h.s8.bf16 %v648_v25  ;;  %v672_v21 = vld [vmem:[#allocation5 + $0x260] sm:$0xff]  ;;  %v679_v27 = vld [vmem:[#allocation5 + $0x298] sm:$0xff] }
 0x332   :  { %v1128_v25 = vunpack.c.l.s8.bf16 %v672_v21  ;;  %v1134_v28 = vunpack.c.h.s8.bf16 %v672_v21  ;;  %v727_v21 = vld [vmem:[#allocation5 + $0x418] sm:$0xff] }
 0x333   :  { %2534 = vmatpush1.bf16.msra.mxu0 %v1032_v33  ;;  %v1087_v33 = vunpack.c.h.s8.bf16 %v649_v19  ;;  %v1122_v19 = vunpack.c.h.s8.bf16 %v666_v4 }
 0x334   :  { %2535 = vmatprep.subr.bf16.mxu0 %v1039_v34  ;;  %3382 = vmatpush1.bf16.msra.mxu1 %v3125_v31  ;;  %v655_v34 = vld [vmem:[#allocation5 + $0x1d8] sm:$0xff]  ;;  %v1141_v31 = vunpack.c.l.s8.bf16 %v679_v27 }
 0x335   :  { %3383 = vmatprep.subr.bf16.mxu1 %v3132_v45  ;;  %v685_v45 = vld [vmem:[#allocation5 + $0x2c8] sm:$0xff] }
 0x337   :  { %2536 = vmatpush1.bf16.msra.mxu0 %v1038_v41  ;;  %v1093_v41 = vunpack.c.l.s8.bf16 %v655_v34 }
 0x338   :  { %2537 = vmatprep.subr.bf16.mxu0 %v1045_v17  ;;  %v654_v17 = vld [vmem:[#allocation5 + $0x1d0] sm:$0xff]  ;;  %3384 = vmatpush1.bf16.msra.mxu1 %v3131_v36 }
 0x339   :  { %v1092_v29 = vunpack.c.l.s8.bf16 %v654_v17  ;;  %3385 = vmatprep.subr.bf16.mxu1 %v3138_v40  ;;  %v691_v40 = vld [vmem:[#allocation5 + $0x2f8] sm:$0xff] }
 0x33b   :  { %2538 = vmatpush1.bf16.msra.mxu0 %v1044_v48  ;;  %v1099_v48 = vunpack.c.h.s8.bf16 %v655_v34  ;;  %v1147_v34 = vunpack.c.h.s8.bf16 %v679_v27 }
 0x33c   :  { %2539 = vmatprep.subr.bf16.mxu0 %v1051_v30  ;;  %3386 = vmatpush1.bf16.msra.mxu1 %v3137_v43  ;;  %v3144_v30 = vunpack.c.h.s8.bf16 %v2964_v38  ;;  %v1159_v38 = vunpack.c.h.s8.bf16 %v685_v45  ;;  %v1165_v43 = vunpack.c.l.s8.bf16 %v691_v40 }
 0x33e   :  { %3387 = vmatprep.subr.bf16.mxu1 %v3144_v30  ;;  %v697_v30 = vld [vmem:[#allocation5 + $0x328] sm:$0xff] }
 0x33f   :  { %2540 = vmatpush1.bf16.msra.mxu0 %v1050_v57  ;;  %v2970_v57 = vld [vmem:[#allocation10 + $0x128] sm:$0xff] }
 0x340   :  { %2541 = vmatprep.subr.bf16.mxu0 %v1057_v59  ;;  %3388 = vmatpush1.bf16.msra.mxu1 %v3143_v52  ;;  %v3150_v59 = vunpack.c.l.s8.bf16 %v2970_v57 }
 0x342   :  { %3389 = vmatprep.subr.bf16.mxu1 %v3150_v59  ;;  %v703_v59 = vld [vmem:[#allocation5 + $0x358] sm:$0xff] }
 0x343   :  { %2542 = vmatpush1.bf16.msra.mxu0 %v1056_v0  ;;  %v3156_v0 = vunpack.c.h.s8.bf16 %v2970_v57  ;;  %v1183_v57 = vunpack.c.h.s8.bf16 %v697_v30  ;;  %v1195_v63 = vunpack.c.h.s8.bf16 %v703_v59 }
 0x344   :  { %2543 = vmatprep.subr.bf16.mxu0 %v1063_v1  ;;  %3390 = vmatpush1.bf16.msra.mxu1 %v3149_v49  ;;  %v3155_v1 = vunpack.c.h.s8.bf16 %v2969_v60  ;;  %v1189_v49 = vunpack.c.l.s8.bf16 %v703_v59  ;;  %v2847_v59 = vlaneseq }
 0x345   :  { %3391 = vmatprep.subr.bf16.mxu1 %v3156_v0  ;;  %v709_v0 = vld [vmem:[#allocation5 + $0x388] sm:$0xff] }
 0x347   :  { %2544 = vmatpush1.bf16.msra.mxu0 %v1062_v16  ;;  %v2976_v16 = vld [vmem:[#allocation10 + $0x158] sm:$0xff] }
 0x348   :  { %2545 = vmatprep.subr.bf16.mxu0 %v1069_v5  ;;  %3392 = vmatpush1.bf16.msra.mxu1 %v3155_v1  ;;  %v2975_v5 = vld [vmem:[#allocation10 + $0x150] sm:$0xff]  ;;  %v3162_v6 = vunpack.c.l.s8.bf16 %v2976_v16 }
 0x349   :  { %v3161_v7 = vunpack.c.l.s8.bf16 %v2975_v5 }
 0x34a   :  { %3393 = vmatprep.subr.bf16.mxu1 %v3162_v6  ;;  %v714_v6 = vld [vmem:[#allocation5 + $0x3b0] sm:$0xff] }
 0x34b   :  { %2546 = vmatpush1.bf16.msra.mxu0 %v1068_v37  ;;  %v3168_v37 = vunpack.c.h.s8.bf16 %v2976_v16  ;;  %v715_v16 = vld [vmem:[#allocation5 + $0x3b8] sm:$0xff]  ;;  %v1218_v13 = vunpack.c.h.s8.bf16 %v714_v6 }
 0x34c   :  { %2547 = vmatprep.subr.bf16.mxu0 %v1075_v10  ;;  %3394 = vmatpush1.bf16.msra.mxu1 %v3161_v7  ;;  %v3167_v10 = vunpack.c.h.s8.bf16 %v2975_v5  ;;  %v1213_v5 = vunpack.c.l.s8.bf16 %v715_v16  ;;  %v1212_v7 = vunpack.c.l.s8.bf16 %v714_v6 }
 0x34d   :  { %3395 = vmatprep.subr.bf16.mxu1 %v3168_v37 }
 0x34f   :  { %2548 = vmatpush1.bf16.msra.mxu0 %v1074_v22  ;;  %v6985_v22 = vld [vmem:[#allocation10 + $0x188] sm:$0xff] }
 0x350   :  { %2558 = vmatprep.subr.bf16.mxu0 %v1081_v24  ;;  %3396 = vmatpush1.bf16.msra.mxu1 %v3167_v10  ;;  %v3174_v24 = vunpack.c.l.s8.bf16 %v6985_v22  ;;  %v720_v10 = vld [vmem:[#allocation5 + $0x3e0] sm:$0xff] }
 0x352   :  { %2550 = vmatmul.mubr.bf16.vlgmr.msra.gmra.mrb[4].mxu0 %v6820_v46  ;;  %v661_v46 = vld [vmem:[#allocation5 + $0x208] sm:$0xff]  ;;  %3406 = vmatprep.subr.bf16.mxu1 %v3174_v24  ;;  %v1230_v24 = vunpack.c.h.s8.bf16 %v720_v10 }
 0x353   :  { %2559 = vmatpush1.bf16.msra.mxu0 %v1080_v32  ;;  %2590 = vmatprep.mubr.bf16.mxu0 %v6823_v56  ;;  %v1098_v56 = vunpack.c.h.s8.bf16 %v654_v17  ;;  %v1105_v53 = vunpack.c.l.s8.bf16 %v661_v46  ;;  %v1111_v62 = vunpack.c.h.s8.bf16 %v661_v46  ;;  %v678_v32 = vld [vmem:[#allocation5 + $0x290] sm:$0xff]  ;;  %v1171_v46 = vunpack.c.h.s8.bf16 %v691_v40 }
 0x354   :  { %2560 = vmatprep.subr.bf16.mxu0 %v1087_v33  ;;  %v1140_v33 = vunpack.c.l.s8.bf16 %v678_v32  ;;  %v1146_v36 = vunpack.c.h.s8.bf16 %v678_v32 }
 0x357   :  { %2561 = vmatpush1.bf16.msra.mxu0 %v1086_v14  ;;  %v1153_v14 = vunpack.c.l.s8.bf16 %v685_v45 }
 0x358   :  { %2562 = vmatprep.subr.bf16.mxu0 %v1093_v41  ;;  %v684_v41 = vld [vmem:[#allocation5 + $0x2c0] sm:$0xff] }
 0x359   :  { %v1152_v17 = vunpack.c.l.s8.bf16 %v684_v41  ;;  %v1158_v42 = vunpack.c.h.s8.bf16 %v684_v41 }
 0x35b   :  { %2563 = vmatpush1.bf16.msra.mxu0 %v1092_v29  ;;  %v690_v29 = vld [vmem:[#allocation5 + $0x2f0] sm:$0xff] }
 0x35c   :  { %2564 = vmatprep.subr.bf16.mxu0 %v1099_v48  ;;  %v1164_v48 = vunpack.c.l.s8.bf16 %v690_v29  ;;  %v1170_v52 = vunpack.c.h.s8.bf16 %v690_v29 }
 0x35f   :  { %2565 = vmatpush1.bf16.msra.mxu0 %v1098_v56  ;;  %v1177_v56 = vunpack.c.l.s8.bf16 %v697_v30 }
 0x360   :  { %2566 = vmatprep.subr.bf16.mxu0 %v1105_v53  ;;  %v696_v53 = vld [vmem:[#allocation5 + $0x320] sm:$0xff] }
 0x361   :  { %v1176_v55 = vunpack.c.l.s8.bf16 %v696_v53  ;;  %v1182_v60 = vunpack.c.h.s8.bf16 %v696_v53 }
 0x363   :  { %2567 = vmatpush1.bf16.msra.mxu0 %v1104_v51  ;;  %v702_v51 = vld [vmem:[#allocation5 + $0x350] sm:$0xff] }
 0x364   :  { %2568 = vmatprep.subr.bf16.mxu0 %v1111_v62  ;;  %v1188_v62 = vunpack.c.l.s8.bf16 %v702_v51  ;;  %v1194_v1 = vunpack.c.h.s8.bf16 %v702_v51  ;;  %v757_v51 = vld [vmem:[#allocation5 + $0x508] sm:$0xff] }
 0x367   :  { %2569 = vmatpush1.bf16.msra.mxu0 %v1110_v3  ;;  %v1201_v3 = vunpack.c.l.s8.bf16 %v709_v0 }
 0x368   :  { %2570 = vmatprep.subr.bf16.mxu0 %v1117_v15  ;;  %v708_v15 = vld [vmem:[#allocation5 + $0x380] sm:$0xff] }
 0x369   :  { %v1200_v4 = vunpack.c.l.s8.bf16 %v708_v15 }
 0x36b   :  { %2571 = vmatpush1.bf16.msra.mxu0 %v1116_v11  ;;  %v1219_v11 = vunpack.c.h.s8.bf16 %v715_v16  ;;  %v7005_v16 = vld [vmem:[#allocation8] sm:$0x3f] }
 0x36c   :  { %2572 = vmatprep.subr.bf16.mxu0 %v1123_v9  ;;  %v721_v9 = vld [vmem:[#allocation5 + $0x3e8] sm:$0xff] }
 0x36d   :  { %v1225_v37 = vunpack.c.l.s8.bf16 %v721_v9 }
 0x36f   :  { %2573 = vmatpush1.bf16.msra.mxu0 %v1122_v19  ;;  %v1224_v19 = vunpack.c.l.s8.bf16 %v720_v10 }
 0x370   :  { %2574 = vmatprep.subr.bf16.mxu0 %v1129_v20  ;;  %v1231_v20 = vunpack.c.h.s8.bf16 %v721_v9 }
 0x373   :  { %2575 = vmatpush1.bf16.msra.mxu0 %v1128_v25  ;;  %v1237_v25 = vunpack.c.l.s8.bf16 %v727_v21 }
 0x374   :  { %2576 = vmatprep.subr.bf16.mxu0 %v1135_v26  ;;  %v726_v26 = vld [vmem:[#allocation5 + $0x410] sm:$0xff] }
 0x375   :  { %v1236_v27 = vunpack.c.l.s8.bf16 %v726_v26  ;;  %v1242_v32 = vunpack.c.h.s8.bf16 %v726_v26 }
 0x377   :  { %2577 = vmatpush1.bf16.msra.mxu0 %v1134_v28  ;;  %v1243_v28 = vunpack.c.h.s8.bf16 %v727_v21 }
 0x378   :  { %2578 = vmatprep.subr.bf16.mxu0 %v1141_v31  ;;  %v733_v31 = vld [vmem:[#allocation5 + $0x448] sm:$0xff] }
 0x37b   :  { %2579 = vmatpush1.bf16.msra.mxu0 %v1140_v33  ;;  %v1249_v33 = vunpack.c.l.s8.bf16 %v733_v31 }
 0x37c   :  { %2580 = vmatprep.subr.bf16.mxu0 %v1147_v34  ;;  %v732_v34 = vld [vmem:[#allocation5 + $0x440] sm:$0xff] }
 0x37d   :  { %v1248_v45 = vunpack.c.l.s8.bf16 %v732_v34  ;;  %v1254_v41 = vunpack.c.h.s8.bf16 %v732_v34 }
 0x37f   :  { %2581 = vmatpush1.bf16.msra.mxu0 %v1146_v36  ;;  %v1255_v36 = vunpack.c.h.s8.bf16 %v733_v31 }
 0x380   :  { %2582 = vmatprep.subr.bf16.mxu0 %v1153_v14  ;;  %v739_v14 = vld [vmem:[#allocation5 + $0x478] sm:$0xff] }
 0x383   :  { %2583 = vmatpush1.bf16.msra.mxu0 %v1152_v17  ;;  %v1261_v17 = vunpack.c.l.s8.bf16 %v739_v14 }
 0x384   :  { %2584 = vmatprep.subr.bf16.mxu0 %v1159_v38  ;;  %v738_v38 = vld [vmem:[#allocation5 + $0x470] sm:$0xff] }
 0x385   :  { %v1260_v40 = vunpack.c.l.s8.bf16 %v738_v38  ;;  %v1266_v29 = vunpack.c.h.s8.bf16 %v738_v38  ;;  %v769_v38 = vld [vmem:[#allocation5 + $0x568] sm:$0xff] }
 0x387   :  { %2585 = vmatpush1.bf16.msra.mxu0 %v1158_v42  ;;  %v1267_v42 = vunpack.c.h.s8.bf16 %v739_v14 }
 0x388   :  { %2586 = vmatprep.subr.bf16.mxu0 %v1165_v43  ;;  %v745_v43 = vld [vmem:[#allocation5 + $0x4a8] sm:$0xff] }
 0x38b   :  { %2587 = vmatpush1.bf16.msra.mxu0 %v1164_v48  ;;  %v1273_v48 = vunpack.c.l.s8.bf16 %v745_v43 }
 0x38c   :  { %2588 = vmatprep.subr.bf16.mxu0 %v1171_v46  ;;  %v744_v46 = vld [vmem:[#allocation5 + $0x4a0] sm:$0xff] }
 0x38d   :  { %v1272_v30 = vunpack.c.l.s8.bf16 %v744_v46  ;;  %v1278_v53 = vunpack.c.h.s8.bf16 %v744_v46  ;;  %v1321_v46 = vunpack.c.l.s8.bf16 %v769_v38 }
 0x38f   :  { %2589 = vmatpush1.bf16.msra.mxu0 %v1170_v52  ;;  %v1279_v52 = vunpack.c.h.s8.bf16 %v745_v43 }
 0x390   :  { %2599 = vmatprep.subr.bf16.mxu0 %v1177_v56  ;;  %v751_v56 = vld [vmem:[#allocation5 + $0x4d8] sm:$0xff] }
 0x392   :  { %2591 = vmatmul.mubr.bf16.vlgmr.msra.gmra.mrb[4].mxu0 %v6844_v8  ;;  %v1207_v8 = vunpack.c.h.s8.bf16 %v709_v0  ;;  %v1297_v0 = vunpack.c.l.s8.bf16 %v757_v51 }
 0x393   :  { %2600 = vmatpush1.bf16.msra.mxu0 %v1176_v55  ;;  %2631 = vmatprep.mubr.bf16.mxu0 %v6847_v18  ;;  %v1206_v18 = vunpack.c.h.s8.bf16 %v708_v15  ;;  %v1285_v55 = vunpack.c.l.s8.bf16 %v751_v56 }
 0x394   :  { %2601 = vmatprep.subr.bf16.mxu0 %v1183_v57  ;;  %v750_v57 = vld [vmem:[#allocation5 + $0x4d0] sm:$0xff] }
 0x397   :  { %2602 = vmatpush1.bf16.msra.mxu0 %v1182_v60  ;;  %v1284_v60 = vunpack.c.l.s8.bf16 %v750_v57 }
 0x398   :  { %2603 = vmatprep.subr.bf16.mxu0 %v1189_v49  ;;  %v1291_v49 = vunpack.c.h.s8.bf16 %v751_v56 }
 0x39b   :  { %2604 = vmatpush1.bf16.msra.mxu0 %v1188_v62  ;;  %v6992_v62 = vshrl.u32 %v2847_v59, 7 }
 0x39c   :  { %2605 = vmatprep.subr.bf16.mxu0 %v1195_v63  ;;  %v1290_v63 = vunpack.c.h.s8.bf16 %v750_v57 }
 0x39d   :  { %v7000_v15 = vsub.s32 1, %v6992_v62 }
 0x39f   :  { %2606 = vmatpush1.bf16.msra.mxu0 %v1194_v1  ;;  %v6995_v1 = vsub.s32 0, %v6992_v62 }
 0x3a0   :  { %2607 = vmatprep.subr.bf16.mxu0 %v1201_v3  ;;  %v6997_v3 = vld [vmem:[#allocation7] sm:$0x3f] }
 0x3a1   :  { %v2854_v6 = vrot.slane %v6997_v3, %v7000_v15  ;;  %v2888_v9 = vrot.slane %v7005_v16, %v6995_v1 }
 0x3a3   :  { %2608 = vmatpush1.bf16.msra.mxu0 %v1200_v4  ;;  %v7003_v4 = vsub.s32 3, %v6992_v62 }
 0x3a4   :  { %2609 = vmatprep.subr.bf16.mxu0 %v1207_v8  ;;  %v1303_v8 = vunpack.c.h.s8.bf16 %v757_v51 }
 0x3a5   :  { %v2900_v21 = vrot.slane %v7005_v16, %v7003_v4 }
 0x3a7   :  { %2610 = vmatpush1.bf16.msra.mxu0 %v1206_v18  ;;  %v763_v18 = vld [vmem:[#allocation5 + $0x538] sm:$0xff] }
 0x3a8   :  { %2611 = vmatprep.subr.bf16.mxu0 %v1213_v5  ;;  %v2850_v5 = vrot.slane %v6997_v3, %v6995_v1  ;;  %v1315_v14 = vunpack.c.h.s8.bf16 %v763_v18 }
 0x3ab   :  { %2612 = vmatpush1.bf16.msra.mxu0 %v1212_v7  ;;  %v2862_v7 = vrot.slane %v6997_v3, %v7003_v4 }
 0x3ac   :  { %2613 = vmatprep.subr.bf16.mxu0 %v1219_v11 }
 0x3af   :  { %2614 = vmatpush1.bf16.msra.mxu0 %v1218_v13  ;;  %v1309_v13 = vunpack.c.l.s8.bf16 %v763_v18 }
 0x3b0   :  { %2615 = vmatprep.subr.bf16.mxu0 %v1225_v37  ;;  %v762_v37 = vld [vmem:[#allocation5 + $0x530] sm:$0xff] }
 0x3b3   :  { %2616 = vmatpush1.bf16.msra.mxu0 %v1224_v19 }
 0x3b4   :  { %2617 = vmatprep.subr.bf16.mxu0 %v1231_v20  ;;  %v2892_v20 = vrot.slane %v7005_v16, %v7000_v15 }
 0x3b7   :  { %2618 = vmatpush1.bf16.msra.mxu0 %v1230_v24 }
 0x3b8   :  { %2619 = vmatprep.subr.bf16.mxu0 %v1237_v25 }
 0x3bb   :  { %2620 = vmatpush1.bf16.msra.mxu0 %v1236_v27 }
 0x3bc   :  { %2621 = vmatprep.subr.bf16.mxu0 %v1243_v28 }
 0x3bf   :  { %2622 = vmatpush1.bf16.msra.mxu0 %v1242_v32 }
 0x3c0   :  { %2623 = vmatprep.subr.bf16.mxu0 %v1249_v33  ;;  %v1308_v33 = vunpack.c.l.s8.bf16 %v762_v37 }
 0x3c3   :  { %2624 = vmatpush1.bf16.msra.mxu0 %v1248_v45 }
 0x3c4   :  { %2625 = vmatprep.subr.bf16.mxu0 %v1255_v36 }
 0x3c7   :  { %2626 = vmatpush1.bf16.msra.mxu0 %v1254_v41 }
 0x3c8   :  { %2627 = vmatprep.subr.bf16.mxu0 %v1261_v17 }
 0x3cb   :  { %2628 = vmatpush1.bf16.msra.mxu0 %v1260_v40 }
 0x3cc   :  { %2629 = vmatprep.subr.bf16.mxu0 %v1267_v42  ;;  %v2981_v42 = vld [vmem:[#allocation10 + $0x180] sm:$0xff] }
 0x3cd   :  { %v3173_v56 = vunpack.c.l.s8.bf16 %v2981_v42  ;;  %v3179_v51 = vunpack.c.h.s8.bf16 %v2981_v42  ;;  %v3006_v42 = vld [vmem:[#allocation10 + $0x248] sm:$0xff] }
 0x3cf   :  { %2630 = vmatpush1.bf16.msra.mxu0 %v1266_v29 }
 0x3d0   :  { %2640 = vmatprep.subr.bf16.mxu0 %v1273_v48  ;;  %v1314_v48 = vunpack.c.h.s8.bf16 %v762_v37 }
 0x3d2   :  { %2632 = vmatmul.mubr.bf16.vlgmr.msra.gmra.mrb[4].mxu0 %v6868_v39  ;;  %v756_v39 = vld [vmem:[#allocation5 + $0x500] sm:$0xff] }
 0x3d3   :  { %2641 = vmatpush1.bf16.msra.mxu0 %v1272_v30  ;;  %2672 = vmatprep.mubr.bf16.mxu0 %v6871_v50  ;;  %v1296_v50 = vunpack.c.l.s8.bf16 %v756_v39  ;;  %v1302_v11 = vunpack.c.h.s8.bf16 %v756_v39  ;;  %v768_v30 = vld [vmem:[#allocation5 + $0x560] sm:$0xff] }
 0x3d4   :  { %2642 = vmatprep.subr.bf16.mxu0 %v1279_v52  ;;  %v1320_v59 = vunpack.c.l.s8.bf16 %v768_v30  ;;  %v2987_v39 = vld [vmem:[#allocation10 + $0x1b0] sm:$0xff] }
 0x3d5   :  { %v3185_v18 = vunpack.c.l.s8.bf16 %v2987_v39 }
 0x3d7   :  { %2643 = vmatpush1.bf16.msra.mxu0 %v1278_v53 }
 0x3d8   :  { %2644 = vmatprep.subr.bf16.mxu0 %v1285_v55  ;;  %v3180_v55 = vunpack.c.h.s8.bf16 %v6985_v22  ;;  %v1326_v22 = vunpack.c.h.s8.bf16 %v768_v30  ;;  %v3005_v30 = vld [vmem:[#allocation10 + $0x240] sm:$0xff] }
 0x3db   :  { %2645 = vmatpush1.bf16.msra.mxu0 %v1284_v60  ;;  %v2988_v60 = vld [vmem:[#allocation10 + $0x1b8] sm:$0xff] }
 0x3dc   :  { %2646 = vmatprep.subr.bf16.mxu0 %v1291_v49  ;;  %v1327_v49 = vunpack.c.h.s8.bf16 %v769_v38 }
 0x3df   :  { %2647 = vmatpush1.bf16.msra.mxu0 %v1290_v63  ;;  %v775_v63 = vld [vmem:[#allocation5 + $0x598] sm:$0xff] }
 0x3e0   :  { %2648 = vmatprep.subr.bf16.mxu0 %v1297_v0  ;;  %v3186_v0 = vunpack.c.l.s8.bf16 %v2988_v60 }
 0x3e3   :  { %2649 = vmatpush1.bf16.msra.mxu0 %v1296_v50  ;;  %v1333_v50 = vunpack.c.l.s8.bf16 %v775_v63 }
 0x3e4   :  { %2650 = vmatprep.subr.bf16.mxu0 %v1303_v8  ;;  %v774_v8 = vld [vmem:[#allocation5 + $0x590] sm:$0xff] }
 0x3e5   :  { %v2182_v10 = vpop.f32.mrb[0].mxu0  ;;  %v7015_v19 = vpop.f32.mrb[0].mxu1 }
 0x3e6   :  { %v2877_v24 = vmul.f32 %v2850_v5, %v2182_v10  ;;  %v2184_v25 = vpop.f32.mrb[1].mxu0  ;;  %v2512_v26 = vpop.f32.mrb[1].mxu1  ;;  %v3192_v5 = vunpack.c.h.s8.bf16 %v2988_v60  ;;  %v2993_v10 = vld [vmem:[#allocation10 + $0x1e0] sm:$0xff]  ;;  %v3221_v60 = vunpack.c.l.s8.bf16 %v3005_v30 }
 0x3e7   :  { %v2878_v27 = vmul.f32 %v2854_v6, %v2184_v25  ;;  %v2880_v28 = vmul.f32 %v2862_v7, %v2512_v26  ;;  %v2186_v31 = vpop.f32.mrb[2].mxu0  ;;  %v2514_v32 = vpop.f32.mrb[2].mxu1  ;;  %2651 = vmatpush1.bf16.msra.mxu0 %v1302_v11  ;;  %v1332_v6 = vunpack.c.l.s8.bf16 %v774_v8  ;;  %v2994_v7 = vld [vmem:[#allocation10 + $0x1e8] sm:$0xff]  ;;  %v1339_v11 = vunpack.c.h.s8.bf16 %v775_v63  ;;  %v3012_v63 = vld [vmem:[#allocation10 + $0x278] sm:$0xff] }
 0x3e8   :  { %v2915_v34 = vadd.f32 %v2888_v9, %v2877_v24  ;;  %v2187_v45 = vpop.f32.mrb[3].mxu0  ;;  %v2515_v36 = vpop.f32.mrb[3].mxu1  ;;  %2652 = vmatprep.subr.bf16.mxu0 %v1309_v13  ;;  %v3191_v9 = vunpack.c.h.s8.bf16 %v2987_v39  ;;  %v781_v13 = vld [vmem:[#allocation5 + $0x5c8] sm:$0xff]  ;;  %v3198_v37 = vunpack.c.l.s8.bf16 %v2994_v7  ;;  %v780_v24 = vld [vmem:[#allocation5 + $0x5c0] sm:$0xff]  ;;  %v3197_v25 = vunpack.c.l.s8.bf16 %v2993_v10 }
 0x3e9   :  { %v2916_v41 = vadd.f32 %v2892_v20, %v2878_v27  ;;  %v2918_v17 = vadd.f32 %v2900_v21, %v2880_v28  ;;  %v1338_v20 = vunpack.c.h.s8.bf16 %v774_v8  ;;  %v1345_v21 = vunpack.c.l.s8.bf16 %v781_v13  ;;  %v3000_v28 = vld [vmem:[#allocation10 + $0x218] sm:$0xff]  ;;  %v2999_v45 = vld [vmem:[#allocation10 + $0x210] sm:$0xff] }
 0x3ea   :  { %v2921_v40 = vmax.f32 %v2915_v34, 0.0  ;;  %v3204_v26 = vunpack.c.h.s8.bf16 %v2994_v7  ;;  %v1344_v27 = vunpack.c.l.s8.bf16 %v780_v24  ;;  %v1351_v31 = vunpack.c.h.s8.bf16 %v781_v13  ;;  %v3011_v8 = vld [vmem:[#allocation10 + $0x270] sm:$0xff]  ;;  %v3018_v13 = vld [vmem:[#allocation10 + $0x2a8] sm:$0xff] }
 0x3eb   :  { %v2922_v43 = vmax.f32 %v2916_v41, 0.0  ;;  %v2924_v29 = vmax.f32 %v2918_v17, 0.0  ;;  %2653 = vmatpush1.bf16.msra.mxu0 %v1308_v33  ;;  %v3203_v32 = vunpack.c.h.s8.bf16 %v2993_v10  ;;  %v787_v33 = vld [vmem:[#allocation5 + $0x5f8] sm:$0xff]  ;;  %v3210_v34 = vunpack.c.l.s8.bf16 %v3000_v28  ;;  %v786_v41 = vld [vmem:[#allocation5 + $0x5f0] sm:$0xff]  ;;  %v805_v10 = vld [vmem:[#allocation5 + $0x688] sm:$0xff] }
 0x3ec   :  { %2654 = vmatprep.subr.bf16.mxu0 %v1315_v14  ;;  %v7023_v53 = vpack.c.bf16 %v2921_v40, %v2921_v40  ;;  %v1350_v36 = vunpack.c.h.s8.bf16 %v780_v24  ;;  %v1357_v14 = vunpack.c.l.s8.bf16 %v787_v33  ;;  %v3209_v17 = vunpack.c.l.s8.bf16 %v2999_v45 }
 0x3ed   :  { %v7021_v52 = vpack.c.bf16 %v2922_v43, %v2922_v43  ;;  %v7026_v57 = vpack.c.bf16 %v2924_v29, %v2924_v29  ;;  %v3216_v38 = vunpack.c.h.s8.bf16 %v3000_v28  ;;  %v1356_v40 = vunpack.c.l.s8.bf16 %v786_v41 }
 0x3ee   :  { %v1363_v43 = vunpack.c.h.s8.bf16 %v787_v33  ;;  %v3215_v29 = vunpack.c.h.s8.bf16 %v2999_v45  ;;  %v3227_v39 = vunpack.c.h.s8.bf16 %v3005_v30  ;;  %v3233_v7 = vunpack.c.l.s8.bf16 %v3011_v8  ;;  %v3024_v33 = vld [vmem:[#allocation10 + $0x2d8] sm:$0xff] }
 0x3ef   :  { %2655 = vmatpush1.bf16.msra.mxu0 %v1314_v48  ;;  %3397 = vmatprep.mubr.bf16.mxu1 %v7021_v52  ;;  %v793_v48 = vld [vmem:[#allocation5 + $0x628] sm:$0xff] }
 0x3f0   :  { %3398 = vmatmul.mubr.bf16.vlgmr.msra.gmra.mrb[4].mxu1 %v7023_v53  ;;  %2656 = vmatprep.subr.bf16.mxu0 %v1321_v46  ;;  %v3222_v46 = vunpack.c.l.s8.bf16 %v3006_v42 }
 0x3f1   :  { %3407 = vmatpush1.bf16.msra.mxu1 %v3173_v56  ;;  %3438 = vmatprep.mubr.bf16.mxu1 %v7026_v57  ;;  %v1362_v56 = vunpack.c.h.s8.bf16 %v786_v41 }
 0x3f2   :  { %3408 = vmatprep.subr.bf16.mxu1 %v3180_v55  ;;  %v1369_v55 = vunpack.c.l.s8.bf16 %v793_v48 }
 0x3f3   :  { %2657 = vmatpush1.bf16.msra.mxu0 %v1320_v59  ;;  %v792_v59 = vld [vmem:[#allocation5 + $0x620] sm:$0xff] }
 0x3f4   :  { %2658 = vmatprep.subr.bf16.mxu0 %v1327_v49  ;;  %v3228_v49 = vunpack.c.h.s8.bf16 %v3006_v42  ;;  %v810_v42 = vld [vmem:[#allocation5 + $0x6b0] sm:$0xff] }
 0x3f5   :  { %3409 = vmatpush1.bf16.msra.mxu1 %v3179_v51  ;;  %v1368_v51 = vunpack.c.l.s8.bf16 %v792_v59 }
 0x3f6   :  { %3410 = vmatprep.subr.bf16.mxu1 %v3186_v0  ;;  %v1375_v0 = vunpack.c.h.s8.bf16 %v793_v48  ;;  %v3264_v48 = vunpack.c.h.s8.bf16 %v3024_v33 }
 0x3f7   :  { %2659 = vmatpush1.bf16.msra.mxu0 %v1326_v22  ;;  %v799_v22 = vld [vmem:[#allocation5 + $0x658] sm:$0xff] }
 0x3f8   :  { %2660 = vmatprep.subr.bf16.mxu0 %v1333_v50  ;;  %v3234_v50 = vunpack.c.l.s8.bf16 %v3012_v63 }
 0x3f9   :  { %3411 = vmatpush1.bf16.msra.mxu1 %v3185_v18  ;;  %v1374_v18 = vunpack.c.h.s8.bf16 %v792_v59 }
 0x3fa   :  { %3412 = vmatprep.subr.bf16.mxu1 %v3192_v5  ;;  %v1381_v5 = vunpack.c.l.s8.bf16 %v799_v22 }
 0x3fb   :  { %2661 = vmatpush1.bf16.msra.mxu0 %v1332_v6  ;;  %v798_v6 = vld [vmem:[#allocation5 + $0x650] sm:$0xff] }
 0x3fc   :  { %2662 = vmatprep.subr.bf16.mxu0 %v1339_v11  ;;  %v3240_v11 = vunpack.c.h.s8.bf16 %v3012_v63  ;;  %v1386_v24 = vunpack.c.h.s8.bf16 %v798_v6 }
 0x3fd   :  { %3413 = vmatpush1.bf16.msra.mxu1 %v3191_v9  ;;  %v1380_v9 = vunpack.c.l.s8.bf16 %v798_v6 }
 0x3fe   :  { %3414 = vmatprep.subr.bf16.mxu1 %v3198_v37  ;;  %v1387_v37 = vunpack.c.h.s8.bf16 %v799_v22 }
 0x3ff   :  { %2663 = vmatpush1.bf16.msra.mxu0 %v1338_v20  ;;  %v7034_v20 = vsub.s32 2, %v6992_v62 }
 0x400   :  { %2664 = vmatprep.subr.bf16.mxu0 %v1345_v21  ;;  %v3017_v21 = vld [vmem:[#allocation10 + $0x2a0] sm:$0xff] }
 0x401   :  { %3415 = vmatpush1.bf16.msra.mxu1 %v3197_v25  ;;  %v1393_v25 = vunpack.c.l.s8.bf16 %v805_v10  ;;  %v2858_v28 = vrot.slane %v6997_v3, %v7034_v20  ;;  %v3251_v45 = vunpack.c.h.s8.bf16 %v3017_v21  ;;  %v2896_v41 = vrot.slane %v7005_v16, %v7034_v20  ;;  %v817_v16 = vld [vmem:[#allocation5 + $0x6e8] sm:$0xff] }
 0x402   :  { %3416 = vmatprep.subr.bf16.mxu1 %v3204_v26  ;;  %v804_v26 = vld [vmem:[#allocation5 + $0x680] sm:$0xff]  ;;  %v1417_v59 = vunpack.c.l.s8.bf16 %v817_v16  ;;  %v1423_v63 = vunpack.c.h.s8.bf16 %v817_v16 }
 0x403   :  { %2665 = vmatpush1.bf16.msra.mxu0 %v1344_v27  ;;  %v3245_v27 = vunpack.c.l.s8.bf16 %v3017_v21  ;;  %v1398_v3 = vunpack.c.h.s8.bf16 %v804_v26 }
 0x404   :  { %2666 = vmatprep.subr.bf16.mxu0 %v1351_v31  ;;  %v3252_v31 = vunpack.c.h.s8.bf16 %v3018_v13 }
 0x405   :  { %3417 = vmatpush1.bf16.msra.mxu1 %v3203_v32  ;;  %v1392_v32 = vunpack.c.l.s8.bf16 %v804_v26 }
 0x406   :  { %3418 = vmatprep.subr.bf16.mxu1 %v3210_v34  ;;  %v1399_v34 = vunpack.c.h.s8.bf16 %v805_v10 }
 0x407   :  { %2667 = vmatpush1.bf16.msra.mxu0 %v1350_v36  ;;  %v811_v36 = vld [vmem:[#allocation5 + $0x6b8] sm:$0xff] }
 0x408   :  { %2668 = vmatprep.subr.bf16.mxu0 %v1357_v14  ;;  %v2879_v14 = vmul.f32 %v2858_v28, %v7015_v19  ;;  %v1411_v19 = vunpack.c.h.s8.bf16 %v811_v36  ;;  %v840_v28 = vld [vmem:[#allocation5 + $0x7a0] sm:$0xff] }
 0x409   :  { %3419 = vmatpush1.bf16.msra.mxu1 %v3209_v17  ;;  %v3258_v17 = vunpack.c.l.s8.bf16 %v3024_v33  ;;  %v847_v33 = vld [vmem:[#allocation5 + $0x7d8] sm:$0xff] }
 0x40a   :  { %3420 = vmatprep.subr.bf16.mxu1 %v3216_v38  ;;  %v3023_v38 = vld [vmem:[#allocation10 + $0x2d0] sm:$0xff] }
 0x40b   :  { %2669 = vmatpush1.bf16.msra.mxu0 %v1356_v40  ;;  %v1405_v40 = vunpack.c.l.s8.bf16 %v811_v36  ;;  %v3263_v30 = vunpack.c.h.s8.bf16 %v3023_v38  ;;  %v846_v36 = vld [vmem:[#allocation5 + $0x7d0] sm:$0xff] }
 0x40c   :  { %2670 = vmatprep.subr.bf16.mxu0 %v1363_v43  ;;  %v3257_v43 = vunpack.c.l.s8.bf16 %v3023_v38  ;;  %v1482_v38 = vunpack.c.h.s8.bf16 %v846_v36 }
 0x40d   :  { %3421 = vmatpush1.bf16.msra.mxu1 %v3215_v29  ;;  %v2917_v29 = vadd.f32 %v2896_v41, %v2879_v14  ;;  %v1476_v14 = vunpack.c.l.s8.bf16 %v846_v36  ;;  %v1483_v41 = vunpack.c.h.s8.bf16 %v847_v33 }
 0x40e   :  { %3422 = vmatprep.subr.bf16.mxu1 %v3222_v46  ;;  %v1404_v46 = vunpack.c.l.s8.bf16 %v810_v42 }
 0x40f   :  { %2671 = vmatpush1.bf16.msra.mxu0 %v1362_v56  ;;  %v2923_v56 = vmax.f32 %v2917_v29, 0.0 }
 0x410   :  { %2681 = vmatprep.subr.bf16.mxu0 %v1369_v55  ;;  %v1410_v55 = vunpack.c.h.s8.bf16 %v810_v42 }
 0x411   :  { %3423 = vmatpush1.bf16.msra.mxu1 %v3221_v60  ;;  %v816_v60 = vld [vmem:[#allocation5 + $0x6e0] sm:$0xff] }
 0x412   :  { %2673 = vmatmul.mubr.bf16.vlgmr.msra.gmra.mrb[4].mxu0 %v6892_v12  ;;  %3424 = vmatprep.subr.bf16.mxu1 %v3228_v49  ;;  %v3239_v12 = vunpack.c.h.s8.bf16 %v3011_v8  ;;  %v7041_v49 = vpack.c.bf16 %v2923_v56, %v2923_v56 }
 0x413   :  { %2682 = vmatpush1.bf16.msra.mxu0 %v1368_v51  ;;  %2713 = vmatprep.mubr.bf16.mxu0 %v6895_v23  ;;  %v3246_v23 = vunpack.c.l.s8.bf16 %v3018_v13  ;;  %v1416_v51 = vunpack.c.l.s8.bf16 %v816_v60 }
 0x414   :  { %2683 = vmatprep.subr.bf16.mxu0 %v1375_v0  ;;  %v823_v0 = vld [vmem:[#allocation5 + $0x718] sm:$0xff] }
 0x415   :  { %3425 = vmatpush1.bf16.msra.mxu1 %v3227_v39  ;;  %v1422_v39 = vunpack.c.h.s8.bf16 %v816_v60  ;;  %v1429_v22 = vunpack.c.l.s8.bf16 %v823_v0 }
 0x416   :  { %3426 = vmatprep.subr.bf16.mxu1 %v3234_v50  ;;  %v822_v50 = vld [vmem:[#allocation5 + $0x710] sm:$0xff] }
 0x417   :  { %2684 = vmatpush1.bf16.msra.mxu0 %v1374_v18  ;;  %v1428_v8 = vunpack.c.l.s8.bf16 %v822_v50  ;;  %v1435_v18 = vunpack.c.h.s8.bf16 %v823_v0  ;;  %v1434_v6 = vunpack.c.h.s8.bf16 %v822_v50 }
 0x418   :  { %2685 = vmatprep.subr.bf16.mxu0 %v1381_v5  ;;  %v829_v5 = vld [vmem:[#allocation5 + $0x748] sm:$0xff] }
 0x419   :  { %3427 = vmatpush1.bf16.msra.mxu1 %v3233_v7  ;;  %v1441_v7 = vunpack.c.l.s8.bf16 %v829_v5  ;;  %v1447_v13 = vunpack.c.h.s8.bf16 %v829_v5 }
 0x41a   :  { %3428 = vmatprep.subr.bf16.mxu1 %v3240_v11  ;;  %v828_v11 = vld [vmem:[#allocation5 + $0x740] sm:$0xff] }
 0x41b   :  { %2686 = vmatpush1.bf16.msra.mxu0 %v1380_v9  ;;  %v1440_v9 = vunpack.c.l.s8.bf16 %v828_v11 }
 0x41c   :  { %2687 = vmatprep.subr.bf16.mxu0 %v1387_v37  ;;  %v835_v37 = vld [vmem:[#allocation5 + $0x778] sm:$0xff] }
 0x41d   :  { %3429 = vmatpush1.bf16.msra.mxu1 %v3239_v12  ;;  %v1446_v12 = vunpack.c.h.s8.bf16 %v828_v11  ;;  %v1453_v10 = vunpack.c.l.s8.bf16 %v835_v37 }
 0x41e   :  { %3430 = vmatprep.subr.bf16.mxu1 %v3246_v23  ;;  %v834_v23 = vld [vmem:[#allocation5 + $0x770] sm:$0xff] }
 0x41f   :  { %2688 = vmatpush1.bf16.msra.mxu0 %v1386_v24  ;;  %v1452_v21 = vunpack.c.l.s8.bf16 %v834_v23  ;;  %v1459_v24 = vunpack.c.h.s8.bf16 %v835_v37  ;;  %v1458_v26 = vunpack.c.h.s8.bf16 %v834_v23 }
 0x420   :  { %2689 = vmatprep.subr.bf16.mxu0 %v1393_v25  ;;  %v841_v25 = vld [vmem:[#allocation5 + $0x7a8] sm:$0xff] }
 0x421   :  { %3431 = vmatpush1.bf16.msra.mxu1 %v3245_v27  ;;  %v1465_v27 = vunpack.c.l.s8.bf16 %v841_v25 }
 0x422   :  { %3432 = vmatprep.subr.bf16.mxu1 %v3252_v31  ;;  %v1464_v31 = vunpack.c.l.s8.bf16 %v840_v28 }
 0x423   :  { %2690 = vmatpush1.bf16.msra.mxu0 %v1392_v32  ;;  %v1471_v32 = vunpack.c.h.s8.bf16 %v841_v25 }
 0x424   :  { %2691 = vmatprep.subr.bf16.mxu0 %v1399_v34  ;;  %v1470_v34 = vunpack.c.h.s8.bf16 %v840_v28 }
 0x425   :  { %3433 = vmatpush1.bf16.msra.mxu1 %v3251_v45  ;;  %v1477_v45 = vunpack.c.l.s8.bf16 %v847_v33 }
 0x426   :  { %3434 = vmatprep.subr.bf16.mxu1 %v3258_v17  ;;  %v853_v17 = vld [vmem:[#allocation5 + $0x808] sm:$0xff] }
 0x427   :  { %2692 = vmatpush1.bf16.msra.mxu0 %v1398_v3  ;;  %v1489_v3 = vunpack.c.l.s8.bf16 %v853_v17 }
 0x428   :  { %2693 = vmatprep.subr.bf16.mxu0 %v1405_v40  ;;  %v852_v40 = vld [vmem:[#allocation5 + $0x800] sm:$0xff] }
 0x429   :  { %3435 = vmatpush1.bf16.msra.mxu1 %v3257_v43  ;;  %v1488_v42 = vunpack.c.l.s8.bf16 %v852_v40  ;;  %v859_v43 = vld [vmem:[#allocation5 + $0x838] sm:$0xff] }
 0x42a   :  { %3436 = vmatprep.subr.bf16.mxu1 %v3264_v48  ;;  %v1501_v29 = vunpack.c.l.s8.bf16 %v859_v43  ;;  %v858_v48 = vld [vmem:[#allocation5 + $0x830] sm:$0xff] }
 0x42b   :  { %2694 = vmatpush1.bf16.msra.mxu0 %v1404_v46  ;;  %v1500_v46 = vunpack.c.l.s8.bf16 %v858_v48  ;;  %v1506_v16 = vunpack.c.h.s8.bf16 %v858_v48 }
 0x42c   :  { %2695 = vmatprep.subr.bf16.mxu0 %v1411_v19  ;;  %v1507_v19 = vunpack.c.h.s8.bf16 %v859_v43 }
 0x42d   :  { %3437 = vmatpush1.bf16.msra.mxu1 %v3263_v30  ;;  %v865_v30 = vld [vmem:[#allocation5 + $0x868] sm:$0xff] }
 0x42e   :  { %v1513_v56 = vunpack.c.l.s8.bf16 %v865_v30  ;;  %v1519_v60 = vunpack.c.h.s8.bf16 %v865_v30 }
 0x42f   :  { %2696 = vmatpush1.bf16.msra.mxu0 %v1410_v55  ;;  %v864_v55 = vld [vmem:[#allocation5 + $0x860] sm:$0xff] }
 0x430   :  { %3439 = vmatmul.mubr.bf16.vlgmr.msra.gmra.mrb[4].mxu1 %v7041_v49  ;;  %2697 = vmatprep.subr.bf16.mxu0 %v1417_v59  ;;  %v1512_v59 = vunpack.c.l.s8.bf16 %v864_v55 }
 0x433   :  { %2698 = vmatpush1.bf16.msra.mxu0 %v1416_v51  ;;  %v871_v51 = vld [vmem:[#allocation5 + $0x898] sm:$0xff] }
 0x434   :  { %2699 = vmatprep.subr.bf16.mxu0 %v1423_v63  ;;  %v1518_v63 = vunpack.c.h.s8.bf16 %v864_v55  ;;  %v1525_v0 = vunpack.c.l.s8.bf16 %v871_v51  ;;  %v1531_v50 = vunpack.c.h.s8.bf16 %v871_v51 }
 0x437   :  { %2700 = vmatpush1.bf16.msra.mxu0 %v1422_v39  ;;  %v870_v39 = vld [vmem:[#allocation5 + $0x890] sm:$0xff] }
 0x438   :  { %2701 = vmatprep.subr.bf16.mxu0 %v1429_v22  ;;  %v1524_v22 = vunpack.c.l.s8.bf16 %v870_v39 }
 0x43b   :  { %2702 = vmatpush1.bf16.msra.mxu0 %v1428_v8  ;;  %v877_v8 = vld [vmem:[#allocation5 + $0x8c8] sm:$0xff] }
 0x43c   :  { %2703 = vmatprep.subr.bf16.mxu0 %v1435_v18  ;;  %v1530_v18 = vunpack.c.h.s8.bf16 %v870_v39  ;;  %v1537_v5 = vunpack.c.l.s8.bf16 %v877_v8  ;;  %v1543_v11 = vunpack.c.h.s8.bf16 %v877_v8 }
 0x43f   :  { %2704 = vmatpush1.bf16.msra.mxu0 %v1434_v6  ;;  %v876_v6 = vld [vmem:[#allocation5 + $0x8c0] sm:$0xff] }
 0x440   :  { %2705 = vmatprep.subr.bf16.mxu0 %v1441_v7  ;;  %v1536_v7 = vunpack.c.l.s8.bf16 %v876_v6 }
 0x443   :  { %2706 = vmatpush1.bf16.msra.mxu0 %v1440_v9  ;;  %v883_v9 = vld [vmem:[#allocation5 + $0x8f8] sm:$0xff] }
 0x444   :  { %2707 = vmatprep.subr.bf16.mxu0 %v1447_v13  ;;  %v1542_v13 = vunpack.c.h.s8.bf16 %v876_v6  ;;  %v1549_v37 = vunpack.c.l.s8.bf16 %v883_v9  ;;  %v1555_v23 = vunpack.c.h.s8.bf16 %v883_v9 }
 0x447   :  { %2708 = vmatpush1.bf16.msra.mxu0 %v1446_v12  ;;  %v882_v12 = vld [vmem:[#allocation5 + $0x8f0] sm:$0xff] }
 0x448   :  { %2709 = vmatprep.subr.bf16.mxu0 %v1453_v10  ;;  %v1548_v10 = vunpack.c.l.s8.bf16 %v882_v12 }
 0x44b   :  { %2710 = vmatpush1.bf16.msra.mxu0 %v1452_v21  ;;  %v889_v21 = vld [vmem:[#allocation5 + $0x928] sm:$0xff] }
 0x44c   :  { %2711 = vmatprep.subr.bf16.mxu0 %v1459_v24  ;;  %v1554_v24 = vunpack.c.h.s8.bf16 %v882_v12  ;;  %v1561_v25 = vunpack.c.l.s8.bf16 %v889_v21  ;;  %v1567_v28 = vunpack.c.h.s8.bf16 %v889_v21 }
 0x44f   :  { %2712 = vmatpush1.bf16.msra.mxu0 %v1458_v26  ;;  %v888_v26 = vld [vmem:[#allocation5 + $0x920] sm:$0xff] }
 0x450   :  { %2722 = vmatprep.subr.bf16.mxu0 %v1465_v27  ;;  %v1560_v27 = vunpack.c.l.s8.bf16 %v888_v26 }
 0x452   :  { %2714 = vmatmul.mubr.bf16.vlgmr.msra.gmra.mrb[4].mxu0 %v6916_v58  ;;  %v1495_v58 = vunpack.c.h.s8.bf16 %v853_v17 }
 0x453   :  { %2723 = vmatpush1.bf16.msra.mxu0 %v1464_v31  ;;  %2754 = vmatprep.mubr.bf16.mxu0 %v6919_v2  ;;  %v1494_v2 = vunpack.c.h.s8.bf16 %v852_v40  ;;  %v895_v31 = vld [vmem:[#allocation5 + $0x958] sm:$0xff] }
 0x454   :  { %2724 = vmatprep.subr.bf16.mxu0 %v1471_v32  ;;  %v1566_v32 = vunpack.c.h.s8.bf16 %v888_v26  ;;  %v1573_v33 = vunpack.c.l.s8.bf16 %v895_v31  ;;  %v1579_v36 = vunpack.c.h.s8.bf16 %v895_v31  ;;  %v907_v40 = vld [vmem:[#allocation5 + $0x9b8] sm:$0xff] }
 0x457   :  { %2725 = vmatpush1.bf16.msra.mxu0 %v1470_v34  ;;  %v894_v34 = vld [vmem:[#allocation5 + $0x950] sm:$0xff] }
 0x458   :  { %2726 = vmatprep.subr.bf16.mxu0 %v1477_v45  ;;  %v1572_v45 = vunpack.c.l.s8.bf16 %v894_v34 }
 0x45b   :  { %2727 = vmatpush1.bf16.msra.mxu0 %v1476_v14  ;;  %v901_v14 = vld [vmem:[#allocation5 + $0x988] sm:$0xff] }
 0x45c   :  { %2728 = vmatprep.subr.bf16.mxu0 %v1483_v41  ;;  %v1578_v41 = vunpack.c.h.s8.bf16 %v894_v34  ;;  %v1585_v17 = vunpack.c.l.s8.bf16 %v901_v14 }
 0x45f   :  { %2729 = vmatpush1.bf16.msra.mxu0 %v1482_v38  ;;  %v900_v38 = vld [vmem:[#allocation5 + $0x980] sm:$0xff] }
 0x460   :  { %2730 = vmatprep.subr.bf16.mxu0 %v1489_v3  ;;  %v1584_v3 = vunpack.c.l.s8.bf16 %v900_v38 }
 0x463   :  { %2731 = vmatpush1.bf16.msra.mxu0 %v1488_v42  ;;  %v1597_v42 = vunpack.c.l.s8.bf16 %v907_v40 }
 0x464   :  { %2732 = vmatprep.subr.bf16.mxu0 %v1495_v58  ;;  %v906_v58 = vld [vmem:[#allocation5 + $0x9b0] sm:$0xff] }
 0x465   :  { %v1596_v43 = vunpack.c.l.s8.bf16 %v906_v58  ;;  %v1602_v48 = vunpack.c.h.s8.bf16 %v906_v58  ;;  %v960_v58 = vld [vmem:[#allocation5 + $0xb60] sm:$0xff] }
 0x467   :  { %2733 = vmatpush1.bf16.msra.mxu0 %v1494_v2  ;;  %v1603_v2 = vunpack.c.h.s8.bf16 %v907_v40  ;;  %v961_v40 = vld [vmem:[#allocation5 + $0xb68] sm:$0xff] }
 0x468   :  { %2734 = vmatprep.subr.bf16.mxu0 %v1501_v29  ;;  %v913_v29 = vld [vmem:[#allocation5 + $0x9e8] sm:$0xff] }
 0x46b   :  { %2735 = vmatpush1.bf16.msra.mxu0 %v1500_v46  ;;  %v1609_v46 = vunpack.c.l.s8.bf16 %v913_v29 }
 0x46c   :  { %2736 = vmatprep.subr.bf16.mxu0 %v1507_v19  ;;  %v912_v19 = vld [vmem:[#allocation5 + $0x9e0] sm:$0xff] }
 0x46d   :  { %v1608_v30 = vunpack.c.l.s8.bf16 %v912_v19  ;;  %v1614_v55 = vunpack.c.h.s8.bf16 %v912_v19  ;;  %v966_v19 = vld [vmem:[#allocation5 + $0xb90] sm:$0xff] }
 0x46f   :  { %2737 = vmatpush1.bf16.msra.mxu0 %v1506_v16  ;;  %v1615_v16 = vunpack.c.h.s8.bf16 %v913_v29  ;;  %v967_v29 = vld [vmem:[#allocation5 + $0xb98] sm:$0xff] }
 0x470   :  { %2738 = vmatprep.subr.bf16.mxu0 %v1513_v56  ;;  %v919_v56 = vld [vmem:[#allocation5 + $0xa18] sm:$0xff] }
 0x473   :  { %2739 = vmatpush1.bf16.msra.mxu0 %v1512_v59  ;;  %v1621_v59 = vunpack.c.l.s8.bf16 %v919_v56 }
 0x474   :  { %2740 = vmatprep.subr.bf16.mxu0 %v1519_v60  ;;  %v918_v60 = vld [vmem:[#allocation5 + $0xa10] sm:$0xff] }
 0x475   :  { %v1620_v51 = vunpack.c.l.s8.bf16 %v918_v60  ;;  %v1626_v39 = vunpack.c.h.s8.bf16 %v918_v60  ;;  %v972_v60 = vld [vmem:[#allocation5 + $0xbc0] sm:$0xff] }
 0x477   :  { %2741 = vmatpush1.bf16.msra.mxu0 %v1518_v63  ;;  %v1627_v63 = vunpack.c.h.s8.bf16 %v919_v56  ;;  %v973_v56 = vld [vmem:[#allocation5 + $0xbc8] sm:$0xff] }
 0x478   :  { %2742 = vmatprep.subr.bf16.mxu0 %v1525_v0  ;;  %v925_v0 = vld [vmem:[#allocation5 + $0xa48] sm:$0xff] }
 0x47b   :  { %2743 = vmatpush1.bf16.msra.mxu0 %v1524_v22  ;;  %v1633_v22 = vunpack.c.l.s8.bf16 %v925_v0 }
 0x47c   :  { %2744 = vmatprep.subr.bf16.mxu0 %v1531_v50  ;;  %v924_v50 = vld [vmem:[#allocation5 + $0xa40] sm:$0xff] }
 0x47d   :  { %v1632_v8 = vunpack.c.l.s8.bf16 %v924_v50  ;;  %v1638_v6 = vunpack.c.h.s8.bf16 %v924_v50  ;;  %v978_v50 = vld [vmem:[#allocation5 + $0xbf0] sm:$0xff] }
 0x47f   :  { %2745 = vmatpush1.bf16.msra.mxu0 %v1530_v18  ;;  %v1639_v18 = vunpack.c.h.s8.bf16 %v925_v0  ;;  %v979_v0 = vld [vmem:[#allocation5 + $0xbf8] sm:$0xff] }
 0x480   :  { %2746 = vmatprep.subr.bf16.mxu0 %v1537_v5  ;;  %v931_v5 = vld [vmem:[#allocation5 + $0xa78] sm:$0xff] }
 0x483   :  { %2747 = vmatpush1.bf16.msra.mxu0 %v1536_v7  ;;  %v1645_v7 = vunpack.c.l.s8.bf16 %v931_v5 }
 0x484   :  { %2748 = vmatprep.subr.bf16.mxu0 %v1543_v11  ;;  %v930_v11 = vld [vmem:[#allocation5 + $0xa70] sm:$0xff] }
 0x485   :  { %v1644_v9 = vunpack.c.l.s8.bf16 %v930_v11  ;;  %v1650_v12 = vunpack.c.h.s8.bf16 %v930_v11  ;;  %v3845_v11 = vld [vmem:[#allocation14] sm:$0xff] }
 0x487   :  { %2749 = vmatpush1.bf16.msra.mxu0 %v1542_v13  ;;  %v1651_v13 = vunpack.c.h.s8.bf16 %v931_v5  ;;  %v3846_v5 = vld [vmem:[#allocation14 + $0x8] sm:$0xff] }
 0x488   :  { %2750 = vmatprep.subr.bf16.mxu0 %v1549_v37  ;;  %v937_v37 = vld [vmem:[#allocation5 + $0xaa8] sm:$0xff] }
 0x48b   :  { %2751 = vmatpush1.bf16.msra.mxu0 %v1548_v10  ;;  %v1657_v10 = vunpack.c.l.s8.bf16 %v937_v37 }
 0x48c   :  { %2752 = vmatprep.subr.bf16.mxu0 %v1555_v23  ;;  %v936_v23 = vld [vmem:[#allocation5 + $0xaa0] sm:$0xff] }
 0x48d   :  { %v1656_v21 = vunpack.c.l.s8.bf16 %v936_v23  ;;  %v1662_v26 = vunpack.c.h.s8.bf16 %v936_v23  ;;  %v3995_v23 = vunpack.c.h.s8.bf16 %v3845_v11 }
 0x48f   :  { %2753 = vmatpush1.bf16.msra.mxu0 %v1554_v24  ;;  %v1663_v24 = vunpack.c.h.s8.bf16 %v937_v37  ;;  %v3852_v37 = vld [vmem:[#allocation14 + $0x38] sm:$0xff] }
 0x490   :  { %2763 = vmatprep.subr.bf16.mxu0 %v1561_v25  ;;  %v943_v25 = vld [vmem:[#allocation5 + $0xad8] sm:$0xff] }
 0x492   :  { %2755 = vmatmul.mubr.bf16.vlgmr.msra.gmra.mrb[4].mxu0 %v6940_v44  ;;  %v1591_v44 = vunpack.c.h.s8.bf16 %v901_v14 }
 0x493   :  { %2764 = vmatpush1.bf16.msra.mxu0 %v1560_v27  ;;  %2795 = vmatprep.mubr.bf16.mxu0 %v6943_v54  ;;  %v1590_v54 = vunpack.c.h.s8.bf16 %v900_v38  ;;  %v1669_v27 = vunpack.c.l.s8.bf16 %v943_v25  ;;  %v954_v38 = vld [vmem:[#allocation5 + $0xb30] sm:$0xff] }
 0x494   :  { %2765 = vmatprep.subr.bf16.mxu0 %v1567_v28  ;;  %v942_v28 = vld [vmem:[#allocation5 + $0xad0] sm:$0xff] }
 0x495   :  { %v1668_v31 = vunpack.c.l.s8.bf16 %v942_v28  ;;  %v1674_v34 = vunpack.c.h.s8.bf16 %v942_v28 }
 0x497   :  { %2766 = vmatpush1.bf16.msra.mxu0 %v1566_v32  ;;  %v1675_v32 = vunpack.c.h.s8.bf16 %v943_v25 }
 0x498   :  { %2767 = vmatprep.subr.bf16.mxu0 %v1573_v33  ;;  %v949_v33 = vld [vmem:[#allocation5 + $0xb08] sm:$0xff] }
 0x49b   :  { %2768 = vmatpush1.bf16.msra.mxu0 %v1572_v45  ;;  %v1681_v45 = vunpack.c.l.s8.bf16 %v949_v33 }
 0x49c   :  { %2769 = vmatprep.subr.bf16.mxu0 %v1579_v36  ;;  %v948_v36 = vld [vmem:[#allocation5 + $0xb00] sm:$0xff] }
 0x49d   :  { %v1680_v14 = vunpack.c.l.s8.bf16 %v948_v36 }
 0x49f   :  { %2770 = vmatpush1.bf16.msra.mxu0 %v1578_v41  ;;  %v955_v41 = vld [vmem:[#allocation5 + $0xb38] sm:$0xff] }
 0x4a0   :  { %2771 = vmatprep.subr.bf16.mxu0 %v1585_v17  ;;  %v1693_v17 = vunpack.c.l.s8.bf16 %v955_v41 }
 0x4a3   :  { %2772 = vmatpush1.bf16.msra.mxu0 %v1584_v3  ;;  %v1692_v3 = vunpack.c.l.s8.bf16 %v954_v38 }
 0x4a4   :  { %2773 = vmatprep.subr.bf16.mxu0 %v1591_v44  ;;  %v1699_v44 = vunpack.c.h.s8.bf16 %v955_v41 }
 0x4a7   :  { %2774 = vmatpush1.bf16.msra.mxu0 %v1590_v54  ;;  %v1698_v54 = vunpack.c.h.s8.bf16 %v954_v38 }
 0x4a8   :  { %2775 = vmatprep.subr.bf16.mxu0 %v1597_v42  ;;  %v1705_v42 = vunpack.c.l.s8.bf16 %v961_v40 }
 0x4ab   :  { %2776 = vmatpush1.bf16.msra.mxu0 %v1596_v43  ;;  %v1704_v43 = vunpack.c.l.s8.bf16 %v960_v58 }
 0x4ac   :  { %2777 = vmatprep.subr.bf16.mxu0 %v1603_v2  ;;  %v1711_v2 = vunpack.c.h.s8.bf16 %v961_v40 }
 0x4af   :  { %2778 = vmatpush1.bf16.msra.mxu0 %v1602_v48  ;;  %v1710_v48 = vunpack.c.h.s8.bf16 %v960_v58 }
 0x4b0   :  { %2779 = vmatprep.subr.bf16.mxu0 %v1609_v46  ;;  %v1717_v46 = vunpack.c.l.s8.bf16 %v967_v29 }
 0x4b3   :  { %2780 = vmatpush1.bf16.msra.mxu0 %v1608_v30  ;;  %v1716_v30 = vunpack.c.l.s8.bf16 %v966_v19 }
 0x4b4   :  { %2781 = vmatprep.subr.bf16.mxu0 %v1615_v16  ;;  %v1723_v16 = vunpack.c.h.s8.bf16 %v967_v29 }
 0x4b7   :  { %2782 = vmatpush1.bf16.msra.mxu0 %v1614_v55  ;;  %v1722_v55 = vunpack.c.h.s8.bf16 %v966_v19 }
 0x4b8   :  { %2783 = vmatprep.subr.bf16.mxu0 %v1621_v59  ;;  %v1729_v59 = vunpack.c.l.s8.bf16 %v973_v56 }
 0x4bb   :  { %2784 = vmatpush1.bf16.msra.mxu0 %v1620_v51  ;;  %v1728_v51 = vunpack.c.l.s8.bf16 %v972_v60 }
 0x4bc   :  { %2785 = vmatprep.subr.bf16.mxu0 %v1627_v63  ;;  %v1735_v63 = vunpack.c.h.s8.bf16 %v973_v56 }
 0x4bf   :  { %2786 = vmatpush1.bf16.msra.mxu0 %v1626_v39  ;;  %v1734_v39 = vunpack.c.h.s8.bf16 %v972_v60 }
 0x4c0   :  { %2787 = vmatprep.subr.bf16.mxu0 %v1633_v22  ;;  %v1741_v22 = vunpack.c.l.s8.bf16 %v979_v0 }
 0x4c3   :  { %2788 = vmatpush1.bf16.msra.mxu0 %v1632_v8  ;;  %v1740_v8 = vunpack.c.l.s8.bf16 %v978_v50 }
 0x4c4   :  { %2789 = vmatprep.subr.bf16.mxu0 %v1639_v18  ;;  %v1747_v18 = vunpack.c.h.s8.bf16 %v979_v0 }
 0x4c7   :  { %2790 = vmatpush1.bf16.msra.mxu0 %v1638_v6  ;;  %v1746_v6 = vunpack.c.h.s8.bf16 %v978_v50 }
 0x4c8   :  { %2791 = vmatprep.subr.bf16.mxu0 %v1645_v7  ;;  %v3990_v7 = vunpack.c.l.s8.bf16 %v3846_v5 }
 0x4cb   :  { %2792 = vmatpush1.bf16.msra.mxu0 %v1644_v9  ;;  %v3989_v9 = vunpack.c.l.s8.bf16 %v3845_v11 }
 0x4cc   :  { %2793 = vmatprep.subr.bf16.mxu0 %v1651_v13  ;;  %v3996_v13 = vunpack.c.h.s8.bf16 %v3846_v5 }
 0x4cf   :  { %2794 = vmatpush1.bf16.msra.mxu0 %v1650_v12  ;;  %v3030_v12 = vld [vmem:[#allocation10 + $0x308] sm:$0xff] }
 0x4d0   :  { %2804 = vmatprep.subr.bf16.mxu0 %v1657_v10  ;;  %v3029_v10 = vld [vmem:[#allocation10 + $0x300] sm:$0xff]  ;;  %v3276_v25 = vunpack.c.h.s8.bf16 %v3030_v12 }
 0x4d1   :  { %v3275_v28 = vunpack.c.h.s8.bf16 %v3029_v10 }
 0x4d2   :  { %2796 = vmatmul.mubr.bf16.vlgmr.msra.gmra.mrb[4].mxu0 %v6964_v35  ;;  %v1687_v35 = vunpack.c.h.s8.bf16 %v949_v33 }
 0x4d3   :  { %2805 = vmatpush1.bf16.msra.mxu0 %v1656_v21  ;;  %2836 = vmatprep.mubr.bf16.mxu0 %v6967_v47  ;;  %v1686_v47 = vunpack.c.h.s8.bf16 %v948_v36  ;;  %v3270_v21 = vunpack.c.l.s8.bf16 %v3030_v12  ;;  %v3875_v12 = vld [vmem:[#allocation14 + $0xf0] sm:$0xff] }
 0x4d4   :  { %2806 = vmatprep.subr.bf16.mxu0 %v1663_v24  ;;  %v3269_v24 = vunpack.c.l.s8.bf16 %v3029_v10 }
 0x4d5   :  { %3447 = vmatprep.subr.bf16.mxu1 %v3270_v21  ;;  %v3060_v21 = vld [vmem:[#allocation10 + $0x3f8] sm:$0xff] }
 0x4d6   :  { %3448 = vmatpush1.bf16.msra.mxu1 %v3269_v24 }
 0x4d7   :  { %2807 = vmatpush1.bf16.msra.mxu0 %v1662_v26  ;;  %v4002_v26 = vunpack.c.l.s8.bf16 %v3852_v37  ;;  %3449 = vmatprep.subr.bf16.mxu1 %v3276_v25  ;;  %v3330_v25 = vunpack.c.l.s8.bf16 %v3060_v21 }
 0x4d8   :  { %2808 = vmatprep.subr.bf16.mxu0 %v1669_v27  ;;  %v3851_v27 = vld [vmem:[#allocation14 + $0x30] sm:$0xff] }
 0x4da   :  { %3450 = vmatpush1.bf16.msra.mxu1 %v3275_v28 }
 0x4db   :  { %2809 = vmatpush1.bf16.msra.mxu0 %v1668_v31  ;;  %v4001_v31 = vunpack.c.l.s8.bf16 %v3851_v27 }
 0x4dc   :  { %2810 = vmatprep.subr.bf16.mxu0 %v1675_v32  ;;  %v3036_v32 = vld [vmem:[#allocation10 + $0x338] sm:$0xff] }
 0x4dd   :  { %v3282_v33 = vunpack.c.l.s8.bf16 %v3036_v32 }
 0x4df   :  { %2811 = vmatpush1.bf16.msra.mxu0 %v1674_v34  ;;  %v3035_v34 = vld [vmem:[#allocation10 + $0x330] sm:$0xff]  ;;  %3451 = vmatprep.subr.bf16.mxu1 %v3282_v33 }
 0x4e0   :  { %2812 = vmatprep.subr.bf16.mxu0 %v1681_v45  ;;  %v3858_v45 = vld [vmem:[#allocation14 + $0x68] sm:$0xff]  ;;  %v3281_v36 = vunpack.c.l.s8.bf16 %v3035_v34  ;;  %v3881_v33 = vld [vmem:[#allocation14 + $0x120] sm:$0xff] }
 0x4e1   :  { %v4014_v41 = vunpack.c.l.s8.bf16 %v3858_v45 }
 0x4e2   :  { %3452 = vmatpush1.bf16.msra.mxu1 %v3281_v36  ;;  %v3066_v36 = vld [vmem:[#allocation10 + $0x428] sm:$0xff] }
 0x4e3   :  { %2813 = vmatpush1.bf16.msra.mxu0 %v1680_v14  ;;  %v4007_v14 = vunpack.c.h.s8.bf16 %v3851_v27  ;;  %v3882_v27 = vld [vmem:[#allocation14 + $0x128] sm:$0xff] }
 0x4e4   :  { %2814 = vmatprep.subr.bf16.mxu0 %v1687_v35  ;;  %v3288_v35 = vunpack.c.h.s8.bf16 %v3036_v32  ;;  %v3336_v32 = vunpack.c.h.s8.bf16 %v3060_v21 }
 0x4e6   :  { %3453 = vmatprep.subr.bf16.mxu1 %v3288_v35  ;;  %v3342_v35 = vunpack.c.l.s8.bf16 %v3066_v36 }
 0x4e7   :  { %2815 = vmatpush1.bf16.msra.mxu0 %v1686_v47  ;;  %v3857_v47 = vld [vmem:[#allocation14 + $0x60] sm:$0xff] }
 0x4e8   :  { %2816 = vmatprep.subr.bf16.mxu0 %v1693_v17  ;;  %v3287_v17 = vunpack.c.h.s8.bf16 %v3035_v34  ;;  %v4013_v38 = vunpack.c.l.s8.bf16 %v3857_v47 }
 0x4ea   :  { %3454 = vmatpush1.bf16.msra.mxu1 %v3287_v17 }
 0x4eb   :  { %2817 = vmatpush1.bf16.msra.mxu0 %v1692_v3  ;;  %v3042_v3 = vld [vmem:[#allocation10 + $0x368] sm:$0xff] }
 0x4ec   :  { %2818 = vmatprep.subr.bf16.mxu0 %v1699_v44  ;;  %v4020_v44 = vunpack.c.h.s8.bf16 %v3858_v45  ;;  %v3294_v40 = vunpack.c.l.s8.bf16 %v3042_v3  ;;  %v4061_v45 = vunpack.c.l.s8.bf16 %v3881_v33 }
 0x4ee   :  { %3455 = vmatprep.subr.bf16.mxu1 %v3294_v40  ;;  %v3887_v40 = vld [vmem:[#allocation14 + $0x150] sm:$0xff] }
 0x4ef   :  { %2819 = vmatpush1.bf16.msra.mxu0 %v1698_v54  ;;  %v3041_v54 = vld [vmem:[#allocation10 + $0x360] sm:$0xff] }
 0x4f0   :  { %2820 = vmatprep.subr.bf16.mxu0 %v1705_v42  ;;  %v3864_v42 = vld [vmem:[#allocation14 + $0x98] sm:$0xff]  ;;  %v3293_v58 = vunpack.c.l.s8.bf16 %v3041_v54 }
 0x4f1   :  { %v4026_v29 = vunpack.c.l.s8.bf16 %v3864_v42 }
 0x4f2   :  { %3456 = vmatpush1.bf16.msra.mxu1 %v3293_v58 }
 0x4f3   :  { %2821 = vmatpush1.bf16.msra.mxu0 %v1704_v43  ;;  %v4019_v43 = vunpack.c.h.s8.bf16 %v3857_v47  ;;  %v3888_v47 = vld [vmem:[#allocation14 + $0x158] sm:$0xff] }
 0x4f4   :  { %2822 = vmatprep.subr.bf16.mxu0 %v1711_v2  ;;  %v3300_v2 = vunpack.c.h.s8.bf16 %v3042_v3  ;;  %v3348_v3 = vunpack.c.h.s8.bf16 %v3066_v36  ;;  %v4080_v58 = vunpack.c.h.s8.bf16 %v3888_v47 }
 0x4f6   :  { %3457 = vmatprep.subr.bf16.mxu1 %v3300_v2  ;;  %v4079_v2 = vunpack.c.h.s8.bf16 %v3887_v40 }
 0x4f7   :  { %2823 = vmatpush1.bf16.msra.mxu0 %v1710_v48  ;;  %v3863_v48 = vld [vmem:[#allocation14 + $0x90] sm:$0xff] }
 0x4f8   :  { %2824 = vmatprep.subr.bf16.mxu0 %v1717_v46  ;;  %v3299_v46 = vunpack.c.h.s8.bf16 %v3041_v54  ;;  %v4025_v19 = vunpack.c.l.s8.bf16 %v3863_v48 }
 0x4fa   :  { %3458 = vmatpush1.bf16.msra.mxu1 %v3299_v46 }
 0x4fb   :  { %2825 = vmatpush1.bf16.msra.mxu0 %v1716_v30  ;;  %v3048_v30 = vld [vmem:[#allocation10 + $0x398] sm:$0xff] }
 0x4fc   :  { %2826 = vmatprep.subr.bf16.mxu0 %v1723_v16  ;;  %v4032_v16 = vunpack.c.h.s8.bf16 %v3864_v42  ;;  %v3306_v56 = vunpack.c.l.s8.bf16 %v3048_v30  ;;  %v4073_v42 = vunpack.c.l.s8.bf16 %v3887_v40 }
 0x4fe   :  { %3459 = vmatprep.subr.bf16.mxu1 %v3306_v56 }
 0x4ff   :  { %2827 = vmatpush1.bf16.msra.mxu0 %v1722_v55  ;;  %v3047_v55 = vld [vmem:[#allocation10 + $0x390] sm:$0xff] }
 0x500   :  { %2828 = vmatprep.subr.bf16.mxu0 %v1729_v59  ;;  %v3870_v59 = vld [vmem:[#allocation14 + $0xc8] sm:$0xff]  ;;  %v3305_v60 = vunpack.c.l.s8.bf16 %v3047_v55 }
 0x501   :  { %v4038_v0 = vunpack.c.l.s8.bf16 %v3870_v59 }
 0x502   :  { %3460 = vmatpush1.bf16.msra.mxu1 %v3305_v60 }
 0x503   :  { %2829 = vmatpush1.bf16.msra.mxu0 %v1728_v51  ;;  %v4031_v51 = vunpack.c.h.s8.bf16 %v3863_v48  ;;  %v3893_v48 = vld [vmem:[#allocation14 + $0x180] sm:$0xff] }
 0x504   :  { %2830 = vmatprep.subr.bf16.mxu0 %v1735_v63  ;;  %v3312_v63 = vunpack.c.h.s8.bf16 %v3048_v30  ;;  %v4085_v46 = vunpack.c.l.s8.bf16 %v3893_v48  ;;  %v3900_v30 = vld [vmem:[#allocation14 + $0x1b8] sm:$0xff] }
 0x505   :  { %v4098_v56 = vunpack.c.l.s8.bf16 %v3900_v30  ;;  %v4104_v60 = vunpack.c.h.s8.bf16 %v3900_v30 }
 0x506   :  { %3461 = vmatprep.subr.bf16.mxu1 %v3312_v63 }
 0x507   :  { %2831 = vmatpush1.bf16.msra.mxu0 %v1734_v39  ;;  %v3869_v39 = vld [vmem:[#allocation14 + $0xc0] sm:$0xff] }
 0x508   :  { %2832 = vmatprep.subr.bf16.mxu0 %v1741_v22  ;;  %v3311_v22 = vunpack.c.h.s8.bf16 %v3047_v55  ;;  %v4037_v50 = vunpack.c.l.s8.bf16 %v3869_v39  ;;  %v3899_v55 = vld [vmem:[#allocation14 + $0x1b0] sm:$0xff] }
 0x509   :  { %v4103_v63 = vunpack.c.h.s8.bf16 %v3899_v55 }
 0x50a   :  { %3462 = vmatpush1.bf16.msra.mxu1 %v3311_v22 }
 0x50b   :  { %2833 = vmatpush1.bf16.msra.mxu0 %v1740_v8  ;;  %v3054_v8 = vld [vmem:[#allocation10 + $0x3c8] sm:$0xff] }
 0x50c   :  { %2834 = vmatprep.subr.bf16.mxu0 %v1747_v18  ;;  %v4044_v18 = vunpack.c.h.s8.bf16 %v3870_v59  ;;  %v3318_v5 = vunpack.c.l.s8.bf16 %v3054_v8  ;;  %v4097_v59 = vunpack.c.l.s8.bf16 %v3899_v55 }
 0x50e   :  { %3463 = vmatprep.subr.bf16.mxu1 %v3318_v5 }
 0x50f   :  { %2835 = vmatpush1.bf16.msra.mxu0 %v1746_v6  ;;  %v3053_v6 = vld [vmem:[#allocation10 + $0x3c0] sm:$0xff] }
 0x510   :  { %4277 = vmatprep.subr.bf16.mxu0 %v3990_v7  ;;  %v3876_v7 = vld [vmem:[#allocation14 + $0xf8] sm:$0xff]  ;;  %v3317_v11 = vunpack.c.l.s8.bf16 %v3053_v6  ;;  %v3323_v10 = vunpack.c.h.s8.bf16 %v3053_v6  ;;  %v3911_v6 = vld [vmem:[#allocation14 + $0x210] sm:$0xff] }
 0x511   :  { %v4056_v24 = vunpack.c.h.s8.bf16 %v3876_v7  ;;  %v4127_v21 = vunpack.c.h.s8.bf16 %v3911_v6 }
 0x512   :  { %2837 = vmatmul.mubr.bf16.vlgmr.msra.gmra.mrb[4].mxu0 %v6978_v61  ;;  %v4008_v61 = vunpack.c.h.s8.bf16 %v3852_v37  ;;  %v4050_v37 = vunpack.c.l.s8.bf16 %v3876_v7  ;;  %3464 = vmatpush1.bf16.msra.mxu1 %v3317_v11  ;;  %v3072_v7 = vld [vmem:[#allocation10 + $0x458] sm:$0xff] }
 0x513   :  { %4278 = vmatpush1.bf16.msra.mxu0 %v3989_v9  ;;  %4309 = vmatprep.mubr.bf16.mxu0 %v7021_v52  ;;  %v4043_v9 = vunpack.c.h.s8.bf16 %v3869_v39  ;;  %v3905_v39 = vld [vmem:[#allocation14 + $0x1e0] sm:$0xff]  ;;  %v3354_v11 = vunpack.c.l.s8.bf16 %v3072_v7 }
 0x514   :  { %4279 = vmatprep.subr.bf16.mxu0 %v3996_v13  ;;  %v3324_v13 = vunpack.c.h.s8.bf16 %v3054_v8  ;;  %v4109_v22 = vunpack.c.l.s8.bf16 %v3905_v39  ;;  %v3912_v8 = vld [vmem:[#allocation14 + $0x218] sm:$0xff] }
 0x515   :  { %v4122_v5 = vunpack.c.l.s8.bf16 %v3912_v8 }
 0x516   :  { %3465 = vmatprep.subr.bf16.mxu1 %v3324_v13  ;;  %v4121_v13 = vunpack.c.l.s8.bf16 %v3911_v6 }
 0x517   :  { %4280 = vmatpush1.bf16.msra.mxu0 %v3995_v23  ;;  %v4049_v23 = vunpack.c.l.s8.bf16 %v3875_v12  ;;  %3466 = vmatpush1.bf16.msra.mxu1 %v3323_v10  ;;  %v3918_v10 = vld [vmem:[#allocation14 + $0x248] sm:$0xff] }
 0x518   :  { %4281 = vmatprep.subr.bf16.mxu0 %v4002_v26  ;;  %v3059_v26 = vld [vmem:[#allocation10 + $0x3f0] sm:$0xff]  ;;  %3467 = vmatprep.subr.bf16.mxu1 %v3330_v25  ;;  %v4134_v25 = vunpack.c.l.s8.bf16 %v3918_v10 }
 0x519   :  { %v3329_v28 = vunpack.c.l.s8.bf16 %v3059_v26  ;;  %v3335_v34 = vunpack.c.h.s8.bf16 %v3059_v26  ;;  %v3917_v26 = vld [vmem:[#allocation14 + $0x240] sm:$0xff] }
 0x51b   :  { %4282 = vmatpush1.bf16.msra.mxu0 %v4001_v31  ;;  %v4055_v31 = vunpack.c.h.s8.bf16 %v3875_v12  ;;  %3468 = vmatpush1.bf16.msra.mxu1 %v3329_v28  ;;  %v4128_v12 = vunpack.c.h.s8.bf16 %v3912_v8 }
 0x51c   :  { %4283 = vmatprep.subr.bf16.mxu0 %v4008_v61  ;;  %v4062_v61 = vunpack.c.l.s8.bf16 %v3882_v27  ;;  %3469 = vmatprep.subr.bf16.mxu1 %v3336_v32  ;;  %v4140_v32 = vunpack.c.h.s8.bf16 %v3918_v10  ;;  %v3965_v10 = vld [vmem:[#allocation14 + $0x3c0] sm:$0xff] }
 0x51f   :  { %4284 = vmatpush1.bf16.msra.mxu0 %v4007_v14  ;;  %v4068_v14 = vunpack.c.h.s8.bf16 %v3882_v27  ;;  %3470 = vmatpush1.bf16.msra.mxu1 %v3335_v34  ;;  %v7054_v27 = vld [vmem:[#allocation10 + $0x18] sm:$0xff] }
 0x520   :  { %4285 = vmatprep.subr.bf16.mxu0 %v4014_v41  ;;  %v3065_v41 = vld [vmem:[#allocation10 + $0x420] sm:$0xff]  ;;  %3471 = vmatprep.subr.bf16.mxu1 %v3342_v35  ;;  %v3080_v28 = vunpack.c.l.s8.bf16 %v7054_v27  ;;  %v3930_v35 = vld [vmem:[#allocation14 + $0x2a8] sm:$0xff] }
 0x521   :  { %v3341_v17 = vunpack.c.l.s8.bf16 %v3065_v41  ;;  %v3347_v54 = vunpack.c.h.s8.bf16 %v3065_v41 }
 0x523   :  { %4286 = vmatpush1.bf16.msra.mxu0 %v4013_v38  ;;  %v4067_v38 = vunpack.c.h.s8.bf16 %v3881_v33  ;;  %3472 = vmatpush1.bf16.msra.mxu1 %v3341_v17  ;;  %v4139_v33 = vunpack.c.h.s8.bf16 %v3917_v26  ;;  %v3929_v17 = vld [vmem:[#allocation14 + $0x2a0] sm:$0xff] }
 0x524   :  { %4287 = vmatprep.subr.bf16.mxu0 %v4020_v44  ;;  %v4074_v44 = vunpack.c.l.s8.bf16 %v3888_v47  ;;  %3473 = vmatprep.subr.bf16.mxu1 %v3348_v3  ;;  %v4158_v47 = vunpack.c.l.s8.bf16 %v3930_v35  ;;  %v4164_v3 = vunpack.c.h.s8.bf16 %v3930_v35  ;;  %v4163_v40 = vunpack.c.h.s8.bf16 %v3929_v17  ;;  %v3984_v35 = vld [vmem:[#allocation14 + $0x458] sm:$0xff] }
 0x527   :  { %4288 = vmatpush1.bf16.msra.mxu0 %v4019_v43  ;;  %v3894_v43 = vld [vmem:[#allocation14 + $0x188] sm:$0xff]  ;;  %3474 = vmatpush1.bf16.msra.mxu1 %v3347_v54 }
 0x528   :  { %4289 = vmatprep.subr.bf16.mxu0 %v4026_v29  ;;  %v4086_v29 = vunpack.c.l.s8.bf16 %v3894_v43  ;;  %3475 = vmatprep.subr.bf16.mxu1 %v3354_v11 }
 0x52b   :  { %4290 = vmatpush1.bf16.msra.mxu0 %v4025_v19  ;;  %v4092_v19 = vunpack.c.h.s8.bf16 %v3894_v43 }
 0x52c   :  { %4291 = vmatprep.subr.bf16.mxu0 %v4032_v16  ;;  %v4091_v16 = vunpack.c.h.s8.bf16 %v3893_v48 }
 0x52f   :  { %4292 = vmatpush1.bf16.msra.mxu0 %v4031_v51  ;;  %v3906_v51 = vld [vmem:[#allocation14 + $0x1e8] sm:$0xff] }
 0x530   :  { %4293 = vmatprep.subr.bf16.mxu0 %v4038_v0  ;;  %v4110_v0 = vunpack.c.l.s8.bf16 %v3906_v51 }
 0x533   :  { %4294 = vmatpush1.bf16.msra.mxu0 %v4037_v50  ;;  %v4116_v50 = vunpack.c.h.s8.bf16 %v3906_v51 }
 0x534   :  { %4295 = vmatprep.subr.bf16.mxu0 %v4044_v18  ;;  %v4115_v18 = vunpack.c.h.s8.bf16 %v3905_v39 }
 0x537   :  { %4296 = vmatpush1.bf16.msra.mxu0 %v4043_v9  ;;  %v3071_v9 = vld [vmem:[#allocation10 + $0x450] sm:$0xff] }
 0x538   :  { %4297 = vmatprep.subr.bf16.mxu0 %v4050_v37  ;;  %v3353_v37 = vunpack.c.l.s8.bf16 %v3071_v9 }
 0x53a   :  { %3476 = vmatpush1.bf16.msra.mxu1 %v3353_v37 }
 0x53b   :  { %4298 = vmatpush1.bf16.msra.mxu0 %v4049_v23  ;;  %v3360_v23 = vunpack.c.h.s8.bf16 %v3072_v7  ;;  %v3959_v7 = vld [vmem:[#allocation14 + $0x390] sm:$0xff] }
 0x53c   :  { %4299 = vmatprep.subr.bf16.mxu0 %v4056_v24  ;;  %v3359_v24 = vunpack.c.h.s8.bf16 %v3071_v9  ;;  %v4217_v11 = vunpack.c.l.s8.bf16 %v3959_v7  ;;  %v4223_v37 = vunpack.c.h.s8.bf16 %v3959_v7  ;;  %v3086_v7 = vunpack.c.h.s8.bf16 %v7054_v27 }
 0x53d   :  { %3477 = vmatprep.subr.bf16.mxu1 %v3360_v23  ;;  %v4229_v23 = vunpack.c.l.s8.bf16 %v3965_v10 }
 0x53e   :  { %3478 = vmatpush1.bf16.msra.mxu1 %v3359_v24  ;;  %v3972_v24 = vld [vmem:[#allocation14 + $0x3f8] sm:$0xff] }
 0x53f   :  { %4300 = vmatpush1.bf16.msra.mxu0 %v4055_v31  ;;  %v4133_v31 = vunpack.c.l.s8.bf16 %v3917_v26  ;;  %3488 = vmatprep.subr.bf16.mxu1 %v3080_v28  ;;  %v4242_v26 = vunpack.c.l.s8.bf16 %v3972_v24  ;;  %v3971_v28 = vld [vmem:[#allocation14 + $0x3f0] sm:$0xff] }
 0x540   :  { %4301 = vmatprep.subr.bf16.mxu0 %v4062_v61  ;;  %v3924_v61 = vld [vmem:[#allocation14 + $0x278] sm:$0xff] }
 0x541   :  { %v4146_v34 = vunpack.c.l.s8.bf16 %v3924_v61 }
 0x543   :  { %4302 = vmatpush1.bf16.msra.mxu0 %v4061_v45  ;;  %v3923_v45 = vld [vmem:[#allocation14 + $0x270] sm:$0xff] }
 0x544   :  { %4303 = vmatprep.subr.bf16.mxu0 %v4068_v14  ;;  %v4145_v36 = vunpack.c.l.s8.bf16 %v3923_v45  ;;  %v4152_v14 = vunpack.c.h.s8.bf16 %v3924_v61  ;;  %v4151_v41 = vunpack.c.h.s8.bf16 %v3923_v45  ;;  %v3978_v61 = vld [vmem:[#allocation14 + $0x428] sm:$0xff]  ;;  %v3977_v45 = vld [vmem:[#allocation14 + $0x420] sm:$0xff] }
 0x547   :  { %4304 = vmatpush1.bf16.msra.mxu0 %v4067_v38  ;;  %v4157_v38 = vunpack.c.l.s8.bf16 %v3929_v17  ;;  %v3983_v17 = vld [vmem:[#allocation14 + $0x450] sm:$0xff] }
 0x548   :  { %4305 = vmatprep.subr.bf16.mxu0 %v4074_v44  ;;  %v3936_v44 = vld [vmem:[#allocation14 + $0x2d8] sm:$0xff] }
 0x549   :  { %v4170_v54 = vunpack.c.l.s8.bf16 %v3936_v44  ;;  %v4176_v43 = vunpack.c.h.s8.bf16 %v3936_v44  ;;  %v3850_v44 = vld [vmem:[#allocation14 + $0x28] sm:$0xff] }
 0x54b   :  { %4306 = vmatpush1.bf16.msra.mxu0 %v4073_v42  ;;  %v3935_v42 = vld [vmem:[#allocation14 + $0x2d0] sm:$0xff] }
 0x54c   :  { %4307 = vmatprep.subr.bf16.mxu0 %v4080_v58  ;;  %v4169_v58 = vunpack.c.l.s8.bf16 %v3935_v42 }
 0x54f   :  { %4308 = vmatpush1.bf16.msra.mxu0 %v4079_v2  ;;  %v3942_v2 = vld [vmem:[#allocation14 + $0x308] sm:$0xff] }
 0x550   :  { %4318 = vmatprep.subr.bf16.mxu0 %v4086_v29  ;;  %v4175_v29 = vunpack.c.h.s8.bf16 %v3935_v42  ;;  %v4182_v48 = vunpack.c.l.s8.bf16 %v3942_v2  ;;  %v4188_v30 = vunpack.c.h.s8.bf16 %v3942_v2  ;;  %v7059_v42 = vsub.s32 4, %v6992_v62 }
 0x552   :  { %4310 = vmatmul.mubr.bf16.vlgmr.msra.gmra.mrb[8].mxu0 %v7023_v53 }
 0x553   :  { %4319 = vmatpush1.bf16.msra.mxu0 %v4085_v46  ;;  %4350 = vmatprep.mubr.bf16.mxu0 %v7026_v57  ;;  %v3941_v46 = vld [vmem:[#allocation14 + $0x300] sm:$0xff] }
 0x554   :  { %4320 = vmatprep.subr.bf16.mxu0 %v4092_v19  ;;  %v4181_v19 = vunpack.c.l.s8.bf16 %v3941_v46 }
 0x557   :  { %4321 = vmatpush1.bf16.msra.mxu0 %v4091_v16  ;;  %v3948_v16 = vld [vmem:[#allocation14 + $0x338] sm:$0xff] }
 0x558   :  { %4322 = vmatprep.subr.bf16.mxu0 %v4098_v56  ;;  %v4187_v56 = vunpack.c.h.s8.bf16 %v3941_v46  ;;  %v4194_v55 = vunpack.c.l.s8.bf16 %v3948_v16  ;;  %v4200_v51 = vunpack.c.h.s8.bf16 %v3948_v16 }
 0x55b   :  { %4323 = vmatpush1.bf16.msra.mxu0 %v4097_v59  ;;  %v3947_v59 = vld [vmem:[#allocation14 + $0x330] sm:$0xff] }
 0x55c   :  { %4324 = vmatprep.subr.bf16.mxu0 %v4104_v60  ;;  %v4193_v60 = vunpack.c.l.s8.bf16 %v3947_v59 }
 0x55f   :  { %4325 = vmatpush1.bf16.msra.mxu0 %v4103_v63  ;;  %v3954_v63 = vld [vmem:[#allocation14 + $0x368] sm:$0xff] }
 0x560   :  { %4326 = vmatprep.subr.bf16.mxu0 %v4110_v0  ;;  %v4199_v0 = vunpack.c.h.s8.bf16 %v3947_v59  ;;  %v4206_v39 = vunpack.c.l.s8.bf16 %v3954_v63  ;;  %v4212_v8 = vunpack.c.h.s8.bf16 %v3954_v63 }
 0x563   :  { %4327 = vmatpush1.bf16.msra.mxu0 %v4109_v22  ;;  %v3953_v22 = vld [vmem:[#allocation14 + $0x360] sm:$0xff] }
 0x564   :  { %4328 = vmatprep.subr.bf16.mxu0 %v4116_v50  ;;  %v4205_v50 = vunpack.c.l.s8.bf16 %v3953_v22 }
 0x567   :  { %4329 = vmatpush1.bf16.msra.mxu0 %v4115_v18  ;;  %v3960_v18 = vld [vmem:[#allocation14 + $0x398] sm:$0xff] }
 0x568   :  { %4330 = vmatprep.subr.bf16.mxu0 %v4122_v5  ;;  %v4211_v5 = vunpack.c.h.s8.bf16 %v3953_v22  ;;  %v4218_v6 = vunpack.c.l.s8.bf16 %v3960_v18  ;;  %v4224_v9 = vunpack.c.h.s8.bf16 %v3960_v18  ;;  %v3849_v22 = vld [vmem:[#allocation14 + $0x20] sm:$0xff] }
 0x56b   :  { %4331 = vmatpush1.bf16.msra.mxu0 %v4121_v13  ;;  %v3966_v13 = vld [vmem:[#allocation14 + $0x3c8] sm:$0xff] }
 0x56c   :  { %4332 = vmatprep.subr.bf16.mxu0 %v4128_v12  ;;  %v4230_v12 = vunpack.c.l.s8.bf16 %v3966_v13 }
 0x56f   :  { %4333 = vmatpush1.bf16.msra.mxu0 %v4127_v21  ;;  %v4236_v21 = vunpack.c.h.s8.bf16 %v3966_v13  ;;  %v3856_v13 = vld [vmem:[#allocation14 + $0x58] sm:$0xff] }
 0x570   :  { %4334 = vmatprep.subr.bf16.mxu0 %v4134_v25  ;;  %v4235_v25 = vunpack.c.h.s8.bf16 %v3965_v10 }
 0x573   :  { %4335 = vmatpush1.bf16.msra.mxu0 %v4133_v31  ;;  %v4241_v31 = vunpack.c.l.s8.bf16 %v3971_v28 }
 0x574   :  { %4336 = vmatprep.subr.bf16.mxu0 %v4140_v32  ;;  %v4248_v32 = vunpack.c.h.s8.bf16 %v3972_v24  ;;  %v3855_v24 = vld [vmem:[#allocation14 + $0x50] sm:$0xff] }
 0x577   :  { %4337 = vmatpush1.bf16.msra.mxu0 %v4139_v33  ;;  %v4247_v33 = vunpack.c.h.s8.bf16 %v3971_v28  ;;  %v4012_v28 = vunpack.c.h.s8.bf16 %v3856_v13 }
 0x578   :  { %4338 = vmatprep.subr.bf16.mxu0 %v4146_v34  ;;  %v4254_v34 = vunpack.c.l.s8.bf16 %v3978_v61 }
 0x57b   :  { %4339 = vmatpush1.bf16.msra.mxu0 %v4145_v36  ;;  %v4253_v36 = vunpack.c.l.s8.bf16 %v3977_v45 }
 0x57c   :  { %4340 = vmatprep.subr.bf16.mxu0 %v4152_v14  ;;  %v4260_v14 = vunpack.c.h.s8.bf16 %v3978_v61 }
 0x57f   :  { %4341 = vmatpush1.bf16.msra.mxu0 %v4151_v41  ;;  %v4259_v41 = vunpack.c.h.s8.bf16 %v3977_v45 }
 0x580   :  { %4342 = vmatprep.subr.bf16.mxu0 %v4158_v47  ;;  %v4266_v47 = vunpack.c.l.s8.bf16 %v3984_v35 }
 0x583   :  { %4343 = vmatpush1.bf16.msra.mxu0 %v4157_v38  ;;  %v4265_v38 = vunpack.c.l.s8.bf16 %v3983_v17 }
 0x584   :  { %4344 = vmatprep.subr.bf16.mxu0 %v4164_v3  ;;  %v4272_v3 = vunpack.c.h.s8.bf16 %v3984_v35 }
 0x587   :  { %4345 = vmatpush1.bf16.msra.mxu0 %v4163_v40  ;;  %v4271_v40 = vunpack.c.h.s8.bf16 %v3983_v17 }
 0x588   :  { %4346 = vmatprep.subr.bf16.mxu0 %v4170_v54  ;;  %v3994_v54 = vunpack.c.l.s8.bf16 %v3850_v44 }
 0x58b   :  { %4347 = vmatpush1.bf16.msra.mxu0 %v4169_v58  ;;  %v7062_v58 = vsub.s32 5, %v6992_v62 }
 0x58c   :  { %4348 = vmatprep.subr.bf16.mxu0 %v4176_v43  ;;  %v6112_v43 = vld [vmem:[#allocation7] sm:$0x3f] }
 0x58d   :  { %v2866_v2 = vrot.slane %v6112_v43, %v7059_v42 }
 0x58f   :  { %4349 = vmatpush1.bf16.msra.mxu0 %v4175_v29  ;;  %v2870_v29 = vrot.slane %v6112_v43, %v7062_v58 }
 0x590   :  { %4359 = vmatprep.subr.bf16.mxu0 %v4182_v48  ;;  %v6113_v48 = vld [vmem:[#allocation8] sm:$0x3f] }
 0x591   :  { %v2904_v46 = vrot.slane %v6113_v48, %v7059_v42 }
 0x592   :  { %4351 = vmatmul.mubr.bf16.vlgmr.msra.gmra.mrb[8].mxu0 %v7041_v49 }
 0x593   :  { %4360 = vmatpush1.bf16.msra.mxu0 %v4181_v19 }
 0x594   :  { %4361 = vmatprep.subr.bf16.mxu0 %v4188_v30  ;;  %v2908_v30 = vrot.slane %v6113_v48, %v7062_v58 }
 0x597   :  { %4362 = vmatpush1.bf16.msra.mxu0 %v4187_v56 }
 0x598   :  { %4363 = vmatprep.subr.bf16.mxu0 %v4194_v55 }
 0x59b   :  { %4364 = vmatpush1.bf16.msra.mxu0 %v4193_v60 }
 0x59c   :  { %4365 = vmatprep.subr.bf16.mxu0 %v4200_v51 }
 0x59f   :  { %4366 = vmatpush1.bf16.msra.mxu0 %v4199_v0 }
 0x5a0   :  { %4367 = vmatprep.subr.bf16.mxu0 %v4206_v39  ;;  %v2935_v39 = vld [vmem:[#allocation10 + $0x10] sm:$0xff] }
 0x5a1   :  { %v3079_v18 = vunpack.c.l.s8.bf16 %v2935_v39 }
 0x5a3   :  { %4368 = vmatpush1.bf16.msra.mxu0 %v4205_v50 }
 0x5a4   :  { %4369 = vmatprep.subr.bf16.mxu0 %v4212_v8 }
 0x5a7   :  { %4370 = vmatpush1.bf16.msra.mxu0 %v4211_v5  ;;  %v3993_v5 = vunpack.c.l.s8.bf16 %v3849_v22 }
 0x5a8   :  { %4371 = vmatprep.subr.bf16.mxu0 %v4218_v6 }
 0x5ab   :  { %4372 = vmatpush1.bf16.msra.mxu0 %v4217_v11  ;;  %v4000_v11 = vunpack.c.h.s8.bf16 %v3850_v44 }
 0x5ac   :  { %4373 = vmatprep.subr.bf16.mxu0 %v4224_v9  ;;  %v2942_v9 = vld [vmem:[#allocation10 + $0x48] sm:$0xff] }
 0x5ad   :  { %v3092_v10 = vunpack.c.l.s8.bf16 %v2942_v9 }
 0x5af   :  { %4374 = vmatpush1.bf16.msra.mxu0 %v4223_v37  ;;  %v3085_v37 = vunpack.c.h.s8.bf16 %v2935_v39 }
 0x5b0   :  { %4375 = vmatprep.subr.bf16.mxu0 %v4230_v12  ;;  %v3999_v12 = vunpack.c.h.s8.bf16 %v3849_v22 }
 0x5b3   :  { %4376 = vmatpush1.bf16.msra.mxu0 %v4229_v23  ;;  %v4006_v23 = vunpack.c.l.s8.bf16 %v3856_v13 }
 0x5b4   :  { %4377 = vmatprep.subr.bf16.mxu0 %v4236_v21  ;;  %v2941_v21 = vld [vmem:[#allocation10 + $0x40] sm:$0xff] }
 0x5b5   :  { %v3091_v27 = vunpack.c.l.s8.bf16 %v2941_v21  ;;  %v3097_v61 = vunpack.c.h.s8.bf16 %v2941_v21 }
 0x5b7   :  { %4378 = vmatpush1.bf16.msra.mxu0 %v4235_v25  ;;  %v4005_v25 = vunpack.c.l.s8.bf16 %v3855_v24 }
 0x5b8   :  { %4379 = vmatprep.subr.bf16.mxu0 %v4242_v26  ;;  %v3098_v26 = vunpack.c.h.s8.bf16 %v2942_v9 }
 0x5bb   :  { %4380 = vmatpush1.bf16.msra.mxu0 %v4241_v31  ;;  %v2948_v31 = vld [vmem:[#allocation10 + $0x78] sm:$0xff] }
 0x5bc   :  { %4381 = vmatprep.subr.bf16.mxu0 %v4248_v32  ;;  %v3862_v32 = vld [vmem:[#allocation14 + $0x88] sm:$0xff] }
 0x5bd   :  { %v4018_v45 = vunpack.c.l.s8.bf16 %v3862_v32  ;;  %v4024_v17 = vunpack.c.h.s8.bf16 %v3862_v32 }
 0x5bf   :  { %4382 = vmatpush1.bf16.msra.mxu0 %v4247_v33  ;;  %v4011_v33 = vunpack.c.h.s8.bf16 %v3855_v24 }
 0x5c0   :  { %4383 = vmatprep.subr.bf16.mxu0 %v4254_v34  ;;  %v3104_v34 = vunpack.c.l.s8.bf16 %v2948_v31 }
 0x5c3   :  { %4384 = vmatpush1.bf16.msra.mxu0 %v4253_v36  ;;  %v2947_v36 = vld [vmem:[#allocation10 + $0x70] sm:$0xff] }
 0x5c4   :  { %4385 = vmatprep.subr.bf16.mxu0 %v4260_v14  ;;  %v3861_v14 = vld [vmem:[#allocation14 + $0x80] sm:$0xff]  ;;  %v3103_v35 = vunpack.c.l.s8.bf16 %v2947_v36  ;;  %v3109_v44 = vunpack.c.h.s8.bf16 %v2947_v36 }
 0x5c7   :  { %4386 = vmatpush1.bf16.msra.mxu0 %v4259_v41  ;;  %v4017_v41 = vunpack.c.l.s8.bf16 %v3861_v14 }
 0x5c8   :  { %4387 = vmatprep.subr.bf16.mxu0 %v4266_v47  ;;  %v3110_v47 = vunpack.c.h.s8.bf16 %v2948_v31 }
 0x5cb   :  { %4388 = vmatpush1.bf16.msra.mxu0 %v4265_v38  ;;  %v2954_v38 = vld [vmem:[#allocation10 + $0xa8] sm:$0xff] }
 0x5cc   :  { %4389 = vmatprep.subr.bf16.mxu0 %v4272_v3  ;;  %v3868_v3 = vld [vmem:[#allocation14 + $0xb8] sm:$0xff] }
 0x5cd   :  { %v4030_v43 = vunpack.c.l.s8.bf16 %v3868_v3 }
 0x5cf   :  { %4390 = vmatpush1.bf16.msra.mxu0 %v4271_v40  ;;  %v4023_v40 = vunpack.c.h.s8.bf16 %v3861_v14 }
 0x5d0   :  { %4523 = vmatprep.subr.bf16.mxu0 %v3994_v54  ;;  %v3116_v54 = vunpack.c.l.s8.bf16 %v2954_v38 }
 0x5e5   :  { %v2838_v19 = vpop.f32.mrb[4].mxu0 }
 0x5e6   :  { %v2881_v16 = vmul.f32 %v2866_v2, %v2838_v19  ;;  %v2840_v56 = vpop.f32.mrb[5].mxu0  ;;  %v2953_v2 = vld [vmem:[#allocation10 + $0xa0] sm:$0xff]  ;;  %v3122_v19 = vunpack.c.h.s8.bf16 %v2954_v38 }
 0x5e7   :  { %v2882_v55 = vmul.f32 %v2870_v29, %v2840_v56  ;;  %v2842_v59 = vpop.f32.mrb[6].mxu0  ;;  %v3867_v29 = vld [vmem:[#allocation14 + $0xb0] sm:$0xff]  ;;  %v3115_v48 = vunpack.c.l.s8.bf16 %v2953_v2  ;;  %v3874_v56 = vld [vmem:[#allocation14 + $0xe8] sm:$0xff] }
 0x5e8   :  { %v2919_v60 = vadd.f32 %v2904_v46, %v2881_v16  ;;  %v2843_v51 = vpop.f32.mrb[7].mxu0  ;;  %v4029_v46 = vunpack.c.l.s8.bf16 %v3867_v29  ;;  %v2960_v16 = vld [vmem:[#allocation10 + $0xd8] sm:$0xff]  ;;  %v4035_v59 = vunpack.c.h.s8.bf16 %v3867_v29 }
 0x5e9   :  { %v2920_v63 = vadd.f32 %v2908_v30, %v2882_v55  ;;  %v4036_v30 = vunpack.c.h.s8.bf16 %v3868_v3  ;;  %v3121_v55 = vunpack.c.h.s8.bf16 %v2953_v2  ;;  %v4042_v51 = vunpack.c.l.s8.bf16 %v3874_v56 }
 0x5ea   :  { %v2925_v0 = vmax.f32 %v2919_v60, 0.0  ;;  %v3128_v60 = vunpack.c.l.s8.bf16 %v2960_v16 }
 0x5eb   :  { %v2926_v50 = vmax.f32 %v2920_v63, 0.0  ;;  %v2959_v63 = vld [vmem:[#allocation10 + $0xd0] sm:$0xff] }
 0x5ec   :  { %v7070_v6 = vpack.c.bf16 %v2925_v0, %v2925_v0  ;;  %v3873_v0 = vld [vmem:[#allocation14 + $0xe0] sm:$0xff]  ;;  %v3127_v39 = vunpack.c.l.s8.bf16 %v2959_v63 }
 0x5ed   :  { %v7068_v8 = vpack.c.bf16 %v2926_v50, %v2926_v50  ;;  %v4041_v22 = vunpack.c.l.s8.bf16 %v3873_v0  ;;  %v3134_v50 = vunpack.c.h.s8.bf16 %v2960_v16  ;;  %v4047_v9 = vunpack.c.h.s8.bf16 %v3873_v0 }
 0x5ef   :  { %3479 = vmatprep.mubr.bf16.mxu1 %v7068_v8  ;;  %4391 = vmatprep.mubr.bf16.mxu0 %v7068_v8 }
 0x5f0   :  { %3480 = vmatmul.mubr.bf16.vlgmr.msra.gmra.mrb[4].mxu1 %v7070_v6  ;;  %4392 = vmatmul.mubr.bf16.vlgmr.msra.gmra.mrb[8].mxu0 %v7070_v6 }
 0x5f1   :  { %3489 = vmatpush1.bf16.msra.mxu1 %v3079_v18  ;;  %4524 = vmatpush1.bf16.msra.mxu0 %v3993_v5  ;;  %v4048_v18 = vunpack.c.h.s8.bf16 %v3874_v56  ;;  %v2966_v5 = vld [vmem:[#allocation10 + $0x108] sm:$0xff] }
 0x5f2   :  { %3520 = vmatprep.mubr.bf16.mxu1 %v7021_v52  ;;  %4555 = vmatprep.mubr.bf16.mxu0 %v7021_v52  ;;  %v3140_v13 = vunpack.c.l.s8.bf16 %v2966_v5  ;;  %v3146_v24 = vunpack.c.h.s8.bf16 %v2966_v5 }
 0x5f3   :  { %3490 = vmatprep.subr.bf16.mxu1 %v3086_v7  ;;  %4525 = vmatprep.subr.bf16.mxu0 %v4000_v11  ;;  %v3880_v7 = vld [vmem:[#allocation14 + $0x118] sm:$0xff]  ;;  %v3133_v11 = vunpack.c.h.s8.bf16 %v2959_v63 }
 0x5f5   :  { %3491 = vmatpush1.bf16.msra.mxu1 %v3085_v37  ;;  %4526 = vmatpush1.bf16.msra.mxu0 %v3999_v12  ;;  %v4054_v37 = vunpack.c.l.s8.bf16 %v3880_v7  ;;  %v2965_v12 = vld [vmem:[#allocation10 + $0x100] sm:$0xff] }
 0x5f6   :  { %3492 = vmatprep.subr.bf16.mxu1 %v3092_v10  ;;  %4527 = vmatprep.subr.bf16.mxu0 %v4006_v23  ;;  %v3879_v10 = vld [vmem:[#allocation14 + $0x110] sm:$0xff]  ;;  %v3139_v23 = vunpack.c.l.s8.bf16 %v2965_v12 }
 0x5f7   :  { %v4053_v21 = vunpack.c.l.s8.bf16 %v3879_v10  ;;  %v4059_v31 = vunpack.c.h.s8.bf16 %v3879_v10 }
 0x5f9   :  { %3493 = vmatpush1.bf16.msra.mxu1 %v3091_v27  ;;  %4528 = vmatpush1.bf16.msra.mxu0 %v4005_v25  ;;  %v4060_v27 = vunpack.c.h.s8.bf16 %v3880_v7  ;;  %v2972_v25 = vld [vmem:[#allocation10 + $0x138] sm:$0xff] }
 0x5fa   :  { %3494 = vmatprep.subr.bf16.mxu1 %v3098_v26  ;;  %4529 = vmatprep.subr.bf16.mxu0 %v4012_v28  ;;  %v3886_v26 = vld [vmem:[#allocation14 + $0x148] sm:$0xff]  ;;  %v3145_v28 = vunpack.c.h.s8.bf16 %v2965_v12  ;;  %v3152_v32 = vunpack.c.l.s8.bf16 %v2972_v25  ;;  %v3158_v14 = vunpack.c.h.s8.bf16 %v2972_v25 }
 0x5fd   :  { %3495 = vmatpush1.bf16.msra.mxu1 %v3097_v61  ;;  %4530 = vmatpush1.bf16.msra.mxu0 %v4011_v33  ;;  %v4066_v61 = vunpack.c.l.s8.bf16 %v3886_v26  ;;  %v2971_v33 = vld [vmem:[#allocation10 + $0x130] sm:$0xff] }
 0x5fe   :  { %3496 = vmatprep.subr.bf16.mxu1 %v3104_v34  ;;  %4531 = vmatprep.subr.bf16.mxu0 %v4018_v45  ;;  %v3885_v34 = vld [vmem:[#allocation14 + $0x140] sm:$0xff]  ;;  %v3151_v45 = vunpack.c.l.s8.bf16 %v2971_v33 }
 0x5ff   :  { %v4065_v36 = vunpack.c.l.s8.bf16 %v3885_v34  ;;  %v4071_v38 = vunpack.c.h.s8.bf16 %v3885_v34 }
 0x601   :  { %3497 = vmatpush1.bf16.msra.mxu1 %v3103_v35  ;;  %4532 = vmatpush1.bf16.msra.mxu0 %v4017_v41  ;;  %v4072_v35 = vunpack.c.h.s8.bf16 %v3886_v26  ;;  %v2978_v41 = vld [vmem:[#allocation10 + $0x168] sm:$0xff] }
 0x602   :  { %3498 = vmatprep.subr.bf16.mxu1 %v3110_v47  ;;  %4533 = vmatprep.subr.bf16.mxu0 %v4024_v17  ;;  %v3892_v47 = vld [vmem:[#allocation14 + $0x178] sm:$0xff]  ;;  %v3157_v17 = vunpack.c.h.s8.bf16 %v2971_v33  ;;  %v3164_v3 = vunpack.c.l.s8.bf16 %v2978_v41  ;;  %v3170_v29 = vunpack.c.h.s8.bf16 %v2978_v41 }
 0x605   :  { %3499 = vmatpush1.bf16.msra.mxu1 %v3109_v44  ;;  %4534 = vmatpush1.bf16.msra.mxu0 %v4023_v40  ;;  %v4078_v44 = vunpack.c.l.s8.bf16 %v3892_v47  ;;  %v2977_v40 = vld [vmem:[#allocation10 + $0x160] sm:$0xff] }
 0x606   :  { %3500 = vmatprep.subr.bf16.mxu1 %v3116_v54  ;;  %4535 = vmatprep.subr.bf16.mxu0 %v4030_v43  ;;  %v3891_v54 = vld [vmem:[#allocation14 + $0x170] sm:$0xff]  ;;  %v3163_v43 = vunpack.c.l.s8.bf16 %v2977_v40 }
 0x607   :  { %v4077_v2 = vunpack.c.l.s8.bf16 %v3891_v54  ;;  %v4083_v16 = vunpack.c.h.s8.bf16 %v3891_v54 }
 0x609   :  { %3501 = vmatpush1.bf16.msra.mxu1 %v3115_v48  ;;  %4536 = vmatpush1.bf16.msra.mxu0 %v4029_v46  ;;  %v4084_v48 = vunpack.c.h.s8.bf16 %v3892_v47  ;;  %v2984_v46 = vld [vmem:[#allocation10 + $0x198] sm:$0xff] }
 0x60a   :  { %3502 = vmatprep.subr.bf16.mxu1 %v3122_v19  ;;  %4537 = vmatprep.subr.bf16.mxu0 %v4036_v30  ;;  %v3898_v19 = vld [vmem:[#allocation14 + $0x1a8] sm:$0xff]  ;;  %v3169_v30 = vunpack.c.h.s8.bf16 %v2977_v40  ;;  %v3176_v56 = vunpack.c.l.s8.bf16 %v2984_v46  ;;  %v3182_v0 = vunpack.c.h.s8.bf16 %v2984_v46 }
 0x60d   :  { %3503 = vmatpush1.bf16.msra.mxu1 %v3121_v55  ;;  %4538 = vmatpush1.bf16.msra.mxu0 %v4035_v59  ;;  %v4090_v55 = vunpack.c.l.s8.bf16 %v3898_v19  ;;  %v2983_v59 = vld [vmem:[#allocation10 + $0x190] sm:$0xff] }
 0x60e   :  { %3504 = vmatprep.subr.bf16.mxu1 %v3128_v60  ;;  %4539 = vmatprep.subr.bf16.mxu0 %v4042_v51  ;;  %v3897_v60 = vld [vmem:[#allocation14 + $0x1a0] sm:$0xff]  ;;  %v3175_v51 = vunpack.c.l.s8.bf16 %v2983_v59 }
 0x60f   :  { %v4089_v63 = vunpack.c.l.s8.bf16 %v3897_v60  ;;  %v4095_v5 = vunpack.c.h.s8.bf16 %v3897_v60 }
 0x611   :  { %3505 = vmatpush1.bf16.msra.mxu1 %v3127_v39  ;;  %4540 = vmatpush1.bf16.msra.mxu0 %v4041_v22  ;;  %v4096_v39 = vunpack.c.h.s8.bf16 %v3898_v19  ;;  %v2990_v22 = vld [vmem:[#allocation10 + $0x1c8] sm:$0xff] }
 0x612   :  { %3506 = vmatprep.subr.bf16.mxu1 %v3134_v50  ;;  %4541 = vmatprep.subr.bf16.mxu0 %v4048_v18  ;;  %v3904_v50 = vld [vmem:[#allocation14 + $0x1d8] sm:$0xff]  ;;  %v3181_v18 = vunpack.c.h.s8.bf16 %v2983_v59  ;;  %v3188_v7 = vunpack.c.l.s8.bf16 %v2990_v22  ;;  %v3194_v10 = vunpack.c.h.s8.bf16 %v2990_v22 }
 0x615   :  { %3507 = vmatpush1.bf16.msra.mxu1 %v3133_v11  ;;  %4542 = vmatpush1.bf16.msra.mxu0 %v4047_v9  ;;  %v2989_v11 = vld [vmem:[#allocation10 + $0x1c0] sm:$0xff]  ;;  %v4102_v9 = vunpack.c.l.s8.bf16 %v3904_v50 }
 0x616   :  { %3508 = vmatprep.subr.bf16.mxu1 %v3140_v13  ;;  %4543 = vmatprep.subr.bf16.mxu0 %v4054_v37  ;;  %v3903_v13 = vld [vmem:[#allocation14 + $0x1d0] sm:$0xff]  ;;  %v3187_v37 = vunpack.c.l.s8.bf16 %v2989_v11 }
 0x617   :  { %v4101_v12 = vunpack.c.l.s8.bf16 %v3903_v13  ;;  %v4107_v25 = vunpack.c.h.s8.bf16 %v3903_v13 }
 0x619   :  { %3509 = vmatpush1.bf16.msra.mxu1 %v3139_v23  ;;  %4544 = vmatpush1.bf16.msra.mxu0 %v4053_v21  ;;  %v4108_v23 = vunpack.c.h.s8.bf16 %v3904_v50  ;;  %v2996_v21 = vld [vmem:[#allocation10 + $0x1f8] sm:$0xff] }
 0x61a   :  { %3510 = vmatprep.subr.bf16.mxu1 %v3146_v24  ;;  %4545 = vmatprep.subr.bf16.mxu0 %v4060_v27  ;;  %v3910_v24 = vld [vmem:[#allocation14 + $0x208] sm:$0xff]  ;;  %v3193_v27 = vunpack.c.h.s8.bf16 %v2989_v11  ;;  %v3200_v26 = vunpack.c.l.s8.bf16 %v2996_v21  ;;  %v3206_v34 = vunpack.c.h.s8.bf16 %v2996_v21 }
 0x61d   :  { %3511 = vmatpush1.bf16.msra.mxu1 %v3145_v28  ;;  %4546 = vmatpush1.bf16.msra.mxu0 %v4059_v31  ;;  %v2995_v28 = vld [vmem:[#allocation10 + $0x1f0] sm:$0xff]  ;;  %v4114_v31 = vunpack.c.l.s8.bf16 %v3910_v24 }
 0x61e   :  { %3512 = vmatprep.subr.bf16.mxu1 %v3152_v32  ;;  %4547 = vmatprep.subr.bf16.mxu0 %v4066_v61  ;;  %v3909_v32 = vld [vmem:[#allocation14 + $0x200] sm:$0xff]  ;;  %v3199_v61 = vunpack.c.l.s8.bf16 %v2995_v28 }
 0x61f   :  { %v4113_v33 = vunpack.c.l.s8.bf16 %v3909_v32  ;;  %v4119_v41 = vunpack.c.h.s8.bf16 %v3909_v32 }
 0x621   :  { %3513 = vmatpush1.bf16.msra.mxu1 %v3151_v45  ;;  %4548 = vmatpush1.bf16.msra.mxu0 %v4065_v36  ;;  %v4120_v45 = vunpack.c.h.s8.bf16 %v3910_v24  ;;  %v3002_v36 = vld [vmem:[#allocation10 + $0x228] sm:$0xff] }
 0x622   :  { %3514 = vmatprep.subr.bf16.mxu1 %v3158_v14  ;;  %4549 = vmatprep.subr.bf16.mxu0 %v4072_v35  ;;  %v3916_v14 = vld [vmem:[#allocation14 + $0x238] sm:$0xff]  ;;  %v3205_v35 = vunpack.c.h.s8.bf16 %v2995_v28  ;;  %v3212_v47 = vunpack.c.l.s8.bf16 %v3002_v36  ;;  %v3218_v54 = vunpack.c.h.s8.bf16 %v3002_v36 }
 0x625   :  { %3515 = vmatpush1.bf16.msra.mxu1 %v3157_v17  ;;  %4550 = vmatpush1.bf16.msra.mxu0 %v4071_v38  ;;  %v3001_v17 = vld [vmem:[#allocation10 + $0x220] sm:$0xff]  ;;  %v4126_v38 = vunpack.c.l.s8.bf16 %v3916_v14 }
 0x626   :  { %3516 = vmatprep.subr.bf16.mxu1 %v3164_v3  ;;  %4551 = vmatprep.subr.bf16.mxu0 %v4078_v44  ;;  %v3915_v3 = vld [vmem:[#allocation14 + $0x230] sm:$0xff]  ;;  %v3211_v44 = vunpack.c.l.s8.bf16 %v3001_v17 }
 0x627   :  { %v4125_v40 = vunpack.c.l.s8.bf16 %v3915_v3  ;;  %v4131_v46 = vunpack.c.h.s8.bf16 %v3915_v3 }
 0x629   :  { %3517 = vmatpush1.bf16.msra.mxu1 %v3163_v43  ;;  %4552 = vmatpush1.bf16.msra.mxu0 %v4077_v2  ;;  %v4132_v43 = vunpack.c.h.s8.bf16 %v3916_v14  ;;  %v3008_v2 = vld [vmem:[#allocation10 + $0x258] sm:$0xff] }
 0x62a   :  { %3518 = vmatprep.subr.bf16.mxu1 %v3170_v29  ;;  %4553 = vmatprep.subr.bf16.mxu0 %v4084_v48  ;;  %v3922_v29 = vld [vmem:[#allocation14 + $0x268] sm:$0xff]  ;;  %v3217_v48 = vunpack.c.h.s8.bf16 %v3001_v17  ;;  %v3224_v19 = vunpack.c.l.s8.bf16 %v3008_v2  ;;  %v3230_v60 = vunpack.c.h.s8.bf16 %v3008_v2 }
 0x62d   :  { %3519 = vmatpush1.bf16.msra.mxu1 %v3169_v30  ;;  %4554 = vmatpush1.bf16.msra.mxu0 %v4083_v16  ;;  %v3007_v30 = vld [vmem:[#allocation10 + $0x250] sm:$0xff]  ;;  %v4138_v16 = vunpack.c.l.s8.bf16 %v3922_v29 }
 0x62e   :  { %3529 = vmatprep.subr.bf16.mxu1 %v3176_v56  ;;  %4564 = vmatprep.subr.bf16.mxu0 %v4090_v55  ;;  %v3921_v56 = vld [vmem:[#allocation14 + $0x260] sm:$0xff]  ;;  %v3223_v55 = vunpack.c.l.s8.bf16 %v3007_v30 }
 0x62f   :  { %v4137_v59 = vunpack.c.l.s8.bf16 %v3921_v56  ;;  %v4143_v22 = vunpack.c.h.s8.bf16 %v3921_v56 }
 0x630   :  { %3521 = vmatmul.mubr.bf16.vlgmr.msra.gmra.mrb[8].mxu1 %v7023_v53  ;;  %4556 = vmatmul.mubr.bf16.vlgmr.msra.gmra.mrb[12].mxu0 %v7023_v53 }
 0x631   :  { %3530 = vmatpush1.bf16.msra.mxu1 %v3175_v51  ;;  %3561 = vmatprep.mubr.bf16.mxu1 %v7026_v57  ;;  %v4144_v51 = vunpack.c.h.s8.bf16 %v3922_v29 }
 0x632   :  { %4565 = vmatpush1.bf16.msra.mxu0 %v4089_v63  ;;  %4596 = vmatprep.mubr.bf16.mxu0 %v7026_v57  ;;  %v3014_v63 = vld [vmem:[#allocation10 + $0x288] sm:$0xff] }
 0x633   :  { %3531 = vmatprep.subr.bf16.mxu1 %v3182_v0  ;;  %4566 = vmatprep.subr.bf16.mxu0 %v4096_v39  ;;  %v3928_v0 = vld [vmem:[#allocation14 + $0x298] sm:$0xff]  ;;  %v3229_v39 = vunpack.c.h.s8.bf16 %v3007_v30  ;;  %v3236_v50 = vunpack.c.l.s8.bf16 %v3014_v63  ;;  %v3242_v13 = vunpack.c.h.s8.bf16 %v3014_v63 }
 0x635   :  { %3532 = vmatpush1.bf16.msra.mxu1 %v3181_v18  ;;  %v3013_v18 = vld [vmem:[#allocation10 + $0x280] sm:$0xff] }
 0x636   :  { %4567 = vmatpush1.bf16.msra.mxu0 %v4095_v5  ;;  %3533 = vmatprep.subr.bf16.mxu1 %v3188_v7  ;;  %v4150_v5 = vunpack.c.l.s8.bf16 %v3928_v0  ;;  %v3927_v7 = vld [vmem:[#allocation14 + $0x290] sm:$0xff]  ;;  %v3235_v11 = vunpack.c.l.s8.bf16 %v3013_v18 }
 0x637   :  { %4568 = vmatprep.subr.bf16.mxu0 %v4102_v9  ;;  %v4149_v9 = vunpack.c.l.s8.bf16 %v3927_v7  ;;  %v4155_v21 = vunpack.c.h.s8.bf16 %v3927_v7 }
 0x639   :  { %3534 = vmatpush1.bf16.msra.mxu1 %v3187_v37  ;;  %v4156_v37 = vunpack.c.h.s8.bf16 %v3928_v0 }
 0x63a   :  { %4569 = vmatpush1.bf16.msra.mxu0 %v4101_v12  ;;  %3535 = vmatprep.subr.bf16.mxu1 %v3194_v10  ;;  %v3020_v12 = vld [vmem:[#allocation10 + $0x2b8] sm:$0xff] }
 0x63b   :  { %4570 = vmatprep.subr.bf16.mxu0 %v4108_v23  ;;  %v3934_v10 = vld [vmem:[#allocation14 + $0x2c8] sm:$0xff]  ;;  %v3241_v23 = vunpack.c.h.s8.bf16 %v3013_v18  ;;  %v3248_v24 = vunpack.c.l.s8.bf16 %v3020_v12  ;;  %v3254_v32 = vunpack.c.h.s8.bf16 %v3020_v12 }
 0x63d   :  { %3536 = vmatpush1.bf16.msra.mxu1 %v3193_v27  ;;  %v3019_v27 = vld [vmem:[#allocation10 + $0x2b0] sm:$0xff] }
 0x63e   :  { %4571 = vmatpush1.bf16.msra.mxu0 %v4107_v25  ;;  %3537 = vmatprep.subr.bf16.mxu1 %v3200_v26  ;;  %v4162_v25 = vunpack.c.l.s8.bf16 %v3934_v10  ;;  %v3933_v26 = vld [vmem:[#allocation14 + $0x2c0] sm:$0xff]  ;;  %v3247_v28 = vunpack.c.l.s8.bf16 %v3019_v27 }
 0x63f   :  { %4572 = vmatprep.subr.bf16.mxu0 %v4114_v31  ;;  %v4161_v31 = vunpack.c.l.s8.bf16 %v3933_v26  ;;  %v4167_v36 = vunpack.c.h.s8.bf16 %v3933_v26 }
 0x641   :  { %3538 = vmatpush1.bf16.msra.mxu1 %v3199_v61  ;;  %v4168_v61 = vunpack.c.h.s8.bf16 %v3934_v10 }
 0x642   :  { %4573 = vmatpush1.bf16.msra.mxu0 %v4113_v33  ;;  %3539 = vmatprep.subr.bf16.mxu1 %v3206_v34  ;;  %v3026_v33 = vld [vmem:[#allocation10 + $0x2e8] sm:$0xff] }
 0x643   :  { %4574 = vmatprep.subr.bf16.mxu0 %v4120_v45  ;;  %v3940_v34 = vld [vmem:[#allocation14 + $0x2f8] sm:$0xff]  ;;  %v3253_v45 = vunpack.c.h.s8.bf16 %v3019_v27  ;;  %v3260_v14 = vunpack.c.l.s8.bf16 %v3026_v33  ;;  %v3266_v3 = vunpack.c.h.s8.bf16 %v3026_v33 }
 0x645   :  { %3540 = vmatpush1.bf16.msra.mxu1 %v3205_v35  ;;  %v3025_v35 = vld [vmem:[#allocation10 + $0x2e0] sm:$0xff] }
 0x646   :  { %4575 = vmatpush1.bf16.msra.mxu0 %v4119_v41  ;;  %3541 = vmatprep.subr.bf16.mxu1 %v3212_v47  ;;  %v4174_v41 = vunpack.c.l.s8.bf16 %v3940_v34  ;;  %v3939_v47 = vld [vmem:[#allocation14 + $0x2f0] sm:$0xff]  ;;  %v3259_v17 = vunpack.c.l.s8.bf16 %v3025_v35 }
 0x647   :  { %4576 = vmatprep.subr.bf16.mxu0 %v4126_v38  ;;  %v4173_v38 = vunpack.c.l.s8.bf16 %v3939_v47  ;;  %v4179_v2 = vunpack.c.h.s8.bf16 %v3939_v47 }
 0x649   :  { %3542 = vmatpush1.bf16.msra.mxu1 %v3211_v44  ;;  %v4180_v44 = vunpack.c.h.s8.bf16 %v3940_v34 }
 0x64a   :  { %4577 = vmatpush1.bf16.msra.mxu0 %v4125_v40  ;;  %3543 = vmatprep.subr.bf16.mxu1 %v3218_v54  ;;  %v3032_v40 = vld [vmem:[#allocation10 + $0x318] sm:$0xff] }
 0x64b   :  { %4578 = vmatprep.subr.bf16.mxu0 %v4132_v43  ;;  %v3946_v54 = vld [vmem:[#allocation14 + $0x328] sm:$0xff]  ;;  %v3265_v43 = vunpack.c.h.s8.bf16 %v3025_v35  ;;  %v3272_v29 = vunpack.c.l.s8.bf16 %v3032_v40  ;;  %v3278_v56 = vunpack.c.h.s8.bf16 %v3032_v40 }
 0x64d   :  { %3544 = vmatpush1.bf16.msra.mxu1 %v3217_v48  ;;  %v3031_v48 = vld [vmem:[#allocation10 + $0x310] sm:$0xff] }
 0x64e   :  { %4579 = vmatpush1.bf16.msra.mxu0 %v4131_v46  ;;  %3545 = vmatprep.subr.bf16.mxu1 %v3224_v19  ;;  %v4186_v46 = vunpack.c.l.s8.bf16 %v3946_v54  ;;  %v3945_v19 = vld [vmem:[#allocation14 + $0x320] sm:$0xff]  ;;  %v3271_v30 = vunpack.c.l.s8.bf16 %v3031_v48 }
 0x64f   :  { %4580 = vmatprep.subr.bf16.mxu0 %v4138_v16  ;;  %v4185_v16 = vunpack.c.l.s8.bf16 %v3945_v19  ;;  %v4191_v63 = vunpack.c.h.s8.bf16 %v3945_v19 }
 0x651   :  { %3546 = vmatpush1.bf16.msra.mxu1 %v3223_v55  ;;  %v3038_v55 = vld [vmem:[#allocation10 + $0x348] sm:$0xff] }
 0x652   :  { %4581 = vmatpush1.bf16.msra.mxu0 %v4137_v59  ;;  %3547 = vmatprep.subr.bf16.mxu1 %v3230_v60  ;;  %v4192_v59 = vunpack.c.h.s8.bf16 %v3946_v54  ;;  %v3952_v60 = vld [vmem:[#allocation14 + $0x358] sm:$0xff]  ;;  %v3284_v0 = vunpack.c.l.s8.bf16 %v3038_v55  ;;  %v3290_v7 = vunpack.c.h.s8.bf16 %v3038_v55 }
 0x653   :  { %4582 = vmatprep.subr.bf16.mxu0 %v4144_v51  ;;  %v3277_v51 = vunpack.c.h.s8.bf16 %v3031_v48 }
 0x655   :  { %3548 = vmatpush1.bf16.msra.mxu1 %v3229_v39  ;;  %v3037_v39 = vld [vmem:[#allocation10 + $0x340] sm:$0xff] }
 0x656   :  { %4583 = vmatpush1.bf16.msra.mxu0 %v4143_v22  ;;  %3549 = vmatprep.subr.bf16.mxu1 %v3236_v50  ;;  %v4198_v22 = vunpack.c.l.s8.bf16 %v3952_v60  ;;  %v3951_v50 = vld [vmem:[#allocation14 + $0x350] sm:$0xff]  ;;  %v3283_v18 = vunpack.c.l.s8.bf16 %v3037_v39 }
 0x657   :  { %4584 = vmatprep.subr.bf16.mxu0 %v4150_v5  ;;  %v4197_v5 = vunpack.c.l.s8.bf16 %v3951_v50  ;;  %v4203_v12 = vunpack.c.h.s8.bf16 %v3951_v50 }
 0x659   :  { %3550 = vmatpush1.bf16.msra.mxu1 %v3235_v11  ;;  %v4204_v11 = vunpack.c.h.s8.bf16 %v3952_v60 }
 0x65a   :  { %4585 = vmatpush1.bf16.msra.mxu0 %v4149_v9  ;;  %3551 = vmatprep.subr.bf16.mxu1 %v3242_v13  ;;  %v3044_v9 = vld [vmem:[#allocation10 + $0x378] sm:$0xff] }
 0x65b   :  { %4586 = vmatprep.subr.bf16.mxu0 %v4156_v37  ;;  %v3958_v13 = vld [vmem:[#allocation14 + $0x388] sm:$0xff]  ;;  %v3289_v37 = vunpack.c.h.s8.bf16 %v3037_v39  ;;  %v3296_v10 = vunpack.c.l.s8.bf16 %v3044_v9  ;;  %v3302_v26 = vunpack.c.h.s8.bf16 %v3044_v9 }
 0x65d   :  { %3552 = vmatpush1.bf16.msra.mxu1 %v3241_v23  ;;  %v3043_v23 = vld [vmem:[#allocation10 + $0x370] sm:$0xff] }
 0x65e   :  { %4587 = vmatpush1.bf16.msra.mxu0 %v4155_v21  ;;  %3553 = vmatprep.subr.bf16.mxu1 %v3248_v24  ;;  %v4210_v21 = vunpack.c.l.s8.bf16 %v3958_v13  ;;  %v3957_v24 = vld [vmem:[#allocation14 + $0x380] sm:$0xff]  ;;  %v3295_v27 = vunpack.c.l.s8.bf16 %v3043_v23 }
 0x65f   :  { %4588 = vmatprep.subr.bf16.mxu0 %v4162_v25  ;;  %v4209_v25 = vunpack.c.l.s8.bf16 %v3957_v24  ;;  %v4215_v33 = vunpack.c.h.s8.bf16 %v3957_v24 }
 0x661   :  { %3554 = vmatpush1.bf16.msra.mxu1 %v3247_v28  ;;  %v4216_v28 = vunpack.c.h.s8.bf16 %v3958_v13 }
 0x662   :  { %4589 = vmatpush1.bf16.msra.mxu0 %v4161_v31  ;;  %3555 = vmatprep.subr.bf16.mxu1 %v3254_v32  ;;  %v3050_v31 = vld [vmem:[#allocation10 + $0x3a8] sm:$0xff] }
 0x663   :  { %4590 = vmatprep.subr.bf16.mxu0 %v4168_v61  ;;  %v3964_v32 = vld [vmem:[#allocation14 + $0x3b8] sm:$0xff]  ;;  %v3301_v61 = vunpack.c.h.s8.bf16 %v3043_v23  ;;  %v3308_v34 = vunpack.c.l.s8.bf16 %v3050_v31  ;;  %v3314_v47 = vunpack.c.h.s8.bf16 %v3050_v31 }
 0x665   :  { %3556 = vmatpush1.bf16.msra.mxu1 %v3253_v45  ;;  %v3049_v45 = vld [vmem:[#allocation10 + $0x3a0] sm:$0xff] }
 0x666   :  { %4591 = vmatpush1.bf16.msra.mxu0 %v4167_v36  ;;  %3557 = vmatprep.subr.bf16.mxu1 %v3260_v14  ;;  %v4222_v36 = vunpack.c.l.s8.bf16 %v3964_v32  ;;  %v3963_v14 = vld [vmem:[#allocation14 + $0x3b0] sm:$0xff]  ;;  %v3307_v35 = vunpack.c.l.s8.bf16 %v3049_v45 }
 0x667   :  { %4592 = vmatprep.subr.bf16.mxu0 %v4174_v41  ;;  %v4221_v41 = vunpack.c.l.s8.bf16 %v3963_v14  ;;  %v4227_v40 = vunpack.c.h.s8.bf16 %v3963_v14 }
 0x669   :  { %3558 = vmatpush1.bf16.msra.mxu1 %v3259_v17  ;;  %v4228_v17 = vunpack.c.h.s8.bf16 %v3964_v32 }
 0x66a   :  { %4593 = vmatpush1.bf16.msra.mxu0 %v4173_v38  ;;  %3559 = vmatprep.subr.bf16.mxu1 %v3266_v3  ;;  %v3056_v38 = vld [vmem:[#allocation10 + $0x3d8] sm:$0xff] }
 0x66b   :  { %4594 = vmatprep.subr.bf16.mxu0 %v4180_v44  ;;  %v3970_v3 = vld [vmem:[#allocation14 + $0x3e8] sm:$0xff]  ;;  %v3313_v44 = vunpack.c.h.s8.bf16 %v3049_v45  ;;  %v3320_v54 = vunpack.c.l.s8.bf16 %v3056_v38  ;;  %v3326_v19 = vunpack.c.h.s8.bf16 %v3056_v38 }
 0x66d   :  { %3560 = vmatpush1.bf16.msra.mxu1 %v3265_v43  ;;  %v3055_v43 = vld [vmem:[#allocation10 + $0x3d0] sm:$0xff] }
 0x66e   :  { %4595 = vmatpush1.bf16.msra.mxu0 %v4179_v2  ;;  %3570 = vmatprep.subr.bf16.mxu1 %v3272_v29  ;;  %v4234_v2 = vunpack.c.l.s8.bf16 %v3970_v3  ;;  %v3969_v29 = vld [vmem:[#allocation14 + $0x3e0] sm:$0xff]  ;;  %v3319_v48 = vunpack.c.l.s8.bf16 %v3055_v43  ;;  %v3325_v55 = vunpack.c.h.s8.bf16 %v3055_v43 }
 0x66f   :  { %4605 = vmatprep.subr.bf16.mxu0 %v4186_v46  ;;  %v4233_v46 = vunpack.c.l.s8.bf16 %v3969_v29 }
 0x670   :  { %3562 = vmatmul.mubr.bf16.vlgmr.msra.gmra.mrb[8].mxu1 %v7041_v49 }
 0x671   :  { %4597 = vmatmul.mubr.bf16.vlgmr.msra.gmra.mrb[12].mxu0 %v7041_v49  ;;  %3571 = vmatpush1.bf16.msra.mxu1 %v3271_v30  ;;  %v4240_v30 = vunpack.c.h.s8.bf16 %v3970_v3  ;;  %v2937_v3 = vld [vmem:[#allocation10 + $0x20] sm:$0xff] }
 0x672   :  { %3602 = vmatprep.mubr.bf16.mxu1 %v7068_v8  ;;  %4606 = vmatpush1.bf16.msra.mxu0 %v4185_v16  ;;  %v3062_v16 = vld [vmem:[#allocation10 + $0x408] sm:$0xff]  ;;  %v3087_v43 = vunpack.c.h.s8.bf16 %v2937_v3 }
 0x673   :  { %4637 = vmatprep.mubr.bf16.mxu0 %v7068_v8  ;;  %3572 = vmatprep.subr.bf16.mxu1 %v3278_v56  ;;  %v3976_v56 = vld [vmem:[#allocation14 + $0x418] sm:$0xff]  ;;  %v3332_v60 = vunpack.c.l.s8.bf16 %v3062_v16  ;;  %v3338_v50 = vunpack.c.h.s8.bf16 %v3062_v16 }
 0x674   :  { %4607 = vmatprep.subr.bf16.mxu0 %v4192_v59  ;;  %v4239_v59 = vunpack.c.h.s8.bf16 %v3969_v29  ;;  %v2943_v29 = vld [vmem:[#allocation10 + $0x50] sm:$0xff] }
 0x675   :  { %3573 = vmatpush1.bf16.msra.mxu1 %v3277_v51  ;;  %v3061_v51 = vld [vmem:[#allocation10 + $0x400] sm:$0xff] }
 0x676   :  { %4608 = vmatpush1.bf16.msra.mxu0 %v4191_v63  ;;  %3574 = vmatprep.subr.bf16.mxu1 %v3284_v0  ;;  %v4246_v63 = vunpack.c.l.s8.bf16 %v3976_v56  ;;  %v3975_v0 = vld [vmem:[#allocation14 + $0x410] sm:$0xff]  ;;  %v3331_v39 = vunpack.c.l.s8.bf16 %v3061_v51 }
 0x677   :  { %4609 = vmatprep.subr.bf16.mxu0 %v4198_v22  ;;  %v4245_v22 = vunpack.c.l.s8.bf16 %v3975_v0  ;;  %v4251_v9 = vunpack.c.h.s8.bf16 %v3975_v0 }
 0x679   :  { %3575 = vmatpush1.bf16.msra.mxu1 %v3283_v18  ;;  %v4252_v18 = vunpack.c.h.s8.bf16 %v3976_v56  ;;  %v2949_v56 = vld [vmem:[#allocation10 + $0x80] sm:$0xff] }
 0x67a   :  { %4610 = vmatpush1.bf16.msra.mxu0 %v4197_v5  ;;  %3576 = vmatprep.subr.bf16.mxu1 %v3290_v7  ;;  %v3068_v5 = vld [vmem:[#allocation10 + $0x438] sm:$0xff] }
 0x67b   :  { %4611 = vmatprep.subr.bf16.mxu0 %v4204_v11  ;;  %v3982_v7 = vld [vmem:[#allocation14 + $0x448] sm:$0xff]  ;;  %v3337_v11 = vunpack.c.h.s8.bf16 %v3061_v51  ;;  %v3344_v13 = vunpack.c.l.s8.bf16 %v3068_v5  ;;  %v3350_v24 = vunpack.c.h.s8.bf16 %v3068_v5  ;;  %v7092_v51 = vld [vmem:[#allocation13] sm:$0x3f] }
 0x67c   :  { %v2955_v5 = vld [vmem:[#allocation10 + $0xb0] sm:$0xff] }
 0x67d   :  { %3577 = vmatpush1.bf16.msra.mxu1 %v3289_v37  ;;  %v3067_v37 = vld [vmem:[#allocation10 + $0x430] sm:$0xff] }
 0x67e   :  { %4612 = vmatpush1.bf16.msra.mxu0 %v4203_v12  ;;  %3578 = vmatprep.subr.bf16.mxu1 %v3296_v10  ;;  %v4258_v12 = vunpack.c.l.s8.bf16 %v3982_v7  ;;  %v3981_v10 = vld [vmem:[#allocation14 + $0x440] sm:$0xff]  ;;  %v3343_v23 = vunpack.c.l.s8.bf16 %v3067_v37 }
 0x67f   :  { %4613 = vmatprep.subr.bf16.mxu0 %v4210_v21  ;;  %v4257_v21 = vunpack.c.l.s8.bf16 %v3981_v10  ;;  %v4263_v31 = vunpack.c.h.s8.bf16 %v3981_v10 }
 0x681   :  { %3579 = vmatpush1.bf16.msra.mxu1 %v3295_v27  ;;  %v4264_v27 = vunpack.c.h.s8.bf16 %v3982_v7 }
 0x682   :  { %4614 = vmatpush1.bf16.msra.mxu0 %v4209_v25  ;;  %3580 = vmatprep.subr.bf16.mxu1 %v3302_v26  ;;  %v3074_v25 = vld [vmem:[#allocation10 + $0x468] sm:$0xff] }
 0x683   :  { %4615 = vmatprep.subr.bf16.mxu0 %v4216_v28  ;;  %v3988_v26 = vld [vmem:[#allocation14 + $0x478] sm:$0xff]  ;;  %v3349_v28 = vunpack.c.h.s8.bf16 %v3067_v37  ;;  %v3356_v32 = vunpack.c.l.s8.bf16 %v3074_v25  ;;  %v3362_v14 = vunpack.c.h.s8.bf16 %v3074_v25 }
 0x685   :  { %3581 = vmatpush1.bf16.msra.mxu1 %v3301_v61  ;;  %v3073_v61 = vld [vmem:[#allocation10 + $0x460] sm:$0xff] }
 0x686   :  { %4616 = vmatpush1.bf16.msra.mxu0 %v4215_v33  ;;  %3582 = vmatprep.subr.bf16.mxu1 %v3308_v34  ;;  %v4270_v33 = vunpack.c.l.s8.bf16 %v3988_v26  ;;  %v3987_v34 = vld [vmem:[#allocation14 + $0x470] sm:$0xff]  ;;  %v3355_v45 = vunpack.c.l.s8.bf16 %v3073_v61 }
 0x687   :  { %4617 = vmatprep.subr.bf16.mxu0 %v4222_v36  ;;  %v4269_v36 = vunpack.c.l.s8.bf16 %v3987_v34 }
 0x689   :  { %3583 = vmatpush1.bf16.msra.mxu1 %v3307_v35  ;;  %v4276_v35 = vunpack.c.h.s8.bf16 %v3988_v26 }
 0x68a   :  { %4618 = vmatpush1.bf16.msra.mxu0 %v4221_v41  ;;  %3584 = vmatprep.subr.bf16.mxu1 %v3314_v47  ;;  %v2938_v41 = vld [vmem:[#allocation10 + $0x28] sm:$0xff]  ;;  %v3361_v47 = vunpack.c.h.s8.bf16 %v3073_v61 }
 0x68b   :  { %4619 = vmatprep.subr.bf16.mxu0 %v4228_v17  ;;  %v4275_v17 = vunpack.c.h.s8.bf16 %v3987_v34  ;;  %v3082_v38 = vunpack.c.l.s8.bf16 %v2938_v41 }
 0x68d   :  { %3585 = vmatpush1.bf16.msra.mxu1 %v3313_v44  ;;  %v3081_v44 = vunpack.c.l.s8.bf16 %v2937_v3  ;;  %v4726_v3 = vld [vmem:[#allocation17 + $0x18] sm:$0xff] }
 0x68e   :  { %4620 = vmatpush1.bf16.msra.mxu0 %v4227_v40  ;;  %3586 = vmatprep.subr.bf16.mxu1 %v3320_v54  ;;  %v3088_v40 = vunpack.c.h.s8.bf16 %v2938_v41  ;;  %v2944_v54 = vld [vmem:[#allocation10 + $0x58] sm:$0xff] }
 0x68f   :  { %4621 = vmatprep.subr.bf16.mxu0 %v4234_v2  ;;  %v3094_v2 = vunpack.c.l.s8.bf16 %v2944_v54 }
 0x691   :  { %3587 = vmatpush1.bf16.msra.mxu1 %v3319_v48  ;;  %v3093_v48 = vunpack.c.l.s8.bf16 %v2943_v29 }
 0x692   :  { %4622 = vmatpush1.bf16.msra.mxu0 %v4233_v46  ;;  %3588 = vmatprep.subr.bf16.mxu1 %v3326_v19  ;;  %v3100_v46 = vunpack.c.h.s8.bf16 %v2944_v54  ;;  %v2950_v19 = vld [vmem:[#allocation10 + $0x88] sm:$0xff] }
 0x693   :  { %4623 = vmatprep.subr.bf16.mxu0 %v4240_v30  ;;  %v3099_v30 = vunpack.c.h.s8.bf16 %v2943_v29  ;;  %v3106_v16 = vunpack.c.l.s8.bf16 %v2950_v19  ;;  %v4725_v54 = vld [vmem:[#allocation17 + $0x10] sm:$0xff] }
 0x695   :  { %3589 = vmatpush1.bf16.msra.mxu1 %v3325_v55  ;;  %v3105_v55 = vunpack.c.l.s8.bf16 %v2949_v56 }
 0x696   :  { %4624 = vmatpush1.bf16.msra.mxu0 %v4239_v59  ;;  %3590 = vmatprep.subr.bf16.mxu1 %v3332_v60  ;;  %v7090_v59 = vld [vmem:[#allocation11] sm:$0x3f]  ;;  %v3112_v60 = vunpack.c.h.s8.bf16 %v2950_v19 }
 0x697   :  { %4625 = vmatprep.subr.bf16.mxu0 %v4246_v63  ;;  %v2956_v63 = vld [vmem:[#allocation10 + $0xb8] sm:$0xff]  ;;  %v3739_v0 = vrot.slane %v7090_v59, %v6995_v1  ;;  %v2973_v19 = vld [vmem:[#allocation10 + $0x140] sm:$0xff] }
 0x699   :  { %3591 = vmatpush1.bf16.msra.mxu1 %v3331_v39  ;;  %v3743_v39 = vrot.slane %v7090_v59, %v7000_v15 }
 0x69a   :  { %4626 = vmatpush1.bf16.msra.mxu0 %v4245_v22  ;;  %3592 = vmatprep.subr.bf16.mxu1 %v3338_v50  ;;  %v3111_v22 = vunpack.c.h.s8.bf16 %v2949_v56  ;;  %v3777_v50 = vrot.slane %v7092_v51, %v6995_v1  ;;  %v4732_v56 = vld [vmem:[#allocation17 + $0x48] sm:$0xff] }
 0x69b   :  { %4627 = vmatprep.subr.bf16.mxu0 %v4252_v18  ;;  %v3118_v18 = vunpack.c.l.s8.bf16 %v2956_v63 }
 0x69d   :  { %3593 = vmatpush1.bf16.msra.mxu1 %v3337_v11 }
 0x69e   :  { %4628 = vmatpush1.bf16.msra.mxu0 %v4251_v9  ;;  %3594 = vmatprep.subr.bf16.mxu1 %v3344_v13  ;;  %v3781_v9 = vrot.slane %v7092_v51, %v7000_v15 }
 0x69f   :  { %4629 = vmatprep.subr.bf16.mxu0 %v4258_v12 }
 0x6a1   :  { %3595 = vmatpush1.bf16.msra.mxu1 %v3343_v23 }
 0x6a2   :  { %4630 = vmatpush1.bf16.msra.mxu0 %v4257_v21  ;;  %3596 = vmatprep.subr.bf16.mxu1 %v3350_v24  ;;  %v3117_v24 = vunpack.c.l.s8.bf16 %v2955_v5 }
 0x6a3   :  { %4631 = vmatprep.subr.bf16.mxu0 %v4264_v27 }
 0x6a5   :  { %3597 = vmatpush1.bf16.msra.mxu1 %v3349_v28  ;;  %v3124_v28 = vunpack.c.h.s8.bf16 %v2956_v63  ;;  %v4731_v63 = vld [vmem:[#allocation17 + $0x40] sm:$0xff] }
 0x6a6   :  { %4632 = vmatpush1.bf16.msra.mxu0 %v4263_v31  ;;  %3598 = vmatprep.subr.bf16.mxu1 %v3356_v32  ;;  %v2962_v32 = vld [vmem:[#allocation10 + $0xe8] sm:$0xff] }
 0x6a7   :  { %4633 = vmatprep.subr.bf16.mxu0 %v4270_v33  ;;  %v3123_v33 = vunpack.c.h.s8.bf16 %v2955_v5  ;;  %v3130_v34 = vunpack.c.l.s8.bf16 %v2962_v32  ;;  %v2979_v5 = vld [vmem:[#allocation10 + $0x170] sm:$0xff] }
 0x6a9   :  { %3599 = vmatpush1.bf16.msra.mxu1 %v3355_v45  ;;  %v2961_v45 = vld [vmem:[#allocation10 + $0xe0] sm:$0xff] }
 0x6aa   :  { %4634 = vmatpush1.bf16.msra.mxu0 %v4269_v36  ;;  %3600 = vmatprep.subr.bf16.mxu1 %v3362_v14  ;;  %v3129_v36 = vunpack.c.l.s8.bf16 %v2961_v45  ;;  %v3136_v14 = vunpack.c.h.s8.bf16 %v2962_v32  ;;  %v3135_v41 = vunpack.c.h.s8.bf16 %v2961_v45  ;;  %v2985_v32 = vld [vmem:[#allocation10 + $0x1a0] sm:$0xff] }
 0x6ab   :  { %4635 = vmatprep.subr.bf16.mxu0 %v4276_v35  ;;  %v2968_v35 = vld [vmem:[#allocation10 + $0x118] sm:$0xff] }
 0x6ac   :  { %v4744_v45 = vld [vmem:[#allocation17 + $0xa8] sm:$0xff] }
 0x6ad   :  { %3601 = vmatpush1.bf16.msra.mxu1 %v3361_v47  ;;  %v3142_v47 = vunpack.c.l.s8.bf16 %v2968_v35 }
 0x6ae   :  { %4636 = vmatpush1.bf16.msra.mxu0 %v4275_v17  ;;  %3611 = vmatprep.subr.bf16.mxu1 %v3082_v38  ;;  %v2967_v17 = vld [vmem:[#allocation10 + $0x110] sm:$0xff] }
 0x6af   :  { %v3141_v38 = vunpack.c.l.s8.bf16 %v2967_v17  ;;  %v3147_v29 = vunpack.c.h.s8.bf16 %v2967_v17  ;;  %v3183_v17 = vunpack.c.h.s8.bf16 %v2985_v32 }
 0x6b0   :  { %3603 = vmatmul.mubr.bf16.vlgmr.msra.gmra.mrb[8].mxu1 %v7070_v6 }
 0x6b1   :  { %4638 = vmatmul.mubr.bf16.vlgmr.msra.gmra.mrb[12].mxu0 %v7070_v6  ;;  %3612 = vmatpush1.bf16.msra.mxu1 %v3081_v44  ;;  %v3148_v44 = vunpack.c.h.s8.bf16 %v2968_v35  ;;  %v2992_v35 = vld [vmem:[#allocation10 + $0x1d8] sm:$0xff] }
 0x6b2   :  { %3643 = vmatprep.mubr.bf16.mxu1 %v7021_v52  ;;  %3613 = vmatprep.subr.bf16.mxu1 %v3088_v40  ;;  %v4870_v40 = vunpack.c.l.s8.bf16 %v4726_v3 }
 0x6b4   :  { %5278 = vmatprep.subr.bf16.mxu0 %v4870_v40 }
 0x6b5   :  { %3614 = vmatpush1.bf16.msra.mxu1 %v3087_v43  ;;  %v2974_v43 = vld [vmem:[#allocation10 + $0x148] sm:$0xff] }
 0x6b6   :  { %3615 = vmatprep.subr.bf16.mxu1 %v3094_v2  ;;  %v4869_v2 = vunpack.c.l.s8.bf16 %v4725_v54 }
 0x6b8   :  { %5279 = vmatpush1.bf16.msra.mxu0 %v4869_v2  ;;  %v3196_v2 = vunpack.c.h.s8.bf16 %v2992_v35 }
 0x6b9   :  { %3616 = vmatpush1.bf16.msra.mxu1 %v3093_v48  ;;  %v4876_v48 = vunpack.c.h.s8.bf16 %v4726_v3  ;;  %v3190_v3 = vunpack.c.l.s8.bf16 %v2992_v35 }
 0x6ba   :  { %3617 = vmatprep.subr.bf16.mxu1 %v3100_v46  ;;  %v3154_v46 = vunpack.c.l.s8.bf16 %v2974_v43 }
 0x6bb   :  { %5280 = vmatprep.subr.bf16.mxu0 %v4876_v48  ;;  %v4749_v48 = vld [vmem:[#allocation17 + $0xd0] sm:$0xff] }
 0x6bd   :  { %3618 = vmatpush1.bf16.msra.mxu1 %v3099_v30  ;;  %v4875_v30 = vunpack.c.h.s8.bf16 %v4725_v54 }
 0x6be   :  { %3619 = vmatprep.subr.bf16.mxu1 %v3106_v16  ;;  %v3153_v16 = vunpack.c.l.s8.bf16 %v2973_v19 }
 0x6bf   :  { %5281 = vmatpush1.bf16.msra.mxu0 %v4875_v30 }
 0x6c1   :  { %3620 = vmatpush1.bf16.msra.mxu1 %v3105_v55  ;;  %v3160_v55 = vunpack.c.h.s8.bf16 %v2974_v43  ;;  %v4750_v43 = vld [vmem:[#allocation17 + $0xd8] sm:$0xff] }
 0x6c2   :  { %3621 = vmatprep.subr.bf16.mxu1 %v3112_v60  ;;  %v4882_v60 = vunpack.c.l.s8.bf16 %v4732_v56 }
 0x6c3   :  { %v3481_v7 = vpop.f32.mrb[4].mxu1  ;;  %v7100_v11 = vpop.f32.mrb[8].mxu0 }
 0x6c4   :  { %v3766_v13 = vmul.f32 %v3739_v0, %v3481_v7  ;;  %v3483_v37 = vpop.f32.mrb[5].mxu1  ;;  %v7104_v12 = vpop.f32.mrb[9].mxu0  ;;  %v2980_v0 = vld [vmem:[#allocation10 + $0x178] sm:$0xff]  ;;  %5282 = vmatprep.subr.bf16.mxu0 %v4882_v60  ;;  %v4887_v7 = vunpack.c.h.s8.bf16 %v4731_v63  ;;  %v4923_v60 = vunpack.c.h.s8.bf16 %v4749_v48 }
 0x6c5   :  { %v3767_v10 = vmul.f32 %v3743_v39, %v3483_v37  ;;  %3622 = vmatpush1.bf16.msra.mxu1 %v3111_v22  ;;  %v3485_v23 = vpop.f32.mrb[6].mxu1  ;;  %v4397_v21 = vpop.f32.mrb[10].mxu0  ;;  %v4881_v39 = vunpack.c.l.s8.bf16 %v4731_v63  ;;  %v3159_v22 = vunpack.c.h.s8.bf16 %v2973_v19  ;;  %v3172_v37 = vunpack.c.h.s8.bf16 %v2980_v0 }
 0x6c6   :  { %v7106_v27 = vadd.f32 %v3777_v50, %v3766_v13  ;;  %v3486_v25 = vpop.f32.mrb[7].mxu1  ;;  %v4398_v26 = vpop.f32.mrb[11].mxu0  ;;  %3623 = vmatprep.subr.bf16.mxu1 %v3118_v18  ;;  %v4888_v50 = vunpack.c.h.s8.bf16 %v4732_v56  ;;  %v3166_v18 = vunpack.c.l.s8.bf16 %v2980_v0  ;;  %v4738_v13 = vld [vmem:[#allocation17 + $0x78] sm:$0xff]  ;;  %v4737_v23 = vld [vmem:[#allocation17 + $0x70] sm:$0xff]  ;;  %v4917_v19 = vunpack.c.l.s8.bf16 %v4749_v48  ;;  %v4756_v0 = vld [vmem:[#allocation17 + $0x108] sm:$0xff] }
 0x6c7   :  { %v7108_v31 = vadd.f32 %v3781_v9, %v3767_v10  ;;  %5283 = vmatpush1.bf16.msra.mxu0 %v4881_v39  ;;  %v3165_v9 = vunpack.c.l.s8.bf16 %v2979_v5  ;;  %v4894_v10 = vunpack.c.l.s8.bf16 %v4738_v13  ;;  %v2986_v21 = vld [vmem:[#allocation10 + $0x1a8] sm:$0xff]  ;;  %v3171_v25 = vunpack.c.h.s8.bf16 %v2979_v5 }
 0x6c8   :  { %5284 = vmatprep.subr.bf16.mxu0 %v4888_v50  ;;  %v4900_v26 = vunpack.c.h.s8.bf16 %v4738_v13  ;;  %v4755_v50 = vld [vmem:[#allocation17 + $0x100] sm:$0xff] }
 0x6c9   :  { %v3816_v61 = vcombine.low %v7106_v27, %v7108_v31  ;;  %3624 = vmatpush1.bf16.msra.mxu1 %v3117_v24  ;;  %v4893_v24 = vunpack.c.l.s8.bf16 %v4737_v23  ;;  %v4929_v5 = vunpack.c.l.s8.bf16 %v4755_v50  ;;  %v3003_v13 = vld [vmem:[#allocation10 + $0x230] sm:$0xff]  ;;  %v4773_v31 = vld [vmem:[#allocation17 + $0x190] sm:$0xff] }
 0x6ca   :  { %3625 = vmatprep.subr.bf16.mxu1 %v3124_v28  ;;  %v3178_v28 = vunpack.c.l.s8.bf16 %v2986_v21 }
 0x6cb   :  { %5285 = vmatpush1.bf16.msra.mxu0 %v4887_v7 }
 0x6cc   :  { %5286 = vmatprep.subr.bf16.mxu0 %v4894_v10  ;;  %v4935_v10 = vunpack.c.h.s8.bf16 %v4755_v50 }
 0x6cd   :  { %3626 = vmatpush1.bf16.msra.mxu1 %v3123_v33  ;;  %v4899_v33 = vunpack.c.h.s8.bf16 %v4737_v23  ;;  %v3213_v23 = vunpack.c.l.s8.bf16 %v3003_v13 }
 0x6ce   :  { %3627 = vmatprep.subr.bf16.mxu1 %v3130_v34  ;;  %v3177_v34 = vunpack.c.l.s8.bf16 %v2985_v32 }
 0x6cf   :  { %5287 = vmatpush1.bf16.msra.mxu0 %v4893_v24  ;;  %v4762_v24 = vld [vmem:[#allocation17 + $0x138] sm:$0xff] }
 0x6d0   :  { %5288 = vmatprep.subr.bf16.mxu0 %v4900_v26  ;;  %v4942_v26 = vunpack.c.l.s8.bf16 %v4762_v24 }
 0x6d1   :  { %3628 = vmatpush1.bf16.msra.mxu1 %v3129_v36  ;;  %v3184_v36 = vunpack.c.h.s8.bf16 %v2986_v21 }
 0x6d2   :  { %3629 = vmatprep.subr.bf16.mxu1 %v3136_v14  ;;  %v4906_v14 = vunpack.c.l.s8.bf16 %v4744_v45 }
 0x6d3   :  { %5289 = vmatpush1.bf16.msra.mxu0 %v4899_v33  ;;  %v3219_v33 = vunpack.c.h.s8.bf16 %v3003_v13 }
 0x6d4   :  { %5290 = vmatprep.subr.bf16.mxu0 %v4906_v14 }
 0x6d5   :  { %3630 = vmatpush1.bf16.msra.mxu1 %v3135_v41  ;;  %v4743_v41 = vld [vmem:[#allocation17 + $0xa0] sm:$0xff] }
 0x6d6   :  { %3631 = vmatprep.subr.bf16.mxu1 %v3142_v47  ;;  %v4905_v47 = vunpack.c.l.s8.bf16 %v4743_v41  ;;  %v4911_v40 = vunpack.c.h.s8.bf16 %v4743_v41  ;;  %v4768_v41 = vld [vmem:[#allocation17 + $0x168] sm:$0xff] }
 0x6d8   :  { %5291 = vmatpush1.bf16.msra.mxu0 %v4905_v47 }
 0x6d9   :  { %3632 = vmatpush1.bf16.msra.mxu1 %v3141_v38  ;;  %v4912_v38 = vunpack.c.h.s8.bf16 %v4744_v45  ;;  %v3009_v45 = vld [vmem:[#allocation10 + $0x260] sm:$0xff] }
 0x6da   :  { %3633 = vmatprep.subr.bf16.mxu1 %v3148_v44  ;;  %v2991_v44 = vld [vmem:[#allocation10 + $0x1d0] sm:$0xff]  ;;  %v3225_v35 = vunpack.c.l.s8.bf16 %v3009_v45 }
 0x6db   :  { %5292 = vmatprep.subr.bf16.mxu0 %v4912_v38  ;;  %v3189_v54 = vunpack.c.l.s8.bf16 %v2991_v44  ;;  %v3195_v30 = vunpack.c.h.s8.bf16 %v2991_v44  ;;  %v4767_v38 = vld [vmem:[#allocation17 + $0x160] sm:$0xff] }
 0x6dc   :  { %5293 = vmatpush1.bf16.msra.mxu0 %v4911_v40  ;;  %v4953_v44 = vunpack.c.l.s8.bf16 %v4767_v38  ;;  %v3231_v40 = vunpack.c.h.s8.bf16 %v3009_v45 }
 0x6dd   :  { %3634 = vmatpush1.bf16.msra.mxu1 %v3147_v29  ;;  %v4918_v29 = vunpack.c.l.s8.bf16 %v4750_v43 }
 0x6de   :  { %3635 = vmatprep.subr.bf16.mxu1 %v3154_v46  ;;  %v2998_v46 = vld [vmem:[#allocation10 + $0x208] sm:$0xff] }
 0x6df   :  { %5294 = vmatprep.subr.bf16.mxu0 %v4918_v29  ;;  %v3202_v56 = vunpack.c.l.s8.bf16 %v2998_v46  ;;  %v3208_v39 = vunpack.c.h.s8.bf16 %v2998_v46  ;;  %v4959_v29 = vunpack.c.h.s8.bf16 %v4767_v38 }
 0x6e0   :  { %5295 = vmatpush1.bf16.msra.mxu0 %v4917_v19  ;;  %v7114_v19 = vld [vmem:[#allocation17 + $0x198] sm:$0xff] }
 0x6e1   :  { %3636 = vmatpush1.bf16.msra.mxu1 %v3153_v16  ;;  %v4924_v16 = vunpack.c.h.s8.bf16 %v4750_v43 }
 0x6e2   :  { %3637 = vmatprep.subr.bf16.mxu1 %v3160_v55  ;;  %v2997_v55 = vld [vmem:[#allocation10 + $0x200] sm:$0xff] }
 0x6e3   :  { %5296 = vmatprep.subr.bf16.mxu0 %v4924_v16  ;;  %v3201_v63 = vunpack.c.l.s8.bf16 %v2997_v55  ;;  %v3207_v7 = vunpack.c.h.s8.bf16 %v2997_v55  ;;  %v4966_v16 = vunpack.c.l.s8.bf16 %v7114_v19 }
 0x6e4   :  { %5297 = vmatpush1.bf16.msra.mxu0 %v4923_v60  ;;  %v3021_v60 = vld [vmem:[#allocation10 + $0x2c0] sm:$0xff] }
 0x6e5   :  { %3638 = vmatpush1.bf16.msra.mxu1 %v3159_v22  ;;  %v4930_v22 = vunpack.c.l.s8.bf16 %v4756_v0 }
 0x6e6   :  { %3639 = vmatprep.subr.bf16.mxu1 %v3166_v18  ;;  %v3004_v18 = vld [vmem:[#allocation10 + $0x238] sm:$0xff] }
 0x6e7   :  { %5298 = vmatprep.subr.bf16.mxu0 %v4930_v22  ;;  %v3220_v21 = vunpack.c.h.s8.bf16 %v3004_v18  ;;  %v3255_v22 = vunpack.c.h.s8.bf16 %v3021_v60 }
 0x6e8   :  { %5299 = vmatpush1.bf16.msra.mxu0 %v4929_v5 }
 0x6e9   :  { %3640 = vmatpush1.bf16.msra.mxu1 %v3165_v9  ;;  %v3214_v9 = vunpack.c.l.s8.bf16 %v3004_v18  ;;  %v3027_v18 = vld [vmem:[#allocation10 + $0x2f0] sm:$0xff] }
 0x6ea   :  { %3641 = vmatprep.subr.bf16.mxu1 %v3172_v37  ;;  %v4936_v37 = vunpack.c.h.s8.bf16 %v4756_v0  ;;  %v3261_v5 = vunpack.c.l.s8.bf16 %v3027_v18  ;;  %v3267_v13 = vunpack.c.h.s8.bf16 %v3027_v18 }
 0x6ec   :  { %5300 = vmatprep.subr.bf16.mxu0 %v4936_v37 }
 0x6ed   :  { %3642 = vmatpush1.bf16.msra.mxu1 %v3171_v25  ;;  %5301 = vmatpush1.bf16.msra.mxu0 %v4935_v10  ;;  %v3010_v25 = vld [vmem:[#allocation10 + $0x268] sm:$0xff]  ;;  %v3033_v10 = vld [vmem:[#allocation10 + $0x320] sm:$0xff] }
 0x6ee   :  { %3652 = vmatprep.subr.bf16.mxu1 %v3178_v28  ;;  %v4761_v28 = vld [vmem:[#allocation17 + $0x130] sm:$0xff]  ;;  %5302 = vmatprep.subr.bf16.mxu0 %v4942_v26  ;;  %v3232_v47 = vunpack.c.h.s8.bf16 %v3010_v25 }
 0x6ef   :  { %v4941_v32 = vunpack.c.l.s8.bf16 %v4761_v28  ;;  %v4947_v14 = vunpack.c.h.s8.bf16 %v4761_v28  ;;  %v3039_v28 = vld [vmem:[#allocation10 + $0x350] sm:$0xff] }
 0x6f0   :  { %3644 = vmatmul.mubr.bf16.vlgmr.msra.gmra.mrb[12].mxu1 %v7023_v53  ;;  %v3291_v45 = vunpack.c.h.s8.bf16 %v3039_v28 }
 0x6f1   :  { %3653 = vmatpush1.bf16.msra.mxu1 %v3177_v34  ;;  %3684 = vmatprep.mubr.bf16.mxu1 %v7026_v57  ;;  %v3226_v34 = vunpack.c.l.s8.bf16 %v3010_v25  ;;  %v3279_v25 = vunpack.c.h.s8.bf16 %v3033_v10 }
 0x6f2   :  { %3654 = vmatprep.subr.bf16.mxu1 %v3184_v36  ;;  %5303 = vmatpush1.bf16.msra.mxu0 %v4941_v32  ;;  %v4948_v36 = vunpack.c.h.s8.bf16 %v4762_v24  ;;  %v3040_v24 = vld [vmem:[#allocation10 + $0x358] sm:$0xff]  ;;  %v3285_v32 = vunpack.c.l.s8.bf16 %v3039_v28 }
 0x6f3   :  { %v3286_v26 = vunpack.c.l.s8.bf16 %v3040_v24 }
 0x6f4   :  { %5304 = vmatprep.subr.bf16.mxu0 %v4948_v36 }
 0x6f5   :  { %3655 = vmatpush1.bf16.msra.mxu1 %v3183_v17  ;;  %v4954_v17 = vunpack.c.l.s8.bf16 %v4768_v41 }
 0x6f6   :  { %3656 = vmatprep.subr.bf16.mxu1 %v3190_v3  ;;  %5305 = vmatpush1.bf16.msra.mxu0 %v4947_v14  ;;  %v3016_v3 = vld [vmem:[#allocation10 + $0x298] sm:$0xff]  ;;  %v3045_v14 = vld [vmem:[#allocation10 + $0x380] sm:$0xff] }
 0x6f7   :  { %5306 = vmatprep.subr.bf16.mxu0 %v4954_v17  ;;  %v3238_v43 = vunpack.c.l.s8.bf16 %v3016_v3  ;;  %v3244_v46 = vunpack.c.h.s8.bf16 %v3016_v3  ;;  %v3303_v17 = vunpack.c.h.s8.bf16 %v3045_v14  ;;  %v3051_v3 = vld [vmem:[#allocation10 + $0x3b0] sm:$0xff] }
 0x6f9   :  { %3657 = vmatpush1.bf16.msra.mxu1 %v3189_v54  ;;  %v4960_v54 = vunpack.c.h.s8.bf16 %v4768_v41 }
 0x6fa   :  { %3658 = vmatprep.subr.bf16.mxu1 %v3196_v2  ;;  %v3015_v2 = vld [vmem:[#allocation10 + $0x290] sm:$0xff]  ;;  %5307 = vmatpush1.bf16.msra.mxu0 %v4953_v44  ;;  %v3309_v44 = vunpack.c.l.s8.bf16 %v3051_v3 }
 0x6fb   :  { %5308 = vmatprep.subr.bf16.mxu0 %v4960_v54  ;;  %v3237_v48 = vunpack.c.l.s8.bf16 %v3015_v2  ;;  %v3058_v54 = vld [vmem:[#allocation10 + $0x3e8] sm:$0xff] }
 0x6fd   :  { %3659 = vmatpush1.bf16.msra.mxu1 %v3195_v30  ;;  %v3022_v30 = vld [vmem:[#allocation10 + $0x2c8] sm:$0xff] }
 0x6fe   :  { %3660 = vmatprep.subr.bf16.mxu1 %v3202_v56  ;;  %5309 = vmatpush1.bf16.msra.mxu0 %v4959_v29  ;;  %v3243_v56 = vunpack.c.h.s8.bf16 %v3015_v2  ;;  %v3250_v55 = vunpack.c.l.s8.bf16 %v3022_v30  ;;  %v3256_v0 = vunpack.c.h.s8.bf16 %v3022_v30  ;;  %v3322_v2 = vunpack.c.l.s8.bf16 %v3058_v54  ;;  %v3057_v29 = vld [vmem:[#allocation10 + $0x3e0] sm:$0xff]  ;;  %v3064_v30 = vld [vmem:[#allocation10 + $0x418] sm:$0xff] }
 0x6ff   :  { %5319 = vmatprep.subr.bf16.mxu0 %v4966_v16  ;;  %v3327_v16 = vunpack.c.h.s8.bf16 %v3057_v29 }
 0x701   :  { %3661 = vmatpush1.bf16.msra.mxu1 %v3201_v63  ;;  %v3249_v63 = vunpack.c.l.s8.bf16 %v3021_v60 }
 0x702   :  { %3662 = vmatprep.subr.bf16.mxu1 %v3208_v39  ;;  %v3028_v39 = vld [vmem:[#allocation10 + $0x2f8] sm:$0xff] }
 0x703   :  { %v3262_v50 = vunpack.c.l.s8.bf16 %v3028_v39 }
 0x705   :  { %3663 = vmatpush1.bf16.msra.mxu1 %v3207_v7  ;;  %v3268_v7 = vunpack.c.h.s8.bf16 %v3028_v39 }
 0x706   :  { %3664 = vmatprep.subr.bf16.mxu1 %v3214_v9  ;;  %v3034_v9 = vld [vmem:[#allocation10 + $0x328] sm:$0xff] }
 0x707   :  { %v3274_v37 = vunpack.c.l.s8.bf16 %v3034_v9 }
 0x709   :  { %3665 = vmatpush1.bf16.msra.mxu1 %v3213_v23  ;;  %v3273_v23 = vunpack.c.l.s8.bf16 %v3033_v10 }
 0x70a   :  { %3666 = vmatprep.subr.bf16.mxu1 %v3220_v21  ;;  %v3280_v21 = vunpack.c.h.s8.bf16 %v3034_v9 }
 0x70d   :  { %3667 = vmatpush1.bf16.msra.mxu1 %v3219_v33  ;;  %v3292_v33 = vunpack.c.h.s8.bf16 %v3040_v24 }
 0x70e   :  { %3668 = vmatprep.subr.bf16.mxu1 %v3226_v34  ;;  %v3046_v34 = vld [vmem:[#allocation10 + $0x388] sm:$0xff] }
 0x70f   :  { %v3298_v36 = vunpack.c.l.s8.bf16 %v3046_v34  ;;  %v3304_v41 = vunpack.c.h.s8.bf16 %v3046_v34 }
 0x711   :  { %3669 = vmatpush1.bf16.msra.mxu1 %v3225_v35  ;;  %v3297_v35 = vunpack.c.l.s8.bf16 %v3045_v14 }
 0x712   :  { %3670 = vmatprep.subr.bf16.mxu1 %v3232_v47  ;;  %v3052_v47 = vld [vmem:[#allocation10 + $0x3b8] sm:$0xff] }
 0x713   :  { %v3310_v38 = vunpack.c.l.s8.bf16 %v3052_v47 }
 0x715   :  { %3671 = vmatpush1.bf16.msra.mxu1 %v3231_v40  ;;  %v3316_v40 = vunpack.c.h.s8.bf16 %v3052_v47 }
 0x716   :  { %3672 = vmatprep.subr.bf16.mxu1 %v3238_v43  ;;  %v3315_v43 = vunpack.c.h.s8.bf16 %v3051_v3 }
 0x719   :  { %3673 = vmatpush1.bf16.msra.mxu1 %v3237_v48  ;;  %v3321_v48 = vunpack.c.l.s8.bf16 %v3057_v29 }
 0x71a   :  { %3674 = vmatprep.subr.bf16.mxu1 %v3244_v46  ;;  %v3328_v46 = vunpack.c.h.s8.bf16 %v3058_v54  ;;  %v3866_v54 = vld [vmem:[#allocation14 + $0xa8] sm:$0xff] }
 0x71d   :  { %3675 = vmatpush1.bf16.msra.mxu1 %v3243_v56  ;;  %v3334_v56 = vunpack.c.l.s8.bf16 %v3064_v30 }
 0x71e   :  { %3676 = vmatprep.subr.bf16.mxu1 %v3250_v55  ;;  %v3063_v55 = vld [vmem:[#allocation10 + $0x410] sm:$0xff] }
 0x71f   :  { %v3333_v60 = vunpack.c.l.s8.bf16 %v3063_v55  ;;  %v3339_v39 = vunpack.c.h.s8.bf16 %v3063_v55  ;;  %v3789_v55 = vrot.slane %v7092_v51, %v7003_v4 }
 0x721   :  { %3677 = vmatpush1.bf16.msra.mxu1 %v3249_v63  ;;  %v3340_v63 = vunpack.c.h.s8.bf16 %v3064_v30  ;;  %v3865_v30 = vld [vmem:[#allocation14 + $0xa0] sm:$0xff] }
 0x722   :  { %3678 = vmatprep.subr.bf16.mxu1 %v3256_v0  ;;  %v3070_v0 = vld [vmem:[#allocation10 + $0x448] sm:$0xff] }
 0x725   :  { %3679 = vmatpush1.bf16.msra.mxu1 %v3255_v22  ;;  %v3346_v22 = vunpack.c.l.s8.bf16 %v3070_v0 }
 0x726   :  { %3680 = vmatprep.subr.bf16.mxu1 %v3262_v50  ;;  %v3069_v50 = vld [vmem:[#allocation10 + $0x440] sm:$0xff] }
 0x727   :  { %v3345_v18 = vunpack.c.l.s8.bf16 %v3069_v50  ;;  %v3351_v9 = vunpack.c.h.s8.bf16 %v3069_v50  ;;  %v4027_v50 = vunpack.c.l.s8.bf16 %v3865_v30 }
 0x729   :  { %3681 = vmatpush1.bf16.msra.mxu1 %v3261_v5  ;;  %v3352_v5 = vunpack.c.h.s8.bf16 %v3070_v0 }
 0x72a   :  { %3682 = vmatprep.subr.bf16.mxu1 %v3268_v7  ;;  %v3076_v7 = vld [vmem:[#allocation10 + $0x478] sm:$0xff] }
 0x72d   :  { %3683 = vmatpush1.bf16.msra.mxu1 %v3267_v13  ;;  %v3358_v13 = vunpack.c.l.s8.bf16 %v3076_v7 }
 0x72e   :  { %3693 = vmatprep.subr.bf16.mxu1 %v3274_v37  ;;  %v3075_v37 = vld [vmem:[#allocation10 + $0x470] sm:$0xff] }
 0x72f   :  { %v3357_v10 = vunpack.c.l.s8.bf16 %v3075_v37  ;;  %v3363_v24 = vunpack.c.h.s8.bf16 %v3075_v37 }
 0x730   :  { %3685 = vmatmul.mubr.bf16.vlgmr.msra.gmra.mrb[12].mxu1 %v7041_v49 }
 0x731   :  { %3694 = vmatpush1.bf16.msra.mxu1 %v3273_v23  ;;  %3725 = vmatprep.mubr.bf16.mxu1 %v7068_v8  ;;  %v3364_v23 = vunpack.c.h.s8.bf16 %v3076_v7 }
 0x732   :  { %3695 = vmatprep.subr.bf16.mxu1 %v3280_v21  ;;  %v3848_v21 = vld [vmem:[#allocation14 + $0x18] sm:$0xff] }
 0x735   :  { %3696 = vmatpush1.bf16.msra.mxu1 %v3279_v25  ;;  %v3992_v25 = vunpack.c.l.s8.bf16 %v3848_v21 }
 0x736   :  { %3697 = vmatprep.subr.bf16.mxu1 %v3286_v26  ;;  %v3847_v26 = vld [vmem:[#allocation14 + $0x10] sm:$0xff] }
 0x737   :  { %v3991_v28 = vunpack.c.l.s8.bf16 %v3847_v26  ;;  %v3997_v34 = vunpack.c.h.s8.bf16 %v3847_v26 }
 0x739   :  { %3698 = vmatpush1.bf16.msra.mxu1 %v3285_v32  ;;  %v3998_v32 = vunpack.c.h.s8.bf16 %v3848_v21  ;;  %v4033_v21 = vunpack.c.h.s8.bf16 %v3865_v30 }
 0x73a   :  { %3699 = vmatprep.subr.bf16.mxu1 %v3292_v33  ;;  %v3854_v33 = vld [vmem:[#allocation14 + $0x48] sm:$0xff] }
 0x73d   :  { %3700 = vmatpush1.bf16.msra.mxu1 %v3291_v45  ;;  %v4004_v45 = vunpack.c.l.s8.bf16 %v3854_v33 }
 0x73e   :  { %3701 = vmatprep.subr.bf16.mxu1 %v3298_v36  ;;  %v3853_v36 = vld [vmem:[#allocation14 + $0x40] sm:$0xff] }
 0x73f   :  { %v4003_v14 = vunpack.c.l.s8.bf16 %v3853_v36  ;;  %v4009_v47 = vunpack.c.h.s8.bf16 %v3853_v36  ;;  %v3878_v36 = vld [vmem:[#allocation14 + $0x108] sm:$0xff] }
 0x740   :  { %v4052_v27 = vunpack.c.l.s8.bf16 %v3878_v36 }
 0x741   :  { %3702 = vmatpush1.bf16.msra.mxu1 %v3297_v35  ;;  %v4010_v35 = vunpack.c.h.s8.bf16 %v3854_v33 }
 0x742   :  { %3703 = vmatprep.subr.bf16.mxu1 %v3304_v41  ;;  %v3860_v41 = vld [vmem:[#allocation14 + $0x78] sm:$0xff] }
 0x745   :  { %3704 = vmatpush1.bf16.msra.mxu1 %v3303_v17  ;;  %v4016_v17 = vunpack.c.l.s8.bf16 %v3860_v41 }
 0x746   :  { %3705 = vmatprep.subr.bf16.mxu1 %v3310_v38  ;;  %v3859_v38 = vld [vmem:[#allocation14 + $0x70] sm:$0xff] }
 0x747   :  { %v4015_v3 = vunpack.c.l.s8.bf16 %v3859_v38  ;;  %v4021_v29 = vunpack.c.h.s8.bf16 %v3859_v38 }
 0x749   :  { %3706 = vmatpush1.bf16.msra.mxu1 %v3309_v44  ;;  %v4022_v44 = vunpack.c.h.s8.bf16 %v3860_v41 }
 0x74a   :  { %3707 = vmatprep.subr.bf16.mxu1 %v3316_v40  ;;  %v6507_v40 = vmov 1983009808  }
 0x74d   :  { %3708 = vmatpush1.bf16.msra.mxu1 %v3315_v43  ;;  %v3747_v43 = vrot.slane %v7090_v59, %v7034_v20 }
 0x74e   :  { %3709 = vmatprep.subr.bf16.mxu1 %v3322_v2  ;;  %v3751_v2 = vrot.slane %v7090_v59, %v7003_v4 }
 0x751   :  { %3710 = vmatpush1.bf16.msra.mxu1 %v3321_v48  ;;  %v3785_v48 = vrot.slane %v7092_v51, %v7034_v20 }
 0x752   :  { %3711 = vmatprep.subr.bf16.mxu1 %v3328_v46  ;;  %v4028_v46 = vunpack.c.l.s8.bf16 %v3866_v54 }
 0x755   :  { %3712 = vmatpush1.bf16.msra.mxu1 %v3327_v16 }
 0x756   :  { %3713 = vmatprep.subr.bf16.mxu1 %v3334_v56 }
 0x759   :  { %3714 = vmatpush1.bf16.msra.mxu1 %v3333_v60 }
 0x75a   :  { %3715 = vmatprep.subr.bf16.mxu1 %v3340_v63 }
 0x75d   :  { %3716 = vmatpush1.bf16.msra.mxu1 %v3339_v39 }
 0x75e   :  { %3717 = vmatprep.subr.bf16.mxu1 %v3346_v22 }
 0x761   :  { %3718 = vmatpush1.bf16.msra.mxu1 %v3345_v18 }
 0x762   :  { %3719 = vmatprep.subr.bf16.mxu1 %v3352_v5 }
 0x765   :  { %3720 = vmatpush1.bf16.msra.mxu1 %v3351_v9  ;;  %v4034_v9 = vunpack.c.h.s8.bf16 %v3866_v54  ;;  %v4972_v54 = vunpack.c.h.s8.bf16 %v7114_v19  ;;  %v3883_v19 = vld [vmem:[#allocation14 + $0x130] sm:$0xff] }
 0x766   :  { %3721 = vmatprep.subr.bf16.mxu1 %v3358_v13 }
 0x769   :  { %3722 = vmatpush1.bf16.msra.mxu1 %v3357_v10  ;;  %v3872_v10 = vld [vmem:[#allocation14 + $0xd8] sm:$0xff] }
 0x76a   :  { %3723 = vmatprep.subr.bf16.mxu1 %v3364_v23 }
 0x76d   :  { %3724 = vmatpush1.bf16.msra.mxu1 %v3363_v24  ;;  %v4040_v24 = vunpack.c.l.s8.bf16 %v3872_v10 }
 0x76e   :  { %4400 = vmatprep.subr.bf16.mxu1 %v3992_v25  ;;  %v3871_v25 = vld [vmem:[#allocation14 + $0xd0] sm:$0xff] }
 0x76f   :  { %v4039_v33 = vunpack.c.l.s8.bf16 %v3871_v25 }
 0x770   :  { %3726 = vmatmul.mubr.bf16.vlgmr.msra.gmra.mrb[12].mxu1 %v7070_v6 }
 0x771   :  { %4401 = vmatpush1.bf16.msra.mxu1 %v3991_v28  ;;  %4432 = vmatprep.mubr.bf16.mxu1 %v7021_v52  ;;  %v3819_v52 = vunpack.c.l.s4 %v6507_v40 }
 0x772   :  { %4402 = vmatprep.subr.bf16.mxu1 %v3998_v32 }
 0x773   :  { %v3820_v16 = vunpack.c.0.s8 %v3819_v52 }
 0x775   :  { %4403 = vmatpush1.bf16.msra.mxu1 %v3997_v34  ;;  %v7134_v13 = vsub.s32 %v3820_v16, %v6992_v62  ;;  %v240_v62 = vld [vmem:[%s7289_s29] sm:$0xff]  ;;  %v4046_v34 = vunpack.c.h.s8.bf16 %v3872_v10  ;;  %v3889_v10 = vld [vmem:[#allocation14 + $0x160] sm:$0xff] }
 0x776   :  { %4404 = vmatprep.subr.bf16.mxu1 %v4004_v45 }
 0x777   :  { %v3824_v26 = vrot.slane %v3816_v61, %v7134_v13  ;;  %v3877_v61 = vld [vmem:[#allocation14 + $0x100] sm:$0xff] }
 0x778   :  { %v4057_v30 = vunpack.c.h.s8.bf16 %v3877_v61 }
 0x779   :  { %4405 = vmatpush1.bf16.msra.mxu1 %v4003_v14  ;;  %v4045_v14 = vunpack.c.h.s8.bf16 %v3871_v25 }
 0x77a   :  { %4406 = vmatprep.subr.bf16.mxu1 %v4010_v35 }
 0x77d   :  { %4407 = vmatpush1.bf16.msra.mxu1 %v4009_v47 }
 0x77e   :  { %4408 = vmatprep.subr.bf16.mxu1 %v4016_v17 }
 0x781   :  { %4409 = vmatpush1.bf16.msra.mxu1 %v4015_v3  ;;  %v4965_v3 = vunpack.c.l.s8.bf16 %v4773_v31 }
 0x782   :  { %4410 = vmatprep.subr.bf16.mxu1 %v4022_v44  ;;  %v4051_v44 = vunpack.c.l.s8.bf16 %v3877_v61  ;;  %v3902_v61 = vld [vmem:[#allocation14 + $0x1c8] sm:$0xff] }
 0x783   :  { %v3604_v56 = vpop.f32.mrb[8].mxu1 }
 0x784   :  { %v3768_v60 = vmul.f32 %v3747_v43, %v3604_v56  ;;  %v7129_v63 = vpop.f32.mrb[12].mxu0  ;;  %v3606_v0 = vpop.f32.mrb[9].mxu1 }
 0x785   :  { %v3769_v39 = vmul.f32 %v3751_v2, %v3606_v0  ;;  %v7131_v22 = vpop.f32.mrb[13].mxu0  ;;  %v3608_v59 = vpop.f32.mrb[10].mxu1  ;;  %4411 = vmatpush1.bf16.msra.mxu1 %v4021_v29  ;;  %v4058_v2 = vunpack.c.h.s8.bf16 %v3878_v36  ;;  %v4780_v29 = vld [vmem:[#allocation17 + $0x1c8] sm:$0xff]  ;;  %v4063_v0 = vunpack.c.l.s8.bf16 %v3883_v19 }
 0x786   :  { %v3806_v18 = vadd.f32 %v3785_v48, %v3768_v60  ;;  %v4643_v5 = vpop.f32.mrb[14].mxu0  ;;  %v3609_v7 = vpop.f32.mrb[11].mxu1  ;;  %4412 = vmatprep.subr.bf16.mxu1 %v4028_v46  ;;  %v3884_v48 = vld [vmem:[#allocation14 + $0x138] sm:$0xff]  ;;  %v4971_v46 = vunpack.c.h.s8.bf16 %v4773_v31  ;;  %v4978_v16 = vunpack.c.l.s8.bf16 %v4780_v29  ;;  %v3895_v36 = vld [vmem:[#allocation14 + $0x190] sm:$0xff] }
 0x787   :  { %v3807_v37 = vadd.f32 %v3789_v55, %v3769_v39  ;;  %v4644_v51 = vpop.f32.mrb[15].mxu0  ;;  %v4064_v56 = vunpack.c.l.s8.bf16 %v3884_v48  ;;  %v4779_v55 = vld [vmem:[#allocation17 + $0x1c0] sm:$0xff]  ;;  %v4984_v39 = vunpack.c.h.s8.bf16 %v4780_v29  ;;  %v4070_v59 = vunpack.c.h.s8.bf16 %v3884_v48  ;;  %v4798_v31 = vld [vmem:[#allocation17 + $0x258] sm:$0xff] }
 0x788   :  { %v4977_v60 = vunpack.c.l.s8.bf16 %v4779_v55  ;;  %v4983_v5 = vunpack.c.h.s8.bf16 %v4779_v55  ;;  %v4069_v7 = vunpack.c.h.s8.bf16 %v3883_v19  ;;  %v4785_v51 = vld [vmem:[#allocation17 + $0x1f0] sm:$0xff] }
 0x789   :  { %v3817_v23 = vcombine.low %v3806_v18, %v3807_v37  ;;  %4413 = vmatpush1.bf16.msra.mxu1 %v4027_v50  ;;  %v4786_v50 = vld [vmem:[#allocation17 + $0x1f8] sm:$0xff]  ;;  %v3890_v18 = vld [vmem:[#allocation14 + $0x168] sm:$0xff] }
 0x78a   :  { %4414 = vmatprep.subr.bf16.mxu1 %v4034_v9  ;;  %v4990_v9 = vunpack.c.l.s8.bf16 %v4786_v50  ;;  %v4076_v37 = vunpack.c.l.s8.bf16 %v3890_v18  ;;  %v4082_v25 = vunpack.c.h.s8.bf16 %v3890_v18 }
 0x78b   :  { %v3831_v28 = vrot.slane %v3817_v23, %v7134_v13  ;;  %v4989_v23 = vunpack.c.l.s8.bf16 %v4785_v51 }
 0x78d   :  { %v3832_v32 = vcombine.low %v3824_v26, %v3831_v28  ;;  %4415 = vmatpush1.bf16.msra.mxu1 %v4033_v21  ;;  %v4075_v21 = vunpack.c.l.s8.bf16 %v3889_v10  ;;  %v4792_v26 = vld [vmem:[#allocation17 + $0x228] sm:$0xff]  ;;  %v3896_v28 = vld [vmem:[#allocation14 + $0x198] sm:$0xff] }
 0x78e   :  { %4416 = vmatprep.subr.bf16.mxu1 %v4040_v24  ;;  %v4996_v24 = vunpack.c.h.s8.bf16 %v4786_v50 }
 0x78f   :  { %v3843_v45 = vmul.f32 %v3832_v32, %v240_v62  ;;  %v4995_v62 = vunpack.c.h.s8.bf16 %v4785_v51  ;;  %v4081_v32 = vunpack.c.h.s8.bf16 %v3889_v10 }
 0x791   :  { %4417 = vmatpush1.bf16.msra.mxu1 %v4039_v33  ;;  %v4693_v35 = vrot.slane %v3843_v45, %v7134_v13  ;;  %v4686_v41 = vcombine.high %v3843_v45, %v3843_v45  ;;  %v5002_v33 = vunpack.c.l.s8.bf16 %v4792_v26  ;;  %v4791_v45 = vld [vmem:[#allocation17 + $0x220] sm:$0xff] }
 0x792   :  { %4418 = vmatprep.subr.bf16.mxu1 %v4046_v34  ;;  %v4088_v34 = vunpack.c.l.s8.bf16 %v3896_v28 }
 0x793   :  { %v4701_v47 = vcombine.high %v4693_v35, %v4693_v35  ;;  %v7146_v17 = vrot.slane %v4686_v41, %v7134_v13  ;;  %v7152_v52 = vpack.c.bf16 %v4693_v35, %v4693_v35  ;;  %v4087_v35 = vunpack.c.l.s8.bf16 %v3895_v36 }
 0x794   :  { %v5008_v41 = vunpack.c.h.s8.bf16 %v4792_v26 }
 0x795   :  { %4419 = vmatpush1.bf16.msra.mxu1 %v4045_v14  ;;  %v7148_v38 = vpack.c.bf16 %v4701_v47, %v4701_v47  ;;  %v4702_v40 = vcombine.high %v7146_v17, %v7146_v17  ;;  %v5001_v14 = vunpack.c.l.s8.bf16 %v4791_v45  ;;  %v5007_v47 = vunpack.c.h.s8.bf16 %v4791_v45 }
 0x796   :  { %4420 = vmatprep.subr.bf16.mxu1 %v4052_v27  ;;  %v4094_v27 = vunpack.c.h.s8.bf16 %v3896_v28 }
 0x797   :  { %5310 = vmatprep.mubr.bf16.mxu0 %v7148_v38  ;;  %v7156_v43 = vpack.c.bf16 %v4702_v40, %v4702_v40  ;;  %v4100_v40 = vunpack.c.l.s8.bf16 %v3902_v61 }
 0x798   :  { %5311 = vmatmul.mubr.bf16.vlgmr.msra.gmra.mrb[16].mxu0 %v7152_v52 }
 0x799   :  { %5320 = vmatpush1.bf16.msra.mxu0 %v4965_v3  ;;  %4421 = vmatpush1.bf16.msra.mxu1 %v4051_v44  ;;  %v4093_v3 = vunpack.c.h.s8.bf16 %v3895_v36  ;;  %v5014_v44 = vunpack.c.l.s8.bf16 %v4798_v31 }
 0x79a   :  { %5351 = vmatprep.mubr.bf16.mxu0 %v7156_v43  ;;  %5321 = vmatprep.subr.bf16.mxu0 %v4972_v54  ;;  %v4797_v54 = vld [vmem:[#allocation17 + $0x250] sm:$0xff] }
 0x79b   :  { %4422 = vmatprep.subr.bf16.mxu1 %v4058_v2  ;;  %v3901_v2 = vld [vmem:[#allocation14 + $0x1c0] sm:$0xff]  ;;  %v5013_v29 = vunpack.c.l.s8.bf16 %v4797_v54 }
 0x79c   :  { %v4099_v48 = vunpack.c.l.s8.bf16 %v3901_v2 }
 0x79d   :  { %5322 = vmatpush1.bf16.msra.mxu0 %v4971_v46  ;;  %4423 = vmatpush1.bf16.msra.mxu1 %v4057_v30  ;;  %v5020_v46 = vunpack.c.h.s8.bf16 %v4798_v31  ;;  %v4804_v30 = vld [vmem:[#allocation17 + $0x288] sm:$0xff] }
 0x79e   :  { %5323 = vmatprep.subr.bf16.mxu0 %v4978_v16  ;;  %4424 = vmatprep.subr.bf16.mxu1 %v4064_v56  ;;  %v3908_v16 = vld [vmem:[#allocation14 + $0x1f8] sm:$0xff]  ;;  %v5019_v56 = vunpack.c.h.s8.bf16 %v4797_v54  ;;  %v5026_v55 = vunpack.c.l.s8.bf16 %v4804_v30  ;;  %v5032_v50 = vunpack.c.h.s8.bf16 %v4804_v30  ;;  %v7164_v30 = vpack.c.bf16 %v7146_v17, %v7146_v17 }
 0x79f   :  { %v4112_v19 = vunpack.c.l.s8.bf16 %v3908_v16  ;;  %v4118_v18 = vunpack.c.h.s8.bf16 %v3908_v16 }
 0x7a1   :  { %5324 = vmatpush1.bf16.msra.mxu0 %v4977_v60  ;;  %4425 = vmatpush1.bf16.msra.mxu1 %v4063_v0  ;;  %v4803_v60 = vld [vmem:[#allocation17 + $0x280] sm:$0xff]  ;;  %v3907_v0 = vld [vmem:[#allocation14 + $0x1f0] sm:$0xff] }
 0x7a2   :  { %5325 = vmatprep.subr.bf16.mxu0 %v4984_v39  ;;  %4426 = vmatprep.subr.bf16.mxu1 %v4070_v59  ;;  %v5025_v39 = vunpack.c.l.s8.bf16 %v4803_v60  ;;  %v4111_v59 = vunpack.c.l.s8.bf16 %v3907_v0 }
 0x7a5   :  { %5326 = vmatpush1.bf16.msra.mxu0 %v4983_v5  ;;  %4427 = vmatpush1.bf16.msra.mxu1 %v4069_v7  ;;  %v4810_v5 = vld [vmem:[#allocation17 + $0x2b8] sm:$0xff]  ;;  %v3914_v7 = vld [vmem:[#allocation14 + $0x228] sm:$0xff] }
 0x7a6   :  { %5327 = vmatprep.subr.bf16.mxu0 %v4990_v9  ;;  %4428 = vmatprep.subr.bf16.mxu1 %v4076_v37  ;;  %v5031_v9 = vunpack.c.h.s8.bf16 %v4803_v60  ;;  %v4117_v37 = vunpack.c.h.s8.bf16 %v3907_v0  ;;  %v5038_v51 = vunpack.c.l.s8.bf16 %v4810_v5  ;;  %v4124_v10 = vunpack.c.l.s8.bf16 %v3914_v7 }
 0x7a7   :  { %v5044_v26 = vunpack.c.h.s8.bf16 %v4810_v5  ;;  %v4130_v28 = vunpack.c.h.s8.bf16 %v3914_v7 }
 0x7a9   :  { %5328 = vmatpush1.bf16.msra.mxu0 %v4989_v23  ;;  %4429 = vmatpush1.bf16.msra.mxu1 %v4075_v21  ;;  %v4809_v23 = vld [vmem:[#allocation17 + $0x2b0] sm:$0xff]  ;;  %v3913_v21 = vld [vmem:[#allocation14 + $0x220] sm:$0xff] }
 0x7aa   :  { %5329 = vmatprep.subr.bf16.mxu0 %v4996_v24  ;;  %4430 = vmatprep.subr.bf16.mxu1 %v4082_v25  ;;  %v5037_v24 = vunpack.c.l.s8.bf16 %v4809_v23  ;;  %v4123_v25 = vunpack.c.l.s8.bf16 %v3913_v21 }
 0x7ad   :  { %5330 = vmatpush1.bf16.msra.mxu0 %v4995_v62  ;;  %4431 = vmatpush1.bf16.msra.mxu1 %v4081_v32  ;;  %v4816_v62 = vld [vmem:[#allocation17 + $0x2e8] sm:$0xff]  ;;  %v3920_v32 = vld [vmem:[#allocation14 + $0x258] sm:$0xff] }
 0x7ae   :  { %5331 = vmatprep.subr.bf16.mxu0 %v5002_v33  ;;  %4441 = vmatprep.subr.bf16.mxu1 %v4088_v34  ;;  %v5043_v33 = vunpack.c.h.s8.bf16 %v4809_v23  ;;  %v4129_v34 = vunpack.c.h.s8.bf16 %v3913_v21  ;;  %v5050_v45 = vunpack.c.l.s8.bf16 %v4816_v62  ;;  %v4136_v36 = vunpack.c.l.s8.bf16 %v3920_v32  ;;  %v3937_v21 = vld [vmem:[#allocation14 + $0x2e0] sm:$0xff] }
 0x7af   :  { %v5056_v31 = vunpack.c.h.s8.bf16 %v4816_v62 }
 0x7b0   :  { %4433 = vmatmul.mubr.bf16.vlgmr.msra.gmra.mrb[16].mxu1 %v7023_v53  ;;  %v4106_v53 = vunpack.c.h.s8.bf16 %v3902_v61  ;;  %v4142_v61 = vunpack.c.h.s8.bf16 %v3920_v32 }
 0x7b1   :  { %5332 = vmatpush1.bf16.msra.mxu0 %v5001_v14  ;;  %4442 = vmatpush1.bf16.msra.mxu1 %v4087_v35  ;;  %v4815_v14 = vld [vmem:[#allocation17 + $0x2e0] sm:$0xff]  ;;  %v3919_v35 = vld [vmem:[#allocation14 + $0x250] sm:$0xff] }
 0x7b2   :  { %4473 = vmatprep.mubr.bf16.mxu1 %v7026_v57  ;;  %5333 = vmatprep.subr.bf16.mxu0 %v5008_v41  ;;  %v4105_v57 = vunpack.c.h.s8.bf16 %v3901_v2  ;;  %v5049_v41 = vunpack.c.l.s8.bf16 %v4815_v14  ;;  %v3925_v2 = vld [vmem:[#allocation14 + $0x280] sm:$0xff] }
 0x7b3   :  { %4443 = vmatprep.subr.bf16.mxu1 %v4094_v27  ;;  %v4135_v27 = vunpack.c.l.s8.bf16 %v3919_v35 }
 0x7b5   :  { %5334 = vmatpush1.bf16.msra.mxu0 %v5007_v47  ;;  %4444 = vmatpush1.bf16.msra.mxu1 %v4093_v3  ;;  %v3926_v47 = vld [vmem:[#allocation14 + $0x288] sm:$0xff]  ;;  %v4822_v3 = vld [vmem:[#allocation17 + $0x318] sm:$0xff] }
 0x7b6   :  { %5335 = vmatprep.subr.bf16.mxu0 %v5014_v44  ;;  %4445 = vmatprep.subr.bf16.mxu1 %v4100_v40  ;;  %v5055_v44 = vunpack.c.h.s8.bf16 %v4815_v14  ;;  %v4141_v40 = vunpack.c.h.s8.bf16 %v3919_v35  ;;  %v4148_v54 = vunpack.c.l.s8.bf16 %v3926_v47  ;;  %v4154_v16 = vunpack.c.h.s8.bf16 %v3926_v47  ;;  %v3943_v35 = vld [vmem:[#allocation14 + $0x310] sm:$0xff] }
 0x7b9   :  { %5336 = vmatpush1.bf16.msra.mxu0 %v5013_v29  ;;  %4446 = vmatpush1.bf16.msra.mxu1 %v4099_v48  ;;  %v5062_v29 = vunpack.c.l.s8.bf16 %v4822_v3  ;;  %v4821_v48 = vld [vmem:[#allocation17 + $0x310] sm:$0xff] }
 0x7ba   :  { %5337 = vmatprep.subr.bf16.mxu0 %v5020_v46  ;;  %4447 = vmatprep.subr.bf16.mxu1 %v4106_v53  ;;  %v4147_v46 = vunpack.c.l.s8.bf16 %v3925_v2  ;;  %v5061_v53 = vunpack.c.l.s8.bf16 %v4821_v48  ;;  %v5067_v60 = vunpack.c.h.s8.bf16 %v4821_v48 }
 0x7bd   :  { %5338 = vmatpush1.bf16.msra.mxu0 %v5019_v56  ;;  %4448 = vmatpush1.bf16.msra.mxu1 %v4105_v57  ;;  %v5068_v56 = vunpack.c.h.s8.bf16 %v4822_v3  ;;  %v3932_v57 = vld [vmem:[#allocation14 + $0x2b8] sm:$0xff]  ;;  %v3950_v3 = vld [vmem:[#allocation14 + $0x348] sm:$0xff] }
 0x7be   :  { %5339 = vmatprep.subr.bf16.mxu0 %v5026_v55  ;;  %4449 = vmatprep.subr.bf16.mxu1 %v4112_v19  ;;  %v4828_v55 = vld [vmem:[#allocation17 + $0x348] sm:$0xff]  ;;  %v4153_v19 = vunpack.c.h.s8.bf16 %v3925_v2  ;;  %v4160_v0 = vunpack.c.l.s8.bf16 %v3932_v57  ;;  %v4166_v5 = vunpack.c.h.s8.bf16 %v3932_v57  ;;  %v4196_v2 = vunpack.c.l.s8.bf16 %v3950_v3 }
 0x7bf   :  { %v5080_v7 = vunpack.c.h.s8.bf16 %v4828_v55 }
 0x7c1   :  { %5340 = vmatpush1.bf16.msra.mxu0 %v5025_v39  ;;  %4450 = vmatpush1.bf16.msra.mxu1 %v4111_v59  ;;  %v3931_v39 = vld [vmem:[#allocation14 + $0x2b0] sm:$0xff]  ;;  %v5074_v59 = vunpack.c.l.s8.bf16 %v4828_v55 }
 0x7c2   :  { %5341 = vmatprep.subr.bf16.mxu0 %v5032_v50  ;;  %4451 = vmatprep.subr.bf16.mxu1 %v4118_v18  ;;  %v4827_v50 = vld [vmem:[#allocation17 + $0x340] sm:$0xff]  ;;  %v4159_v17 = vunpack.c.l.s8.bf16 %v3931_v39 }
 0x7c3   :  { %v5073_v18 = vunpack.c.l.s8.bf16 %v4827_v50 }
 0x7c5   :  { %5342 = vmatpush1.bf16.msra.mxu0 %v5031_v9  ;;  %4452 = vmatpush1.bf16.msra.mxu1 %v4117_v37  ;;  %v3938_v9 = vld [vmem:[#allocation14 + $0x2e8] sm:$0xff]  ;;  %v4834_v37 = vld [vmem:[#allocation17 + $0x378] sm:$0xff] }
 0x7c6   :  { %5343 = vmatprep.subr.bf16.mxu0 %v5038_v51  ;;  %4453 = vmatprep.subr.bf16.mxu1 %v4124_v10  ;;  %v4165_v51 = vunpack.c.h.s8.bf16 %v3931_v39  ;;  %v5079_v10 = vunpack.c.h.s8.bf16 %v4827_v50  ;;  %v4172_v23 = vunpack.c.l.s8.bf16 %v3938_v9  ;;  %v4178_v62 = vunpack.c.h.s8.bf16 %v3938_v9  ;;  %v4851_v50 = vld [vmem:[#allocation17 + $0x400] sm:$0xff] }
 0x7c7   :  { %v5092_v32 = vunpack.c.h.s8.bf16 %v4834_v37 }
 0x7c9   :  { %5344 = vmatpush1.bf16.msra.mxu0 %v5037_v24  ;;  %4454 = vmatpush1.bf16.msra.mxu1 %v4123_v25  ;;  %v5086_v24 = vunpack.c.l.s8.bf16 %v4834_v37  ;;  %v4833_v25 = vld [vmem:[#allocation17 + $0x370] sm:$0xff]  ;;  %v4858_v37 = vld [vmem:[#allocation17 + $0x438] sm:$0xff] }
 0x7ca   :  { %5345 = vmatprep.subr.bf16.mxu0 %v5044_v26  ;;  %4455 = vmatprep.subr.bf16.mxu1 %v4130_v28  ;;  %v4171_v26 = vunpack.c.l.s8.bf16 %v3937_v21  ;;  %v5085_v28 = vunpack.c.l.s8.bf16 %v4833_v25 }
 0x7cd   :  { %5346 = vmatpush1.bf16.msra.mxu0 %v5043_v33  ;;  %4456 = vmatpush1.bf16.msra.mxu1 %v4129_v34  ;;  %v3944_v33 = vld [vmem:[#allocation14 + $0x318] sm:$0xff]  ;;  %v4840_v34 = vld [vmem:[#allocation17 + $0x3a8] sm:$0xff] }
 0x7ce   :  { %5347 = vmatprep.subr.bf16.mxu0 %v5050_v45  ;;  %4457 = vmatprep.subr.bf16.mxu1 %v4136_v36  ;;  %v4177_v45 = vunpack.c.h.s8.bf16 %v3937_v21  ;;  %v5091_v36 = vunpack.c.h.s8.bf16 %v4833_v25  ;;  %v4184_v14 = vunpack.c.l.s8.bf16 %v3944_v33  ;;  %v5127_v21 = vunpack.c.h.s8.bf16 %v4851_v50  ;;  %v4857_v25 = vld [vmem:[#allocation17 + $0x430] sm:$0xff] }
 0x7d1   :  { %5348 = vmatpush1.bf16.msra.mxu0 %v5049_v41  ;;  %4458 = vmatpush1.bf16.msra.mxu1 %v4135_v27  ;;  %v5098_v41 = vunpack.c.l.s8.bf16 %v4840_v34  ;;  %v4839_v27 = vld [vmem:[#allocation17 + $0x3a0] sm:$0xff] }
 0x7d2   :  { %5349 = vmatprep.subr.bf16.mxu0 %v5056_v31  ;;  %4459 = vmatprep.subr.bf16.mxu1 %v4142_v61  ;;  %v4183_v31 = vunpack.c.l.s8.bf16 %v3943_v35  ;;  %v4190_v61 = vunpack.c.h.s8.bf16 %v3944_v33  ;;  %v5097_v47 = vunpack.c.l.s8.bf16 %v4839_v27  ;;  %v5103_v48 = vunpack.c.h.s8.bf16 %v4839_v27  ;;  %v4863_v27 = vld [vmem:[#allocation17 + $0x460] sm:$0xff] }
 0x7d3   :  { %v5140_v33 = vunpack.c.h.s8.bf16 %v4858_v37 }
 0x7d5   :  { %5350 = vmatpush1.bf16.msra.mxu0 %v5055_v44  ;;  %4460 = vmatpush1.bf16.msra.mxu1 %v4141_v40  ;;  %v5104_v44 = vunpack.c.h.s8.bf16 %v4840_v34  ;;  %v4846_v40 = vld [vmem:[#allocation17 + $0x3d8] sm:$0xff]  ;;  %v4864_v34 = vld [vmem:[#allocation17 + $0x468] sm:$0xff] }
 0x7d6   :  { %4461 = vmatprep.subr.bf16.mxu1 %v4148_v54  ;;  %5360 = vmatprep.subr.bf16.mxu0 %v5062_v29  ;;  %v4189_v54 = vunpack.c.h.s8.bf16 %v3943_v35  ;;  %v3949_v29 = vld [vmem:[#allocation14 + $0x340] sm:$0xff]  ;;  %v5116_v55 = vunpack.c.h.s8.bf16 %v4846_v40  ;;  %v5139_v35 = vunpack.c.h.s8.bf16 %v4857_v25 }
 0x7d8   :  { %5352 = vmatmul.mubr.bf16.vlgmr.msra.gmra.mrb[16].mxu0 %v7164_v30 }
 0x7d9   :  { %4462 = vmatpush1.bf16.msra.mxu1 %v4147_v46  ;;  %5361 = vmatpush1.bf16.msra.mxu0 %v5061_v53  ;;  %v5110_v46 = vunpack.c.l.s8.bf16 %v4846_v40  ;;  %v4845_v53 = vld [vmem:[#allocation17 + $0x3d0] sm:$0xff] }
 0x7da   :  { %4463 = vmatprep.subr.bf16.mxu1 %v4154_v16  ;;  %5362 = vmatprep.subr.bf16.mxu0 %v5068_v56  ;;  %v4195_v16 = vunpack.c.l.s8.bf16 %v3949_v29  ;;  %v4202_v56 = vunpack.c.h.s8.bf16 %v3950_v3  ;;  %v5109_v57 = vunpack.c.l.s8.bf16 %v4845_v53  ;;  %v5115_v39 = vunpack.c.h.s8.bf16 %v4845_v53  ;;  %v3974_v3 = vld [vmem:[#allocation14 + $0x408] sm:$0xff]  ;;  %v3980_v53 = vld [vmem:[#allocation14 + $0x438] sm:$0xff] }
 0x7dd   :  { %4464 = vmatpush1.bf16.msra.mxu1 %v4153_v19  ;;  %5363 = vmatpush1.bf16.msra.mxu0 %v5067_v60  ;;  %v4852_v19 = vld [vmem:[#allocation17 + $0x408] sm:$0xff] }
 0x7de   :  { %4465 = vmatprep.subr.bf16.mxu1 %v4160_v0  ;;  %5364 = vmatprep.subr.bf16.mxu0 %v5074_v59  ;;  %v3955_v0 = vld [vmem:[#allocation14 + $0x370] sm:$0xff]  ;;  %v5122_v59 = vunpack.c.l.s8.bf16 %v4852_v19  ;;  %v5128_v9 = vunpack.c.h.s8.bf16 %v4852_v19  ;;  %v3986_v19 = vld [vmem:[#allocation14 + $0x468] sm:$0xff] }
 0x7e1   :  { %4466 = vmatpush1.bf16.msra.mxu1 %v4159_v17  ;;  %5365 = vmatpush1.bf16.msra.mxu0 %v5073_v18  ;;  %v4207_v17 = vunpack.c.l.s8.bf16 %v3955_v0 }
 0x7e2   :  { %4467 = vmatprep.subr.bf16.mxu1 %v4166_v5  ;;  %5366 = vmatprep.subr.bf16.mxu0 %v5080_v7  ;;  %v5121_v5 = vunpack.c.l.s8.bf16 %v4851_v50  ;;  %v3962_v7 = vld [vmem:[#allocation14 + $0x3a8] sm:$0xff] }
 0x7e3   :  { %v4724_v50 = vld [vmem:[#allocation17 + $0x8] sm:$0xff] }
 0x7e5   :  { %4468 = vmatpush1.bf16.msra.mxu1 %v4165_v51  ;;  %5367 = vmatpush1.bf16.msra.mxu0 %v5079_v10  ;;  %v4213_v51 = vunpack.c.h.s8.bf16 %v3955_v0  ;;  %v4220_v10 = vunpack.c.l.s8.bf16 %v3962_v7  ;;  %v3985_v0 = vld [vmem:[#allocation14 + $0x460] sm:$0xff] }
 0x7e6   :  { %4469 = vmatprep.subr.bf16.mxu1 %v4172_v23  ;;  %5368 = vmatprep.subr.bf16.mxu0 %v5086_v24  ;;  %v3961_v23 = vld [vmem:[#allocation14 + $0x3a0] sm:$0xff]  ;;  %v5134_v24 = vunpack.c.l.s8.bf16 %v4858_v37 }
 0x7e7   :  { %v4730_v37 = vld [vmem:[#allocation17 + $0x38] sm:$0xff] }
 0x7e9   :  { %4470 = vmatpush1.bf16.msra.mxu1 %v4171_v26  ;;  %5369 = vmatpush1.bf16.msra.mxu0 %v5085_v28  ;;  %v4219_v26 = vunpack.c.l.s8.bf16 %v3961_v23  ;;  %v4226_v28 = vunpack.c.h.s8.bf16 %v3962_v7 }
 0x7ea   :  { %4471 = vmatprep.subr.bf16.mxu1 %v4178_v62  ;;  %5370 = vmatprep.subr.bf16.mxu0 %v5092_v32  ;;  %v5133_v62 = vunpack.c.l.s8.bf16 %v4857_v25  ;;  %v3968_v32 = vld [vmem:[#allocation14 + $0x3d8] sm:$0xff]  ;;  %v4736_v25 = vld [vmem:[#allocation17 + $0x68] sm:$0xff] }
 0x7ed   :  { %4472 = vmatpush1.bf16.msra.mxu1 %v4177_v45  ;;  %5371 = vmatpush1.bf16.msra.mxu0 %v5091_v36  ;;  %v4225_v45 = vunpack.c.h.s8.bf16 %v3961_v23  ;;  %v4232_v36 = vunpack.c.l.s8.bf16 %v3968_v32  ;;  %v4729_v23 = vld [vmem:[#allocation17 + $0x30] sm:$0xff] }
 0x7ee   :  { %4482 = vmatprep.subr.bf16.mxu1 %v4184_v14  ;;  %5372 = vmatprep.subr.bf16.mxu0 %v5098_v41  ;;  %v3967_v14 = vld [vmem:[#allocation14 + $0x3d0] sm:$0xff]  ;;  %v5146_v41 = vunpack.c.l.s8.bf16 %v4864_v34 }
 0x7ef   :  { %v4237_v40 = vunpack.c.h.s8.bf16 %v3967_v14 }
 0x7f0   :  { %4474 = vmatmul.mubr.bf16.vlgmr.msra.gmra.mrb[16].mxu1 %v7041_v49  ;;  %v3956_v49 = vld [vmem:[#allocation14 + $0x378] sm:$0xff] }
 0x7f1   :  { %4483 = vmatpush1.bf16.msra.mxu1 %v4183_v31  ;;  %4514 = vmatprep.mubr.bf16.mxu1 %v7068_v8  ;;  %v4201_v8 = vunpack.c.h.s8.bf16 %v3949_v29  ;;  %v4208_v60 = vunpack.c.l.s8.bf16 %v3956_v49  ;;  %v4214_v18 = vunpack.c.h.s8.bf16 %v3956_v49  ;;  %v4231_v31 = vunpack.c.l.s8.bf16 %v3967_v14 }
 0x7f2   :  { %4484 = vmatprep.subr.bf16.mxu1 %v4190_v61  ;;  %5373 = vmatpush1.bf16.msra.mxu0 %v5097_v47  ;;  %v4238_v61 = vunpack.c.h.s8.bf16 %v3968_v32  ;;  %v5145_v47 = vunpack.c.l.s8.bf16 %v4863_v27  ;;  %v5151_v29 = vunpack.c.h.s8.bf16 %v4863_v27 }
 0x7f3   :  { %5374 = vmatprep.subr.bf16.mxu0 %v5104_v44  ;;  %v5152_v44 = vunpack.c.h.s8.bf16 %v4864_v34  ;;  %v6114_v34 = vld [vmem:[#allocation11] sm:$0x3f] }
 0x7f5   :  { %4485 = vmatpush1.bf16.msra.mxu1 %v4189_v54  ;;  %v4244_v54 = vunpack.c.l.s8.bf16 %v3974_v3 }
 0x7f6   :  { %4486 = vmatprep.subr.bf16.mxu1 %v4196_v2  ;;  %5375 = vmatpush1.bf16.msra.mxu0 %v5103_v48  ;;  %v3973_v2 = vld [vmem:[#allocation14 + $0x400] sm:$0xff] }
 0x7f7   :  { %5376 = vmatprep.subr.bf16.mxu0 %v5110_v46  ;;  %v4243_v48 = vunpack.c.l.s8.bf16 %v3973_v2  ;;  %v4250_v46 = vunpack.c.h.s8.bf16 %v3974_v3 }
 0x7f9   :  { %4487 = vmatpush1.bf16.msra.mxu1 %v4195_v16  ;;  %v4249_v16 = vunpack.c.h.s8.bf16 %v3973_v2 }
 0x7fa   :  { %4488 = vmatprep.subr.bf16.mxu1 %v4202_v56  ;;  %5377 = vmatpush1.bf16.msra.mxu0 %v5109_v57  ;;  %v4256_v56 = vunpack.c.l.s8.bf16 %v3980_v53  ;;  %v3979_v57 = vld [vmem:[#allocation14 + $0x430] sm:$0xff] }
 0x7fb   :  { %5378 = vmatprep.subr.bf16.mxu0 %v5116_v55  ;;  %v4255_v49 = vunpack.c.l.s8.bf16 %v3979_v57  ;;  %v4262_v55 = vunpack.c.h.s8.bf16 %v3980_v53 }
 0x7fd   :  { %4489 = vmatpush1.bf16.msra.mxu1 %v4201_v8  ;;  %v4261_v8 = vunpack.c.h.s8.bf16 %v3979_v57 }
 0x7fe   :  { %4490 = vmatprep.subr.bf16.mxu1 %v4208_v60  ;;  %5379 = vmatpush1.bf16.msra.mxu0 %v5115_v39  ;;  %v4268_v60 = vunpack.c.l.s8.bf16 %v3986_v19  ;;  %v4267_v39 = vunpack.c.l.s8.bf16 %v3985_v0 }
 0x7ff   :  { %5380 = vmatprep.subr.bf16.mxu0 %v5122_v59  ;;  %v4274_v59 = vunpack.c.h.s8.bf16 %v3986_v19  ;;  %v241_v19 = vld [vmem:[%s7289_s29 + $0x8] sm:$0xf] }
 0x801   :  { %4491 = vmatpush1.bf16.msra.mxu1 %v4207_v17  ;;  %v4273_v17 = vunpack.c.h.s8.bf16 %v3985_v0 }
 0x802   :  { %4492 = vmatprep.subr.bf16.mxu1 %v4214_v18  ;;  %5381 = vmatpush1.bf16.msra.mxu0 %v5121_v5  ;;  %v4868_v18 = vunpack.c.l.s8.bf16 %v4724_v50  ;;  %v4723_v5 = vld [vmem:[#allocation17] sm:$0xff] }
 0x803   :  { %5382 = vmatprep.subr.bf16.mxu0 %v5128_v9  ;;  %v4867_v7 = vunpack.c.l.s8.bf16 %v4723_v5  ;;  %v4874_v9 = vunpack.c.h.s8.bf16 %v4724_v50  ;;  %v4754_v50 = vld [vmem:[#allocation17 + $0xf8] sm:$0xff] }
 0x805   :  { %4493 = vmatpush1.bf16.msra.mxu1 %v4213_v51  ;;  %v4873_v51 = vunpack.c.h.s8.bf16 %v4723_v5  ;;  %v4928_v5 = vunpack.c.l.s8.bf16 %v4754_v50 }
 0x806   :  { %4494 = vmatprep.subr.bf16.mxu1 %v4220_v10  ;;  %5383 = vmatpush1.bf16.msra.mxu0 %v5127_v21  ;;  %v4880_v10 = vunpack.c.l.s8.bf16 %v4730_v37  ;;  %v4879_v21 = vunpack.c.l.s8.bf16 %v4729_v23 }
 0x807   :  { %5384 = vmatprep.subr.bf16.mxu0 %v5134_v24  ;;  %v4886_v24 = vunpack.c.h.s8.bf16 %v4730_v37 }
 0x809   :  { %4495 = vmatpush1.bf16.msra.mxu1 %v4219_v26  ;;  %v4885_v26 = vunpack.c.h.s8.bf16 %v4729_v23 }
 0x80a   :  { %4496 = vmatprep.subr.bf16.mxu1 %v4226_v28  ;;  %5385 = vmatpush1.bf16.msra.mxu0 %v5133_v62  ;;  %v4892_v28 = vunpack.c.l.s8.bf16 %v4736_v25  ;;  %v4735_v62 = vld [vmem:[#allocation17 + $0x60] sm:$0xff] }
 0x80b   :  { %5386 = vmatprep.subr.bf16.mxu0 %v5140_v33  ;;  %v4891_v32 = vunpack.c.l.s8.bf16 %v4735_v62  ;;  %v4742_v33 = vld [vmem:[#allocation17 + $0x98] sm:$0xff]  ;;  %v4897_v14 = vunpack.c.h.s8.bf16 %v4735_v62 }
 0x80c   :  { %v4904_v27 = vunpack.c.l.s8.bf16 %v4742_v33 }
 0x80d   :  { %4497 = vmatpush1.bf16.msra.mxu1 %v4225_v45  ;;  %v3755_v45 = vrot.slane %v6114_v34, %v7059_v42 }
 0x80e   :  { %4498 = vmatprep.subr.bf16.mxu1 %v4232_v36  ;;  %5387 = vmatpush1.bf16.msra.mxu0 %v5139_v35  ;;  %v3759_v36 = vrot.slane %v6114_v34, %v7062_v58  ;;  %v6115_v35 = vld [vmem:[#allocation13] sm:$0x3f] }
 0x80f   :  { %5388 = vmatprep.subr.bf16.mxu0 %v5146_v41  ;;  %v3793_v41 = vrot.slane %v6115_v35, %v7059_v42 }
 0x811   :  { %4499 = vmatpush1.bf16.msra.mxu1 %v4231_v31  ;;  %v4741_v31 = vld [vmem:[#allocation17 + $0x90] sm:$0xff] }
 0x812   :  { %4500 = vmatprep.subr.bf16.mxu1 %v4238_v61  ;;  %5389 = vmatpush1.bf16.msra.mxu0 %v5145_v47  ;;  %v3797_v47 = vrot.slane %v6115_v35, %v7062_v58  ;;  %v4903_v2 = vunpack.c.l.s8.bf16 %v4741_v31  ;;  %v4909_v57 = vunpack.c.h.s8.bf16 %v4741_v31  ;;  %v4771_v35 = vld [vmem:[#allocation17 + $0x180] sm:$0xff]  ;;  %v4778_v31 = vld [vmem:[#allocation17 + $0x1b8] sm:$0xff] }
 0x813   :  { %5390 = vmatprep.subr.bf16.mxu0 %v5152_v44 }
 0x815   :  { %4501 = vmatpush1.bf16.msra.mxu1 %v4237_v40 }
 0x816   :  { %4502 = vmatprep.subr.bf16.mxu1 %v4244_v54  ;;  %5391 = vmatpush1.bf16.msra.mxu0 %v5151_v29 }
 0x819   :  { %4503 = vmatpush1.bf16.msra.mxu1 %v4243_v48 }
 0x81a   :  { %4504 = vmatprep.subr.bf16.mxu1 %v4250_v46  ;;  %v4910_v46 = vunpack.c.h.s8.bf16 %v4742_v33 }
 0x81d   :  { %4505 = vmatpush1.bf16.msra.mxu1 %v4249_v16  ;;  %v4748_v16 = vld [vmem:[#allocation17 + $0xc8] sm:$0xff] }
 0x81e   :  { %4506 = vmatprep.subr.bf16.mxu1 %v4256_v56 }
 0x821   :  { %4507 = vmatpush1.bf16.msra.mxu1 %v4255_v49  ;;  %v4916_v49 = vunpack.c.l.s8.bf16 %v4748_v16 }
 0x822   :  { %4508 = vmatprep.subr.bf16.mxu1 %v4262_v55  ;;  %v4747_v55 = vld [vmem:[#allocation17 + $0xc0] sm:$0xff] }
 0x825   :  { %4509 = vmatpush1.bf16.msra.mxu1 %v4261_v8 }
 0x826   :  { %4510 = vmatprep.subr.bf16.mxu1 %v4268_v60  ;;  %v4915_v60 = vunpack.c.l.s8.bf16 %v4747_v55 }
 0x829   :  { %4511 = vmatpush1.bf16.msra.mxu1 %v4267_v39  ;;  %v4922_v39 = vunpack.c.h.s8.bf16 %v4748_v16  ;;  %v4790_v16 = vld [vmem:[#allocation17 + $0x218] sm:$0xff] }
 0x82a   :  { %4512 = vmatprep.subr.bf16.mxu1 %v4274_v59 }
 0x82d   :  { %4513 = vmatpush1.bf16.msra.mxu1 %v4273_v17  ;;  %v4921_v17 = vunpack.c.h.s8.bf16 %v4747_v55 }
 0x82e   :  { %5155 = vmatprep.subr.bf16.mxu1 %v4868_v18 }
 0x830   :  { %4515 = vmatmul.mubr.bf16.vlgmr.msra.gmra.mrb[16].mxu1 %v7070_v6  ;;  %v4898_v6 = vunpack.c.h.s8.bf16 %v4736_v25 }
 0x831   :  { %5156 = vmatpush1.bf16.msra.mxu1 %v4867_v7  ;;  %5187 = vmatprep.mubr.bf16.mxu1 %v7148_v38  ;;  %v4753_v7 = vld [vmem:[#allocation17 + $0xf0] sm:$0xff] }
 0x832   :  { %5157 = vmatprep.subr.bf16.mxu1 %v4874_v9  ;;  %v4933_v23 = vunpack.c.h.s8.bf16 %v4753_v7 }
 0x835   :  { %5158 = vmatpush1.bf16.msra.mxu1 %v4873_v51  ;;  %v4927_v51 = vunpack.c.l.s8.bf16 %v4753_v7  ;;  %v4801_v7 = vld [vmem:[#allocation17 + $0x270] sm:$0xff] }
 0x836   :  { %5159 = vmatprep.subr.bf16.mxu1 %v4880_v10  ;;  %v4934_v10 = vunpack.c.h.s8.bf16 %v4754_v50 }
 0x839   :  { %5160 = vmatpush1.bf16.msra.mxu1 %v4879_v21 }
 0x83a   :  { %5161 = vmatprep.subr.bf16.mxu1 %v4886_v24  ;;  %v4759_v24 = vld [vmem:[#allocation17 + $0x120] sm:$0xff] }
 0x83b   :  { %v4939_v25 = vunpack.c.l.s8.bf16 %v4759_v24  ;;  %v4945_v62 = vunpack.c.h.s8.bf16 %v4759_v24  ;;  %v4807_v24 = vld [vmem:[#allocation17 + $0x2a0] sm:$0xff] }
 0x83d   :  { %5162 = vmatpush1.bf16.msra.mxu1 %v4885_v26 }
 0x83e   :  { %5163 = vmatprep.subr.bf16.mxu1 %v4892_v28  ;;  %v4766_v28 = vld [vmem:[#allocation17 + $0x158] sm:$0xff] }
 0x83f   :  { %v4958_v34 = vunpack.c.h.s8.bf16 %v4766_v28 }
 0x841   :  { %5164 = vmatpush1.bf16.msra.mxu1 %v4891_v32  ;;  %v4952_v32 = vunpack.c.l.s8.bf16 %v4766_v28  ;;  %v4814_v28 = vld [vmem:[#allocation17 + $0x2d8] sm:$0xff] }
 0x842   :  { %5165 = vmatprep.subr.bf16.mxu1 %v4898_v6  ;;  %v4765_v6 = vld [vmem:[#allocation17 + $0x150] sm:$0xff] }
 0x843   :  { %v3727_v61 = vpop.f32.mrb[12].mxu1  ;;  %v4951_v33 = vunpack.c.l.s8.bf16 %v4765_v6 }
 0x844   :  { %v3770_v3 = vmul.f32 %v3755_v45, %v3727_v61  ;;  %v3729_v44 = vpop.f32.mrb[13].mxu1  ;;  %v4772_v45 = vld [vmem:[#allocation17 + $0x188] sm:$0xff]  ;;  %v4969_v61 = vunpack.c.h.s8.bf16 %v4771_v35 }
 0x845   :  { %v3771_v40 = vmul.f32 %v3759_v36, %v3729_v44  ;;  %v3731_v54 = vpop.f32.mrb[14].mxu1  ;;  %5166 = vmatpush1.bf16.msra.mxu1 %v4897_v14  ;;  %v4957_v36 = vunpack.c.h.s8.bf16 %v4765_v6  ;;  %v4964_v14 = vunpack.c.l.s8.bf16 %v4772_v45  ;;  %v4813_v6 = vld [vmem:[#allocation17 + $0x2d0] sm:$0xff] }
 0x846   :  { %v3808_v29 = vadd.f32 %v3793_v41, %v3770_v3  ;;  %v3732_v48 = vpop.f32.mrb[15].mxu1  ;;  %5167 = vmatprep.subr.bf16.mxu1 %v4904_v27  ;;  %v4963_v41 = vunpack.c.l.s8.bf16 %v4771_v35  ;;  %v4970_v27 = vunpack.c.h.s8.bf16 %v4772_v45  ;;  %v4777_v3 = vld [vmem:[#allocation17 + $0x1b0] sm:$0xff]  ;;  %v4784_v54 = vld [vmem:[#allocation17 + $0x1e8] sm:$0xff]  ;;  %v4819_v35 = vld [vmem:[#allocation17 + $0x300] sm:$0xff] }
 0x847   :  { %v3809_v53 = vadd.f32 %v3797_v47, %v3771_v40  ;;  %v4976_v47 = vunpack.c.l.s8.bf16 %v4778_v31  ;;  %v4975_v44 = vunpack.c.l.s8.bf16 %v4777_v3  ;;  %v4982_v40 = vunpack.c.h.s8.bf16 %v4778_v31  ;;  %v4783_v48 = vld [vmem:[#allocation17 + $0x1e0] sm:$0xff]  ;;  %v4820_v45 = vld [vmem:[#allocation17 + $0x308] sm:$0xff]  ;;  %v4826_v31 = vld [vmem:[#allocation17 + $0x338] sm:$0xff] }
 0x849   :  { %v3833_v56 = vcombine.low %v3808_v29, %v3809_v53  ;;  %5168 = vmatpush1.bf16.msra.mxu1 %v4903_v2  ;;  %v4981_v2 = vunpack.c.h.s8.bf16 %v4777_v3  ;;  %v4988_v29 = vunpack.c.l.s8.bf16 %v4784_v54  ;;  %v4994_v53 = vunpack.c.h.s8.bf16 %v4784_v54  ;;  %v4825_v3 = vld [vmem:[#allocation17 + $0x330] sm:$0xff]  ;;  %v4832_v54 = vld [vmem:[#allocation17 + $0x368] sm:$0xff] }
 0x84a   :  { %5169 = vmatprep.subr.bf16.mxu1 %v4910_v46  ;;  %v4987_v46 = vunpack.c.l.s8.bf16 %v4783_v48 }
 0x84b   :  { %v3840_v8 = vrot.slane %v3833_v56, %v7134_v13  ;;  %v4993_v56 = vunpack.c.h.s8.bf16 %v4783_v48  ;;  %v4831_v48 = vld [vmem:[#allocation17 + $0x360] sm:$0xff] }
 0x84d   :  { %5170 = vmatpush1.bf16.msra.mxu1 %v4909_v57  ;;  %v3844_v0 = vmul.f32 %v3840_v8, %v241_v19  ;;  %v5000_v57 = vunpack.c.l.s8.bf16 %v4790_v16  ;;  %v5006_v19 = vunpack.c.h.s8.bf16 %v4790_v16  ;;  %v4796_v8 = vld [vmem:[#allocation17 + $0x248] sm:$0xff]  ;;  %v4838_v16 = vld [vmem:[#allocation17 + $0x398] sm:$0xff] }
 0x84e   :  { %5171 = vmatprep.subr.bf16.mxu1 %v4916_v49  ;;  %v4789_v49 = vld [vmem:[#allocation17 + $0x210] sm:$0xff]  ;;  %v5018_v50 = vunpack.c.h.s8.bf16 %v4796_v8 }
 0x84f   :  { %v4709_v59 = vrot.slane %v3844_v0, %v7134_v13  ;;  %v4760_v13 = vld [vmem:[#allocation17 + $0x128] sm:$0xff]  ;;  %v4999_v55 = vunpack.c.l.s8.bf16 %v4789_v49  ;;  %v5012_v0 = vunpack.c.l.s8.bf16 %v4796_v8 }
 0x850   :  { %v4940_v21 = vunpack.c.l.s8.bf16 %v4760_v13  ;;  %v4946_v26 = vunpack.c.h.s8.bf16 %v4760_v13  ;;  %v4808_v13 = vld [vmem:[#allocation17 + $0x2a8] sm:$0xff] }
 0x851   :  { %5172 = vmatpush1.bf16.msra.mxu1 %v4915_v60  ;;  %v4710_v18 = vcombine.high %v4709_v59, %v4709_v59  ;;  %v7182_v37 = vpack.c.bf16 %v4709_v59, %v4709_v59  ;;  %v5005_v60 = vunpack.c.h.s8.bf16 %v4789_v49  ;;  %v4837_v49 = vld [vmem:[#allocation17 + $0x390] sm:$0xff]  ;;  %v4844_v8 = vld [vmem:[#allocation17 + $0x3c8] sm:$0xff] }
 0x852   :  { %5173 = vmatprep.subr.bf16.mxu1 %v4922_v39  ;;  %v4795_v39 = vld [vmem:[#allocation17 + $0x240] sm:$0xff] }
 0x853   :  { %v7180_v9 = vpack.c.bf16 %v4710_v18, %v4710_v18  ;;  %v5011_v59 = vunpack.c.l.s8.bf16 %v4795_v39  ;;  %v5017_v18 = vunpack.c.h.s8.bf16 %v4795_v39  ;;  %v4843_v39 = vld [vmem:[#allocation17 + $0x3c0] sm:$0xff] }
 0x855   :  { %5174 = vmatpush1.bf16.msra.mxu1 %v4921_v17  ;;  %5392 = vmatprep.mubr.bf16.mxu0 %v7180_v9  ;;  %v4802_v17 = vld [vmem:[#allocation17 + $0x278] sm:$0xff] }
 0x856   :  { %5393 = vmatmul.mubr.bf16.vlgmr.msra.gmra.mrb[16].mxu0 %v7182_v37  ;;  %5175 = vmatprep.subr.bf16.mxu1 %v4928_v5  ;;  %v5024_v5 = vunpack.c.l.s8.bf16 %v4802_v17 }
 0x859   :  { %5176 = vmatpush1.bf16.msra.mxu1 %v4927_v51  ;;  %v5023_v51 = vunpack.c.l.s8.bf16 %v4801_v7 }
 0x85a   :  { %5177 = vmatprep.subr.bf16.mxu1 %v4934_v10  ;;  %v5030_v10 = vunpack.c.h.s8.bf16 %v4802_v17  ;;  %v4850_v17 = vld [vmem:[#allocation17 + $0x3f8] sm:$0xff] }
 0x85d   :  { %5178 = vmatpush1.bf16.msra.mxu1 %v4933_v23  ;;  %v5029_v23 = vunpack.c.h.s8.bf16 %v4801_v7  ;;  %v4849_v7 = vld [vmem:[#allocation17 + $0x3f0] sm:$0xff] }
 0x85e   :  { %5179 = vmatprep.subr.bf16.mxu1 %v4940_v21  ;;  %v5036_v21 = vunpack.c.l.s8.bf16 %v4808_v13 }
 0x861   :  { %5180 = vmatpush1.bf16.msra.mxu1 %v4939_v25  ;;  %v5035_v25 = vunpack.c.l.s8.bf16 %v4807_v24 }
 0x862   :  { %5181 = vmatprep.subr.bf16.mxu1 %v4946_v26  ;;  %v5042_v26 = vunpack.c.h.s8.bf16 %v4808_v13  ;;  %v4856_v13 = vld [vmem:[#allocation17 + $0x428] sm:$0xff] }
 0x865   :  { %5182 = vmatpush1.bf16.msra.mxu1 %v4945_v62  ;;  %v5041_v62 = vunpack.c.h.s8.bf16 %v4807_v24  ;;  %v4855_v24 = vld [vmem:[#allocation17 + $0x420] sm:$0xff] }
 0x866   :  { %5183 = vmatprep.subr.bf16.mxu1 %v4952_v32  ;;  %v5048_v32 = vunpack.c.l.s8.bf16 %v4814_v28 }
 0x869   :  { %5184 = vmatpush1.bf16.msra.mxu1 %v4951_v33  ;;  %v5047_v33 = vunpack.c.l.s8.bf16 %v4813_v6 }
 0x86a   :  { %5185 = vmatprep.subr.bf16.mxu1 %v4958_v34  ;;  %v5054_v34 = vunpack.c.h.s8.bf16 %v4814_v28  ;;  %v4862_v28 = vld [vmem:[#allocation17 + $0x458] sm:$0xff] }
 0x86d   :  { %5186 = vmatpush1.bf16.msra.mxu1 %v4957_v36  ;;  %v5053_v36 = vunpack.c.h.s8.bf16 %v4813_v6  ;;  %v4861_v6 = vld [vmem:[#allocation17 + $0x450] sm:$0xff] }
 0x86e   :  { %5196 = vmatprep.subr.bf16.mxu1 %v4964_v14  ;;  %v5060_v14 = vunpack.c.l.s8.bf16 %v4820_v45 }
 0x870   :  { %5188 = vmatmul.mubr.bf16.vlgmr.msra.gmra.mrb[20].mxu1 %v7152_v52 }
 0x871   :  { %5197 = vmatpush1.bf16.msra.mxu1 %v4963_v41  ;;  %5228 = vmatprep.mubr.bf16.mxu1 %v7156_v43  ;;  %v5059_v41 = vunpack.c.l.s8.bf16 %v4819_v35 }
 0x872   :  { %5198 = vmatprep.subr.bf16.mxu1 %v4970_v27  ;;  %v5066_v27 = vunpack.c.h.s8.bf16 %v4820_v45  ;;  %v4728_v45 = vld [vmem:[#allocation17 + $0x28] sm:$0xff] }
 0x875   :  { %5199 = vmatpush1.bf16.msra.mxu1 %v4969_v61  ;;  %v5065_v61 = vunpack.c.h.s8.bf16 %v4819_v35  ;;  %v4727_v35 = vld [vmem:[#allocation17 + $0x20] sm:$0xff] }
 0x876   :  { %5200 = vmatprep.subr.bf16.mxu1 %v4976_v47  ;;  %v5072_v47 = vunpack.c.l.s8.bf16 %v4826_v31 }
 0x879   :  { %5201 = vmatpush1.bf16.msra.mxu1 %v4975_v44  ;;  %v5071_v44 = vunpack.c.l.s8.bf16 %v4825_v3 }
 0x87a   :  { %5202 = vmatprep.subr.bf16.mxu1 %v4982_v40  ;;  %v5078_v40 = vunpack.c.h.s8.bf16 %v4826_v31  ;;  %v4734_v31 = vld [vmem:[#allocation17 + $0x58] sm:$0xff] }
 0x87d   :  { %5203 = vmatpush1.bf16.msra.mxu1 %v4981_v2  ;;  %v5077_v2 = vunpack.c.h.s8.bf16 %v4825_v3  ;;  %v4733_v3 = vld [vmem:[#allocation17 + $0x50] sm:$0xff] }
 0x87e   :  { %5204 = vmatprep.subr.bf16.mxu1 %v4988_v29  ;;  %v5084_v29 = vunpack.c.l.s8.bf16 %v4832_v54 }
 0x881   :  { %5205 = vmatpush1.bf16.msra.mxu1 %v4987_v46  ;;  %v5083_v46 = vunpack.c.l.s8.bf16 %v4831_v48 }
 0x882   :  { %5206 = vmatprep.subr.bf16.mxu1 %v4994_v53  ;;  %v5090_v53 = vunpack.c.h.s8.bf16 %v4832_v54  ;;  %v4740_v54 = vld [vmem:[#allocation17 + $0x88] sm:$0xff] }
 0x885   :  { %5207 = vmatpush1.bf16.msra.mxu1 %v4993_v56  ;;  %v5089_v56 = vunpack.c.h.s8.bf16 %v4831_v48  ;;  %v4739_v48 = vld [vmem:[#allocation17 + $0x80] sm:$0xff] }
 0x886   :  { %5208 = vmatprep.subr.bf16.mxu1 %v5000_v57  ;;  %v5096_v57 = vunpack.c.l.s8.bf16 %v4838_v16 }
 0x889   :  { %5209 = vmatpush1.bf16.msra.mxu1 %v4999_v55  ;;  %v5095_v55 = vunpack.c.l.s8.bf16 %v4837_v49 }
 0x88a   :  { %5210 = vmatprep.subr.bf16.mxu1 %v5006_v19  ;;  %v5102_v19 = vunpack.c.h.s8.bf16 %v4838_v16  ;;  %v4746_v16 = vld [vmem:[#allocation17 + $0xb8] sm:$0xff] }
 0x88d   :  { %5211 = vmatpush1.bf16.msra.mxu1 %v5005_v60  ;;  %v5101_v60 = vunpack.c.h.s8.bf16 %v4837_v49 }
 0x88e   :  { %5212 = vmatprep.subr.bf16.mxu1 %v5012_v0  ;;  %v5108_v0 = vunpack.c.l.s8.bf16 %v4844_v8 }
 0x891   :  { %5213 = vmatpush1.bf16.msra.mxu1 %v5011_v59  ;;  %v5107_v59 = vunpack.c.l.s8.bf16 %v4843_v39 }
 0x892   :  { %5214 = vmatprep.subr.bf16.mxu1 %v5018_v50  ;;  %v5114_v50 = vunpack.c.h.s8.bf16 %v4844_v8 }
 0x895   :  { %5215 = vmatpush1.bf16.msra.mxu1 %v5017_v18  ;;  %v5113_v18 = vunpack.c.h.s8.bf16 %v4843_v39  ;;  %v4752_v39 = vld [vmem:[#allocation17 + $0xe8] sm:$0xff] }
 0x896   :  { %5216 = vmatprep.subr.bf16.mxu1 %v5024_v5  ;;  %v5120_v5 = vunpack.c.l.s8.bf16 %v4850_v17 }
 0x899   :  { %5217 = vmatpush1.bf16.msra.mxu1 %v5023_v51  ;;  %v5119_v51 = vunpack.c.l.s8.bf16 %v4849_v7 }
 0x89a   :  { %5218 = vmatprep.subr.bf16.mxu1 %v5030_v10  ;;  %v5126_v10 = vunpack.c.h.s8.bf16 %v4850_v17  ;;  %v4751_v17 = vld [vmem:[#allocation17 + $0xe0] sm:$0xff] }
 0x89d   :  { %5219 = vmatpush1.bf16.msra.mxu1 %v5029_v23  ;;  %v5125_v23 = vunpack.c.h.s8.bf16 %v4849_v7  ;;  %v4758_v7 = vld [vmem:[#allocation17 + $0x118] sm:$0xff] }
 0x89e   :  { %5220 = vmatprep.subr.bf16.mxu1 %v5036_v21  ;;  %v5132_v21 = vunpack.c.l.s8.bf16 %v4856_v13 }
 0x8a1   :  { %5221 = vmatpush1.bf16.msra.mxu1 %v5035_v25  ;;  %v5131_v25 = vunpack.c.l.s8.bf16 %v4855_v24 }
 0x8a2   :  { %5222 = vmatprep.subr.bf16.mxu1 %v5042_v26  ;;  %v5138_v26 = vunpack.c.h.s8.bf16 %v4856_v13  ;;  %v4757_v13 = vld [vmem:[#allocation17 + $0x110] sm:$0xff] }
 0x8a5   :  { %5223 = vmatpush1.bf16.msra.mxu1 %v5041_v62  ;;  %v5137_v62 = vunpack.c.h.s8.bf16 %v4855_v24  ;;  %v4764_v24 = vld [vmem:[#allocation17 + $0x148] sm:$0xff] }
 0x8a6   :  { %5224 = vmatprep.subr.bf16.mxu1 %v5048_v32  ;;  %v5144_v32 = vunpack.c.l.s8.bf16 %v4862_v28 }
 0x8a9   :  { %5225 = vmatpush1.bf16.msra.mxu1 %v5047_v33  ;;  %v5143_v33 = vunpack.c.l.s8.bf16 %v4861_v6 }
 0x8aa   :  { %5226 = vmatprep.subr.bf16.mxu1 %v5054_v34  ;;  %v5150_v34 = vunpack.c.h.s8.bf16 %v4862_v28  ;;  %v4763_v28 = vld [vmem:[#allocation17 + $0x140] sm:$0xff] }
 0x8ad   :  { %5227 = vmatpush1.bf16.msra.mxu1 %v5053_v36  ;;  %v5149_v36 = vunpack.c.h.s8.bf16 %v4861_v6  ;;  %v4770_v6 = vld [vmem:[#allocation17 + $0x178] sm:$0xff] }
 0x8ae   :  { %5237 = vmatprep.subr.bf16.mxu1 %v5060_v14  ;;  %v4872_v14 = vunpack.c.l.s8.bf16 %v4728_v45 }
 0x8b0   :  { %5229 = vmatmul.mubr.bf16.vlgmr.msra.gmra.mrb[20].mxu1 %v7164_v30 }
 0x8b1   :  { %5238 = vmatpush1.bf16.msra.mxu1 %v5059_v41  ;;  %5269 = vmatprep.mubr.bf16.mxu1 %v7180_v9  ;;  %v4871_v41 = vunpack.c.l.s8.bf16 %v4727_v35 }
 0x8b2   :  { %5239 = vmatprep.subr.bf16.mxu1 %v5066_v27  ;;  %v4878_v27 = vunpack.c.h.s8.bf16 %v4728_v45  ;;  %v4769_v45 = vld [vmem:[#allocation17 + $0x170] sm:$0xff] }
 0x8b5   :  { %5240 = vmatpush1.bf16.msra.mxu1 %v5065_v61  ;;  %v4877_v61 = vunpack.c.h.s8.bf16 %v4727_v35  ;;  %v4955_v35 = vunpack.c.l.s8.bf16 %v4769_v45 }
 0x8b6   :  { %5241 = vmatprep.subr.bf16.mxu1 %v5072_v47  ;;  %v4884_v47 = vunpack.c.l.s8.bf16 %v4734_v31 }
 0x8b9   :  { %5242 = vmatpush1.bf16.msra.mxu1 %v5071_v44  ;;  %v4883_v44 = vunpack.c.l.s8.bf16 %v4733_v3 }
 0x8ba   :  { %5243 = vmatprep.subr.bf16.mxu1 %v5078_v40  ;;  %v4890_v40 = vunpack.c.h.s8.bf16 %v4734_v31  ;;  %v4962_v31 = vunpack.c.h.s8.bf16 %v4770_v6 }
 0x8bd   :  { %5244 = vmatpush1.bf16.msra.mxu1 %v5077_v2  ;;  %v4889_v2 = vunpack.c.h.s8.bf16 %v4733_v3  ;;  %v4776_v3 = vld [vmem:[#allocation17 + $0x1a8] sm:$0xff] }
 0x8be   :  { %5245 = vmatprep.subr.bf16.mxu1 %v5084_v29  ;;  %v4896_v29 = vunpack.c.l.s8.bf16 %v4740_v54 }
 0x8c1   :  { %5246 = vmatpush1.bf16.msra.mxu1 %v5083_v46  ;;  %v4895_v46 = vunpack.c.l.s8.bf16 %v4739_v48 }
 0x8c2   :  { %5247 = vmatprep.subr.bf16.mxu1 %v5090_v53  ;;  %v4902_v53 = vunpack.c.h.s8.bf16 %v4740_v54 }
 0x8c5   :  { %5248 = vmatpush1.bf16.msra.mxu1 %v5089_v56  ;;  %v4908_v56 = vunpack.c.l.s8.bf16 %v4746_v16 }
 0x8c6   :  { %5249 = vmatprep.subr.bf16.mxu1 %v5096_v57  ;;  %v4745_v57 = vld [vmem:[#allocation17 + $0xb0] sm:$0xff] }
 0x8c7   :  { %v4907_v8 = vunpack.c.l.s8.bf16 %v4745_v57 }
 0x8c9   :  { %5250 = vmatpush1.bf16.msra.mxu1 %v5095_v55 }
 0x8ca   :  { %5251 = vmatprep.subr.bf16.mxu1 %v5102_v19 }
 0x8cd   :  { %5252 = vmatpush1.bf16.msra.mxu1 %v5101_v60 }
 0x8ce   :  { %5253 = vmatprep.subr.bf16.mxu1 %v5108_v0  ;;  %v4914_v0 = vunpack.c.h.s8.bf16 %v4746_v16 }
 0x8d1   :  { %5254 = vmatpush1.bf16.msra.mxu1 %v5107_v59  ;;  %v4913_v59 = vunpack.c.h.s8.bf16 %v4745_v57 }
 0x8d2   :  { %5255 = vmatprep.subr.bf16.mxu1 %v5114_v50  ;;  %v4920_v50 = vunpack.c.l.s8.bf16 %v4752_v39 }
 0x8d5   :  { %5256 = vmatpush1.bf16.msra.mxu1 %v5113_v18  ;;  %v4919_v18 = vunpack.c.l.s8.bf16 %v4751_v17 }
 0x8d6   :  { %5257 = vmatprep.subr.bf16.mxu1 %v5120_v5  ;;  %v4926_v5 = vunpack.c.h.s8.bf16 %v4752_v39  ;;  %v4782_v39 = vld [vmem:[#allocation17 + $0x1d8] sm:$0xff] }
 0x8d9   :  { %5258 = vmatpush1.bf16.msra.mxu1 %v5119_v51  ;;  %v4925_v51 = vunpack.c.h.s8.bf16 %v4751_v17  ;;  %v5623_v17 = vld [vmem:[#allocation22 + $0x28] sm:$0xff] }
 0x8da   :  { %5259 = vmatprep.subr.bf16.mxu1 %v5126_v10  ;;  %v4932_v10 = vunpack.c.l.s8.bf16 %v4758_v7 }
 0x8dd   :  { %5260 = vmatpush1.bf16.msra.mxu1 %v5125_v23  ;;  %v4931_v23 = vunpack.c.l.s8.bf16 %v4757_v13 }
 0x8de   :  { %5261 = vmatprep.subr.bf16.mxu1 %v5132_v21  ;;  %v4938_v21 = vunpack.c.h.s8.bf16 %v4758_v7  ;;  %v4781_v7 = vld [vmem:[#allocation17 + $0x1d0] sm:$0xff] }
 0x8e1   :  { %5262 = vmatpush1.bf16.msra.mxu1 %v5131_v25  ;;  %v4937_v25 = vunpack.c.h.s8.bf16 %v4757_v13  ;;  %v5619_v13 = vld [vmem:[#allocation22 + $0x8] sm:$0xff] }
 0x8e2   :  { %5263 = vmatprep.subr.bf16.mxu1 %v5138_v26  ;;  %v4944_v26 = vunpack.c.l.s8.bf16 %v4764_v24 }
 0x8e5   :  { %5264 = vmatpush1.bf16.msra.mxu1 %v5137_v62  ;;  %v4943_v62 = vunpack.c.l.s8.bf16 %v4763_v28 }
 0x8e6   :  { %5265 = vmatprep.subr.bf16.mxu1 %v5144_v32  ;;  %v4950_v32 = vunpack.c.h.s8.bf16 %v4764_v24  ;;  %v4788_v24 = vld [vmem:[#allocation17 + $0x208] sm:$0xff] }
 0x8e9   :  { %5266 = vmatpush1.bf16.msra.mxu1 %v5143_v33  ;;  %v4949_v33 = vunpack.c.h.s8.bf16 %v4763_v28  ;;  %v4992_v28 = vunpack.c.l.s8.bf16 %v4788_v24 }
 0x8ea   :  { %5267 = vmatprep.subr.bf16.mxu1 %v5150_v34  ;;  %v4956_v34 = vunpack.c.l.s8.bf16 %v4770_v6 }
 0x8ed   :  { %5268 = vmatpush1.bf16.msra.mxu1 %v5149_v36  ;;  %v7194_v36 = vld [vmem:[#allocation19] sm:$0x3f] }
 0x8ee   :  { %5401 = vmatprep.subr.bf16.mxu1 %v4872_v14  ;;  %v7196_v14 = vld [vmem:[#allocation16] sm:$0x3f] }
 0x8f0   :  { %5270 = vmatmul.mubr.bf16.vlgmr.msra.gmra.mrb[20].mxu1 %v7182_v37 }
 0x8f1   :  { %5402 = vmatpush1.bf16.msra.mxu1 %v4871_v41  ;;  %5433 = vmatprep.mubr.bf16.mxu1 %v7148_v38  ;;  %v4901_v38 = vunpack.c.h.s8.bf16 %v4739_v48  ;;  %v4659_v41 = vrot.slane %v7196_v14, %v7034_v20  ;;  %v4968_v48 = vunpack.c.l.s8.bf16 %v4776_v3 }
 0x8f2   :  { %5403 = vmatprep.subr.bf16.mxu1 %v4878_v27  ;;  %v5537_v27 = vrot.slane %v7194_v36, %v7034_v20 }
 0x8f5   :  { %5404 = vmatpush1.bf16.msra.mxu1 %v4877_v61  ;;  %v4663_v61 = vrot.slane %v7196_v14, %v7003_v4 }
 0x8f6   :  { %5405 = vmatprep.subr.bf16.mxu1 %v4884_v47  ;;  %v5541_v47 = vrot.slane %v7194_v36, %v7003_v4 }
 0x8f9   :  { %5406 = vmatpush1.bf16.msra.mxu1 %v4883_v44 }
 0x8fa   :  { %5407 = vmatprep.subr.bf16.mxu1 %v4890_v40  ;;  %v4961_v40 = vunpack.c.h.s8.bf16 %v4769_v45  ;;  %v4998_v45 = vunpack.c.h.s8.bf16 %v4788_v24 }
 0x8fd   :  { %5408 = vmatpush1.bf16.msra.mxu1 %v4889_v2 }
 0x8fe   :  { %5409 = vmatprep.subr.bf16.mxu1 %v4896_v29 }
 0x901   :  { %5410 = vmatpush1.bf16.msra.mxu1 %v4895_v46  ;;  %v4775_v46 = vld [vmem:[#allocation17 + $0x1a0] sm:$0xff] }
 0x902   :  { %5411 = vmatprep.subr.bf16.mxu1 %v4902_v53 }
 0x903   :  { %v4516_v49 = vpop.f32.mrb[16].mxu1 }
 0x904   :  { %v7192_v55 = vpop.f32.mrb[17].mxu1  ;;  %v4680_v54 = vmul.f32 %v4659_v41, %v4516_v49  ;;  %v4794_v41 = vld [vmem:[#allocation17 + $0x238] sm:$0xff] }
 0x905   :  { %v4520_v19 = vpop.f32.mrb[18].mxu1  ;;  %5412 = vmatpush1.bf16.msra.mxu1 %v4901_v38  ;;  %v4681_v53 = vmul.f32 %v4663_v61, %v7192_v55  ;;  %v4793_v61 = vld [vmem:[#allocation17 + $0x230] sm:$0xff] }
 0x906   :  { %v4521_v60 = vpop.f32.mrb[19].mxu1  ;;  %5413 = vmatprep.subr.bf16.mxu1 %v4908_v56 }
 0x907   :  { %v5622_v60 = vld [vmem:[#allocation22 + $0x20] sm:$0xff] }
 0x908   :  { %v5650_v49 = vunpack.c.l.s8.bf16 %v5622_v60  ;;  %v5651_v55 = vunpack.c.h.s8.bf16 %v5622_v60 }
 0x909   :  { %5414 = vmatpush1.bf16.msra.mxu1 %v4907_v8  ;;  %v4967_v8 = vunpack.c.l.s8.bf16 %v4775_v46 }
 0x90a   :  { %5415 = vmatprep.subr.bf16.mxu1 %v4914_v0  ;;  %v4974_v0 = vunpack.c.h.s8.bf16 %v4776_v3  ;;  %5851 = vmatprep.subr.bf16.mxu0 %v5650_v49  ;;  %v7213_v49 = vld [vmem:[#allocation22 + $0x60] sm:$0xff] }
 0x90d   :  { %5416 = vmatpush1.bf16.msra.mxu1 %v4913_v59  ;;  %v5618_v59 = vld [vmem:[#allocation22] sm:$0xff] }
 0x90e   :  { %5417 = vmatprep.subr.bf16.mxu1 %v4920_v50  ;;  %v5642_v50 = vunpack.c.l.s8.bf16 %v5618_v59 }
 0x910   :  { %5852 = vmatpush3.bf16.msra.mxu0 %v5642_v50 }
 0x911   :  { %5418 = vmatpush1.bf16.msra.mxu1 %v4919_v18  ;;  %v4973_v18 = vunpack.c.h.s8.bf16 %v4775_v46  ;;  %5853 = vmatprep.subr.bf16.mxu0 %v5651_v55 }
 0x912   :  { %5419 = vmatprep.subr.bf16.mxu1 %v4926_v5  ;;  %v4980_v5 = vunpack.c.l.s8.bf16 %v4782_v39 }
 0x915   :  { %5420 = vmatpush1.bf16.msra.mxu1 %v4925_v51  ;;  %v5643_v51 = vunpack.c.h.s8.bf16 %v5618_v59  ;;  %v5666_v59 = vunpack.c.l.s8.bf16 %v7213_v49 }
 0x916   :  { %5421 = vmatprep.subr.bf16.mxu1 %v4932_v10  ;;  %v5652_v10 = vunpack.c.l.s8.bf16 %v5623_v17 }
 0x917   :  { %5854 = vmatpush3.bf16.msra.mxu0 %v5643_v51 }
 0x918   :  { %5855 = vmatprep.subr.bf16.mxu0 %v5652_v10 }
 0x919   :  { %5422 = vmatpush1.bf16.msra.mxu1 %v4931_v23  ;;  %v4979_v23 = vunpack.c.l.s8.bf16 %v4781_v7 }
 0x91a   :  { %5423 = vmatprep.subr.bf16.mxu1 %v4938_v21  ;;  %v5644_v21 = vunpack.c.l.s8.bf16 %v5619_v13 }
 0x91c   :  { %5856 = vmatpush3.bf16.msra.mxu0 %v5644_v21  ;;  %v4818_v21 = vld [vmem:[#allocation17 + $0x2f8] sm:$0xff] }
 0x91d   :  { %5424 = vmatpush1.bf16.msra.mxu1 %v4937_v25  ;;  %v5653_v25 = vunpack.c.h.s8.bf16 %v5623_v17  ;;  %v4805_v17 = vld [vmem:[#allocation17 + $0x290] sm:$0xff] }
 0x91e   :  { %5425 = vmatprep.subr.bf16.mxu1 %v4944_v26  ;;  %v5624_v26 = vld [vmem:[#allocation22 + $0x30] sm:$0xff]  ;;  %v5033_v51 = vunpack.c.h.s8.bf16 %v4805_v17 }
 0x91f   :  { %5857 = vmatprep.subr.bf16.mxu0 %v5653_v25  ;;  %v5654_v6 = vunpack.c.l.s8.bf16 %v5624_v26  ;;  %v5052_v25 = vunpack.c.l.s8.bf16 %v4818_v21 }
 0x921   :  { %5426 = vmatpush1.bf16.msra.mxu1 %v4943_v62  ;;  %v4787_v62 = vld [vmem:[#allocation17 + $0x200] sm:$0xff] }
 0x922   :  { %5427 = vmatprep.subr.bf16.mxu1 %v4950_v32  ;;  %v5645_v32 = vunpack.c.h.s8.bf16 %v5619_v13  ;;  %v4811_v13 = vld [vmem:[#allocation17 + $0x2c0] sm:$0xff] }
 0x923   :  { %v5045_v24 = vunpack.c.h.s8.bf16 %v4811_v13 }
 0x924   :  { %5858 = vmatpush3.bf16.msra.mxu0 %v5645_v32 }
 0x925   :  { %5428 = vmatpush1.bf16.msra.mxu1 %v4949_v33  ;;  %v5620_v33 = vld [vmem:[#allocation22 + $0x10] sm:$0xff]  ;;  %5859 = vmatprep.subr.bf16.mxu0 %v5654_v6 }
 0x926   :  { %5429 = vmatprep.subr.bf16.mxu1 %v4956_v34  ;;  %v4991_v34 = vunpack.c.l.s8.bf16 %v4787_v62  ;;  %v5647_v3 = vunpack.c.h.s8.bf16 %v5620_v33 }
 0x929   :  { %v5394_v44 = vpop.f32.mrb[16].mxu0  ;;  %5430 = vmatpush1.bf16.msra.mxu1 %v4955_v35  ;;  %v5646_v35 = vunpack.c.l.s8.bf16 %v5620_v33  ;;  %v4823_v33 = vld [vmem:[#allocation17 + $0x320] sm:$0xff] }
 0x92a   :  { %v5558_v2 = vmul.f32 %v5537_v27, %v5394_v44  ;;  %v5396_v29 = vpop.f32.mrb[17].mxu0  ;;  %5431 = vmatprep.subr.bf16.mxu1 %v4962_v31  ;;  %v4997_v27 = vunpack.c.h.s8.bf16 %v4787_v62  ;;  %v5004_v31 = vunpack.c.l.s8.bf16 %v4794_v41  ;;  %v5003_v44 = vunpack.c.l.s8.bf16 %v4793_v61  ;;  %v4824_v62 = vld [vmem:[#allocation17 + $0x328] sm:$0xff] }
 0x92b   :  { %v5559_v16 = vmul.f32 %v5541_v47, %v5396_v29  ;;  %v5398_v38 = vpop.f32.mrb[18].mxu0  ;;  %5860 = vmatpush3.bf16.msra.mxu0 %v5646_v35  ;;  %v5655_v47 = vunpack.c.h.s8.bf16 %v5624_v26  ;;  %v4817_v26 = vld [vmem:[#allocation17 + $0x2f0] sm:$0xff]  ;;  %v5064_v6 = vunpack.c.l.s8.bf16 %v4824_v62  ;;  %v4830_v35 = vld [vmem:[#allocation17 + $0x358] sm:$0xff] }
 0x92c   :  { %v7207_v56 = vadd.f32 %v5558_v2, %v4680_v54  ;;  %v5399_v57 = vpop.f32.mrb[19].mxu0  ;;  %v5625_v54 = vld [vmem:[#allocation22 + $0x38] sm:$0xff]  ;;  %v5057_v32 = vunpack.c.h.s8.bf16 %v4817_v26 }
 0x92d   :  { %v7209_v19 = vadd.f32 %v5559_v16, %v4681_v53  ;;  %5432 = vmatpush1.bf16.msra.mxu1 %v4961_v40  ;;  %5861 = vmatprep.subr.bf16.mxu0 %v5655_v47  ;;  %v5010_v40 = vunpack.c.h.s8.bf16 %v4794_v41  ;;  %v4800_v2 = vld [vmem:[#allocation17 + $0x268] sm:$0xff]  ;;  %v5656_v29 = vunpack.c.l.s8.bf16 %v5625_v54  ;;  %v5009_v53 = vunpack.c.h.s8.bf16 %v4793_v61  ;;  %v4799_v38 = vld [vmem:[#allocation17 + $0x260] sm:$0xff] }
 0x92e   :  { %5442 = vmatprep.subr.bf16.mxu1 %v4968_v48  ;;  %v5621_v48 = vld [vmem:[#allocation22 + $0x18] sm:$0xff]  ;;  %v5016_v16 = vunpack.c.l.s8.bf16 %v4800_v2  ;;  %v5657_v57 = vunpack.c.h.s8.bf16 %v5625_v54  ;;  %v5015_v60 = vunpack.c.l.s8.bf16 %v4799_v38  ;;  %v5021_v50 = vunpack.c.h.s8.bf16 %v4799_v38 }
 0x92f   :  { %5862 = vmatpush3.bf16.msra.mxu0 %v5647_v3  ;;  %v5648_v46 = vunpack.c.l.s8.bf16 %v5621_v48  ;;  %v5069_v41 = vunpack.c.h.s8.bf16 %v4823_v33  ;;  %v5082_v47 = vunpack.c.h.s8.bf16 %v4830_v35  ;;  %v4836_v3 = vld [vmem:[#allocation17 + $0x388] sm:$0xff]  ;;  %v4835_v54 = vld [vmem:[#allocation17 + $0x380] sm:$0xff] }
 0x930   :  { %5434 = vmatmul.mubr.bf16.vlgmr.msra.gmra.mrb[24].mxu1 %v7152_v52  ;;  %v4986_v52 = vunpack.c.h.s8.bf16 %v4782_v39  ;;  %5863 = vmatprep.subr.bf16.mxu0 %v5656_v29  ;;  %v4806_v39 = vld [vmem:[#allocation17 + $0x298] sm:$0xff]  ;;  %v4848_v38 = vld [vmem:[#allocation17 + $0x3e8] sm:$0xff] }
 0x931   :  { %5443 = vmatpush1.bf16.msra.mxu1 %v4967_v8  ;;  %5474 = vmatprep.mubr.bf16.mxu1 %v7156_v43  ;;  %v4985_v43 = vunpack.c.h.s8.bf16 %v4781_v7  ;;  %v5649_v8 = vunpack.c.h.s8.bf16 %v5621_v48  ;;  %v5028_v55 = vunpack.c.l.s8.bf16 %v4806_v39  ;;  %v4812_v7 = vld [vmem:[#allocation17 + $0x2c8] sm:$0xff]  ;;  %v4842_v29 = vld [vmem:[#allocation17 + $0x3b8] sm:$0xff] }
 0x932   :  { %5444 = vmatprep.subr.bf16.mxu1 %v4974_v0  ;;  %v5022_v0 = vunpack.c.h.s8.bf16 %v4800_v2  ;;  %v5040_v10 = vunpack.c.l.s8.bf16 %v4812_v7  ;;  %v5087_v2 = vunpack.c.l.s8.bf16 %v4835_v54  ;;  %v5100_v48 = vunpack.c.l.s8.bf16 %v4842_v29 }
 0x933   :  { %5864 = vmatpush3.bf16.msra.mxu0 %v5648_v46  ;;  %v4841_v46 = vld [vmem:[#allocation17 + $0x3b0] sm:$0xff] }
 0x934   :  { %5865 = vmatprep.subr.bf16.mxu0 %v5657_v57  ;;  %v5105_v57 = vunpack.c.h.s8.bf16 %v4841_v46 }
 0x935   :  { %5445 = vmatpush1.bf16.msra.mxu1 %v4973_v18  ;;  %v5027_v18 = vunpack.c.l.s8.bf16 %v4805_v17  ;;  %v4853_v17 = vld [vmem:[#allocation17 + $0x410] sm:$0xff] }
 0x936   :  { %5446 = vmatprep.subr.bf16.mxu1 %v4980_v5  ;;  %v5034_v5 = vunpack.c.h.s8.bf16 %v4806_v39  ;;  %v5118_v39 = vunpack.c.h.s8.bf16 %v4848_v38 }
 0x937   :  { %5866 = vmatpush3.bf16.msra.mxu0 %v5649_v8  ;;  %v5112_v8 = vunpack.c.l.s8.bf16 %v4848_v38 }
 0x938   :  { %5873 = vmatprep.subr.bf16.mxu0 %v5666_v59  ;;  %v4854_v59 = vld [vmem:[#allocation17 + $0x418] sm:$0xff] }
 0x939   :  { %5447 = vmatpush1.bf16.msra.mxu1 %v4979_v23  ;;  %v5039_v23 = vunpack.c.l.s8.bf16 %v4811_v13  ;;  %v4859_v13 = vld [vmem:[#allocation17 + $0x440] sm:$0xff] }
 0x93a   :  { %5448 = vmatprep.subr.bf16.mxu1 %v4986_v52  ;;  %v5046_v52 = vunpack.c.h.s8.bf16 %v4812_v7  ;;  %v4860_v7 = vld [vmem:[#allocation17 + $0x448] sm:$0xff] }
 0x93d   :  { %5449 = vmatpush1.bf16.msra.mxu1 %v4985_v43  ;;  %v5051_v43 = vunpack.c.l.s8.bf16 %v4817_v26  ;;  %v4865_v26 = vld [vmem:[#allocation17 + $0x470] sm:$0xff] }
 0x93e   :  { %5450 = vmatprep.subr.bf16.mxu1 %v4992_v28  ;;  %v5058_v28 = vunpack.c.h.s8.bf16 %v4818_v21  ;;  %v4866_v21 = vld [vmem:[#allocation17 + $0x478] sm:$0xff] }
 0x941   :  { %5451 = vmatpush1.bf16.msra.mxu1 %v4991_v34  ;;  %v5063_v34 = vunpack.c.l.s8.bf16 %v4823_v33  ;;  %v5529_v33 = vrot.slane %v7194_v36, %v6995_v1 }
 0x942   :  { %5452 = vmatprep.subr.bf16.mxu1 %v4998_v45  ;;  %v5070_v45 = vunpack.c.h.s8.bf16 %v4824_v62  ;;  %v5153_v62 = vunpack.c.h.s8.bf16 %v4865_v26 }
 0x945   :  { %5453 = vmatpush1.bf16.msra.mxu1 %v4997_v27  ;;  %v5076_v27 = vunpack.c.l.s8.bf16 %v4830_v35 }
 0x946   :  { %5454 = vmatprep.subr.bf16.mxu1 %v5004_v31  ;;  %v4829_v31 = vld [vmem:[#allocation17 + $0x350] sm:$0xff] }
 0x947   :  { %v5075_v61 = vunpack.c.l.s8.bf16 %v4829_v31 }
 0x949   :  { %5455 = vmatpush1.bf16.msra.mxu1 %v5003_v44  ;;  %v5081_v44 = vunpack.c.h.s8.bf16 %v4829_v31 }
 0x94a   :  { %5456 = vmatprep.subr.bf16.mxu1 %v5010_v40  ;;  %v5088_v40 = vunpack.c.l.s8.bf16 %v4836_v3 }
 0x94d   :  { %5457 = vmatpush1.bf16.msra.mxu1 %v5009_v53  ;;  %v5099_v53 = vunpack.c.l.s8.bf16 %v4841_v46 }
 0x94e   :  { %5458 = vmatprep.subr.bf16.mxu1 %v5016_v16  ;;  %v5106_v16 = vunpack.c.h.s8.bf16 %v4842_v29 }
 0x951   :  { %5459 = vmatpush1.bf16.msra.mxu1 %v5015_v60  ;;  %v4847_v60 = vld [vmem:[#allocation17 + $0x3e0] sm:$0xff] }
 0x952   :  { %5460 = vmatprep.subr.bf16.mxu1 %v5022_v0  ;;  %v5111_v0 = vunpack.c.l.s8.bf16 %v4847_v60 }
 0x955   :  { %5461 = vmatpush1.bf16.msra.mxu1 %v5021_v50  ;;  %v5117_v50 = vunpack.c.h.s8.bf16 %v4847_v60  ;;  %v5627_v60 = vld [vmem:[#allocation22 + $0x48] sm:$0xff] }
 0x956   :  { %5462 = vmatprep.subr.bf16.mxu1 %v5028_v55  ;;  %v5124_v55 = vunpack.c.l.s8.bf16 %v4854_v59 }
 0x959   :  { %5463 = vmatpush1.bf16.msra.mxu1 %v5027_v18  ;;  %v5123_v18 = vunpack.c.l.s8.bf16 %v4853_v17 }
 0x95a   :  { %5464 = vmatprep.subr.bf16.mxu1 %v5034_v5  ;;  %v5130_v5 = vunpack.c.h.s8.bf16 %v4854_v59  ;;  %v5632_v59 = vld [vmem:[#allocation22 + $0x70] sm:$0xff] }
 0x95d   :  { %5465 = vmatpush1.bf16.msra.mxu1 %v5033_v51  ;;  %v5129_v51 = vunpack.c.h.s8.bf16 %v4853_v17 }
 0x95e   :  { %5466 = vmatprep.subr.bf16.mxu1 %v5040_v10  ;;  %v5136_v10 = vunpack.c.l.s8.bf16 %v4860_v7 }
 0x961   :  { %5467 = vmatpush1.bf16.msra.mxu1 %v5039_v23  ;;  %v5135_v23 = vunpack.c.l.s8.bf16 %v4859_v13 }
 0x962   :  { %5468 = vmatprep.subr.bf16.mxu1 %v5046_v52  ;;  %v5142_v52 = vunpack.c.h.s8.bf16 %v4860_v7 }
 0x965   :  { %5469 = vmatpush1.bf16.msra.mxu1 %v5045_v24  ;;  %v5141_v24 = vunpack.c.h.s8.bf16 %v4859_v13  ;;  %v5629_v13 = vld [vmem:[#allocation22 + $0x58] sm:$0xff] }
 0x966   :  { %5470 = vmatprep.subr.bf16.mxu1 %v5052_v25  ;;  %v5148_v25 = vunpack.c.l.s8.bf16 %v4866_v21 }
 0x969   :  { %5471 = vmatpush1.bf16.msra.mxu1 %v5051_v43  ;;  %v5147_v43 = vunpack.c.l.s8.bf16 %v4865_v26 }
 0x96a   :  { %5472 = vmatprep.subr.bf16.mxu1 %v5058_v28  ;;  %v5154_v28 = vunpack.c.h.s8.bf16 %v4866_v21 }
 0x96d   :  { %5473 = vmatpush1.bf16.msra.mxu1 %v5057_v32  ;;  %v4651_v32 = vrot.slane %v7196_v14, %v6995_v1 }
 0x96e   :  { %5483 = vmatprep.subr.bf16.mxu1 %v5064_v6  ;;  %v7221_v6 = vld [vmem:[#allocation20] sm:$0x3f] }
 0x96f   :  { %v5585_v35 = vrot.slane %v7221_v6, %v7003_v4  ;;  %v5573_v31 = vrot.slane %v7221_v6, %v6995_v1 }
 0x970   :  { %5475 = vmatmul.mubr.bf16.vlgmr.msra.gmra.mrb[24].mxu1 %v7164_v30  ;;  %v5094_v30 = vunpack.c.h.s8.bf16 %v4836_v3 }
 0x971   :  { %5484 = vmatpush1.bf16.msra.mxu1 %v5063_v34  ;;  %5515 = vmatprep.mubr.bf16.mxu1 %v7180_v9  ;;  %v5093_v9 = vunpack.c.h.s8.bf16 %v4835_v54  ;;  %v4655_v34 = vrot.slane %v7196_v14, %v7000_v15 }
 0x972   :  { %5485 = vmatprep.subr.bf16.mxu1 %v5070_v45  ;;  %v5533_v45 = vrot.slane %v7194_v36, %v7000_v15 }
 0x975   :  { %5486 = vmatpush1.bf16.msra.mxu1 %v5069_v41 }
 0x976   :  { %5487 = vmatprep.subr.bf16.mxu1 %v5076_v27 }
 0x979   :  { %5488 = vmatpush1.bf16.msra.mxu1 %v5075_v61 }
 0x97a   :  { %5489 = vmatprep.subr.bf16.mxu1 %v5082_v47  ;;  %v4679_v47 = vmul.f32 %v4655_v34, %v7104_v12  ;;  %v5667_v12 = vunpack.c.h.s8.bf16 %v7213_v49  ;;  %v5628_v49 = vld [vmem:[#allocation22 + $0x50] sm:$0xff] }
 0x97b   :  { %v5662_v17 = vunpack.c.l.s8.bf16 %v5628_v49  ;;  %v5663_v7 = vunpack.c.h.s8.bf16 %v5628_v49 }
 0x97d   :  { %5490 = vmatpush1.bf16.msra.mxu1 %v5081_v44  ;;  %v5577_v44 = vrot.slane %v7221_v6, %v7000_v15  ;;  %v5631_v15 = vld [vmem:[#allocation22 + $0x68] sm:$0xff] }
 0x97e   :  { %5491 = vmatprep.subr.bf16.mxu1 %v5088_v40 }
 0x981   :  { %5492 = vmatpush1.bf16.msra.mxu1 %v5087_v2 }
 0x982   :  { %5493 = vmatprep.subr.bf16.mxu1 %v5094_v30  ;;  %v5603_v30 = vadd.f32 %v5585_v35, %v7209_v19  ;;  %v5668_v19 = vunpack.c.l.s8.bf16 %v5631_v15 }
 0x985   :  { %5494 = vmatpush1.bf16.msra.mxu1 %v5093_v9 }
 0x986   :  { %5495 = vmatprep.subr.bf16.mxu1 %v5100_v48  ;;  %v5626_v48 = vld [vmem:[#allocation22 + $0x40] sm:$0xff] }
 0x989   :  { %5496 = vmatpush1.bf16.msra.mxu1 %v5099_v53  ;;  %v5609_v53 = vmax.f32 %v5603_v30, 0.0 }
 0x98a   :  { %5497 = vmatprep.subr.bf16.mxu1 %v5106_v16  ;;  %v5658_v16 = vunpack.c.l.s8.bf16 %v5626_v48 }
 0x98d   :  { %5498 = vmatpush1.bf16.msra.mxu1 %v5105_v57  ;;  %v5615_v57 = vpack.c.bf16 %v5609_v53, %v5609_v53 }
 0x98e   :  { %5499 = vmatprep.subr.bf16.mxu1 %v5112_v8  ;;  %v5659_v8 = vunpack.c.h.s8.bf16 %v5626_v48  ;;  %v4671_v48 = vrot.slane %v7196_v14, %v7062_v58 }
 0x991   :  { %5500 = vmatpush1.bf16.msra.mxu1 %v5111_v0  ;;  %v5660_v0 = vunpack.c.l.s8.bf16 %v5627_v60 }
 0x992   :  { %5501 = vmatprep.subr.bf16.mxu1 %v5118_v39  ;;  %v5669_v39 = vunpack.c.h.s8.bf16 %v5631_v15 }
 0x995   :  { %5502 = vmatpush1.bf16.msra.mxu1 %v5117_v50  ;;  %v5661_v50 = vunpack.c.h.s8.bf16 %v5627_v60 }
 0x996   :  { %5503 = vmatprep.subr.bf16.mxu1 %v5124_v55  ;;  %v5670_v55 = vunpack.c.l.s8.bf16 %v5632_v59 }
 0x999   :  { %5504 = vmatpush1.bf16.msra.mxu1 %v5123_v18  ;;  %v5671_v18 = vunpack.c.h.s8.bf16 %v5632_v59 }
 0x99a   :  { %5505 = vmatprep.subr.bf16.mxu1 %v5130_v5  ;;  %v5633_v5 = vld [vmem:[#allocation22 + $0x78] sm:$0xff] }
 0x99b   :  { %v5673_v21 = vunpack.c.h.s8.bf16 %v5633_v5 }
 0x99d   :  { %5506 = vmatpush1.bf16.msra.mxu1 %v5129_v51  ;;  %v5581_v51 = vrot.slane %v7221_v6, %v7034_v20 }
 0x99e   :  { %5507 = vmatprep.subr.bf16.mxu1 %v5136_v10  ;;  %v5672_v10 = vunpack.c.l.s8.bf16 %v5633_v5 }
 0x9a1   :  { %5508 = vmatpush1.bf16.msra.mxu1 %v5135_v23  ;;  %v5664_v23 = vunpack.c.l.s8.bf16 %v5629_v13 }
 0x9a2   :  { %5509 = vmatprep.subr.bf16.mxu1 %v5142_v52  ;;  %v5602_v52 = vadd.f32 %v5581_v51, %v7207_v56 }
 0x9a4   :  { %v5608_v26 = vmax.f32 %v5602_v52, 0.0 }
 0x9a5   :  { %5510 = vmatpush1.bf16.msra.mxu1 %v5141_v24  ;;  %v5638_v24 = vld [vmem:[#allocation22 + $0xa0] sm:$0xff] }
 0x9a6   :  { %5511 = vmatprep.subr.bf16.mxu1 %v5148_v25  ;;  %v5665_v25 = vunpack.c.h.s8.bf16 %v5629_v13  ;;  %v5683_v20 = vunpack.c.h.s8.bf16 %v5638_v24 }
 0x9a9   :  { %5512 = vmatpush1.bf16.msra.mxu1 %v5147_v43  ;;  %v5682_v43 = vunpack.c.l.s8.bf16 %v5638_v24  ;;  %v5849_v24 = vld [vmem:[#allocation23] ss:$0 sm:$0xff] }
 0x9aa   :  { %5513 = vmatprep.subr.bf16.mxu1 %v5154_v28  ;;  %v5634_v28 = vld [vmem:[#allocation22 + $0x80] sm:$0xff] }
 0x9ab   :  { %v5675_v34 = vunpack.c.h.s8.bf16 %v5634_v28 }
 0x9ad   :  { %5514 = vmatpush1.bf16.msra.mxu1 %v5153_v62  ;;  %v5674_v62 = vunpack.c.l.s8.bf16 %v5634_v28 }
 0x9b0   :  { %5516 = vmatmul.mubr.bf16.vlgmr.msra.gmra.mrb[24].mxu1 %v7182_v37  ;;  %v4678_v37 = vmul.f32 %v4651_v32, %v7100_v11  ;;  %v5614_v32 = vpack.c.bf16 %v5608_v26, %v5608_v26 }
 0x9c3   :  { %v5271_v41 = vpop.f32.mrb[20].mxu1 }
 0x9c4   :  { %v5556_v27 = vmul.f32 %v5529_v33, %v5271_v41  ;;  %v5273_v61 = vpop.f32.mrb[21].mxu1  ;;  %v5639_v33 = vld [vmem:[#allocation22 + $0xa8] sm:$0xff] }
 0x9c5   :  { %v5557_v3 = vmul.f32 %v5533_v45, %v5273_v61  ;;  %v5275_v40 = vpop.f32.mrb[22].mxu1  ;;  %v5684_v56 = vunpack.c.l.s8.bf16 %v5639_v33  ;;  %v5635_v45 = vld [vmem:[#allocation22 + $0x88] sm:$0xff]  ;;  %v5685_v41 = vunpack.c.h.s8.bf16 %v5639_v33  ;;  %v5636_v61 = vld [vmem:[#allocation22 + $0x90] sm:$0xff] }
 0x9c6   :  { %v5562_v54 = vadd.f32 %v5556_v27, %v4678_v37  ;;  %v5276_v2 = vpop.f32.mrb[23].mxu1  ;;  %v5676_v35 = vunpack.c.l.s8.bf16 %v5635_v45  ;;  %v5640_v37 = vld [vmem:[#allocation22 + $0xb0] sm:$0xff]  ;;  %v5677_v27 = vunpack.c.h.s8.bf16 %v5635_v45  ;;  %v5641_v40 = vld [vmem:[#allocation22 + $0xb8] sm:$0xff] }
 0x9c7   :  { %v5563_v4 = vadd.f32 %v5557_v3, %v4679_v47  ;;  %v5678_v47 = vunpack.c.l.s8.bf16 %v5636_v61  ;;  %v5687_v3 = vunpack.c.h.s8.bf16 %v5640_v37  ;;  %v5637_v2 = vld [vmem:[#allocation22 + $0x98] sm:$0xff] }
 0x9c8   :  { %v5600_v29 = vadd.f32 %v5573_v31, %v5562_v54  ;;  %v5686_v31 = vunpack.c.l.s8.bf16 %v5640_v37  ;;  %v5688_v54 = vunpack.c.l.s8.bf16 %v5641_v40  ;;  %v5680_v30 = vunpack.c.l.s8.bf16 %v5637_v2 }
 0x9c9   :  { %v5601_v9 = vadd.f32 %v5577_v44, %v5563_v4  ;;  %v5679_v44 = vunpack.c.h.s8.bf16 %v5636_v61  ;;  %v5689_v4 = vunpack.c.h.s8.bf16 %v5641_v40 }
 0x9ca   :  { %v5606_v11 = vmax.f32 %v5600_v29, 0.0  ;;  %v5681_v29 = vunpack.c.h.s8.bf16 %v5637_v2 }
 0x9cb   :  { %v5607_v46 = vmax.f32 %v5601_v9, 0.0  ;;  %v4667_v9 = vrot.slane %v7196_v14, %v7059_v42 }
 0x9cc   :  { %v5612_v38 = vpack.c.bf16 %v5606_v11, %v5606_v11  ;;  %v5545_v11 = vrot.slane %v7194_v36, %v7059_v42 }
 0x9cd   :  { %v5613_v1 = vpack.c.bf16 %v5607_v46, %v5607_v46  ;;  %v5549_v46 = vrot.slane %v7194_v36, %v7062_v58 }
 0x9cf   :  { %5722 = vmatprep.mubr.bf16.mxu0 %v5613_v1  ;;  %v4682_v1 = vmul.f32 %v4667_v9, %v7129_v63 }
 0x9d0   :  { %5723 = vmatmul.mubr.bf16.vlgmr.msra.gmra.mrb[20].mxu0 %v5612_v38  ;;  %v5589_v38 = vrot.slane %v7221_v6, %v7059_v42 }
 0x9d1   :  { %5874 = vmatpush3.bf16.msra.mxu0 %v5658_v16  ;;  %5762 = vmatprep.mubr.bf16.mxu0 %v5615_v57  ;;  %v4683_v57 = vmul.f32 %v4671_v48, %v7131_v22 }
 0x9d2   :  { %5875 = vmatprep.subr.bf16.mxu0 %v5667_v12 }
 0x9d5   :  { %5876 = vmatpush3.bf16.msra.mxu0 %v5659_v8  ;;  %v5593_v8 = vrot.slane %v7221_v6, %v7062_v58 }
 0x9d6   :  { %5877 = vmatprep.subr.bf16.mxu0 %v5668_v19 }
 0x9d9   :  { %5878 = vmatpush3.bf16.msra.mxu0 %v5660_v0 }
 0x9da   :  { %5879 = vmatprep.subr.bf16.mxu0 %v5669_v39 }
 0x9dd   :  { %5880 = vmatpush3.bf16.msra.mxu0 %v5661_v50 }
 0x9de   :  { %5881 = vmatprep.subr.bf16.mxu0 %v5670_v55 }
 0x9e1   :  { %5882 = vmatpush3.bf16.msra.mxu0 %v5662_v17 }
 0x9e2   :  { %5883 = vmatprep.subr.bf16.mxu0 %v5671_v18 }
 0x9e5   :  { %5884 = vmatpush3.bf16.msra.mxu0 %v5663_v7 }
 0x9e6   :  { %5885 = vmatprep.subr.bf16.mxu0 %v5672_v10 }
 0x9e9   :  { %5886 = vmatpush3.bf16.msra.mxu0 %v5664_v23 }
 0x9ea   :  { %5887 = vmatprep.subr.bf16.mxu0 %v5673_v21 }
 0x9ed   :  { %5888 = vmatpush3.bf16.msra.mxu0 %v5665_v25 }
 0x9ee   :  { %5895 = vmatprep.subr.bf16.mxu0 %v5682_v43  ;;  %v5850_v43 = vld [vmem:[#allocation25] ss:$0 sm:$0xff] }
 0x9f0   :  { %5763 = vmatmul.mubr.bf16.vlgmr.msra.gmra.mrb[24].mxu0 %v5614_v32 }
 0x9f1   :  { %5896 = vmatpush3.bf16.msra.mxu0 %v5674_v62 }
 0x9f2   :  { %5897 = vmatprep.subr.bf16.mxu0 %v5683_v20 }
 0x9f5   :  { %5898 = vmatpush3.bf16.msra.mxu0 %v5675_v34 }
 0x9f6   :  { %5899 = vmatprep.subr.bf16.mxu0 %v5684_v56 }
 0x9f9   :  { %5900 = vmatpush3.bf16.msra.mxu0 %v5676_v35 }
 0x9fa   :  { %5901 = vmatprep.subr.bf16.mxu0 %v5685_v41 }
 0x9fd   :  { %5902 = vmatpush3.bf16.msra.mxu0 %v5677_v27 }
 0x9fe   :  { %5903 = vmatprep.subr.bf16.mxu0 %v5686_v31 }
 0xa01   :  { %5904 = vmatpush3.bf16.msra.mxu0 %v5678_v47 }
 0xa02   :  { %5905 = vmatprep.subr.bf16.mxu0 %v5687_v3 }
 0xa05   :  { %5906 = vmatpush3.bf16.msra.mxu0 %v5679_v44 }
 0xa06   :  { %5907 = vmatprep.subr.bf16.mxu0 %v5688_v54 }
 0xa09   :  { %5908 = vmatpush3.bf16.msra.mxu0 %v5680_v30 }
 0xa0a   :  { %5909 = vmatprep.subr.bf16.mxu0 %v5689_v4 }
 0xa0d   :  { %5910 = vmatpush3.bf16.msra.mxu0 %v5681_v29 }
 0xa83   :  { %v5517_v53 = vpop.f32.mrb[24].mxu1 }
 0xa84   :  { %v5560_v16 = vmul.f32 %v5545_v11, %v5517_v53  ;;  %v5519_v12 = vpop.f32.mrb[25].mxu1 }
 0xa85   :  { %v5561_v15 = vmul.f32 %v5549_v46, %v5519_v12  ;;  %v5521_v19 = vpop.f32.mrb[26].mxu1 }
 0xa86   :  { %v5566_v60 = vadd.f32 %v5560_v16, %v4682_v1  ;;  %v5522_v14 = vpop.f32.mrb[27].mxu1 }
 0xa87   :  { %v5567_v0 = vadd.f32 %v5561_v15, %v4683_v57 }
 0xa88   :  { %v5604_v39 = vadd.f32 %v5589_v38, %v5566_v60 }
 0xa89   :  { %v5605_v36 = vadd.f32 %v5593_v8, %v5567_v0 }
 0xa8a   :  { %v5610_v59 = vmax.f32 %v5604_v39, 0.0 }
 0xa8b   :  { %v5611_v50 = vmax.f32 %v5605_v36, 0.0 }
 0xa8c   :  { %v5616_v55 = vpack.c.bf16 %v5610_v59, %v5610_v59 }
 0xa8d   :  { %v5617_v63 = vpack.c.bf16 %v5611_v50, %v5611_v50 }
 0xa8f   :  { %5802 = vmatprep.mubr.bf16.mxu0 %v5617_v63 }
 0xa90   :  { %5803 = vmatmul.mubr.bf16.vlgmr.msra.gmra.mrb[28].mxu0 %v5616_v55 }
 0xaa3   :  { %v5867_v42 = vpop.f32.mrb[20].mxu0 }
 0xaa4   :  { %v5868_v49 = vpop.f32.mrb[21].mxu0 }
 0xaa5   :  { %v5869_v17 = vadd.f32 %v5868_v49, %v5867_v42  ;;  %v5870_v22 = vpop.f32.mrb[22].mxu0 }
 0xaa6   :  { %v5871_v18 = vpop.f32.mrb[23].mxu0 }
 0xac3   :  { %v5889_v5 = vpop.f32.mrb[24].mxu0 }
 0xac4   :  { %v5890_v7 = vpop.f32.mrb[25].mxu0 }
 0xac5   :  { %v5891_v58 = vadd.f32 %v5890_v7, %v5889_v5  ;;  %v5892_v6 = vpop.f32.mrb[26].mxu0 }
 0xac6   :  { %v5893_v51 = vpop.f32.mrb[27].mxu0 }
 0xac7   :  { %v5765_v10 = vadd.f32 %v5891_v58, %v5869_v17 }
 0xb63   :  { %v5911_v13 = vpop.f32.mrb[28].mxu0 }
 0xb64   :  { %v5912_v23 = vpop.f32.mrb[29].mxu0 }
 0xb65   :  { %v5913_v52 = vadd.f32 %v5912_v23, %v5911_v13  ;;  %v5914_v21 = vpop.f32.mrb[30].mxu0 }
 0xb66   :  { %v5915_v25 = vpop.f32.mrb[31].mxu0 }
 0xb67   :  { %v5805_v26 = vadd.f32 %v5913_v52, %v5765_v10 }
 0xb69   :  { %v5817_v28 = vmul.f32 %v5849_v24, %v5805_v26 }
 0xb6b   :  { %v5825_v62 = vadd.f32 %v5850_v43, %v5817_v28 }
 0xb6d   :  { %5826 = vst [vmem:[#allocation26] sm:$0x3] %v5825_v62 }
 0xb6e   :  { %6457 = shalt.err (!%p6454_p12)
}
 0xb6f   :  { %s7290_s6 = sld [smem:[#allocation37_spill]] }
 0xb75   :  { %s6458_s10 = scalar_lea.hbm %s7290_s6, 32 }
 0xb76   :  { %p6459_p13 = scmp.ne.s32.totalorder %s7290_s6, %s6458_s10  ;;  %p6462_p0 = scmp.lt.u32.totalorder %s6458_s10, %s7290_s6 }
 0xb78   :  { %p6464_p1 = pnand %p6462_p0, %p6459_p13 }
 0xb7a   :  { %6467 = shalt.err (!%p6464_p1)
}
 0xb7b   :  { %5836 = dma.vmem_to_hbm [thread:$0]  %s5834_s28, 32, %s7290_s6, [#allocation4]  }
 0xb7c   :  { %6484 = dma.done.wait [#allocation4], 32  }
 0xb7d   :  { %6485 = vsyncadd [#allocation4], 4294967264 }
 0xb7e   :  { %5840 = vsyncpa [#allocation3], 1 }
 0xb7f   :  { %5841 = vsyncpa [#allocation6], 1 }
 0xb80   :  { %5842 = vsyncpa [#allocation9], 1 }
 0xb81   :  { %5843 = vsyncpa [#allocation12], 1 }
 0xb82   :  { %5844 = vsyncpa [#allocation15], 1 }
 0xb83   :  { %5845 = vsyncpa [#allocation18], 1 }
 0xb84   :  { %5846 = vsyncpa [#allocation21], 1 }
 0xb85   :  { %5847 = vsyncpa [#allocation24], 1 }
 0xb86   :  { %5848 = vsyncpa [#allocation4], 1 }

</bundles_post_ra>
